<compile_context>
chip_gen: v5e
topology: v5e:2x2
jax: 0.10.0
libtpu: 0.0.40
codegen_flags: <defaults>
</compile_context>

<pallas_src>
import jax
import jax.numpy as jnp
from jax.experimental import pallas as pl
from jax.experimental.pallas import tpu as pltpu

EPS = 1e-5
LANES = 128


def _round_up(x, m):
    return ((x + m - 1) // m) * m


def _make_kernel(H, W, C_p, compute_dtype):
    Wp = W + 2                      # padded row length
    P2 = (H + 2) * Wp               # padded-flat spatial size
    E = _round_up(W + 3, 8)         # halo rows (>= max |tap offset| = Wp + 1), 8-aligned
    inv_hw = 1.0 / float(H * W)

    def conv3x3(dst_ref, src_ref, w_ref):
        # dst_ref: (P2, C_p) f32 accumulator; src_ref: (P2 + 2E, C_p) f32, zero halo.
        # Each tap is a contiguous row-offset slice -> 9 MXU matmuls with K = C_p.
        for t in range(9):
            ky, kx = divmod(t, 3)
            off = E + (ky - 1) * Wp + (kx - 1)
            xs = src_ref[off:off + P2, :]
            if compute_dtype != jnp.float32:
                xs = xs.astype(compute_dtype)
            contrib = jnp.dot(xs, w_ref[t], preferred_element_type=jnp.float32)
            if t == 0:
                dst_ref[...] = contrib          # overwrite: no zero-init store pass
            else:
                dst_ref[...] += contrib

    def instance_norm(y):
        # y is already zero outside the H*W interior rows, so one masked pass of
        # sum / sum-of-squares gives the exact per-channel instance statistics.
        s = jnp.sum(y, axis=0, keepdims=True)
        s2 = jnp.sum(y * y, axis=0, keepdims=True)
        mean = s * inv_hw
        var = s2 * inv_hw - mean * mean          # biased variance (PyTorch)
        return (y - mean) * jax.lax.rsqrt(var + EPS)

    def kernel(mask_ref, xext_ref, w1_ref, b1_ref, w2_ref, b2_ref, o_ref, hext_ref):
        interior = mask_ref[...] != 0.0          # (P2, 1) bool, broadcasts over lanes

        # ---- conv1 (accumulated in o_ref) -> InstanceNorm -> ReLU ----
        conv3x3(o_ref, xext_ref, w1_ref)
        y1 = jnp.where(interior, o_ref[...] + b1_ref[...], 0.0)
        h = jnp.maximum(jnp.where(interior, instance_norm(y1), 0.0), 0.0)

        # Stage h for conv2: zero only the small halo rows, aligned interior store.
        hext_ref[0:E, :] = jnp.zeros((E, C_p), jnp.float32)
        hext_ref[E + P2:E + P2 + E, :] = jnp.zeros((E, C_p), jnp.float32)
        hext_ref[E:E + P2, :] = h

        # ---- conv2 (accumulated in o_ref) -> InstanceNorm -> residual add ----
        conv3x3(o_ref, hext_ref, w2_ref)
        y2 = jnp.where(interior, o_ref[...] + b2_ref[...], 0.0)
        # Border rows of the output are discarded by the wrapper -> no re-mask needed.
        o_ref[...] = instance_norm(y2) + xext_ref[E:E + P2, :]

    return kernel, P2, E


def residual_block(x_nchw, w1, b1, w2, b2, *, compute_dtype=jnp.float32):
    """x_nchw: (N, C, H, W) f32.  w*: (Cout, Cin, 3, 3), b*: (C,) (PyTorch layout)."""
    N, C, H, W = x_nchw.shape
    C_p = _round_up(C, LANES)                               # lane-dense channel axis
    kernel, P2, E = _make_kernel(H, W, C_p, compute_dtype)
    Wp = W + 2

    # ---- input: NHWC, channel-pad to C_p, spatial zero-pad by 1, flatten, add halo ----
    x_nhwc = jnp.transpose(x_nchw, (0, 2, 3, 1)).astype(jnp.float32)
    xe = jnp.pad(x_nhwc, ((0, 0), (1, 1), (1, 1), (0, C_p - C)))
    xe = xe.reshape(N, P2, C_p)
    xe = jnp.pad(xe, ((0, 0), (E, E), (0, 0)))              # (N, P2 + 2E, C_p)

    def prep_w(w):
        wk = jnp.transpose(w, (2, 3, 1, 0))                 # (3, 3, Cin, Cout)
        wk = jnp.pad(wk, ((0, 0), (0, 0), (0, C_p - C), (0, C_p - C)))
        return wk.reshape(9, C_p, C_p).astype(compute_dtype)

    w1k, w2k = prep_w(w1), prep_w(w2)
    b1k = jnp.pad(b1, (0, C_p - C)).reshape(1, C_p).astype(jnp.float32)
    b2k = jnp.pad(b2, (0, C_p - C)).reshape(1, C_p).astype(jnp.float32)

    # interior-row mask over padded-flat positions (1.0 where an output pixel lives)
    row = jnp.arange(P2, dtype=jnp.int32)
    Y, X = row // Wp, row % Wp
    mask = (((Y >= 1) & (Y <= H) & (X >= 1) & (X <= W))
            .astype(jnp.float32).reshape(P2, 1))

    out_flat = pl.pallas_call(
        kernel,
        out_shape=jax.ShapeDtypeStruct((N, P2, C_p), jnp.float32),
        grid_spec=pltpu.PrefetchScalarGridSpec(
            num_scalar_prefetch=0,
            grid=(N,),                                      # one program per image
            in_specs=[
                pl.BlockSpec((P2, 1), lambda n: (0, 0)),                      # mask
                pl.BlockSpec((None, P2 + 2 * E, C_p), lambda n: (n, 0, 0)),   # x (halo'd)
                pl.BlockSpec((9, C_p, C_p), lambda n: (0, 0, 0)),             # w1
                pl.BlockSpec((1, C_p), lambda n: (0, 0)),                     # b1
                pl.BlockSpec((9, C_p, C_p), lambda n: (0, 0, 0)),             # w2
                pl.BlockSpec((1, C_p), lambda n: (0, 0)),                     # b2
            ],
            out_specs=pl.BlockSpec((None, P2, C_p), lambda n: (n, 0, 0)),
            scratch_shapes=[pltpu.VMEM((P2 + 2 * E, C_p), jnp.float32)],      # h staging
        ),
        compiler_params=pltpu.CompilerParams(
            dimension_semantics=("parallel",),
            vmem_limit_bytes=32 * 1024 * 1024,
        ),
    )(mask, xe, w1k, b1k, w2k, b2k)

    out = out_flat.reshape(N, H + 2, Wp, C_p)[:, 1:H + 1, 1:W + 1, :C]
    return jnp.transpose(out, (0, 3, 1, 2)).astype(x_nchw.dtype)


# ---------------- pure-JAX reference (for a sanity check) ----------------
def _ref_forward(x_nchw, w1, b1, w2, b2):
    def conv(x, w, b):
        y = jax.lax.conv_general_dilated(
            x, w, window_strides=(1, 1), padding="SAME",
            dimension_numbers=("NCHW", "OIHW", "NCHW"),
            precision=jax.lax.Precision.HIGHEST)
        return y + b[None, :, None, None]

    def inorm(y):
        m = jnp.mean(y, axis=(2, 3), keepdims=True)
        v = jnp.mean((y - m) ** 2, axis=(2, 3), keepdims=True)
        return (y - m) * jax.lax.rsqrt(v + EPS)

    h = jnp.maximum(inorm(conv(x_nchw, w1, b1)), 0.0)
    return x_nchw + inorm(conv(h, w2, b2))


if __name__ == "__main__":
    N, C, H, W = 2, 8, 16, 16                               # dim = 8

    key = jax.random.PRNGKey(0)
    kx, kw1, kb1, kw2, kb2 = jax.random.split(key, 5)

    x = jax.random.normal(kx, (N, C, H, W), dtype=jnp.float32)
    fan_in = C * 3 * 3
    scale = 1.0 / jnp.sqrt(fan_in)                          # ~ PyTorch Conv2d default init
    w1 = jax.random.uniform(kw1, (C, C, 3, 3), jnp.float32, -scale, scale)
    b1 = jax.random.uniform(kb1, (C,), jnp.float32, -scale, scale)
    w2 = jax.random.uniform(kw2, (C, C, 3, 3), jnp.float32, -scale, scale)
    b2 = jax.random.uniform(kb2, (C,), jnp.float32, -scale, scale)

    ref = _ref_forward(x, w1, b1, w2, b2)

    # f32 path
    out = jax.block_until_ready(residual_block(x, w1, b1, w2, b2))
    assert out.shape == (N, C, H, W)
    err = float(jnp.max(jnp.abs(out - ref)))
    assert err < 3e-2, f"f32 kernel mismatch vs pure-JAX reference: {err}"

    # bf16 MXU path (throughput option for v5e/v6e/v7x); accumulation and norm stay f32.
    out_bf16 = jax.block_until_ready(
        residual_block(x, w1, b1, w2, b2, compute_dtype=jnp.bfloat16))
    err_bf16 = float(jnp.max(jnp.abs(out_bf16 - ref)))
    assert err_bf16 < 1e-1, f"bf16 kernel mismatch vs pure-JAX reference: {err_bf16}"

    print("KERNEL_OK")
</pallas_src>

<mosaic_0001>
module attributes {stable_mosaic.version = 11 : i64} {
  func.func @kernel(%arg0: i32, %arg1: memref<324x1xf32, #tpu.memory_space<vmem>>, %arg2: memref<1x372x128xf32, #tpu.memory_space<vmem>>, %arg3: memref<9x128x128xf32, #tpu.memory_space<vmem>>, %arg4: memref<1x128xf32, #tpu.memory_space<vmem>>, %arg5: memref<9x128x128xf32, #tpu.memory_space<vmem>>, %arg6: memref<1x128xf32, #tpu.memory_space<vmem>>, %arg7: memref<1x324x128xf32, #tpu.memory_space<vmem>>, %arg8: memref<372x128xf32, #tpu.memory_space<vmem>>) attributes {dimension_semantics = [#tpu.dimension_semantics<parallel>], iteration_bounds = array<i64: 2>, scalar_prefetch = 0 : i64, scratch_operands = 1 : i64, tpu.core_type = #tpu.core_type<tc>, window_params = [{pipeline_mode = #tpu.pipeline_mode<synchronous>, transform_indices = @transform_0, window_bounds = array<i64: 324, 1>}, {transform_indices = @transform_1, window_bounds = array<i64: 1, 372, 128>}, {pipeline_mode = #tpu.pipeline_mode<synchronous>, transform_indices = @transform_2, window_bounds = array<i64: 9, 128, 128>}, {pipeline_mode = #tpu.pipeline_mode<synchronous>, transform_indices = @transform_3, window_bounds = array<i64: 1, 128>}, {pipeline_mode = #tpu.pipeline_mode<synchronous>, transform_indices = @transform_4, window_bounds = array<i64: 9, 128, 128>}, {pipeline_mode = #tpu.pipeline_mode<synchronous>, transform_indices = @transform_5, window_bounds = array<i64: 1, 128>}, {transform_indices = @transform_6, window_bounds = array<i64: 1, 324, 128>}]} {
    %c0 = arith.constant 0 : index
    %c0_0 = arith.constant 0 : index
    %0 = vector.load %arg1[%c0, %c0_0] : memref<324x1xf32, #tpu.memory_space<vmem>>, vector<324x1xf32>
    %cst = arith.constant 0.000000e+00 : f32
    %1 = vector.broadcast %cst : f32 to vector<324x1xf32>
    %2 = arith.cmpf one, %0, %1 : vector<324x1xf32>
    %c0_1 = arith.constant 0 : index
    %c5 = arith.constant 5 : index
    %c0_2 = arith.constant 0 : index
    %3 = vector.load %arg2[%c0_1, %c5, %c0_2] : memref<1x372x128xf32, #tpu.memory_space<vmem>>, vector<1x324x128xf32>
    %4 = vector.shape_cast %3 : vector<1x324x128xf32> to vector<324x128xf32>
    %c0_3 = arith.constant 0 : index
    %c0_4 = arith.constant 0 : index
    %c0_5 = arith.constant 0 : index
    %5 = vector.load %arg3[%c0_3, %c0_4, %c0_5] : memref<9x128x128xf32, #tpu.memory_space<vmem>>, vector<1x128x128xf32>
    %6 = vector.shape_cast %5 : vector<1x128x128xf32> to vector<128x128xf32>
    %cst_6 = arith.constant dense<0.000000e+00> : vector<324x128xf32>
    %7 = tpu.matmul %4, %6, %cst_6 {dimension_numbers = #tpu.dot_dimension_numbers<[1], [0], [0], [1], [0, 0, 1, 1], [], []>} : vector<324x128xf32>, vector<128x128xf32>, vector<324x128xf32> -> vector<324x128xf32>
    %c0_7 = arith.constant 0 : index
    %c0_8 = arith.constant 0 : index
    %c0_9 = arith.constant 0 : index
    %8 = vector.load %arg7[%c0_7, %c0_8, %c0_9] : memref<1x324x128xf32, #tpu.memory_space<vmem>>, vector<1x324x128xf32>
    %9 = vector.shape_cast %8 : vector<1x324x128xf32> to vector<324x128xf32>
    %10 = vector.shape_cast %7 : vector<324x128xf32> to vector<1x324x128xf32>
    tpu.vector_store %arg7[%c0_7, %c0_8, %c0_9], %10 {strides = array<i32>} : memref<1x324x128xf32, #tpu.memory_space<vmem>>, vector<1x324x128xf32>,
    %c0_10 = arith.constant 0 : index
    %c6 = arith.constant 6 : index
    %c0_11 = arith.constant 0 : index
    %11 = vector.load %arg2[%c0_10, %c6, %c0_11] : memref<1x372x128xf32, #tpu.memory_space<vmem>>, vector<1x324x128xf32>
    %12 = vector.shape_cast %11 : vector<1x324x128xf32> to vector<324x128xf32>
    %c1 = arith.constant 1 : index
    %c0_12 = arith.constant 0 : index
    %c0_13 = arith.constant 0 : index
    %13 = vector.load %arg3[%c1, %c0_12, %c0_13] : memref<9x128x128xf32, #tpu.memory_space<vmem>>, vector<1x128x128xf32>
    %14 = vector.shape_cast %13 : vector<1x128x128xf32> to vector<128x128xf32>
    %cst_14 = arith.constant dense<0.000000e+00> : vector<324x128xf32>
    %15 = tpu.matmul %12, %14, %cst_14 {dimension_numbers = #tpu.dot_dimension_numbers<[1], [0], [0], [1], [0, 0, 1, 1], [], []>} : vector<324x128xf32>, vector<128x128xf32>, vector<324x128xf32> -> vector<324x128xf32>
    %c0_15 = arith.constant 0 : index
    %c0_16 = arith.constant 0 : index
    %c0_17 = arith.constant 0 : index
    %16 = vector.load %arg7[%c0_15, %c0_16, %c0_17] : memref<1x324x128xf32, #tpu.memory_space<vmem>>, vector<1x324x128xf32>
    %17 = vector.shape_cast %16 : vector<1x324x128xf32> to vector<324x128xf32>
    %18 = arith.addf %17, %15 : vector<324x128xf32>
    %c0_18 = arith.constant 0 : index
    %c0_19 = arith.constant 0 : index
    %c0_20 = arith.constant 0 : index
    %19 = vector.load %arg7[%c0_18, %c0_19, %c0_20] : memref<1x324x128xf32, #tpu.memory_space<vmem>>, vector<1x324x128xf32>
    %20 = vector.shape_cast %19 : vector<1x324x128xf32> to vector<324x128xf32>
    %21 = vector.shape_cast %18 : vector<324x128xf32> to vector<1x324x128xf32>
    tpu.vector_store %arg7[%c0_18, %c0_19, %c0_20], %21 {strides = array<i32>} : memref<1x324x128xf32, #tpu.memory_space<vmem>>, vector<1x324x128xf32>,
    %c0_21 = arith.constant 0 : index
    %c7 = arith.constant 7 : index
    %c0_22 = arith.constant 0 : index
    %22 = vector.load %arg2[%c0_21, %c7, %c0_22] : memref<1x372x128xf32, #tpu.memory_space<vmem>>, vector<1x324x128xf32>
    %23 = vector.shape_cast %22 : vector<1x324x128xf32> to vector<324x128xf32>
    %c2 = arith.constant 2 : index
    %c0_23 = arith.constant 0 : index
    %c0_24 = arith.constant 0 : index
    %24 = vector.load %arg3[%c2, %c0_23, %c0_24] : memref<9x128x128xf32, #tpu.memory_space<vmem>>, vector<1x128x128xf32>
    %25 = vector.shape_cast %24 : vector<1x128x128xf32> to vector<128x128xf32>
    %cst_25 = arith.constant dense<0.000000e+00> : vector<324x128xf32>
    %26 = tpu.matmul %23, %25, %cst_25 {dimension_numbers = #tpu.dot_dimension_numbers<[1], [0], [0], [1], [0, 0, 1, 1], [], []>} : vector<324x128xf32>, vector<128x128xf32>, vector<324x128xf32> -> vector<324x128xf32>
    %c0_26 = arith.constant 0 : index
    %c0_27 = arith.constant 0 : index
    %c0_28 = arith.constant 0 : index
    %27 = vector.load %arg7[%c0_26, %c0_27, %c0_28] : memref<1x324x128xf32, #tpu.memory_space<vmem>>, vector<1x324x128xf32>
    %28 = vector.shape_cast %27 : vector<1x324x128xf32> to vector<324x128xf32>
    %29 = arith.addf %28, %26 : vector<324x128xf32>
    %c0_29 = arith.constant 0 : index
    %c0_30 = arith.constant 0 : index
    %c0_31 = arith.constant 0 : index
    %30 = vector.load %arg7[%c0_29, %c0_30, %c0_31] : memref<1x324x128xf32, #tpu.memory_space<vmem>>, vector<1x324x128xf32>
    %31 = vector.shape_cast %30 : vector<1x324x128xf32> to vector<324x128xf32>
    %32 = vector.shape_cast %29 : vector<324x128xf32> to vector<1x324x128xf32>
    tpu.vector_store %arg7[%c0_29, %c0_30, %c0_31], %32 {strides = array<i32>} : memref<1x324x128xf32, #tpu.memory_space<vmem>>, vector<1x324x128xf32>,
    %c0_32 = arith.constant 0 : index
    %c23 = arith.constant 23 : index
    %c0_33 = arith.constant 0 : index
    %33 = vector.load %arg2[%c0_32, %c23, %c0_33] : memref<1x372x128xf32, #tpu.memory_space<vmem>>, vector<1x324x128xf32>
    %34 = vector.shape_cast %33 : vector<1x324x128xf32> to vector<324x128xf32>
    %c3 = arith.constant 3 : index
    %c0_34 = arith.constant 0 : index
    %c0_35 = arith.constant 0 : index
    %35 = vector.load %arg3[%c3, %c0_34, %c0_35] : memref<9x128x128xf32, #tpu.memory_space<vmem>>, vector<1x128x128xf32>
    %36 = vector.shape_cast %35 : vector<1x128x128xf32> to vector<128x128xf32>
    %cst_36 = arith.constant dense<0.000000e+00> : vector<324x128xf32>
    %37 = tpu.matmul %34, %36, %cst_36 {dimension_numbers = #tpu.dot_dimension_numbers<[1], [0], [0], [1], [0, 0, 1, 1], [], []>} : vector<324x128xf32>, vector<128x128xf32>, vector<324x128xf32> -> vector<324x128xf32>
    %c0_37 = arith.constant 0 : index
    %c0_38 = arith.constant 0 : index
    %c0_39 = arith.constant 0 : index
    %38 = vector.load %arg7[%c0_37, %c0_38, %c0_39] : memref<1x324x128xf32, #tpu.memory_space<vmem>>, vector<1x324x128xf32>
    %39 = vector.shape_cast %38 : vector<1x324x128xf32> to vector<324x128xf32>
    %40 = arith.addf %39, %37 : vector<324x128xf32>
    %c0_40 = arith.constant 0 : index
    %c0_41 = arith.constant 0 : index
    %c0_42 = arith.constant 0 : index
    %41 = vector.load %arg7[%c0_40, %c0_41, %c0_42] : memref<1x324x128xf32, #tpu.memory_space<vmem>>, vector<1x324x128xf32>
    %42 = vector.shape_cast %41 : vector<1x324x128xf32> to vector<324x128xf32>
    %43 = vector.shape_cast %40 : vector<324x128xf32> to vector<1x324x128xf32>
    tpu.vector_store %arg7[%c0_40, %c0_41, %c0_42], %43 {strides = array<i32>} : memref<1x324x128xf32, #tpu.memory_space<vmem>>, vector<1x324x128xf32>,
    %c0_43 = arith.constant 0 : index
    %c24 = arith.constant 24 : index
    %c0_44 = arith.constant 0 : index
    %44 = vector.load %arg2[%c0_43, %c24, %c0_44] : memref<1x372x128xf32, #tpu.memory_space<vmem>>, vector<1x324x128xf32>
    %45 = vector.shape_cast %44 : vector<1x324x128xf32> to vector<324x128xf32>
    %c4 = arith.constant 4 : index
    %c0_45 = arith.constant 0 : index
    %c0_46 = arith.constant 0 : index
    %46 = vector.load %arg3[%c4, %c0_45, %c0_46] : memref<9x128x128xf32, #tpu.memory_space<vmem>>, vector<1x128x128xf32>
    %47 = vector.shape_cast %46 : vector<1x128x128xf32> to vector<128x128xf32>
    %cst_47 = arith.constant dense<0.000000e+00> : vector<324x128xf32>
    %48 = tpu.matmul %45, %47, %cst_47 {dimension_numbers = #tpu.dot_dimension_numbers<[1], [0], [0], [1], [0, 0, 1, 1], [], []>} : vector<324x128xf32>, vector<128x128xf32>, vector<324x128xf32> -> vector<324x128xf32>
    %c0_48 = arith.constant 0 : index
    %c0_49 = arith.constant 0 : index
    %c0_50 = arith.constant 0 : index
    %49 = vector.load %arg7[%c0_48, %c0_49, %c0_50] : memref<1x324x128xf32, #tpu.memory_space<vmem>>, vector<1x324x128xf32>
    %50 = vector.shape_cast %49 : vector<1x324x128xf32> to vector<324x128xf32>
    %51 = arith.addf %50, %48 : vector<324x128xf32>
    %c0_51 = arith.constant 0 : index
    %c0_52 = arith.constant 0 : index
    %c0_53 = arith.constant 0 : index
    %52 = vector.load %arg7[%c0_51, %c0_52, %c0_53] : memref<1x324x128xf32, #tpu.memory_space<vmem>>, vector<1x324x128xf32>
    %53 = vector.shape_cast %52 : vector<1x324x128xf32> to vector<324x128xf32>
    %54 = vector.shape_cast %51 : vector<324x128xf32> to vector<1x324x128xf32>
    tpu.vector_store %arg7[%c0_51, %c0_52, %c0_53], %54 {strides = array<i32>} : memref<1x324x128xf32, #tpu.memory_space<vmem>>, vector<1x324x128xf32>,
    %c0_54 = arith.constant 0 : index
    %c25 = arith.constant 25 : index
    %c0_55 = arith.constant 0 : index
    %55 = vector.load %arg2[%c0_54, %c25, %c0_55] : memref<1x372x128xf32, #tpu.memory_space<vmem>>, vector<1x324x128xf32>
    %56 = vector.shape_cast %55 : vector<1x324x128xf32> to vector<324x128xf32>
    %c5_56 = arith.constant 5 : index
    %c0_57 = arith.constant 0 : index
    %c0_58 = arith.constant 0 : index
    %57 = vector.load %arg3[%c5_56, %c0_57, %c0_58] : memref<9x128x128xf32, #tpu.memory_space<vmem>>, vector<1x128x128xf32>
    %58 = vector.shape_cast %57 : vector<1x128x128xf32> to vector<128x128xf32>
    %cst_59 = arith.constant dense<0.000000e+00> : vector<324x128xf32>
    %59 = tpu.matmul %56, %58, %cst_59 {dimension_numbers = #tpu.dot_dimension_numbers<[1], [0], [0], [1], [0, 0, 1, 1], [], []>} : vector<324x128xf32>, vector<128x128xf32>, vector<324x128xf32> -> vector<324x128xf32>
    %c0_60 = arith.constant 0 : index
    %c0_61 = arith.constant 0 : index
    %c0_62 = arith.constant 0 : index
    %60 = vector.load %arg7[%c0_60, %c0_61, %c0_62] : memref<1x324x128xf32, #tpu.memory_space<vmem>>, vector<1x324x128xf32>
    %61 = vector.shape_cast %60 : vector<1x324x128xf32> to vector<324x128xf32>
    %62 = arith.addf %61, %59 : vector<324x128xf32>
    %c0_63 = arith.constant 0 : index
    %c0_64 = arith.constant 0 : index
    %c0_65 = arith.constant 0 : index
    %63 = vector.load %arg7[%c0_63, %c0_64, %c0_65] : memref<1x324x128xf32, #tpu.memory_space<vmem>>, vector<1x324x128xf32>
    %64 = vector.shape_cast %63 : vector<1x324x128xf32> to vector<324x128xf32>
    %65 = vector.shape_cast %62 : vector<324x128xf32> to vector<1x324x128xf32>
    tpu.vector_store %arg7[%c0_63, %c0_64, %c0_65], %65 {strides = array<i32>} : memref<1x324x128xf32, #tpu.memory_space<vmem>>, vector<1x324x128xf32>,
    %c0_66 = arith.constant 0 : index
    %c41 = arith.constant 41 : index
    %c0_67 = arith.constant 0 : index
    %66 = vector.load %arg2[%c0_66, %c41, %c0_67] : memref<1x372x128xf32, #tpu.memory_space<vmem>>, vector<1x324x128xf32>
    %67 = vector.shape_cast %66 : vector<1x324x128xf32> to vector<324x128xf32>
    %c6_68 = arith.constant 6 : index
    %c0_69 = arith.constant 0 : index
    %c0_70 = arith.constant 0 : index
    %68 = vector.load %arg3[%c6_68, %c0_69, %c0_70] : memref<9x128x128xf32, #tpu.memory_space<vmem>>, vector<1x128x128xf32>
    %69 = vector.shape_cast %68 : vector<1x128x128xf32> to vector<128x128xf32>
    %cst_71 = arith.constant dense<0.000000e+00> : vector<324x128xf32>
    %70 = tpu.matmul %67, %69, %cst_71 {dimension_numbers = #tpu.dot_dimension_numbers<[1], [0], [0], [1], [0, 0, 1, 1], [], []>} : vector<324x128xf32>, vector<128x128xf32>, vector<324x128xf32> -> vector<324x128xf32>
    %c0_72 = arith.constant 0 : index
    %c0_73 = arith.constant 0 : index
    %c0_74 = arith.constant 0 : index
    %71 = vector.load %arg7[%c0_72, %c0_73, %c0_74] : memref<1x324x128xf32, #tpu.memory_space<vmem>>, vector<1x324x128xf32>
    %72 = vector.shape_cast %71 : vector<1x324x128xf32> to vector<324x128xf32>
    %73 = arith.addf %72, %70 : vector<324x128xf32>
    %c0_75 = arith.constant 0 : index
    %c0_76 = arith.constant 0 : index
    %c0_77 = arith.constant 0 : index
    %74 = vector.load %arg7[%c0_75, %c0_76, %c0_77] : memref<1x324x128xf32, #tpu.memory_space<vmem>>, vector<1x324x128xf32>
    %75 = vector.shape_cast %74 : vector<1x324x128xf32> to vector<324x128xf32>
    %76 = vector.shape_cast %73 : vector<324x128xf32> to vector<1x324x128xf32>
    tpu.vector_store %arg7[%c0_75, %c0_76, %c0_77], %76 {strides = array<i32>} : memref<1x324x128xf32, #tpu.memory_space<vmem>>, vector<1x324x128xf32>,
    %c0_78 = arith.constant 0 : index
    %c42 = arith.constant 42 : index
    %c0_79 = arith.constant 0 : index
    %77 = vector.load %arg2[%c0_78, %c42, %c0_79] : memref<1x372x128xf32, #tpu.memory_space<vmem>>, vector<1x324x128xf32>
    %78 = vector.shape_cast %77 : vector<1x324x128xf32> to vector<324x128xf32>
    %c7_80 = arith.constant 7 : index
    %c0_81 = arith.constant 0 : index
    %c0_82 = arith.constant 0 : index
    %79 = vector.load %arg3[%c7_80, %c0_81, %c0_82] : memref<9x128x128xf32, #tpu.memory_space<vmem>>, vector<1x128x128xf32>
    %80 = vector.shape_cast %79 : vector<1x128x128xf32> to vector<128x128xf32>
    %cst_83 = arith.constant dense<0.000000e+00> : vector<324x128xf32>
    %81 = tpu.matmul %78, %80, %cst_83 {dimension_numbers = #tpu.dot_dimension_numbers<[1], [0], [0], [1], [0, 0, 1, 1], [], []>} : vector<324x128xf32>, vector<128x128xf32>, vector<324x128xf32> -> vector<324x128xf32>
    %c0_84 = arith.constant 0 : index
    %c0_85 = arith.constant 0 : index
    %c0_86 = arith.constant 0 : index
    %82 = vector.load %arg7[%c0_84, %c0_85, %c0_86] : memref<1x324x128xf32, #tpu.memory_space<vmem>>, vector<1x324x128xf32>
    %83 = vector.shape_cast %82 : vector<1x324x128xf32> to vector<324x128xf32>
    %84 = arith.addf %83, %81 : vector<324x128xf32>
    %c0_87 = arith.constant 0 : index
    %c0_88 = arith.constant 0 : index
    %c0_89 = arith.constant 0 : index
    %85 = vector.load %arg7[%c0_87, %c0_88, %c0_89] : memref<1x324x128xf32, #tpu.memory_space<vmem>>, vector<1x324x128xf32>
    %86 = vector.shape_cast %85 : vector<1x324x128xf32> to vector<324x128xf32>
    %87 = vector.shape_cast %84 : vector<324x128xf32> to vector<1x324x128xf32>
    tpu.vector_store %arg7[%c0_87, %c0_88, %c0_89], %87 {strides = array<i32>} : memref<1x324x128xf32, #tpu.memory_space<vmem>>, vector<1x324x128xf32>,
    %c0_90 = arith.constant 0 : index
    %c43 = arith.constant 43 : index
    %c0_91 = arith.constant 0 : index
    %88 = vector.load %arg2[%c0_90, %c43, %c0_91] : memref<1x372x128xf32, #tpu.memory_space<vmem>>, vector<1x324x128xf32>
    %89 = vector.shape_cast %88 : vector<1x324x128xf32> to vector<324x128xf32>
    %c8 = arith.constant 8 : index
    %c0_92 = arith.constant 0 : index
    %c0_93 = arith.constant 0 : index
    %90 = vector.load %arg3[%c8, %c0_92, %c0_93] : memref<9x128x128xf32, #tpu.memory_space<vmem>>, vector<1x128x128xf32>
    %91 = vector.shape_cast %90 : vector<1x128x128xf32> to vector<128x128xf32>
    %cst_94 = arith.constant dense<0.000000e+00> : vector<324x128xf32>
    %92 = tpu.matmul %89, %91, %cst_94 {dimension_numbers = #tpu.dot_dimension_numbers<[1], [0], [0], [1], [0, 0, 1, 1], [], []>} : vector<324x128xf32>, vector<128x128xf32>, vector<324x128xf32> -> vector<324x128xf32>
    %c0_95 = arith.constant 0 : index
    %c0_96 = arith.constant 0 : index
    %c0_97 = arith.constant 0 : index
    %93 = vector.load %arg7[%c0_95, %c0_96, %c0_97] : memref<1x324x128xf32, #tpu.memory_space<vmem>>, vector<1x324x128xf32>
    %94 = vector.shape_cast %93 : vector<1x324x128xf32> to vector<324x128xf32>
    %95 = arith.addf %94, %92 : vector<324x128xf32>
    %c0_98 = arith.constant 0 : index
    %c0_99 = arith.constant 0 : index
    %c0_100 = arith.constant 0 : index
    %96 = vector.load %arg7[%c0_98, %c0_99, %c0_100] : memref<1x324x128xf32, #tpu.memory_space<vmem>>, vector<1x324x128xf32>
    %97 = vector.shape_cast %96 : vector<1x324x128xf32> to vector<324x128xf32>
    %98 = vector.shape_cast %95 : vector<324x128xf32> to vector<1x324x128xf32>
    tpu.vector_store %arg7[%c0_98, %c0_99, %c0_100], %98 {strides = array<i32>} : memref<1x324x128xf32, #tpu.memory_space<vmem>>, vector<1x324x128xf32>,
    %c0_101 = arith.constant 0 : index
    %c0_102 = arith.constant 0 : index
    %c0_103 = arith.constant 0 : index
    %99 = vector.load %arg7[%c0_101, %c0_102, %c0_103] : memref<1x324x128xf32, #tpu.memory_space<vmem>>, vector<1x324x128xf32>
    %100 = vector.shape_cast %99 : vector<1x324x128xf32> to vector<324x128xf32>
    %c0_104 = arith.constant 0 : index
    %c0_105 = arith.constant 0 : index
    %101 = vector.load %arg4[%c0_104, %c0_105] : memref<1x128xf32, #tpu.memory_space<vmem>>, vector<1x128xf32>
    %102 = vector.broadcast %101 : vector<1x128xf32> to vector<324x128xf32>
    %103 = arith.addf %100, %102 : vector<324x128xf32>
    %cst_106 = arith.constant 0.000000e+00 : f32
    %104 = vector.shape_cast %2 : vector<324x1xi1> to vector<324x1xi1>
    %105 = vector.broadcast %104 : vector<324x1xi1> to vector<324x128xi1>
    %106 = vector.broadcast %cst_106 : f32 to vector<324x128xf32>
    %107 = arith.select %105, %103, %106 : vector<324x128xi1>, vector<324x128xf32>
    %cst_107 = arith.constant dense<0.000000e+00> : vector<128xf32>
    %108 = vector.multi_reduction <add>, %107, %cst_107 [0] : vector<324x128xf32> to vector<128xf32>
    %109 = vector.shape_cast %108 : vector<128xf32> to vector<1x128xf32>
    %110 = arith.mulf %107, %107 : vector<324x128xf32>
    %cst_108 = arith.constant dense<0.000000e+00> : vector<128xf32>
    %111 = vector.multi_reduction <add>, %110, %cst_108 [0] : vector<324x128xf32> to vector<128xf32>
    %112 = vector.shape_cast %111 : vector<128xf32> to vector<1x128xf32>
    %cst_109 = arith.constant 3.906250e-03 : f32
    %113 = vector.broadcast %cst_109 : f32 to vector<1x128xf32>
    %114 = arith.mulf %109, %113 : vector<1x128xf32>
    %cst_110 = arith.constant 3.906250e-03 : f32
    %115 = vector.broadcast %cst_110 : f32 to vector<1x128xf32>
    %116 = arith.mulf %112, %115 : vector<1x128xf32>
    %117 = arith.mulf %114, %114 : vector<1x128xf32>
    %118 = arith.subf %116, %117 : vector<1x128xf32>
    %119 = vector.broadcast %114 : vector<1x128xf32> to vector<324x128xf32>
    %120 = arith.subf %107, %119 : vector<324x128xf32>
    %cst_111 = arith.constant 9.99999974E-6 : f32
    %121 = vector.broadcast %cst_111 : f32 to vector<1x128xf32>
    %122 = arith.addf %118, %121 : vector<1x128xf32>
    %123 = math.rsqrt %122 : vector<1x128xf32>
    %124 = vector.broadcast %123 : vector<1x128xf32> to vector<324x128xf32>
    %125 = arith.mulf %120, %124 : vector<324x128xf32>
    %cst_112 = arith.constant 0.000000e+00 : f32
    %126 = vector.shape_cast %2 : vector<324x1xi1> to vector<324x1xi1>
    %127 = vector.broadcast %126 : vector<324x1xi1> to vector<324x128xi1>
    %128 = vector.broadcast %cst_112 : f32 to vector<324x128xf32>
    %129 = arith.select %127, %125, %128 : vector<324x128xi1>, vector<324x128xf32>
    %cst_113 = arith.constant 0.000000e+00 : f32
    %130 = vector.broadcast %cst_113 : f32 to vector<324x128xf32>
    %131 = arith.maximumf %129, %130 : vector<324x128xf32>
    %cst_114 = arith.constant 0.000000e+00 : f32
    %132 = vector.broadcast %cst_114 : f32 to vector<24x128xf32>
    %c0_115 = arith.constant 0 : index
    %c0_116 = arith.constant 0 : index
    %133 = vector.load %arg8[%c0_115, %c0_116] : memref<372x128xf32, #tpu.memory_space<vmem>>, vector<24x128xf32>
    tpu.vector_store %arg8[%c0_115, %c0_116], %132 {strides = array<i32>} : memref<372x128xf32, #tpu.memory_space<vmem>>, vector<24x128xf32>,
    %cst_117 = arith.constant 0.000000e+00 : f32
    %134 = vector.broadcast %cst_117 : f32 to vector<24x128xf32>
    %c348 = arith.constant 348 : index
    %c0_118 = arith.constant 0 : index
    %135 = vector.load %arg8[%c348, %c0_118] : memref<372x128xf32, #tpu.memory_space<vmem>>, vector<24x128xf32>
    tpu.vector_store %arg8[%c348, %c0_118], %134 {strides = array<i32>} : memref<372x128xf32, #tpu.memory_space<vmem>>, vector<24x128xf32>,
    %c24_119 = arith.constant 24 : index
    %c0_120 = arith.constant 0 : index
    %136 = vector.load %arg8[%c24_119, %c0_120] : memref<372x128xf32, #tpu.memory_space<vmem>>, vector<324x128xf32>
    tpu.vector_store %arg8[%c24_119, %c0_120], %131 {strides = array<i32>} : memref<372x128xf32, #tpu.memory_space<vmem>>, vector<324x128xf32>,
    %c5_121 = arith.constant 5 : index
    %c0_122 = arith.constant 0 : index
    %137 = vector.load %arg8[%c5_121, %c0_122] : memref<372x128xf32, #tpu.memory_space<vmem>>, vector<324x128xf32>
    %c0_123 = arith.constant 0 : index
    %c0_124 = arith.constant 0 : index
    %c0_125 = arith.constant 0 : index
    %138 = vector.load %arg5[%c0_123, %c0_124, %c0_125] : memref<9x128x128xf32, #tpu.memory_space<vmem>>, vector<1x128x128xf32>
    %139 = vector.shape_cast %138 : vector<1x128x128xf32> to vector<128x128xf32>
    %cst_126 = arith.constant dense<0.000000e+00> : vector<324x128xf32>
    %140 = tpu.matmul %137, %139, %cst_126 {dimension_numbers = #tpu.dot_dimension_numbers<[1], [0], [0], [1], [0, 0, 1, 1], [], []>} : vector<324x128xf32>, vector<128x128xf32>, vector<324x128xf32> -> vector<324x128xf32>
    %c0_127 = arith.constant 0 : index
    %c0_128 = arith.constant 0 : index
    %c0_129 = arith.constant 0 : index
    %141 = vector.load %arg7[%c0_127, %c0_128, %c0_129] : memref<1x324x128xf32, #tpu.memory_space<vmem>>, vector<1x324x128xf32>
    %142 = vector.shape_cast %141 : vector<1x324x128xf32> to vector<324x128xf32>
    %143 = vector.shape_cast %140 : vector<324x128xf32> to vector<1x324x128xf32>
    tpu.vector_store %arg7[%c0_127, %c0_128, %c0_129], %143 {strides = array<i32>} : memref<1x324x128xf32, #tpu.memory_space<vmem>>, vector<1x324x128xf32>,
    %c6_130 = arith.constant 6 : index
    %c0_131 = arith.constant 0 : index
    %144 = vector.load %arg8[%c6_130, %c0_131] : memref<372x128xf32, #tpu.memory_space<vmem>>, vector<324x128xf32>
    %c1_132 = arith.constant 1 : index
    %c0_133 = arith.constant 0 : index
    %c0_134 = arith.constant 0 : index
    %145 = vector.load %arg5[%c1_132, %c0_133, %c0_134] : memref<9x128x128xf32, #tpu.memory_space<vmem>>, vector<1x128x128xf32>
    %146 = vector.shape_cast %145 : vector<1x128x128xf32> to vector<128x128xf32>
    %cst_135 = arith.constant dense<0.000000e+00> : vector<324x128xf32>
    %147 = tpu.matmul %144, %146, %cst_135 {dimension_numbers = #tpu.dot_dimension_numbers<[1], [0], [0], [1], [0, 0, 1, 1], [], []>} : vector<324x128xf32>, vector<128x128xf32>, vector<324x128xf32> -> vector<324x128xf32>
    %c0_136 = arith.constant 0 : index
    %c0_137 = arith.constant 0 : index
    %c0_138 = arith.constant 0 : index
    %148 = vector.load %arg7[%c0_136, %c0_137, %c0_138] : memref<1x324x128xf32, #tpu.memory_space<vmem>>, vector<1x324x128xf32>
    %149 = vector.shape_cast %148 : vector<1x324x128xf32> to vector<324x128xf32>
    %150 = arith.addf %149, %147 : vector<324x128xf32>
    %c0_139 = arith.constant 0 : index
    %c0_140 = arith.constant 0 : index
    %c0_141 = arith.constant 0 : index
    %151 = vector.load %arg7[%c0_139, %c0_140, %c0_141] : memref<1x324x128xf32, #tpu.memory_space<vmem>>, vector<1x324x128xf32>
    %152 = vector.shape_cast %151 : vector<1x324x128xf32> to vector<324x128xf32>
    %153 = vector.shape_cast %150 : vector<324x128xf32> to vector<1x324x128xf32>
    tpu.vector_store %arg7[%c0_139, %c0_140, %c0_141], %153 {strides = array<i32>} : memref<1x324x128xf32, #tpu.memory_space<vmem>>, vector<1x324x128xf32>,
    %c7_142 = arith.constant 7 : index
    %c0_143 = arith.constant 0 : index
    %154 = vector.load %arg8[%c7_142, %c0_143] : memref<372x128xf32, #tpu.memory_space<vmem>>, vector<324x128xf32>
    %c2_144 = arith.constant 2 : index
    %c0_145 = arith.constant 0 : index
    %c0_146 = arith.constant 0 : index
    %155 = vector.load %arg5[%c2_144, %c0_145, %c0_146] : memref<9x128x128xf32, #tpu.memory_space<vmem>>, vector<1x128x128xf32>
    %156 = vector.shape_cast %155 : vector<1x128x128xf32> to vector<128x128xf32>
    %cst_147 = arith.constant dense<0.000000e+00> : vector<324x128xf32>
    %157 = tpu.matmul %154, %156, %cst_147 {dimension_numbers = #tpu.dot_dimension_numbers<[1], [0], [0], [1], [0, 0, 1, 1], [], []>} : vector<324x128xf32>, vector<128x128xf32>, vector<324x128xf32> -> vector<324x128xf32>
    %c0_148 = arith.constant 0 : index
    %c0_149 = arith.constant 0 : index
    %c0_150 = arith.constant 0 : index
    %158 = vector.load %arg7[%c0_148, %c0_149, %c0_150] : memref<1x324x128xf32, #tpu.memory_space<vmem>>, vector<1x324x128xf32>
    %159 = vector.shape_cast %158 : vector<1x324x128xf32> to vector<324x128xf32>
    %160 = arith.addf %159, %157 : vector<324x128xf32>
    %c0_151 = arith.constant 0 : index
    %c0_152 = arith.constant 0 : index
    %c0_153 = arith.constant 0 : index
    %161 = vector.load %arg7[%c0_151, %c0_152, %c0_153] : memref<1x324x128xf32, #tpu.memory_space<vmem>>, vector<1x324x128xf32>
    %162 = vector.shape_cast %161 : vector<1x324x128xf32> to vector<324x128xf32>
    %163 = vector.shape_cast %160 : vector<324x128xf32> to vector<1x324x128xf32>
    tpu.vector_store %arg7[%c0_151, %c0_152, %c0_153], %163 {strides = array<i32>} : memref<1x324x128xf32, #tpu.memory_space<vmem>>, vector<1x324x128xf32>,
    %c23_154 = arith.constant 23 : index
    %c0_155 = arith.constant 0 : index
    %164 = vector.load %arg8[%c23_154, %c0_155] : memref<372x128xf32, #tpu.memory_space<vmem>>, vector<324x128xf32>
    %c3_156 = arith.constant 3 : index
    %c0_157 = arith.constant 0 : index
    %c0_158 = arith.constant 0 : index
    %165 = vector.load %arg5[%c3_156, %c0_157, %c0_158] : memref<9x128x128xf32, #tpu.memory_space<vmem>>, vector<1x128x128xf32>
    %166 = vector.shape_cast %165 : vector<1x128x128xf32> to vector<128x128xf32>
    %cst_159 = arith.constant dense<0.000000e+00> : vector<324x128xf32>
    %167 = tpu.matmul %164, %166, %cst_159 {dimension_numbers = #tpu.dot_dimension_numbers<[1], [0], [0], [1], [0, 0, 1, 1], [], []>} : vector<324x128xf32>, vector<128x128xf32>, vector<324x128xf32> -> vector<324x128xf32>
    %c0_160 = arith.constant 0 : index
    %c0_161 = arith.constant 0 : index
    %c0_162 = arith.constant 0 : index
    %168 = vector.load %arg7[%c0_160, %c0_161, %c0_162] : memref<1x324x128xf32, #tpu.memory_space<vmem>>, vector<1x324x128xf32>
    %169 = vector.shape_cast %168 : vector<1x324x128xf32> to vector<324x128xf32>
    %170 = arith.addf %169, %167 : vector<324x128xf32>
    %c0_163 = arith.constant 0 : index
    %c0_164 = arith.constant 0 : index
    %c0_165 = arith.constant 0 : index
    %171 = vector.load %arg7[%c0_163, %c0_164, %c0_165] : memref<1x324x128xf32, #tpu.memory_space<vmem>>, vector<1x324x128xf32>
    %172 = vector.shape_cast %171 : vector<1x324x128xf32> to vector<324x128xf32>
    %173 = vector.shape_cast %170 : vector<324x128xf32> to vector<1x324x128xf32>
    tpu.vector_store %arg7[%c0_163, %c0_164, %c0_165], %173 {strides = array<i32>} : memref<1x324x128xf32, #tpu.memory_space<vmem>>, vector<1x324x128xf32>,
    %c24_166 = arith.constant 24 : index
    %c0_167 = arith.constant 0 : index
    %174 = vector.load %arg8[%c24_166, %c0_167] : memref<372x128xf32, #tpu.memory_space<vmem>>, vector<324x128xf32>
    %c4_168 = arith.constant 4 : index
    %c0_169 = arith.constant 0 : index
    %c0_170 = arith.constant 0 : index
    %175 = vector.load %arg5[%c4_168, %c0_169, %c0_170] : memref<9x128x128xf32, #tpu.memory_space<vmem>>, vector<1x128x128xf32>
    %176 = vector.shape_cast %175 : vector<1x128x128xf32> to vector<128x128xf32>
    %cst_171 = arith.constant dense<0.000000e+00> : vector<324x128xf32>
    %177 = tpu.matmul %174, %176, %cst_171 {dimension_numbers = #tpu.dot_dimension_numbers<[1], [0], [0], [1], [0, 0, 1, 1], [], []>} : vector<324x128xf32>, vector<128x128xf32>, vector<324x128xf32> -> vector<324x128xf32>
    %c0_172 = arith.constant 0 : index
    %c0_173 = arith.constant 0 : index
    %c0_174 = arith.constant 0 : index
    %178 = vector.load %arg7[%c0_172, %c0_173, %c0_174] : memref<1x324x128xf32, #tpu.memory_space<vmem>>, vector<1x324x128xf32>
    %179 = vector.shape_cast %178 : vector<1x324x128xf32> to vector<324x128xf32>
    %180 = arith.addf %179, %177 : vector<324x128xf32>
    %c0_175 = arith.constant 0 : index
    %c0_176 = arith.constant 0 : index
    %c0_177 = arith.constant 0 : index
    %181 = vector.load %arg7[%c0_175, %c0_176, %c0_177] : memref<1x324x128xf32, #tpu.memory_space<vmem>>, vector<1x324x128xf32>
    %182 = vector.shape_cast %181 : vector<1x324x128xf32> to vector<324x128xf32>
    %183 = vector.shape_cast %180 : vector<324x128xf32> to vector<1x324x128xf32>
    tpu.vector_store %arg7[%c0_175, %c0_176, %c0_177], %183 {strides = array<i32>} : memref<1x324x128xf32, #tpu.memory_space<vmem>>, vector<1x324x128xf32>,
    %c25_178 = arith.constant 25 : index
    %c0_179 = arith.constant 0 : index
    %184 = vector.load %arg8[%c25_178, %c0_179] : memref<372x128xf32, #tpu.memory_space<vmem>>, vector<324x128xf32>
    %c5_180 = arith.constant 5 : index
    %c0_181 = arith.constant 0 : index
    %c0_182 = arith.constant 0 : index
    %185 = vector.load %arg5[%c5_180, %c0_181, %c0_182] : memref<9x128x128xf32, #tpu.memory_space<vmem>>, vector<1x128x128xf32>
    %186 = vector.shape_cast %185 : vector<1x128x128xf32> to vector<128x128xf32>
    %cst_183 = arith.constant dense<0.000000e+00> : vector<324x128xf32>
    %187 = tpu.matmul %184, %186, %cst_183 {dimension_numbers = #tpu.dot_dimension_numbers<[1], [0], [0], [1], [0, 0, 1, 1], [], []>} : vector<324x128xf32>, vector<128x128xf32>, vector<324x128xf32> -> vector<324x128xf32>
    %c0_184 = arith.constant 0 : index
    %c0_185 = arith.constant 0 : index
    %c0_186 = arith.constant 0 : index
    %188 = vector.load %arg7[%c0_184, %c0_185, %c0_186] : memref<1x324x128xf32, #tpu.memory_space<vmem>>, vector<1x324x128xf32>
    %189 = vector.shape_cast %188 : vector<1x324x128xf32> to vector<324x128xf32>
    %190 = arith.addf %189, %187 : vector<324x128xf32>
    %c0_187 = arith.constant 0 : index
    %c0_188 = arith.constant 0 : index
    %c0_189 = arith.constant 0 : index
    %191 = vector.load %arg7[%c0_187, %c0_188, %c0_189] : memref<1x324x128xf32, #tpu.memory_space<vmem>>, vector<1x324x128xf32>
    %192 = vector.shape_cast %191 : vector<1x324x128xf32> to vector<324x128xf32>
    %193 = vector.shape_cast %190 : vector<324x128xf32> to vector<1x324x128xf32>
    tpu.vector_store %arg7[%c0_187, %c0_188, %c0_189], %193 {strides = array<i32>} : memref<1x324x128xf32, #tpu.memory_space<vmem>>, vector<1x324x128xf32>,
    %c41_190 = arith.constant 41 : index
    %c0_191 = arith.constant 0 : index
    %194 = vector.load %arg8[%c41_190, %c0_191] : memref<372x128xf32, #tpu.memory_space<vmem>>, vector<324x128xf32>
    %c6_192 = arith.constant 6 : index
    %c0_193 = arith.constant 0 : index
    %c0_194 = arith.constant 0 : index
    %195 = vector.load %arg5[%c6_192, %c0_193, %c0_194] : memref<9x128x128xf32, #tpu.memory_space<vmem>>, vector<1x128x128xf32>
    %196 = vector.shape_cast %195 : vector<1x128x128xf32> to vector<128x128xf32>
    %cst_195 = arith.constant dense<0.000000e+00> : vector<324x128xf32>
    %197 = tpu.matmul %194, %196, %cst_195 {dimension_numbers = #tpu.dot_dimension_numbers<[1], [0], [0], [1], [0, 0, 1, 1], [], []>} : vector<324x128xf32>, vector<128x128xf32>, vector<324x128xf32> -> vector<324x128xf32>
    %c0_196 = arith.constant 0 : index
    %c0_197 = arith.constant 0 : index
    %c0_198 = arith.constant 0 : index
    %198 = vector.load %arg7[%c0_196, %c0_197, %c0_198] : memref<1x324x128xf32, #tpu.memory_space<vmem>>, vector<1x324x128xf32>
    %199 = vector.shape_cast %198 : vector<1x324x128xf32> to vector<324x128xf32>
    %200 = arith.addf %199, %197 : vector<324x128xf32>
    %c0_199 = arith.constant 0 : index
    %c0_200 = arith.constant 0 : index
    %c0_201 = arith.constant 0 : index
    %201 = vector.load %arg7[%c0_199, %c0_200, %c0_201] : memref<1x324x128xf32, #tpu.memory_space<vmem>>, vector<1x324x128xf32>
    %202 = vector.shape_cast %201 : vector<1x324x128xf32> to vector<324x128xf32>
    %203 = vector.shape_cast %200 : vector<324x128xf32> to vector<1x324x128xf32>
    tpu.vector_store %arg7[%c0_199, %c0_200, %c0_201], %203 {strides = array<i32>} : memref<1x324x128xf32, #tpu.memory_space<vmem>>, vector<1x324x128xf32>,
    %c42_202 = arith.constant 42 : index
    %c0_203 = arith.constant 0 : index
    %204 = vector.load %arg8[%c42_202, %c0_203] : memref<372x128xf32, #tpu.memory_space<vmem>>, vector<324x128xf32>
    %c7_204 = arith.constant 7 : index
    %c0_205 = arith.constant 0 : index
    %c0_206 = arith.constant 0 : index
    %205 = vector.load %arg5[%c7_204, %c0_205, %c0_206] : memref<9x128x128xf32, #tpu.memory_space<vmem>>, vector<1x128x128xf32>
    %206 = vector.shape_cast %205 : vector<1x128x128xf32> to vector<128x128xf32>
    %cst_207 = arith.constant dense<0.000000e+00> : vector<324x128xf32>
    %207 = tpu.matmul %204, %206, %cst_207 {dimension_numbers = #tpu.dot_dimension_numbers<[1], [0], [0], [1], [0, 0, 1, 1], [], []>} : vector<324x128xf32>, vector<128x128xf32>, vector<324x128xf32> -> vector<324x128xf32>
    %c0_208 = arith.constant 0 : index
    %c0_209 = arith.constant 0 : index
    %c0_210 = arith.constant 0 : index
    %208 = vector.load %arg7[%c0_208, %c0_209, %c0_210] : memref<1x324x128xf32, #tpu.memory_space<vmem>>, vector<1x324x128xf32>
    %209 = vector.shape_cast %208 : vector<1x324x128xf32> to vector<324x128xf32>
    %210 = arith.addf %209, %207 : vector<324x128xf32>
    %c0_211 = arith.constant 0 : index
    %c0_212 = arith.constant 0 : index
    %c0_213 = arith.constant 0 : index
    %211 = vector.load %arg7[%c0_211, %c0_212, %c0_213] : memref<1x324x128xf32, #tpu.memory_space<vmem>>, vector<1x324x128xf32>
    %212 = vector.shape_cast %211 : vector<1x324x128xf32> to vector<324x128xf32>
    %213 = vector.shape_cast %210 : vector<324x128xf32> to vector<1x324x128xf32>
    tpu.vector_store %arg7[%c0_211, %c0_212, %c0_213], %213 {strides = array<i32>} : memref<1x324x128xf32, #tpu.memory_space<vmem>>, vector<1x324x128xf32>,
    %c43_214 = arith.constant 43 : index
    %c0_215 = arith.constant 0 : index
    %214 = vector.load %arg8[%c43_214, %c0_215] : memref<372x128xf32, #tpu.memory_space<vmem>>, vector<324x128xf32>
    %c8_216 = arith.constant 8 : index
    %c0_217 = arith.constant 0 : index
    %c0_218 = arith.constant 0 : index
    %215 = vector.load %arg5[%c8_216, %c0_217, %c0_218] : memref<9x128x128xf32, #tpu.memory_space<vmem>>, vector<1x128x128xf32>
    %216 = vector.shape_cast %215 : vector<1x128x128xf32> to vector<128x128xf32>
    %cst_219 = arith.constant dense<0.000000e+00> : vector<324x128xf32>
    %217 = tpu.matmul %214, %216, %cst_219 {dimension_numbers = #tpu.dot_dimension_numbers<[1], [0], [0], [1], [0, 0, 1, 1], [], []>} : vector<324x128xf32>, vector<128x128xf32>, vector<324x128xf32> -> vector<324x128xf32>
    %c0_220 = arith.constant 0 : index
    %c0_221 = arith.constant 0 : index
    %c0_222 = arith.constant 0 : index
    %218 = vector.load %arg7[%c0_220, %c0_221, %c0_222] : memref<1x324x128xf32, #tpu.memory_space<vmem>>, vector<1x324x128xf32>
    %219 = vector.shape_cast %218 : vector<1x324x128xf32> to vector<324x128xf32>
    %220 = arith.addf %219, %217 : vector<324x128xf32>
    %c0_223 = arith.constant 0 : index
    %c0_224 = arith.constant 0 : index
    %c0_225 = arith.constant 0 : index
    %221 = vector.load %arg7[%c0_223, %c0_224, %c0_225] : memref<1x324x128xf32, #tpu.memory_space<vmem>>, vector<1x324x128xf32>
    %222 = vector.shape_cast %221 : vector<1x324x128xf32> to vector<324x128xf32>
    %223 = vector.shape_cast %220 : vector<324x128xf32> to vector<1x324x128xf32>
    tpu.vector_store %arg7[%c0_223, %c0_224, %c0_225], %223 {strides = array<i32>} : memref<1x324x128xf32, #tpu.memory_space<vmem>>, vector<1x324x128xf32>,
    %c0_226 = arith.constant 0 : index
    %c0_227 = arith.constant 0 : index
    %c0_228 = arith.constant 0 : index
    %224 = vector.load %arg7[%c0_226, %c0_227, %c0_228] : memref<1x324x128xf32, #tpu.memory_space<vmem>>, vector<1x324x128xf32>
    %225 = vector.shape_cast %224 : vector<1x324x128xf32> to vector<324x128xf32>
    %c0_229 = arith.constant 0 : index
    %c0_230 = arith.constant 0 : index
    %226 = vector.load %arg6[%c0_229, %c0_230] : memref<1x128xf32, #tpu.memory_space<vmem>>, vector<1x128xf32>
    %227 = vector.broadcast %226 : vector<1x128xf32> to vector<324x128xf32>
    %228 = arith.addf %225, %227 : vector<324x128xf32>
    %cst_231 = arith.constant 0.000000e+00 : f32
    %229 = vector.shape_cast %2 : vector<324x1xi1> to vector<324x1xi1>
    %230 = vector.broadcast %229 : vector<324x1xi1> to vector<324x128xi1>
    %231 = vector.broadcast %cst_231 : f32 to vector<324x128xf32>
    %232 = arith.select %230, %228, %231 : vector<324x128xi1>, vector<324x128xf32>
    %cst_232 = arith.constant dense<0.000000e+00> : vector<128xf32>
    %233 = vector.multi_reduction <add>, %232, %cst_232 [0] : vector<324x128xf32> to vector<128xf32>
    %234 = vector.shape_cast %233 : vector<128xf32> to vector<1x128xf32>
    %235 = arith.mulf %232, %232 : vector<324x128xf32>
    %cst_233 = arith.constant dense<0.000000e+00> : vector<128xf32>
    %236 = vector.multi_reduction <add>, %235, %cst_233 [0] : vector<324x128xf32> to vector<128xf32>
    %237 = vector.shape_cast %236 : vector<128xf32> to vector<1x128xf32>
    %cst_234 = arith.constant 3.906250e-03 : f32
    %238 = vector.broadcast %cst_234 : f32 to vector<1x128xf32>
    %239 = arith.mulf %234, %238 : vector<1x128xf32>
    %cst_235 = arith.constant 3.906250e-03 : f32
    %240 = vector.broadcast %cst_235 : f32 to vector<1x128xf32>
    %241 = arith.mulf %237, %240 : vector<1x128xf32>
    %242 = arith.mulf %239, %239 : vector<1x128xf32>
    %243 = arith.subf %241, %242 : vector<1x128xf32>
    %244 = vector.broadcast %239 : vector<1x128xf32> to vector<324x128xf32>
    %245 = arith.subf %232, %244 : vector<324x128xf32>
    %cst_236 = arith.constant 9.99999974E-6 : f32
    %246 = vector.broadcast %cst_236 : f32 to vector<1x128xf32>
    %247 = arith.addf %243, %246 : vector<1x128xf32>
    %248 = math.rsqrt %247 : vector<1x128xf32>
    %249 = vector.broadcast %248 : vector<1x128xf32> to vector<324x128xf32>
    %250 = arith.mulf %245, %249 : vector<324x128xf32>
    %c0_237 = arith.constant 0 : index
    %c24_238 = arith.constant 24 : index
    %c0_239 = arith.constant 0 : index
    %251 = vector.load %arg2[%c0_237, %c24_238, %c0_239] : memref<1x372x128xf32, #tpu.memory_space<vmem>>, vector<1x324x128xf32>
    %252 = vector.shape_cast %251 : vector<1x324x128xf32> to vector<324x128xf32>
    %253 = arith.addf %250, %252 : vector<324x128xf32>
    %c0_240 = arith.constant 0 : index
    %c0_241 = arith.constant 0 : index
    %c0_242 = arith.constant 0 : index
    %254 = vector.load %arg7[%c0_240, %c0_241, %c0_242] : memref<1x324x128xf32, #tpu.memory_space<vmem>>, vector<1x324x128xf32>
    %255 = vector.shape_cast %254 : vector<1x324x128xf32> to vector<324x128xf32>
    %256 = vector.shape_cast %253 : vector<324x128xf32> to vector<1x324x128xf32>
    tpu.vector_store %arg7[%c0_240, %c0_241, %c0_242], %256 {strides = array<i32>} : memref<1x324x128xf32, #tpu.memory_space<vmem>>, vector<1x324x128xf32>,
    return
  }
  func.func @transform_0(%arg0: i32) -> (i32, i32) {
    %c0_i32 = arith.constant 0 : i32
    %c0_i32_0 = arith.constant 0 : i32
    %c0_i32_1 = arith.constant 0 : i32
    return %c0_i32, %c0_i32_0 : i32, i32
  }
  func.func @transform_1(%arg0: i32) -> (i32, i32, i32) {
    %c0_i32 = arith.constant 0 : i32
    %c0_i32_0 = arith.constant 0 : i32
    %c0_i32_1 = arith.constant 0 : i32
    return %arg0, %c0_i32, %c0_i32_0 : i32, i32, i32
  }
  func.func @transform_2(%arg0: i32) -> (i32, i32, i32) {
    %c0_i32 = arith.constant 0 : i32
    %c0_i32_0 = arith.constant 0 : i32
    %c0_i32_1 = arith.constant 0 : i32
    %c0_i32_2 = arith.constant 0 : i32
    return %c0_i32, %c0_i32_0, %c0_i32_1 : i32, i32, i32
  }
  func.func @transform_3(%arg0: i32) -> (i32, i32) {
    %c0_i32 = arith.constant 0 : i32
    %c0_i32_0 = arith.constant 0 : i32
    %c0_i32_1 = arith.constant 0 : i32
    return %c0_i32, %c0_i32_0 : i32, i32
  }
  func.func @transform_4(%arg0: i32) -> (i32, i32, i32) {
    %c0_i32 = arith.constant 0 : i32
    %c0_i32_0 = arith.constant 0 : i32
    %c0_i32_1 = arith.constant 0 : i32
    %c0_i32_2 = arith.constant 0 : i32
    return %c0_i32, %c0_i32_0, %c0_i32_1 : i32, i32, i32
  }
  func.func @transform_5(%arg0: i32) -> (i32, i32) {
    %c0_i32 = arith.constant 0 : i32
    %c0_i32_0 = arith.constant 0 : i32
    %c0_i32_1 = arith.constant 0 : i32
    return %c0_i32, %c0_i32_0 : i32, i32
  }
  func.func @transform_6(%arg0: i32) -> (i32, i32, i32) {
    %c0_i32 = arith.constant 0 : i32
    %c0_i32_0 = arith.constant 0 : i32
    %c0_i32_1 = arith.constant 0 : i32
    return %arg0, %c0_i32, %c0_i32_0 : i32, i32, i32
  }
}

</mosaic_0001>

<bundles_post_ra>
// kernel: tpu_custom_call.1
= control target key start
LH: loop header
LB: loop body
LE: loop exit
PB: predicated region body
PF: predicated region fallthrough
CT: control target
= control target key end

     0   :  { %11 = vsyncpa [#allocation4], 0  ;;  %s7493_s21 = smov 0   ;;  %s10592_s0 = inlined_call_operand.vmem [shape: f32[324,1], index: 0, kind: input, shape index: {}]   ;;  %s10593_s1 = inlined_call_operand.vmem [shape: f32[2,372,128], index: 1, kind: input, shape index: {}]   ;;  %s10594_s2 = inlined_call_operand.vmem [shape: f32[9,128,128], index: 2, kind: input, shape index: {}]   ;;  %s10595_s3 = inlined_call_operand.vmem [shape: f32[1,128], index: 3, kind: input, shape index: {}]   ;;  %s10596_s4 = inlined_call_operand.hbm [shape: f32[9,128,128], index: 4, kind: input, shape index: {}]   ;;  %s10597_s5 = inlined_call_operand.vmem [shape: f32[1,128], index: 5, kind: input, shape index: {}]   ;;  %s10598_s6 = inlined_call_operand.vmem [shape: f32[2,324,128], index: 6, kind: output, shape index: {}]  }
   0x1 LB: > { %s199_s24 = sshll.u32 %s10596_s4, 4  ;;  %s7502_s25 = sadd.s32 4294967295, %s7451_s21   ;;  %s7451_s21 = sphi %s7493_s21, %s17_s21   ;;  %s200_s24 = int_to_ptr.hbm [resolvable:$true] %s199_s24 }
   0x2   : > { %p7208_p0 = scmp.ge.s32.totalorder %s7451_s21, 1  ;;  %p179_p1 = scmp.lt.s32.totalorder %s7451_s21, 3 }
   0x3   : > { %p7387_p2 = scmp.eq.s32.totalorder %s7502_s25, 0  ;;  %s7453_s26 = smov [#allocation3]  }
   0x4   : > { %p180_p3 = pnand %p7208_p0, %p179_p1  ;;  %s201_s27 = sshll.u32 %s7453_s26, 4  ;;  %s202_s27 = int_to_ptr.vmem [resolvable:$true] %s201_s27 }
   0x5   : > { %s7454_s28 = smov 128   ;;  %s7455_s29 = smov 8  }
   0x6   : > { %p7383_p4 = pneg %p180_p3  ;;  %228 = sbr.rel (%p180_p3) target bundleno = 2267 (0x8db), region = 44 }
   0x8   : > { %p7384_p5 = pnand %p7387_p2, %p7383_p4 }
   0xa   : > { %7386 = dma.hbm_to_vmem [thread:$0]  (!%p7384_p5), %s200_s24, 18432, %s202_s27, [#allocation4], %s7454_s28, %s7454_s28, %s7455_s29  }
   0xb   : > { %7446 = dma.done.wait (%p7387_p2), [#allocation4], 18432  }
   0xc   : > { %7448 = vsyncadd (%p7387_p2), [#allocation4], 4294948864  ;;  %v407_v0 = vld [vmem:[%s10594_s2 + $0x78] sm:$0xff]  ;;  %v406_v1 = vld [vmem:[%s10594_s2 + $0x70] sm:$0xff]  ;;  %p259_p6 = scmp.lt.s32.totalorder %s7502_s25, 1 }
   0xd   : > { %7345 = vmatpush.msra.mxu2 %v407_v0  ;;  %v7230_v2 = vld [vmem:[%s10594_s2 + $0xf8] sm:$0xff]  ;;  %408 = vmatpush.msra.mxu0 %v407_v0  ;;  %v405_v3 = vld [vmem:[%s10594_s2 + $0x68] sm:$0xff]  ;;  %v7229_v4 = vld [vmem:[%s10594_s2 + $0xf0] sm:$0xff] }
   0xe   : > { %7361 = vmatpush.msra.mxu3 %v7230_v2  ;;  %647 = vmatpush.msra.mxu1 %v7230_v2  ;;  %v7228_v5 = vld [vmem:[%s10594_s2 + $0xe8] sm:$0xff]  ;;  %v404_v6 = vld [vmem:[%s10594_s2 + $0x60] sm:$0xff]  ;;  %v403_v8 = vld [vmem:[%s10594_s2 + $0x58] sm:$0xff]  ;;  %s10970_s25 = smov (!%p259_p6, %s7502_s25), 1 }
   0xf   : > { %7346 = vmatpush.msra.mxu2 %v406_v1  ;;  %409 = vmatpush.msra.mxu0 %v406_v1  ;;  %v7227_v7 = vld [vmem:[%s10594_s2 + $0xe0] sm:$0xff]  ;;  %v7226_v9 = vld [vmem:[%s10594_s2 + $0xd8] sm:$0xff]  ;;  %v402_v10 = vld [vmem:[%s10594_s2 + $0x50] sm:$0xff]  ;;  %s7377_s12 = smul.u32 376, %s10970_s25 }
  0x10   : > { %7362 = vmatpush.msra.mxu3 %v7229_v4  ;;  %648 = vmatpush.msra.mxu1 %v7229_v4  ;;  %v7225_v11 = vld [vmem:[%s10594_s2 + $0xd0] sm:$0xff]  ;;  %v401_v12 = vld [vmem:[%s10594_s2 + $0x48] sm:$0xff]  ;;  %v400_v14 = vld [vmem:[%s10594_s2 + $0x40] sm:$0xff]  ;;  %s7378_s11 = smul.u32 328, %s10970_s25 }
  0x11   : > { %7347 = vmatpush.msra.mxu2 %v405_v3  ;;  %410 = vmatpush.msra.mxu0 %v405_v3  ;;  %v7224_v13 = vld [vmem:[%s10594_s2 + $0xc8] sm:$0xff]  ;;  %v7223_v15 = vld [vmem:[%s10594_s2 + $0xc0] sm:$0xff]  ;;  %v399_v16 = vld [vmem:[%s10594_s2 + $0x38] sm:$0xff]  ;;  %s7602_s24 = scalar_lea.vmem %s10593_s1, %s7377_s12 }
  0x12   : > { %7363 = vmatpush.msra.mxu3 %v7228_v5  ;;  %649 = vmatpush.msra.mxu1 %v7228_v5  ;;  %v7222_v17 = vld [vmem:[%s10594_s2 + $0xb8] sm:$0xff]  ;;  %v398_v18 = vld [vmem:[%s10594_s2 + $0x30] sm:$0xff]  ;;  %v397_v20 = vld [vmem:[%s10594_s2 + $0x28] sm:$0xff]  ;;  %s7866_s26 = scalar_lea.vmem %s10598_s6, %s7378_s11 }
  0x13   : > { %7348 = vmatpush.msra.mxu2 %v404_v6  ;;  %411 = vmatpush.msra.mxu0 %v404_v6  ;;  %v7221_v19 = vld [vmem:[%s10594_s2 + $0xb0] sm:$0xff]  ;;  %v7220_v21 = vld [vmem:[%s10594_s2 + $0xa8] sm:$0xff]  ;;  %v396_v22 = vld [vmem:[%s10594_s2 + $0x20] sm:$0xff] }
  0x14   : > { %7364 = vmatpush.msra.mxu3 %v7227_v7  ;;  %650 = vmatpush.msra.mxu1 %v7227_v7  ;;  %v7219_v23 = vld [vmem:[%s10594_s2 + $0xa0] sm:$0xff]  ;;  %v395_v24 = vld [vmem:[%s10594_s2 + $0x18] sm:$0xff]  ;;  %v394_v26 = vld [vmem:[%s10594_s2 + $0x10] sm:$0xff] }
  0x15   : > { %7349 = vmatpush.msra.mxu2 %v403_v8  ;;  %412 = vmatpush.msra.mxu0 %v403_v8  ;;  %v7218_v25 = vld [vmem:[%s10594_s2 + $0x98] sm:$0xff]  ;;  %v7217_v27 = vld [vmem:[%s10594_s2 + $0x90] sm:$0xff]  ;;  %v393_v28 = vld [vmem:[%s10594_s2 + $0x8] sm:$0xff] }
  0x16   : > { %7365 = vmatpush.msra.mxu3 %v7226_v9  ;;  %651 = vmatpush.msra.mxu1 %v7226_v9  ;;  %v7216_v29 = vld [vmem:[%s10594_s2 + $0x88] sm:$0xff]  ;;  %v392_v30 = vld [vmem:[%s10594_s2] sm:$0xff]  ;;  %v7246_v33 = vld [vmem:[%s10594_s2 + $0x178] sm:$0xff] }
  0x17   : > { %7350 = vmatpush.msra.mxu2 %v402_v10  ;;  %413 = vmatpush.msra.mxu0 %v402_v10  ;;  %v372_v31 = vld [vmem:[%s7602_s24 + $0xad] sm:$0xff]  ;;  %v7215_v32 = vld [vmem:[%s10594_s2 + $0x80] sm:$0xff]  ;;  %v7262_v35 = vld [vmem:[%s10594_s2 + $0x1f8] sm:$0xff] }
  0x18   : > { %7366 = vmatpush.msra.mxu3 %v7225_v11  ;;  %652 = vmatpush.msra.mxu1 %v7225_v11  ;;  %v610_v34 = vld [vmem:[%s7602_s24 + $0xae] sm:$0xff]  ;;  %v351_v36 = vld [vmem:[%s7602_s24 + $0x5] sm:$0xff]  ;;  %v7278_v38 = vld [vmem:[%s10594_s2 + $0x278] sm:$0xff] }
  0x19   : > { %7351 = vmatpush.msra.mxu2 %v401_v12  ;;  %414 = vmatpush.msra.mxu0 %v401_v12  ;;  %v7245_v37 = vld [vmem:[%s10594_s2 + $0x170] sm:$0xff]  ;;  %v7244_v40 = vld [vmem:[%s10594_s2 + $0x168] sm:$0xff]  ;;  %v7243_v44 = vld [vmem:[%s10594_s2 + $0x160] sm:$0xff] }
  0x1a   : > { %7367 = vmatpush.msra.mxu3 %v7224_v13  ;;  %653 = vmatpush.msra.mxu1 %v7224_v13  ;;  %v7261_v39 = vld [vmem:[%s10594_s2 + $0x1f0] sm:$0xff]  ;;  %v589_v41 = vld [vmem:[%s7602_s24 + $0x6] sm:$0xff]  ;;  %v7242_v49 = vld [vmem:[%s10594_s2 + $0x158] sm:$0xff] }
  0x1b   : > { %7352 = vmatpush.msra.mxu2 %v400_v14  ;;  %415 = vmatpush.msra.mxu0 %v400_v14  ;;  %v7277_v42 = vld [vmem:[%s10594_s2 + $0x270] sm:$0xff]  ;;  %v7260_v43 = vld [vmem:[%s10594_s2 + $0x1e8] sm:$0xff]  ;;  %v7259_v50 = vld [vmem:[%s10594_s2 + $0x1e0] sm:$0xff] }
  0x1c   : > { %7368 = vmatpush.msra.mxu3 %v7223_v15  ;;  %654 = vmatpush.msra.mxu1 %v7223_v15  ;;  %v373_v45 = vld [vmem:[%s7602_s24 + $0xb5] sm:$0xff]  ;;  %v7276_v46 = vld [vmem:[%s10594_s2 + $0x268] sm:$0xff]  ;;  %v374_v52 = vld [vmem:[%s7602_s24 + $0xbd] sm:$0xff] }
  0x1d   : > { %7353 = vmatpush.msra.mxu2 %v399_v16  ;;  %416 = vmatpush.msra.mxu0 %v399_v16  ;;  %v611_v47 = vld [vmem:[%s7602_s24 + $0xb6] sm:$0xff]  ;;  %v352_v48 = vld [vmem:[%s7602_s24 + $0xd] sm:$0xff]  ;;  %v612_v53 = vld [vmem:[%s7602_s24 + $0xbe] sm:$0xff] }
  0x1e   : > { %7369 = vmatpush.msra.mxu3 %v7222_v17  ;;  %655 = vmatpush.msra.mxu1 %v7222_v17  ;;  %v590_v51 = vld [vmem:[%s7602_s24 + $0xe] sm:$0xff]  ;;  %v7258_v56 = vld [vmem:[%s10594_s2 + $0x1d8] sm:$0xff]  ;;  %v7275_v57 = vld [vmem:[%s10594_s2 + $0x260] sm:$0xff] }
  0x1f   : > { %7354 = vmatpush.msra.mxu2 %v398_v18  ;;  %417 = vmatpush.msra.mxu0 %v398_v18  ;;  %v353_v54 = vld [vmem:[%s7602_s24 + $0x15] sm:$0xff]  ;;  %v375_v59 = vld [vmem:[%s7602_s24 + $0xc5] sm:$0xff]  ;;  %v354_v61 = vld [vmem:[%s7602_s24 + $0x1d] sm:$0xff] }
  0x20   : > { %7370 = vmatpush.msra.mxu3 %v7221_v19  ;;  %656 = vmatpush.msra.mxu1 %v7221_v19  ;;  %v7241_v55 = vld [vmem:[%s10594_s2 + $0x150] sm:$0xff]  ;;  %v613_v60 = vld [vmem:[%s7602_s24 + $0xc6] sm:$0xff]  ;;  %v7274_v0 = vld [vmem:[%s10594_s2 + $0x258] sm:$0xff] }
  0x21   : > { %7355 = vmatpush.msra.mxu2 %v397_v20  ;;  %418 = vmatpush.msra.mxu0 %v397_v20  ;;  %v591_v58 = vld [vmem:[%s7602_s24 + $0x16] sm:$0xff]  ;;  %v7240_v62 = vld [vmem:[%s10594_s2 + $0x148] sm:$0xff]  ;;  %v592_v1 = vld [vmem:[%s7602_s24 + $0x1e] sm:$0xff] }
  0x22   : > { %7371 = vmatpush.msra.mxu3 %v7220_v21  ;;  %657 = vmatpush.msra.mxu1 %v7220_v21  ;;  %v7257_v63 = vld [vmem:[%s10594_s2 + $0x1d0] sm:$0xff]  ;;  %v355_v4 = vld [vmem:[%s7602_s24 + $0x25] sm:$0xff]  ;;  %v378_v13 = vld [vmem:[%s7602_s24 + $0xdd] sm:$0xff] }
  0x23   : > { %7356 = vmatpush.msra.mxu2 %v396_v22  ;;  %419 = vmatpush.msra.mxu0 %v396_v22  ;;  %v376_v2 = vld [vmem:[%s7602_s24 + $0xcd] sm:$0xff]  ;;  %v7239_v5 = vld [vmem:[%s10594_s2 + $0x140] sm:$0xff]  ;;  %v377_v9 = vld [vmem:[%s7602_s24 + $0xd5] sm:$0xff] }
  0x24   : > { %7372 = vmatpush.msra.mxu3 %v7219_v23  ;;  %658 = vmatpush.msra.mxu1 %v7219_v23  ;;  %v614_v3 = vld [vmem:[%s7602_s24 + $0xce] sm:$0xff]  ;;  %v593_v8 = vld [vmem:[%s7602_s24 + $0x26] sm:$0xff]  ;;  %v615_v10 = vld [vmem:[%s7602_s24 + $0xd6] sm:$0xff] }
  0x25   : > { %7357 = vmatpush.msra.mxu2 %v395_v24  ;;  %420 = vmatpush.msra.mxu0 %v395_v24  ;;  %v7256_v6 = vld [vmem:[%s10594_s2 + $0x1c8] sm:$0xff]  ;;  %v7273_v7 = vld [vmem:[%s10594_s2 + $0x250] sm:$0xff]  ;;  %v616_v14 = vld [vmem:[%s7602_s24 + $0xde] sm:$0xff] }
  0x26   : > { %7373 = vmatpush.msra.mxu3 %v7218_v25  ;;  %659 = vmatpush.msra.mxu1 %v7218_v25  ;;  %v356_v11 = vld [vmem:[%s7602_s24 + $0x2d] sm:$0xff]  ;;  %v357_v15 = vld [vmem:[%s7602_s24 + $0x35] sm:$0xff]  ;;  %v7255_v17 = vld [vmem:[%s10594_s2 + $0x1c0] sm:$0xff] }
  0x27   : > { %7358 = vmatpush.msra.mxu2 %v394_v26  ;;  %421 = vmatpush.msra.mxu0 %v394_v26  ;;  %v594_v12 = vld [vmem:[%s7602_s24 + $0x2e] sm:$0xff]  ;;  %v7238_v16 = vld [vmem:[%s10594_s2 + $0x138] sm:$0xff]  ;;  %v379_v20 = vld [vmem:[%s7602_s24 + $0xe5] sm:$0xff] }
  0x28   : > { %7374 = vmatpush.msra.mxu3 %v7217_v27  ;;  %660 = vmatpush.msra.mxu1 %v7217_v27  ;;  %v7272_v18 = vld [vmem:[%s10594_s2 + $0x248] sm:$0xff]  ;;  %v595_v19 = vld [vmem:[%s7602_s24 + $0x36] sm:$0xff]  ;;  %v7271_v25 = vld [vmem:[%s10594_s2 + $0x240] sm:$0xff] }
  0x29   : > { %7359 = vmatpush.msra.mxu2 %v393_v28  ;;  %422 = vmatpush.msra.mxu0 %v393_v28  ;;  %v617_v21 = vld [vmem:[%s7602_s24 + $0xe6] sm:$0xff]  ;;  %v358_v22 = vld [vmem:[%s7602_s24 + $0x3d] sm:$0xff]  ;;  %v7237_v23 = vld [vmem:[%s10594_s2 + $0x130] sm:$0xff] }
  0x2a   : > { %7375 = vmatpush.msra.mxu3 %v7216_v29  ;;  %661 = vmatpush.msra.mxu1 %v7216_v29  ;;  %v7254_v24 = vld [vmem:[%s10594_s2 + $0x1b8] sm:$0xff]  ;;  %v380_v27 = vld [vmem:[%s7602_s24 + $0xed] sm:$0xff]  ;;  %v359_v29 = vld [vmem:[%s7602_s24 + $0x45] sm:$0xff] }
  0x2b   : > { %7360 = vmatpush.msra.mxu2 %v392_v30  ;;  %423 = vmatpush.msra.mxu0 %v392_v30  ;;  %v596_v26 = vld [vmem:[%s7602_s24 + $0x3e] sm:$0xff]  ;;  %v618_v28 = vld [vmem:[%s7602_s24 + $0xee] sm:$0xff] }
  0x2c   : > { %487 = vmatmul.f32.vlgmr.msra.gmra.mxu2 %v372_v31  ;;  %7376 = vmatpush.msra.mxu3 %v7215_v32  ;;  %v7236_v30 = vld [vmem:[%s10594_s2 + $0x128] sm:$0xff]  ;;  %v7253_v31 = vld [vmem:[%s10594_s2 + $0x1b0] sm:$0xff] }
  0x2d   : > { %968 = vmatpush.msrb.mxu2 %v7246_v33  ;;  %726 = vmatmul.f32.vlgmr.msra.gmra.mxu3 %v610_v34  ;;  %v597_v33 = vld [vmem:[%s7602_s24 + $0x46] sm:$0xff]  ;;  %v381_v34 = vld [vmem:[%s7602_s24 + $0xf5] sm:$0xff] }
  0x2e   : > { %1289 = vmatpush.msrb.mxu3 %v7262_v35  ;;  %424 = vmatmul.f32.vlgmr.msra.gmra.mxu0 %v351_v36  ;;  %v619_v35 = vld [vmem:[%s7602_s24 + $0xf6] sm:$0xff]  ;;  %v360_v36 = vld [vmem:[%s7602_s24 + $0x4d] sm:$0xff] }
  0x2f   : > { %969 = vmatpush.msrb.mxu2 %v7245_v37  ;;  %1610 = vmatpush.msrb.mxu0 %v7278_v38  ;;  %v7235_v37 = vld [vmem:[%s10594_s2 + $0x120] sm:$0xff]  ;;  %v7252_v38 = vld [vmem:[%s10594_s2 + $0x1a8] sm:$0xff] }
  0x30   : > { %1290 = vmatpush.msrb.mxu3 %v7261_v39  ;;  %662 = vmatpush.msra.mxu1 %v7215_v32  ;;  %v7270_v32 = vld [vmem:[%s10594_s2 + $0x238] sm:$0xff]  ;;  %v598_v39 = vld [vmem:[%s7602_s24 + $0x4e] sm:$0xff] }
  0x31   : > { %970 = vmatpush.msrb.mxu2 %v7244_v40  ;;  %663 = vmatmul.f32.vlgmr.msra.gmra.mxu1 %v589_v41  ;;  %v382_v40 = vld [vmem:[%s7602_s24 + $0xfd] sm:$0xff] }
  0x32   : > { %1611 = vmatpush.msrb.mxu0 %v7277_v42  ;;  %1291 = vmatpush.msrb.mxu3 %v7260_v43  ;;  %v620_v41 = vld [vmem:[%s7602_s24 + $0xfe] sm:$0xff]  ;;  %v361_v42 = vld [vmem:[%s7602_s24 + $0x55] sm:$0xff] }
  0x33   : > { %971 = vmatpush.msrb.mxu2 %v7243_v44  ;;  %v7269_v43 = vld [vmem:[%s10594_s2 + $0x230] sm:$0xff] }
  0x34   : > { %490 = vmatmul.f32.gmra.mxu2 %v373_v45  ;;  %1612 = vmatpush.msrb.mxu0 %v7276_v46  ;;  %v599_v44 = vld [vmem:[%s7602_s24 + $0x56] sm:$0xff]  ;;  %v383_v45 = vld [vmem:[%s7602_s24 + $0x105] sm:$0xff] }
  0x35   : > { %729 = vmatmul.f32.gmra.mxu3 %v611_v47  ;;  %972 = vmatpush.msrb.mxu2 %v7242_v49  ;;  %v621_v46 = vld [vmem:[%s7602_s24 + $0x106] sm:$0xff]  ;;  %v362_v47 = vld [vmem:[%s7602_s24 + $0x5d] sm:$0xff] }
  0x36   : > { %427 = vmatmul.f32.gmra.mxu0 %v352_v48  ;;  %1292 = vmatpush.msrb.mxu3 %v7259_v50  ;;  %v7234_v48 = vld [vmem:[%s10594_s2 + $0x118] sm:$0xff]  ;;  %v7251_v49 = vld [vmem:[%s10594_s2 + $0x1a0] sm:$0xff]  ;;  %v7268_v50 = vld [vmem:[%s10594_s2 + $0x228] sm:$0xff] }
  0x37   : > { %973 = vmatpush.msrb.mxu2 %v7241_v55  ;;  %1613 = vmatpush.msrb.mxu0 %v7275_v57  ;;  %v7233_v55 = vld [vmem:[%s10594_s2 + $0x110] sm:$0xff]  ;;  %v601_v57 = vld [vmem:[%s7602_s24 + $0x66] sm:$0xff] }
  0x38   : > { %1293 = vmatpush.msrb.mxu3 %v7258_v56  ;;  %v7250_v56 = vld [vmem:[%s10594_s2 + $0x198] sm:$0xff] }
  0x39   : > { %666 = vmatmul.f32.gmra.mxu1 %v590_v51  ;;  %974 = vmatpush.msrb.mxu2 %v7240_v62  ;;  %v600_v51 = vld [vmem:[%s7602_s24 + $0x5e] sm:$0xff]  ;;  %v602_v62 = vld [vmem:[%s7602_s24 + $0x6e] sm:$0xff] }
  0x3a   : > { %1294 = vmatpush.msrb.mxu3 %v7257_v63  ;;  %1614 = vmatpush.msrb.mxu0 %v7274_v0  ;;  %v7232_v63 = vld [vmem:[%s10594_s2 + $0x108] sm:$0xff]  ;;  %v7249_v0 = vld [vmem:[%s10594_s2 + $0x190] sm:$0xff] }
  0x3b   : > { %975 = vmatpush.msrb.mxu2 %v7239_v5  ;;  %v7293_v5 = vld [vmem:[%s10594_s2 + $0x2f0] sm:$0xff] }
  0x3c   : > { %493 = vmatmul.f32.gmra.mxu2 %v374_v52  ;;  %1295 = vmatpush.msrb.mxu3 %v7256_v6  ;;  %v384_v52 = vld [vmem:[%s7602_s24 + $0x10d] sm:$0xff]  ;;  %v7266_v6 = vld [vmem:[%s10594_s2 + $0x218] sm:$0xff] }
  0x3d   : > { %732 = vmatmul.f32.gmra.mxu3 %v612_v53  ;;  %1615 = vmatpush.msrb.mxu0 %v7273_v7  ;;  %v622_v53 = vld [vmem:[%s7602_s24 + $0x10e] sm:$0xff] }
  0x3e   : > { %430 = vmatmul.f32.gmra.mxu0 %v353_v54  ;;  %976 = vmatpush.msrb.mxu2 %v7238_v16  ;;  %v363_v54 = vld [vmem:[%s7602_s24 + $0x65] sm:$0xff]  ;;  %v7289_v16 = vld [vmem:[%s10594_s2 + $0x2d0] sm:$0xff] }
  0x3f   : > { %1296 = vmatpush.msrb.mxu3 %v7255_v17  ;;  %1616 = vmatpush.msrb.mxu0 %v7272_v18  ;;  %v7292_v7 = vld [vmem:[%s10594_s2 + $0x2e8] sm:$0xff]  ;;  %v604_v18 = vld [vmem:[%s7602_s24 + $0x7e] sm:$0xff] }
  0x40   : > { %977 = vmatpush.msrb.mxu2 %v7237_v23  ;;  %v7288_v17 = vld [vmem:[%s10594_s2 + $0x2c8] sm:$0xff] }
  0x41   : > { %669 = vmatmul.f32.gmra.mxu1 %v591_v58  ;;  %1297 = vmatpush.msrb.mxu3 %v7254_v24  ;;  %v7267_v58 = vld [vmem:[%s10594_s2 + $0x220] sm:$0xff]  ;;  %v626_v23 = vld [vmem:[%s7602_s24 + $0x12e] sm:$0xff] }
  0x42   : > { %1617 = vmatpush.msrb.mxu0 %v7271_v25  ;;  %978 = vmatpush.msrb.mxu2 %v7236_v30  ;;  %v367_v25 = vld [vmem:[%s7602_s24 + $0x85] sm:$0xff] }
  0x43   : > { %1298 = vmatpush.msrb.mxu3 %v7253_v31  ;;  %v605_v30 = vld [vmem:[%s7602_s24 + $0x86] sm:$0xff] }
  0x44   : > { %496 = vmatmul.f32.gmra.mxu2 %v375_v59  ;;  %1618 = vmatpush.msrb.mxu0 %v7270_v32  ;;  %v385_v59 = vld [vmem:[%s7602_s24 + $0x115] sm:$0xff]  ;;  %v7264_v32 = vld [vmem:[%s10594_s2 + $0x208] sm:$0xff] }
  0x45   : > { %735 = vmatmul.f32.gmra.mxu3 %v613_v60  ;;  %979 = vmatpush.msrb.mxu2 %v7235_v37  ;;  %v623_v60 = vld [vmem:[%s7602_s24 + $0x116] sm:$0xff]  ;;  %v7283_v37 = vld [vmem:[%s10594_s2 + $0x2a0] sm:$0xff] }
  0x46   : > { %433 = vmatmul.f32.gmra.mxu0 %v354_v61  ;;  %1299 = vmatpush.msrb.mxu3 %v7252_v38  ;;  %v364_v61 = vld [vmem:[%s7602_s24 + $0x6d] sm:$0xff]  ;;  %v627_v38 = vld [vmem:[%s7602_s24 + $0x136] sm:$0xff] }
  0x47   : > { %1619 = vmatpush.msrb.mxu0 %v7269_v43  ;;  %980 = vmatpush.msrb.mxu2 %v7234_v48  ;;  %v7263_v43 = vld [vmem:[%s10594_s2 + $0x200] sm:$0xff] }
  0x48   : > { %1300 = vmatpush.msrb.mxu3 %v7251_v49  ;;  %v390_v49 = vld [vmem:[%s7602_s24 + $0x13d] sm:$0xff] }
  0x49   : > { %672 = vmatmul.f32.gmra.mxu1 %v592_v1  ;;  %1620 = vmatpush.msrb.mxu0 %v7268_v50  ;;  %v386_v1 = vld [vmem:[%s7602_s24 + $0x11d] sm:$0xff] }
  0x4a   : > { %981 = vmatpush.msrb.mxu2 %v7233_v55  ;;  %1301 = vmatpush.msrb.mxu3 %v7250_v56  ;;  %v7279_v55 = vld [vmem:[%s10594_s2 + $0x280] sm:$0xff] }
  0x4b   : > { %1621 = vmatpush.msrb.mxu0 %v7267_v58 }
  0x4c   : > { %499 = vmatmul.f32.gmra.mxu2 %v376_v2  ;;  %1302 = vmatpush.msrb.mxu3 %v7249_v0  ;;  %v7294_v2 = vld [vmem:[%s10594_s2 + $0x2f8] sm:$0xff] }
  0x4d   : > { %738 = vmatmul.f32.gmra.mxu3 %v614_v3  ;;  %982 = vmatpush.msrb.mxu2 %v7232_v63  ;;  %v624_v3 = vld [vmem:[%s7602_s24 + $0x11e] sm:$0xff]  ;;  %v629_v63 = vld [vmem:[%s7602_s24 + $0x146] sm:$0xf] }
  0x4e   : > { %436 = vmatmul.f32.gmra.mxu0 %v355_v4  ;;  %1931 = vmatpush.msrb.mxu1 %v7294_v2  ;;  %v365_v4 = vld [vmem:[%s7602_s24 + $0x75] sm:$0xff] }
  0x4f   : > { %1622 = vmatpush.msrb.mxu0 %v7266_v6  ;;  %v7342_v2 = vld [vmem:[%s10594_s2 + $0x478] sm:$0xff]  ;;  %v7325_v6 = vld [vmem:[%s10594_s2 + $0x3f0] sm:$0xff] }
  0x50   : > { %1932 = vmatpush.msrb.mxu1 %v7293_v5 }
  0x51   : > { %675 = vmatmul.f32.gmra.mxu1 %v593_v8  ;;  %v603_v8 = vld [vmem:[%s7602_s24 + $0x76] sm:$0xff] }
  0x52   : > { %1933 = vmatpush.msrb.mxu1 %v7292_v7 }
  0x54   : > { %502 = vmatmul.f32.gmra.mxu2 %v377_v9  ;;  %v7231_v9 = vld [vmem:[%s10594_s2 + $0x100] sm:$0xff] }
  0x55   : > { %741 = vmatmul.f32.gmra.mxu3 %v615_v10  ;;  %v7248_v10 = vld [vmem:[%s10594_s2 + $0x188] sm:$0xff]  ;;  %983 = vmatpush.msrb.mxu2 %v7231_v9 }
  0x56   : > { %439 = vmatmul.f32.gmra.mxu0 %v356_v11  ;;  %1303 = vmatpush.msrb.mxu3 %v7248_v10  ;;  %v7291_v11 = vld [vmem:[%s10594_s2 + $0x2e0] sm:$0xff]  ;;  %v1231_v10 = vld [vmem:[%s7602_s24 + $0x17] sm:$0xff] }
  0x57   : > { %1934 = vmatpush.msrb.mxu1 %v7291_v11 }
  0x59   : > { %678 = vmatmul.f32.gmra.mxu1 %v594_v12  ;;  %v387_v12 = vld [vmem:[%s7602_s24 + $0x125] sm:$0xff] }
  0x5c   : > { %505 = vmatmul.f32.gmra.mxu2 %v378_v13  ;;  %v7290_v13 = vld [vmem:[%s10594_s2 + $0x2d8] sm:$0xff] }
  0x5d   : > { %744 = vmatmul.f32.gmra.mxu3 %v616_v14  ;;  %v625_v14 = vld [vmem:[%s7602_s24 + $0x126] sm:$0xff]  ;;  %1935 = vmatpush.msrb.mxu1 %v7290_v13 }
  0x5e   : > { %442 = vmatmul.f32.gmra.mxu0 %v357_v15  ;;  %v366_v15 = vld [vmem:[%s7602_s24 + $0x7d] sm:$0xff] }
  0x5f   : > { %1936 = vmatpush.msrb.mxu1 %v7289_v16 }
  0x61   : > { %681 = vmatmul.f32.gmra.mxu1 %v595_v19  ;;  %v7265_v19 = vld [vmem:[%s10594_s2 + $0x210] sm:$0xff] }
  0x62   : > { %1623 = vmatpush.msrb.mxu0 %v7265_v19  ;;  %1937 = vmatpush.msrb.mxu1 %v7288_v17  ;;  %v911_v17 = vld [vmem:[%s7602_s24 + $0xf] sm:$0xff]  ;;  %v1232_v19 = vld [vmem:[%s7602_s24 + $0x1f] sm:$0xff] }
  0x64   : > { %508 = vmatmul.f32.gmra.mxu2 %v379_v20  ;;  %v7287_v20 = vld [vmem:[%s10594_s2 + $0x2c0] sm:$0xff]  ;;  %1624 = vmatpush.msrb.mxu0 %v7264_v32 }
  0x65   : > { %747 = vmatmul.f32.gmra.mxu3 %v617_v21  ;;  %v388_v21 = vld [vmem:[%s7602_s24 + $0x12d] sm:$0xff]  ;;  %1938 = vmatpush.msrb.mxu1 %v7287_v20 }
  0x66   : > { %445 = vmatmul.f32.gmra.mxu0 %v358_v22  ;;  %v7286_v22 = vld [vmem:[%s10594_s2 + $0x2b8] sm:$0xff] }
  0x67   : > { %1939 = vmatpush.msrb.mxu1 %v7286_v22  ;;  %1625 = vmatpush.msrb.mxu0 %v7263_v43  ;;  %v7308_v22 = vld [vmem:[%s10594_s2 + $0x368] sm:$0xff] }
  0x68   : > { %v1554_v43 = vld [vmem:[%s7602_s24 + $0x28] sm:$0xff] }
  0x69   : > { %684 = vmatmul.f32.gmra.mxu1 %v596_v26  ;;  %v7247_v26 = vld [vmem:[%s10594_s2 + $0x180] sm:$0xff]  ;;  %2894 = vmatpush.msra.mxu0 %v7342_v2 }
  0x6a   : > { %1304 = vmatpush.msrb.mxu3 %v7247_v26  ;;  %v7323_v2 = vld [vmem:[%s10594_s2 + $0x3e0] sm:$0xff] }
  0x6c   : > { %511 = vmatmul.f32.gmra.mxu2 %v380_v27  ;;  %v7310_v27 = vld [vmem:[%s10594_s2 + $0x378] sm:$0xff] }
  0x6d   : > { %750 = vmatmul.f32.gmra.mxu3 %v618_v28  ;;  %v7285_v28 = vld [vmem:[%s10594_s2 + $0x2b0] sm:$0xff]  ;;  %2252 = vmatpush.msra.mxu2 %v7310_v27 }
  0x6e   : > { %448 = vmatmul.f32.gmra.mxu0 %v359_v29  ;;  %1940 = vmatpush.msrb.mxu1 %v7285_v28  ;;  %v7341_v27 = vld [vmem:[%s10594_s2 + $0x470] sm:$0xff] }
  0x6f   : > { %2895 = vmatpush.msra.mxu0 %v7341_v27 }
  0x71   : > { %687 = vmatmul.f32.gmra.mxu1 %v597_v33  ;;  %v7284_v33 = vld [vmem:[%s10594_s2 + $0x2a8] sm:$0xff] }
  0x72   : > { %1941 = vmatpush.msrb.mxu1 %v7284_v33  ;;  %v1553_v33 = vld [vmem:[%s7602_s24 + $0x20] sm:$0xff] }
  0x74   : > { %514 = vmatmul.f32.gmra.mxu2 %v381_v34  ;;  %1942 = vmatpush.msrb.mxu1 %v7283_v37  ;;  %v7324_v37 = vld [vmem:[%s10594_s2 + $0x3e8] sm:$0xff] }
  0x75   : > { %753 = vmatmul.f32.gmra.mxu3 %v619_v35  ;;  %v389_v35 = vld [vmem:[%s7602_s24 + $0x135] sm:$0xff] }
  0x76   : > { %451 = vmatmul.f32.gmra.mxu0 %v360_v36 }
  0x79   : > { %690 = vmatmul.f32.gmra.mxu1 %v598_v39 }
  0x7c   : > { %517 = vmatmul.f32.gmra.mxu2 %v382_v40  ;;  %v368_v40 = vld [vmem:[%s7602_s24 + $0x8d] sm:$0xff] }
  0x7d   : > { %756 = vmatmul.f32.gmra.mxu3 %v620_v41  ;;  %v7326_v41 = vld [vmem:[%s10594_s2 + $0x3f8] sm:$0xff] }
  0x7e   : > { %454 = vmatmul.f32.gmra.mxu0 %v361_v42  ;;  %v7282_v42 = vld [vmem:[%s10594_s2 + $0x298] sm:$0xff]  ;;  %2573 = vmatpush.msra.mxu3 %v7326_v41  ;;  %v1234_v41 = vld [vmem:[%s7602_s24 + $0x2f] sm:$0xff] }
  0x7f   : > { %1943 = vmatpush.msrb.mxu1 %v7282_v42 }
  0x80   : > { %2574 = vmatpush.msra.mxu3 %v7325_v6 }
  0x81   : > { %693 = vmatmul.f32.gmra.mxu1 %v599_v44 }
  0x82   : > { %2575 = vmatpush.msra.mxu3 %v7324_v37 }
  0x84   : > { %520 = vmatmul.f32.gmra.mxu2 %v383_v45  ;;  %v606_v45 = vld [vmem:[%s7602_s24 + $0x8e] sm:$0xff]  ;;  %2576 = vmatpush.msra.mxu3 %v7323_v2  ;;  %v1561_v2 = vld [vmem:[%s7602_s24 + $0x60] sm:$0xff] }
  0x85   : > { %759 = vmatmul.f32.gmra.mxu3 %v621_v46 }
  0x86   : > { %457 = vmatmul.f32.gmra.mxu0 %v362_v47  ;;  %v7281_v47 = vld [vmem:[%s10594_s2 + $0x290] sm:$0xff] }
  0x87   : > { %1944 = vmatpush.msrb.mxu1 %v7281_v47 }
  0x89   : > { %696 = vmatmul.f32.gmra.mxu1 %v600_v51  ;;  %v7280_v51 = vld [vmem:[%s10594_s2 + $0x288] sm:$0xff] }
  0x8a   : > { %1945 = vmatpush.msrb.mxu1 %v7280_v51  ;;  %v1235_v51 = vld [vmem:[%s7602_s24 + $0x37] sm:$0xff] }
  0x8c   : > { %523 = vmatmul.f32.gmra.mxu2 %v384_v52  ;;  %v628_v52 = vld [vmem:[%s7602_s24 + $0x13e] sm:$0xff]  ;;  %1946 = vmatpush.msrb.mxu1 %v7279_v55 }
  0x8d   : > { %762 = vmatmul.f32.gmra.mxu3 %v622_v53 }
  0x8e   : > { %460 = vmatmul.f32.gmra.mxu0 %v363_v54  ;;  %v369_v54 = vld [vmem:[%s7602_s24 + $0x95] sm:$0xff] }
  0x91   : > { %699 = vmatmul.f32.gmra.mxu1 %v601_v57  ;;  %v607_v57 = vld [vmem:[%s7602_s24 + $0x96] sm:$0xff] }
  0x94   : > { %526 = vmatmul.f32.gmra.mxu2 %v385_v59  ;;  %v7309_v59 = vld [vmem:[%s10594_s2 + $0x370] sm:$0xff] }
  0x95   : > { %765 = vmatmul.f32.gmra.mxu3 %v623_v60  ;;  %2253 = vmatpush.msra.mxu2 %v7309_v59  ;;  %v7340_v59 = vld [vmem:[%s10594_s2 + $0x468] sm:$0xff] }
  0x96   : > { %463 = vmatmul.f32.gmra.mxu0 %v364_v61  ;;  %v391_v61 = vld [vmem:[%s7602_s24 + $0x145] sm:$0xf] }
  0x97   : > { %2254 = vmatpush.msra.mxu2 %v7308_v22  ;;  %2896 = vmatpush.msra.mxu0 %v7340_v59  ;;  %v7338_v59 = vld [vmem:[%s10594_s2 + $0x458] sm:$0xff] }
  0x99   : > { %702 = vmatmul.f32.gmra.mxu1 %v602_v62 }
  0x9c   : > { %529 = vmatmul.f32.gmra.mxu2 %v386_v1  ;;  %v370_v1 = vld [vmem:[%s7602_s24 + $0x9d] sm:$0xff] }
  0x9d   : > { %768 = vmatmul.f32.gmra.mxu3 %v624_v3 }
  0x9e   : > { %466 = vmatmul.f32.gmra.mxu0 %v365_v4  ;;  %v608_v4 = vld [vmem:[%s7602_s24 + $0x9e] sm:$0xff] }
  0xa1   : > { %705 = vmatmul.f32.gmra.mxu1 %v603_v8  ;;  %v910_v8 = vld [vmem:[%s7602_s24 + $0x7] sm:$0xff] }
  0xa4   : > { %532 = vmatmul.f32.gmra.mxu2 %v387_v12  ;;  %v371_v12 = vld [vmem:[%s7602_s24 + $0xa5] sm:$0xff] }
  0xa5   : > { %771 = vmatmul.f32.gmra.mxu3 %v625_v14  ;;  %v609_v14 = vld [vmem:[%s7602_s24 + $0xa6] sm:$0xff] }
  0xa6   : > { %469 = vmatmul.f32.gmra.mxu0 %v366_v15 }
  0xa9   : > { %708 = vmatmul.f32.gmra.mxu1 %v604_v18 }
  0xab   : > { %v7841_v24 = vpop.f32.mrf.mxu0 }
  0xac   : > { %535 = vmatmul.f32.gmra.mxu2 %v388_v21  ;;  %v1552_v21 = vld [vmem:[%s7602_s24 + $0x18] sm:$0xff] }
  0xad   : > { %774 = vmatmul.f32.gmra.mxu3 %v626_v23 }
  0xae   : > { %472 = vmatmul.f32.gmra.mxu0 %v367_v25  ;;  %v7854_v29 = vpop.f32.mrf.mxu1  ;;  %v1873_v25 = vld [vmem:[%s7602_s24 + $0x19] sm:$0xff] }
  0xaf   : > { %v488_v31 = vpop.f32.mrf.mxu2 }
  0xb0   : > { %v727_v34 = vpop.f32.mrf.mxu3 }
  0xb1   : > { %v849_v36 = vadd.f32 %v727_v34, %v488_v31  ;;  %711 = vmatmul.f32.gmra.mxu1 %v605_v30  ;;  %v1233_v31 = vld [vmem:[%s7602_s24 + $0x27] sm:$0xff] }
  0xb3   : > { %890 = vst [vmem:[%s7866_s26 + $0xa8] sm:$0xff] %v849_v36  ;;  %v7874_v39 = vpop.f32.mrf.mxu0 }
  0xb4   : > { %538 = vmatmul.f32.gmra.mxu2 %v389_v35  ;;  %v1874_v35 = vld [vmem:[%s7602_s24 + $0x21] sm:$0xff] }
  0xb5   : > { %777 = vmatmul.f32.gmra.mxu3 %v627_v38 }
  0xb6   : > { %475 = vmatmul.f32.gmra.mxu0 %v368_v40  ;;  %v7886_v44 = vpop.f32.mrf.mxu1 }
  0xb7   : > { %v491_v46 = vpop.f32.mrf.mxu2 }
  0xb8   : > { %v730_v48 = vpop.f32.mrf.mxu3 }
  0xb9   : > { %v850_v50 = vadd.f32 %v730_v48, %v491_v46  ;;  %714 = vmatmul.f32.gmra.mxu1 %v606_v45  ;;  %v1875_v46 = vld [vmem:[%s7602_s24 + $0x29] sm:$0xff]  ;;  %v7307_v48 = vld [vmem:[%s10594_s2 + $0x360] sm:$0xff] }
  0xba   : > { %2255 = vmatpush.msra.mxu2 %v7307_v48 }
  0xbb   : > { %891 = vst [vmem:[%s7866_s26 + $0xb0] sm:$0xff] %v850_v50  ;;  %v7898_v53 = vpop.f32.mrf.mxu0 }
  0xbc   : > { %541 = vmatmul.f32.gmra.mxu2 %v390_v49 }
  0xbd   : > { %780 = vmatmul.f32.gmra.mxu3 %v628_v52 }
  0xbe   : > { %478 = vmatmul.f32.gmra.mxu0 %v369_v54  ;;  %v7904_v56 = vpop.f32.mrf.mxu1  ;;  %v1555_v54 = vld [vmem:[%s7602_s24 + $0x30] sm:$0xff] }
  0xbf   : > { %v494_v58 = vpop.f32.mrf.mxu2 }
  0xc0   : > { %v733_v60 = vpop.f32.mrf.mxu3 }
  0xc1   : > { %v851_v62 = vadd.f32 %v733_v60, %v494_v58  ;;  %717 = vmatmul.f32.gmra.mxu1 %v607_v57  ;;  %v1876_v57 = vld [vmem:[%s7602_s24 + $0x31] sm:$0xff] }
  0xc3   : > { %892 = vst [vmem:[%s7866_s26 + $0xb8] sm:$0xff] %v851_v62  ;;  %v7913_v0 = vpop.f32.mrf.mxu0  ;;  %v1236_v62 = vld [vmem:[%s7602_s24 + $0x3f] sm:$0xff] }
  0xc4   : > { %544 = vmatmul.f32.gmra.mxu2 %v391_v61 }
  0xc5   : > { %783 = vmatmul.f32.gmra.mxu3 %v629_v63 }
  0xc6   : > { %481 = vmatmul.f32.gmra.mxu0 %v370_v1  ;;  %v7919_v3 = vpop.f32.mrf.mxu1  ;;  %v1556_v1 = vld [vmem:[%s7602_s24 + $0x38] sm:$0xff] }
  0xc7   : > { %v497_v5 = vpop.f32.mrf.mxu2 }
  0xc8   : > { %v736_v7 = vpop.f32.mrf.mxu3 }
  0xc9   : > { %v852_v9 = vadd.f32 %v736_v7, %v497_v5  ;;  %720 = vmatmul.f32.gmra.mxu1 %v608_v4  ;;  %v1877_v5 = vld [vmem:[%s7602_s24 + $0x39] sm:$0xff] }
  0xcb   : > { %893 = vst [vmem:[%s7866_s26 + $0xc0] sm:$0xff] %v852_v9  ;;  %v7928_v11 = vpop.f32.mrf.mxu0  ;;  %v1237_v9 = vld [vmem:[%s7602_s24 + $0x47] sm:$0xff] }
  0xcc   : > { %984 = vmatmul.f32.vlgmr.msrb.gmra.mxu2 %v910_v8 }
  0xcd   : > { %1305 = vmatmul.f32.vlgmr.msrb.gmra.mxu3 %v1231_v10 }
  0xce   : > { %484 = vmatmul.f32.gmra.mxu0 %v371_v12  ;;  %v7931_v13 = vpop.f32.mrf.mxu1  ;;  %v1557_v12 = vld [vmem:[%s7602_s24 + $0x40] sm:$0xff] }
  0xcf   : > { %v500_v15 = vpop.f32.mrf.mxu2 }
  0xd0   : > { %v739_v16 = vpop.f32.mrf.mxu3 }
  0xd1   : > { %v853_v18 = vadd.f32 %v739_v16, %v500_v15  ;;  %723 = vmatmul.f32.gmra.mxu1 %v609_v14  ;;  %v7306_v14 = vld [vmem:[%s10594_s2 + $0x358] sm:$0xff]  ;;  %v1878_v16 = vld [vmem:[%s7602_s24 + $0x41] sm:$0xff] }
  0xd2   : > { %2256 = vmatpush.msra.mxu2 %v7306_v14  ;;  %v1242_v14 = vld [vmem:[%s7602_s24 + $0x6f] sm:$0xff] }
  0xd3   : > { %894 = vst [vmem:[%s7866_s26 + $0xc8] sm:$0xff] %v853_v18  ;;  %v7937_v20 = vpop.f32.mrf.mxu0 }
  0xd4   : > { %987 = vmatmul.f32.gmra.mxu2 %v911_v17 }
  0xd5   : > { %1308 = vmatmul.f32.gmra.mxu3 %v1232_v19 }
  0xd6   : > { %1626 = vmatmul.f32.vlgmr.msrb.gmra.mxu0 %v1552_v21  ;;  %v7943_v23 = vpop.f32.mrf.mxu1  ;;  %v1238_v21 = vld [vmem:[%s7602_s24 + $0x4f] sm:$0xff] }
  0xd7   : > { %v503_v26 = vpop.f32.mrf.mxu2 }
  0xd8   : > { %v742_v28 = vpop.f32.mrf.mxu3 }
  0xd9   : > { %v854_v30 = vadd.f32 %v742_v28, %v503_v26  ;;  %1947 = vmatmul.f32.vlgmr.msrb.gmra.mxu1 %v1873_v25  ;;  %v1558_v25 = vld [vmem:[%s7602_s24 + $0x48] sm:$0xff]  ;;  %v7339_v26 = vld [vmem:[%s10594_s2 + $0x460] sm:$0xff] }
  0xda   : > { %2897 = vmatpush.msra.mxu0 %v7339_v26  ;;  %v1879_v28 = vld [vmem:[%s7602_s24 + $0x49] sm:$0xff] }
  0xdb   : > { %895 = vst [vmem:[%s7866_s26 + $0xd0] sm:$0xff] %v854_v30  ;;  %v7951_v32 = vpop.f32.mrf.mxu0 }
  0xdc   : > { %990 = vmatmul.f32.gmra.mxu2 %v1231_v10  ;;  %2898 = vmatpush.msra.mxu0 %v7338_v59 }
  0xdd   : > { %1311 = vmatmul.f32.gmra.mxu3 %v1233_v31 }
  0xde   : > { %1629 = vmatmul.f32.gmra.mxu0 %v1553_v33  ;;  %v7954_v34 = vpop.f32.mrf.mxu1 }
  0xdf   : > { %v506_v36 = vpop.f32.mrf.mxu2 }
  0xe0   : > { %v745_v38 = vpop.f32.mrf.mxu3 }
  0xe1   : > { %v855_v40 = vadd.f32 %v745_v38, %v506_v36  ;;  %1950 = vmatmul.f32.gmra.mxu1 %v1874_v35  ;;  %v1239_v36 = vld [vmem:[%s7602_s24 + $0x57] sm:$0xff] }
  0xe2   : > { %v1559_v38 = vld [vmem:[%s7602_s24 + $0x50] sm:$0xff] }
  0xe3   : > { %896 = vst [vmem:[%s7866_s26 + $0xd8] sm:$0xff] %v855_v40  ;;  %v7962_v42 = vpop.f32.mrf.mxu0 }
  0xe4   : > { %993 = vmatmul.f32.gmra.mxu2 %v1232_v19 }
  0xe5   : > { %1314 = vmatmul.f32.gmra.mxu3 %v1234_v41 }
  0xe6   : > { %1632 = vmatmul.f32.gmra.mxu0 %v1554_v43  ;;  %v7965_v45 = vpop.f32.mrf.mxu1 }
  0xe7   : > { %v509_v47 = vpop.f32.mrf.mxu2 }
  0xe8   : > { %v748_v49 = vpop.f32.mrf.mxu3 }
  0xe9   : > { %v856_v50 = vadd.f32 %v748_v49, %v509_v47  ;;  %1953 = vmatmul.f32.gmra.mxu1 %v1875_v46  ;;  %v7305_v46 = vld [vmem:[%s10594_s2 + $0x350] sm:$0xff]  ;;  %v1240_v49 = vld [vmem:[%s7602_s24 + $0x5f] sm:$0xff] }
  0xea   : > { %2257 = vmatpush.msra.mxu2 %v7305_v46 }
  0xeb   : > { %897 = vst [vmem:[%s7866_s26 + $0xe0] sm:$0xff] %v856_v50  ;;  %v7973_v52 = vpop.f32.mrf.mxu0 }
  0xec   : > { %996 = vmatmul.f32.gmra.mxu2 %v1233_v31  ;;  %v7322_v31 = vld [vmem:[%s10594_s2 + $0x3d8] sm:$0xff] }
  0xed   : > { %1317 = vmatmul.f32.gmra.mxu3 %v1235_v51 }
  0xee   : > { %1635 = vmatmul.f32.gmra.mxu0 %v1555_v54  ;;  %v7976_v55 = vpop.f32.mrf.mxu1  ;;  %2577 = vmatpush.msra.mxu3 %v7322_v31  ;;  %v1563_v31 = vld [vmem:[%s7602_s24 + $0x70] sm:$0xff] }
  0xef   : > { %v512_v58 = vpop.f32.mrf.mxu2 }
  0xf0   : > { %v751_v60 = vpop.f32.mrf.mxu3 }
  0xf1   : > { %v857_v61 = vadd.f32 %v751_v60, %v512_v58  ;;  %1956 = vmatmul.f32.gmra.mxu1 %v1876_v57  ;;  %v1881_v57 = vld [vmem:[%s7602_s24 + $0x59] sm:$0xff] }
  0xf3   : > { %898 = vst [vmem:[%s7866_s26 + $0xe8] sm:$0xff] %v857_v61  ;;  %v7984_v63 = vpop.f32.mrf.mxu0 }
  0xf4   : > { %999 = vmatmul.f32.gmra.mxu2 %v1234_v41  ;;  %v1880_v41 = vld [vmem:[%s7602_s24 + $0x51] sm:$0xff] }
  0xf5   : > { %1320 = vmatmul.f32.gmra.mxu3 %v1236_v62 }
  0xf6   : > { %1638 = vmatmul.f32.gmra.mxu0 %v1556_v1  ;;  %v7990_v4 = vpop.f32.mrf.mxu1 }
  0xf7   : > { %v515_v6 = vpop.f32.mrf.mxu2 }
  0xf8   : > { %v754_v7 = vpop.f32.mrf.mxu3 }
  0xf9   : > { %v858_v8 = vadd.f32 %v754_v7, %v515_v6  ;;  %1959 = vmatmul.f32.gmra.mxu1 %v1877_v5  ;;  %v7321_v5 = vld [vmem:[%s10594_s2 + $0x3d0] sm:$0xff]  ;;  %v1882_v7 = vld [vmem:[%s7602_s24 + $0x61] sm:$0xff] }
  0xfa   : > { %2578 = vmatpush.msra.mxu3 %v7321_v5  ;;  %v1565_v5 = vld [vmem:[%s7602_s24 + $0x80] sm:$0xff] }
  0xfb   : > { %899 = vst [vmem:[%s7866_s26 + $0xf0] sm:$0xff] %v858_v8  ;;  %v7995_v10 = vpop.f32.mrf.mxu0 }
  0xfc   : > { %1002 = vmatmul.f32.gmra.mxu2 %v1235_v51  ;;  %v1560_v51 = vld [vmem:[%s7602_s24 + $0x58] sm:$0xff] }
  0xfd   : > { %1323 = vmatmul.f32.gmra.mxu3 %v1237_v9 }
  0xfe   : > { %1641 = vmatmul.f32.gmra.mxu0 %v1557_v12  ;;  %v8001_v15 = vpop.f32.mrf.mxu1 }
  0xff   : > { %v518_v17 = vpop.f32.mrf.mxu2 }
 0x100   : > { %v757_v18 = vpop.f32.mrf.mxu3 }
 0x101   : > { %v859_v19 = vadd.f32 %v757_v18, %v518_v17  ;;  %1962 = vmatmul.f32.gmra.mxu1 %v1878_v16  ;;  %v1562_v17 = vld [vmem:[%s7602_s24 + $0x68] sm:$0xff] }
 0x103   : > { %900 = vst [vmem:[%s7866_s26 + $0xf8] sm:$0xff] %v859_v19  ;;  %v8006_v22 = vpop.f32.mrf.mxu0  ;;  %v1883_v19 = vld [vmem:[%s7602_s24 + $0x69] sm:$0xff] }
 0x104   : > { %1005 = vmatmul.f32.gmra.mxu2 %v1236_v62  ;;  %v1241_v62 = vld [vmem:[%s7602_s24 + $0x67] sm:$0xff] }
 0x105   : > { %1326 = vmatmul.f32.gmra.mxu3 %v1238_v21 }
 0x106   : > { %1644 = vmatmul.f32.gmra.mxu0 %v1558_v25  ;;  %v8012_v27 = vpop.f32.mrf.mxu1 }
 0x107   : > { %v521_v30 = vpop.f32.mrf.mxu2 }
 0x108   : > { %v760_v33 = vpop.f32.mrf.mxu3 }
 0x109   : > { %v860_v35 = vadd.f32 %v760_v33, %v521_v30  ;;  %1965 = vmatmul.f32.gmra.mxu1 %v1879_v28  ;;  %v1243_v28 = vld [vmem:[%s7602_s24 + $0x77] sm:$0xff] }
 0x10b   : > { %901 = vst [vmem:[%s7866_s26 + $0x100] sm:$0xff] %v860_v35  ;;  %v8020_v37 = vpop.f32.mrf.mxu0  ;;  %v1884_v35 = vld [vmem:[%s7602_s24 + $0x71] sm:$0xff] }
 0x10c   : > { %1008 = vmatmul.f32.gmra.mxu2 %v1237_v9 }
 0x10d   : > { %1329 = vmatmul.f32.gmra.mxu3 %v1239_v36 }
 0x10e   : > { %1647 = vmatmul.f32.gmra.mxu0 %v1559_v38  ;;  %v8023_v40 = vpop.f32.mrf.mxu1  ;;  %v7304_v38 = vld [vmem:[%s10594_s2 + $0x348] sm:$0xff] }
 0x10f   : > { %v524_v43 = vpop.f32.mrf.mxu2  ;;  %2258 = vmatpush.msra.mxu2 %v7304_v38 }
 0x110   : > { %v763_v47 = vpop.f32.mrf.mxu3 }
 0x111   : > { %v861_v48 = vadd.f32 %v763_v47, %v524_v43  ;;  %1968 = vmatmul.f32.gmra.mxu1 %v1880_v41  ;;  %v7337_v41 = vld [vmem:[%s10594_s2 + $0x450] sm:$0xff]  ;;  %v1244_v47 = vld [vmem:[%s7602_s24 + $0x7f] sm:$0xff] }
 0x112   : > { %2899 = vmatpush.msra.mxu0 %v7337_v41  ;;  %v1247_v41 = vld [vmem:[%s7602_s24 + $0x97] sm:$0xff] }
 0x113   : > { %902 = vst [vmem:[%s7866_s26 + $0x108] sm:$0xff] %v861_v48  ;;  %v8031_v50 = vpop.f32.mrf.mxu0 }
 0x114   : > { %1011 = vmatmul.f32.gmra.mxu2 %v1238_v21 }
 0x115   : > { %1332 = vmatmul.f32.gmra.mxu3 %v1240_v49 }
 0x116   : > { %1650 = vmatmul.f32.gmra.mxu0 %v1560_v51  ;;  %v8034_v54 = vpop.f32.mrf.mxu1 }
 0x117   : > { %v527_v58 = vpop.f32.mrf.mxu2 }
 0x118   : > { %v766_v60 = vpop.f32.mrf.mxu3 }
 0x119   : > { %v862_v61 = vadd.f32 %v766_v60, %v527_v58  ;;  %1971 = vmatmul.f32.gmra.mxu1 %v1881_v57  ;;  %v1885_v57 = vld [vmem:[%s7602_s24 + $0x79] sm:$0xff] }
 0x11b   : > { %903 = vst [vmem:[%s7866_s26 + $0x110] sm:$0xff] %v862_v61  ;;  %v8042_v1 = vpop.f32.mrf.mxu0  ;;  %v7320_v61 = vld [vmem:[%s10594_s2 + $0x3c8] sm:$0xff] }
 0x11c   : > { %1014 = vmatmul.f32.gmra.mxu2 %v1239_v36  ;;  %2579 = vmatpush.msra.mxu3 %v7320_v61 }
 0x11d   : > { %1335 = vmatmul.f32.gmra.mxu3 %v1241_v62 }
 0x11e   : > { %1653 = vmatmul.f32.gmra.mxu0 %v1561_v2  ;;  %v8048_v6 = vpop.f32.mrf.mxu1 }
 0x11f   : > { %v530_v8 = vpop.f32.mrf.mxu2 }
 0x120   : > { %v769_v9 = vpop.f32.mrf.mxu3 }
 0x121   : > { %v863_v12 = vadd.f32 %v769_v9, %v530_v8  ;;  %1974 = vmatmul.f32.gmra.mxu1 %v1882_v7  ;;  %v7303_v7 = vld [vmem:[%s10594_s2 + $0x340] sm:$0xff] }
 0x122   : > { %2259 = vmatpush.msra.mxu2 %v7303_v7  ;;  %v1886_v9 = vld [vmem:[%s7602_s24 + $0x81] sm:$0xff]  ;;  %v7302_v7 = vld [vmem:[%s10594_s2 + $0x338] sm:$0xff] }
 0x123   : > { %904 = vst [vmem:[%s7866_s26 + $0x118] sm:$0xff] %v863_v12  ;;  %v8053_v16 = vpop.f32.mrf.mxu0 }
 0x124   : > { %1017 = vmatmul.f32.gmra.mxu2 %v1240_v49  ;;  %v1564_v49 = vld [vmem:[%s7602_s24 + $0x78] sm:$0xff] }
 0x125   : > { %1338 = vmatmul.f32.gmra.mxu3 %v1242_v14  ;;  %2260 = vmatpush.msra.mxu2 %v7302_v7 }
 0x126   : > { %1656 = vmatmul.f32.gmra.mxu0 %v1562_v17  ;;  %v8056_v18 = vpop.f32.mrf.mxu1  ;;  %v7336_v17 = vld [vmem:[%s10594_s2 + $0x448] sm:$0xff] }
 0x127   : > { %v533_v21 = vpop.f32.mrf.mxu2  ;;  %2900 = vmatpush.msra.mxu0 %v7336_v17  ;;  %v829_v17 = vadd.f32 %v7886_v44, %v7874_v39  ;;  %v1569_v39 = vld [vmem:[%s7602_s24 + $0xa0] sm:$0xff] }
 0x128   : > { %v772_v25 = vpop.f32.mrf.mxu3 }
 0x129   : > { %v864_v26 = vadd.f32 %v772_v25, %v533_v21  ;;  %1977 = vmatmul.f32.gmra.mxu1 %v1883_v19  ;;  %v1246_v21 = vld [vmem:[%s7602_s24 + $0x8f] sm:$0xff] }
 0x12b   : > { %905 = vst [vmem:[%s7866_s26 + $0x120] sm:$0xff] %v864_v26  ;;  %v8061_v30 = vpop.f32.mrf.mxu0  ;;  %v1566_v26 = vld [vmem:[%s7602_s24 + $0x88] sm:$0xff] }
 0x12c   : > { %1020 = vmatmul.f32.gmra.mxu2 %v1241_v62  ;;  %v1245_v62 = vld [vmem:[%s7602_s24 + $0x87] sm:$0xff] }
 0x12d   : > { %1341 = vmatmul.f32.gmra.mxu3 %v1243_v28 }
 0x12e   : > { %1659 = vmatmul.f32.gmra.mxu0 %v1563_v31  ;;  %v8064_v33 = vpop.f32.mrf.mxu1 }
 0x12f   : > { %v536_v36 = vpop.f32.mrf.mxu2 }
 0x130   : > { %v775_v43 = vpop.f32.mrf.mxu3 }
 0x131   : > { %v865_v46 = vadd.f32 %v775_v43, %v536_v36  ;;  %1980 = vmatmul.f32.gmra.mxu1 %v1884_v35  ;;  %v1887_v35 = vld [vmem:[%s7602_s24 + $0x89] sm:$0xff] }
 0x133   : > { %906 = vst [vmem:[%s7866_s26 + $0x128] sm:$0xff] %v865_v46  ;;  %v8075_v48 = vpop.f32.mrf.mxu0  ;;  %v1567_v46 = vld [vmem:[%s7602_s24 + $0x90] sm:$0xff] }
 0x134   : > { %1023 = vmatmul.f32.gmra.mxu2 %v1242_v14 }
 0x135   : > { %1344 = vmatmul.f32.gmra.mxu3 %v1244_v47 }
 0x136   : > { %1662 = vmatmul.f32.gmra.mxu0 %v1564_v49  ;;  %v8078_v51 = vpop.f32.mrf.mxu1 }
 0x137   : > { %v539_v58 = vpop.f32.mrf.mxu2 }
 0x138   : > { %v778_v59 = vpop.f32.mrf.mxu3 }
 0x139   : > { %v866_v60 = vadd.f32 %v778_v59, %v539_v58  ;;  %1983 = vmatmul.f32.gmra.mxu1 %v1885_v57  ;;  %v1888_v57 = vld [vmem:[%s7602_s24 + $0x91] sm:$0xff] }
 0x13b   : > { %907 = vst [vmem:[%s7866_s26 + $0x130] sm:$0xff] %v866_v60  ;;  %v8086_v2 = vpop.f32.mrf.mxu0 }
 0x13c   : > { %1026 = vmatmul.f32.gmra.mxu2 %v1243_v28  ;;  %v7319_v28 = vld [vmem:[%s10594_s2 + $0x3c0] sm:$0xff] }
 0x13d   : > { %1347 = vmatmul.f32.gmra.mxu3 %v1245_v62 }
 0x13e   : > { %1665 = vmatmul.f32.gmra.mxu0 %v1565_v5  ;;  %v8092_v8 = vpop.f32.mrf.mxu1  ;;  %2580 = vmatpush.msra.mxu3 %v7319_v28 }
 0x13f   : > { %v542_v12 = vpop.f32.mrf.mxu2 }
 0x140   : > { %v781_v14 = vpop.f32.mrf.mxu3 }
 0x141   : > { %v867_v19 = vadd.f32 %v781_v14, %v542_v12  ;;  %1986 = vmatmul.f32.gmra.mxu1 %v1886_v9  ;;  %v1568_v9 = vld [vmem:[%s7602_s24 + $0x98] sm:$0xff]  ;;  %v7335_v14 = vld [vmem:[%s10594_s2 + $0x440] sm:$0xff] }
 0x142   : > { %2901 = vmatpush.msra.mxu0 %v7335_v14 }
 0x143   : > { %908 = vst [vmem:[%s7866_s26 + $0x138] sm:$0xff] %v867_v19  ;;  %v8100_v25 = vpop.f32.mrf.mxu0 }
 0x144   : > { %1029 = vmatmul.f32.gmra.mxu2 %v1244_v47  ;;  %v828_v47 = vadd.f32 %v7854_v29, %v7841_v24  ;;  %v1248_v24 = vld [vmem:[%s7602_s24 + $0x9f] sm:$0xff] }
 0x145   : > { %1350 = vmatmul.f32.gmra.mxu3 %v1246_v21 }
 0x146   : > { %1668 = vmatmul.f32.gmra.mxu0 %v1566_v26  ;;  %v8106_v31 = vpop.f32.mrf.mxu1  ;;  %v1889_v26 = vld [vmem:[%s7602_s24 + $0x99] sm:$0xff] }
 0x147   : > { %v545_v36 = vpop.f32.mrf.mxu2 }
 0x148   : > { %588 = vst [vmem:[%s7866_s26 + $0x140] sm:$0xf] %v545_v36  ;;  %v784_v38 = vpop.f32.mrf.mxu3 }
 0x149   : > { %1989 = vmatmul.f32.gmra.mxu1 %v1887_v35 }
 0x14b   : > { %v8111_v43 = vpop.f32.mrf.mxu0 }
 0x14c   : > { %1032 = vmatmul.f32.gmra.mxu2 %v1245_v62 }
 0x14d   : > { %1353 = vmatmul.f32.gmra.mxu3 %v1247_v41 }
 0x14e   : > { %1671 = vmatmul.f32.gmra.mxu0 %v1567_v46  ;;  %v8116_v49 = vpop.f32.mrf.mxu1 }
 0x14f   : > { %v827_v58 = vld [vmem:[%s7866_s26 + $0x140] sm:$0xf]  ;;  %v985_v59 = vpop.f32.mrf.mxu2 }
 0x150   : > { %v868_v60 = vadd.f32 %v827_v58, %v784_v38  ;;  %v1149_v61 = vadd.f32 %v985_v59, %v828_v47  ;;  %v1306_v5 = vpop.f32.mrf.mxu3  ;;  %v7318_v38 = vld [vmem:[%s10594_s2 + $0x3b8] sm:$0xff]  ;;  %v1249_v47 = vld [vmem:[%s7602_s24 + $0xa7] sm:$0xff]  ;;  %v830_v58 = vadd.f32 %v7904_v56, %v7898_v53  ;;  %v7301_v53 = vld [vmem:[%s10594_s2 + $0x330] sm:$0xff]  ;;  %v831_v56 = vadd.f32 %v7919_v3, %v7913_v0 }
 0x151   : > { %1992 = vmatmul.f32.gmra.mxu1 %v1888_v57  ;;  %2581 = vmatpush.msra.mxu3 %v7318_v38  ;;  %v1251_v38 = vld [vmem:[%s7602_s24 + $0xb7] sm:$0xff] }
 0x152   : > { %909 = vst [vmem:[%s7866_s26 + $0x140] sm:$0xf] %v868_v60  ;;  %v1470_v62 = vadd.f32 %v1306_v5, %v1149_v61  ;;  %v1890_v60 = vld [vmem:[%s7602_s24 + $0xa1] sm:$0xff]  ;;  %2261 = vmatpush.msra.mxu2 %v7301_v53  ;;  %v1571_v0 = vld [vmem:[%s7602_s24 + $0xb0] sm:$0xff] }
 0x153   : > { %v1627_v29 = vpop.f32.mrf.mxu0 }
 0x154   : > { %1035 = vmatmul.f32.gmra.mxu2 %v1246_v21  ;;  %v1791_v12 = vadd.f32 %v1627_v29, %v1470_v62 }
 0x155   : > { %1356 = vmatmul.f32.gmra.mxu3 %v1248_v24 }
 0x156   : > { %1674 = vmatmul.f32.gmra.mxu0 %v1568_v9  ;;  %v1948_v19 = vpop.f32.mrf.mxu1  ;;  %v1250_v9 = vld [vmem:[%s7602_s24 + $0xaf] sm:$0xff] }
 0x157   : > { %v988_v28 = vpop.f32.mrf.mxu2  ;;  %v2112_v35 = vadd.f32 %v1948_v19, %v1791_v12  ;;  %v1891_v19 = vld [vmem:[%s7602_s24 + $0xa9] sm:$0xff] }
 0x158   : > { %v1150_v36 = vadd.f32 %v988_v28, %v829_v17  ;;  %v1309_v21 = vpop.f32.mrf.mxu3 }
 0x159   : > { %2153 = vst [vmem:[%s7866_s26] sm:$0xff] %v2112_v35  ;;  %1995 = vmatmul.f32.gmra.mxu1 %v1889_v26 }
 0x15a   : > { %v1471_v46 = vadd.f32 %v1309_v21, %v1150_v36  ;;  %v7334_v36 = vld [vmem:[%s10594_s2 + $0x438] sm:$0xff] }
 0x15b   : > { %v1630_v57 = vpop.f32.mrf.mxu0  ;;  %2902 = vmatpush.msra.mxu0 %v7334_v36  ;;  %v1894_v36 = vld [vmem:[%s7602_s24 + $0xc1] sm:$0xff] }
 0x15c   : > { %1038 = vmatmul.f32.gmra.mxu2 %v1247_v41  ;;  %v1792_v44 = vadd.f32 %v1630_v57, %v1471_v46  ;;  %v1570_v41 = vld [vmem:[%s7602_s24 + $0xa8] sm:$0xff]  ;;  %v832_v57 = vadd.f32 %v7931_v13, %v7928_v11  ;;  %v1572_v11 = vld [vmem:[%s7602_s24 + $0xb8] sm:$0xff] }
 0x15d   : > { %1359 = vmatmul.f32.gmra.mxu3 %v1249_v47 }
 0x15e   : > { %1677 = vmatmul.f32.gmra.mxu0 %v1569_v39  ;;  %v1951_v59 = vpop.f32.mrf.mxu1 }
 0x15f   : > { %v991_v61 = vpop.f32.mrf.mxu2  ;;  %v2113_v5 = vadd.f32 %v1951_v59, %v1792_v44  ;;  %v1892_v44 = vld [vmem:[%s7602_s24 + $0xb1] sm:$0xff] }
 0x160   : > { %v1151_v7 = vadd.f32 %v991_v61, %v830_v58  ;;  %v1312_v62 = vpop.f32.mrf.mxu3 }
 0x161   : > { %2154 = vst [vmem:[%s7866_s26 + $0x8] sm:$0xff] %v2113_v5  ;;  %1998 = vmatmul.f32.gmra.mxu1 %v1890_v60  ;;  %v7317_v5 = vld [vmem:[%s10594_s2 + $0x3b0] sm:$0xff] }
 0x162   : > { %v1472_v29 = vadd.f32 %v1312_v62, %v1151_v7  ;;  %2582 = vmatpush.msra.mxu3 %v7317_v5  ;;  %v1252_v7 = vld [vmem:[%s7602_s24 + $0xbf] sm:$0xff] }
 0x163   : > { %v1633_v12 = vpop.f32.mrf.mxu0 }
 0x164   : > { %1041 = vmatmul.f32.gmra.mxu2 %v1248_v24  ;;  %v1793_v14 = vadd.f32 %v1633_v12, %v1472_v29  ;;  %v833_v29 = vadd.f32 %v7943_v23, %v7937_v20  ;;  %v1573_v20 = vld [vmem:[%s7602_s24 + $0xc0] sm:$0xff] }
 0x165   : > { %1362 = vmatmul.f32.gmra.mxu3 %v1250_v9 }
 0x166   : > { %1680 = vmatmul.f32.gmra.mxu0 %v1570_v41  ;;  %v1954_v17 = vpop.f32.mrf.mxu1  ;;  %v1893_v41 = vld [vmem:[%s7602_s24 + $0xb9] sm:$0xff] }
 0x167   : > { %v994_v26 = vpop.f32.mrf.mxu2  ;;  %v2114_v28 = vadd.f32 %v1954_v17, %v1793_v14 }
 0x168   : > { %v1152_v35 = vadd.f32 %v994_v26, %v831_v56  ;;  %v1315_v24 = vpop.f32.mrf.mxu3  ;;  %v1253_v26 = vld [vmem:[%s7602_s24 + $0xc7] sm:$0xff] }
 0x169   : > { %2155 = vst [vmem:[%s7866_s26 + $0x10] sm:$0xff] %v2114_v28  ;;  %2001 = vmatmul.f32.gmra.mxu1 %v1891_v19  ;;  %v7300_v19 = vld [vmem:[%s10594_s2 + $0x328] sm:$0xff] }
 0x16a   : > { %v1473_v21 = vadd.f32 %v1315_v24, %v1152_v35  ;;  %2262 = vmatpush.msra.mxu2 %v7300_v19  ;;  %v834_v35 = vadd.f32 %v7954_v34, %v7951_v32  ;;  %v1254_v34 = vld [vmem:[%s7602_s24 + $0xcf] sm:$0xff] }
 0x16b   : > { %v1636_v46 = vpop.f32.mrf.mxu0 }
 0x16c   : > { %1044 = vmatmul.f32.gmra.mxu2 %v1249_v47  ;;  %v1794_v3 = vadd.f32 %v1636_v46, %v1473_v21 }
 0x16d   : > { %1365 = vmatmul.f32.gmra.mxu3 %v1251_v38 }
 0x16e   : > { %1683 = vmatmul.f32.gmra.mxu0 %v1571_v0  ;;  %v1957_v39 = vpop.f32.mrf.mxu1 }
 0x16f   : > { %v997_v58 = vpop.f32.mrf.mxu2  ;;  %v2115_v59 = vadd.f32 %v1957_v39, %v1794_v3 }
 0x170   : > { %v1153_v60 = vadd.f32 %v997_v58, %v832_v57  ;;  %v1318_v61 = vpop.f32.mrf.mxu3  ;;  %v7333_v57 = vld [vmem:[%s10594_s2 + $0x430] sm:$0xff] }
 0x171   : > { %2156 = vst [vmem:[%s7866_s26 + $0x18] sm:$0xff] %v2115_v59  ;;  %2004 = vmatmul.f32.gmra.mxu1 %v1892_v44  ;;  %2903 = vmatpush.msra.mxu0 %v7333_v57  ;;  %v1574_v44 = vld [vmem:[%s7602_s24 + $0xc8] sm:$0xff]  ;;  %v835_v59 = vadd.f32 %v7965_v45, %v7962_v42  ;;  %v7299_v42 = vld [vmem:[%s10594_s2 + $0x320] sm:$0xff]  ;;  %v836_v45 = vadd.f32 %v7976_v55, %v7973_v52  ;;  %v1576_v52 = vld [vmem:[%s7602_s24 + $0xd8] sm:$0xff] }
 0x172   : > { %v1474_v47 = vadd.f32 %v1318_v61, %v1153_v60  ;;  %v1895_v61 = vld [vmem:[%s7602_s24 + $0xc9] sm:$0xff]  ;;  %2263 = vmatpush.msra.mxu2 %v7299_v42  ;;  %v7315_v57 = vld [vmem:[%s10594_s2 + $0x3a0] sm:$0xff] }
 0x173   : > { %v1639_v62 = vpop.f32.mrf.mxu0 }
 0x174   : > { %1047 = vmatmul.f32.gmra.mxu2 %v1250_v9  ;;  %v1795_v13 = vadd.f32 %v1639_v62, %v1474_v47 }
 0x175   : > { %1368 = vmatmul.f32.gmra.mxu3 %v1252_v7 }
 0x176   : > { %1686 = vmatmul.f32.gmra.mxu0 %v1572_v11  ;;  %v1960_v12 = vpop.f32.mrf.mxu1 }
 0x177   : > { %v1000_v14 = vpop.f32.mrf.mxu2  ;;  %v2116_v53 = vadd.f32 %v1960_v12, %v1795_v13 }
 0x178   : > { %v1154_v56 = vadd.f32 %v1000_v14, %v833_v29  ;;  %v1321_v17 = vpop.f32.mrf.mxu3  ;;  %v1255_v29 = vld [vmem:[%s7602_s24 + $0xd7] sm:$0xff] }
 0x179   : > { %2157 = vst [vmem:[%s7866_s26 + $0x20] sm:$0xff] %v2116_v53  ;;  %2007 = vmatmul.f32.gmra.mxu1 %v1893_v41  ;;  %v1896_v53 = vld [vmem:[%s7602_s24 + $0xd1] sm:$0xff] }
 0x17a   : > { %v1475_v9 = vadd.f32 %v1321_v17, %v1154_v56 }
 0x17b   : > { %v1642_v28 = vpop.f32.mrf.mxu0 }
 0x17c   : > { %1050 = vmatmul.f32.gmra.mxu2 %v1251_v38  ;;  %v1796_v23 = vadd.f32 %v1642_v28, %v1475_v9  ;;  %v7316_v38 = vld [vmem:[%s10594_s2 + $0x3a8] sm:$0xff] }
 0x17d   : > { %1371 = vmatmul.f32.gmra.mxu3 %v1253_v26 }
 0x17e   : > { %1689 = vmatmul.f32.gmra.mxu0 %v1573_v20  ;;  %v1963_v24 = vpop.f32.mrf.mxu1  ;;  %2583 = vmatpush.msra.mxu3 %v7316_v38  ;;  %v1256_v20 = vld [vmem:[%s7602_s24 + $0xdf] sm:$0xff] }
 0x17f   : > { %v1003_v21 = vpop.f32.mrf.mxu2  ;;  %v2117_v46 = vadd.f32 %v1963_v24, %v1796_v23 }
 0x180   : > { %v1155_v0 = vadd.f32 %v1003_v21, %v834_v35  ;;  %v1324_v3 = vpop.f32.mrf.mxu3  ;;  %v837_v35 = vadd.f32 %v7990_v4, %v7984_v63  ;;  %2584 = vmatpush.msra.mxu3 %v7315_v57  ;;  %v1577_v63 = vld [vmem:[%s7602_s24 + $0xe0] sm:$0xff] }
 0x181   : > { %2158 = vst [vmem:[%s7866_s26 + $0x28] sm:$0xff] %v2117_v46  ;;  %2010 = vmatmul.f32.gmra.mxu1 %v1894_v36  ;;  %v1897_v36 = vld [vmem:[%s7602_s24 + $0xd9] sm:$0xff] }
 0x182   : > { %v1476_v32 = vadd.f32 %v1324_v3, %v1155_v0 }
 0x183   : > { %v1645_v39 = vpop.f32.mrf.mxu0 }
 0x184   : > { %1053 = vmatmul.f32.gmra.mxu2 %v1252_v7  ;;  %v1797_v58 = vadd.f32 %v1645_v39, %v1476_v32  ;;  %v1575_v7 = vld [vmem:[%s7602_s24 + $0xd0] sm:$0xff]  ;;  %v1257_v32 = vld [vmem:[%s7602_s24 + $0xe7] sm:$0xff]  ;;  %v838_v39 = vadd.f32 %v8001_v15, %v7995_v10 }
 0x185   : > { %1374 = vmatmul.f32.gmra.mxu3 %v1254_v34  ;;  %v1578_v10 = vld [vmem:[%s7602_s24 + $0xe8] sm:$0xff] }
 0x186   : > { %1692 = vmatmul.f32.gmra.mxu0 %v1574_v44  ;;  %v1966_v60 = vpop.f32.mrf.mxu1 }
 0x187   : > { %v1006_v5 = vpop.f32.mrf.mxu2  ;;  %v2118_v47 = vadd.f32 %v1966_v60, %v1797_v58  ;;  %v1898_v58 = vld [vmem:[%s7602_s24 + $0xe1] sm:$0xff] }
 0x188   : > { %v1156_v62 = vadd.f32 %v1006_v5, %v835_v59  ;;  %v1327_v11 = vpop.f32.mrf.mxu3 }
 0x189   : > { %2159 = vst [vmem:[%s7866_s26 + $0x30] sm:$0xff] %v2118_v47  ;;  %2013 = vmatmul.f32.gmra.mxu1 %v1895_v61  ;;  %v7298_v47 = vld [vmem:[%s10594_s2 + $0x318] sm:$0xff] }
 0x18a   : > { %v1477_v13 = vadd.f32 %v1327_v11, %v1156_v62  ;;  %2264 = vmatpush.msra.mxu2 %v7298_v47  ;;  %v1258_v11 = vld [vmem:[%s7602_s24 + $0xef] sm:$0xff] }
 0x18b   : > { %v1648_v12 = vpop.f32.mrf.mxu0 }
 0x18c   : > { %1056 = vmatmul.f32.gmra.mxu2 %v1253_v26  ;;  %v1798_v41 = vadd.f32 %v1648_v12, %v1477_v13  ;;  %v7332_v26 = vld [vmem:[%s10594_s2 + $0x428] sm:$0xff] }
 0x18d   : > { %1377 = vmatmul.f32.gmra.mxu3 %v1255_v29  ;;  %2904 = vmatpush.msra.mxu0 %v7332_v26  ;;  %v840_v26 = vadd.f32 %v8023_v40, %v8020_v37  ;;  %v841_v37 = vadd.f32 %v8034_v54, %v8031_v50  ;;  %v1581_v50 = vld [vmem:[%s7602_s24 + $0x100] sm:$0xff] }
 0x18e   : > { %1695 = vmatmul.f32.gmra.mxu0 %v1575_v7  ;;  %v1969_v14 = vpop.f32.mrf.mxu1  ;;  %v1899_v7 = vld [vmem:[%s7602_s24 + $0xe9] sm:$0xff] }
 0x18f   : > { %v1009_v56 = vpop.f32.mrf.mxu2  ;;  %v2119_v17 = vadd.f32 %v1969_v14, %v1798_v41 }
 0x190   : > { %v1157_v19 = vadd.f32 %v1009_v56, %v836_v45  ;;  %v1330_v9 = vpop.f32.mrf.mxu3 }
 0x191   : > { %2160 = vst [vmem:[%s7866_s26 + $0x38] sm:$0xff] %v2119_v17  ;;  %2016 = vmatmul.f32.gmra.mxu1 %v1896_v53  ;;  %v7331_v53 = vld [vmem:[%s10594_s2 + $0x420] sm:$0xff]  ;;  %v1259_v17 = vld [vmem:[%s7602_s24 + $0xf7] sm:$0xff] }
 0x192   : > { %v1478_v28 = vadd.f32 %v1330_v9, %v1157_v19  ;;  %2905 = vmatpush.msra.mxu0 %v7331_v53  ;;  %v7314_v9 = vld [vmem:[%s10594_s2 + $0x398] sm:$0xff] }
 0x193   : > { %v1651_v23 = vpop.f32.mrf.mxu0  ;;  %2585 = vmatpush.msra.mxu3 %v7314_v9 }
 0x194   : > { %1059 = vmatmul.f32.gmra.mxu2 %v1254_v34  ;;  %v1799_v55 = vadd.f32 %v1651_v23, %v1478_v28 }
 0x195   : > { %1380 = vmatmul.f32.gmra.mxu3 %v1256_v20 }
 0x196   : > { %1698 = vmatmul.f32.gmra.mxu0 %v1576_v52  ;;  %v1972_v24 = vpop.f32.mrf.mxu1 }
 0x197   : > { %v1012_v21 = vpop.f32.mrf.mxu2  ;;  %v2120_v46 = vadd.f32 %v1972_v24, %v1799_v55 }
 0x198   : > { %v1158_v0 = vadd.f32 %v1012_v21, %v837_v35  ;;  %v1333_v3 = vpop.f32.mrf.mxu3 }
 0x199   : > { %2161 = vst [vmem:[%s7866_s26 + $0x40] sm:$0xff] %v2120_v46  ;;  %2019 = vmatmul.f32.gmra.mxu1 %v1897_v36  ;;  %v1260_v36 = vld [vmem:[%s7602_s24 + $0xff] sm:$0xff] }
 0x19a   : > { %v1479_v38 = vadd.f32 %v1333_v3, %v1158_v0  ;;  %v1580_v46 = vld [vmem:[%s7602_s24 + $0xf8] sm:$0xff] }
 0x19b   : > { %v1654_v34 = vpop.f32.mrf.mxu0  ;;  %v1901_v3 = vld [vmem:[%s7602_s24 + $0xf9] sm:$0xff] }
 0x19c   : > { %1062 = vmatmul.f32.gmra.mxu2 %v1255_v29  ;;  %v1800_v4 = vadd.f32 %v1654_v34, %v1479_v38  ;;  %v839_v29 = vadd.f32 %v8012_v27, %v8006_v22  ;;  %v1579_v22 = vld [vmem:[%s7602_s24 + $0xf0] sm:$0xff] }
 0x19d   : > { %1383 = vmatmul.f32.gmra.mxu3 %v1257_v32 }
 0x19e   : > { %1701 = vmatmul.f32.gmra.mxu0 %v1577_v63  ;;  %v1975_v44 = vpop.f32.mrf.mxu1  ;;  %v7297_v63 = vld [vmem:[%s10594_s2 + $0x310] sm:$0xff] }
 0x19f   : > { %v1015_v59 = vpop.f32.mrf.mxu2  ;;  %v2121_v60 = vadd.f32 %v1975_v44, %v1800_v4  ;;  %2265 = vmatpush.msra.mxu2 %v7297_v63 }
 0x1a0   : > { %v1159_v61 = vadd.f32 %v1015_v59, %v838_v39  ;;  %v1336_v5 = vpop.f32.mrf.mxu3  ;;  %v1261_v39 = vld [vmem:[%s7602_s24 + $0x107] sm:$0xff]  ;;  %v842_v59 = vadd.f32 %v8048_v6, %v8042_v1 }
 0x1a1   : > { %2162 = vst [vmem:[%s7866_s26 + $0x48] sm:$0xff] %v2121_v60  ;;  %2022 = vmatmul.f32.gmra.mxu1 %v1898_v58  ;;  %v7330_v58 = vld [vmem:[%s10594_s2 + $0x418] sm:$0xff]  ;;  %v1582_v1 = vld [vmem:[%s7602_s24 + $0x108] sm:$0xff] }
 0x1a2   : > { %v1480_v62 = vadd.f32 %v1336_v5, %v1159_v61  ;;  %2906 = vmatpush.msra.mxu0 %v7330_v58  ;;  %v1902_v61 = vld [vmem:[%s7602_s24 + $0x101] sm:$0xff] }
 0x1a3   : > { %v1657_v13 = vpop.f32.mrf.mxu0 }
 0x1a4   : > { %1065 = vmatmul.f32.gmra.mxu2 %v1256_v20  ;;  %v1801_v15 = vadd.f32 %v1657_v13, %v1480_v62  ;;  %v1900_v20 = vld [vmem:[%s7602_s24 + $0xf1] sm:$0xff] }
 0x1a5   : > { %1386 = vmatmul.f32.gmra.mxu3 %v1258_v11  ;;  %v7313_v13 = vld [vmem:[%s10594_s2 + $0x390] sm:$0xff] }
 0x1a6   : > { %1704 = vmatmul.f32.gmra.mxu0 %v1578_v10  ;;  %v1978_v12 = vpop.f32.mrf.mxu1  ;;  %2586 = vmatpush.msra.mxu3 %v7313_v13 }
 0x1a7   : > { %v1018_v41 = vpop.f32.mrf.mxu2  ;;  %v2122_v42 = vadd.f32 %v1978_v12, %v1801_v15  ;;  %v1262_v15 = vld [vmem:[%s7602_s24 + $0x10f] sm:$0xff]  ;;  %v843_v12 = vadd.f32 %v8056_v18, %v8053_v16 }
 0x1a8   : > { %v1160_v45 = vadd.f32 %v1018_v41, %v839_v29  ;;  %v1339_v14 = vpop.f32.mrf.mxu3  ;;  %v1903_v41 = vld [vmem:[%s7602_s24 + $0x109] sm:$0xff] }
 0x1a9   : > { %2163 = vst [vmem:[%s7866_s26 + $0x50] sm:$0xff] %v2122_v42  ;;  %2025 = vmatmul.f32.gmra.mxu1 %v1899_v7  ;;  %v1583_v16 = vld [vmem:[%s7602_s24 + $0x110] sm:$0xff] }
 0x1aa   : > { %v1481_v56 = vadd.f32 %v1339_v14, %v1160_v45 }
 0x1ab   : > { %v1660_v19 = vpop.f32.mrf.mxu0 }
 0x1ac   : > { %1068 = vmatmul.f32.gmra.mxu2 %v1257_v32  ;;  %v1802_v27 = vadd.f32 %v1660_v19, %v1481_v56  ;;  %v7296_v56 = vld [vmem:[%s10594_s2 + $0x308] sm:$0xff]  ;;  %v1263_v19 = vld [vmem:[%s7602_s24 + $0x117] sm:$0xff] }
 0x1ad   : > { %1389 = vmatmul.f32.gmra.mxu3 %v1259_v17  ;;  %2266 = vmatpush.msra.mxu2 %v7296_v56 }
 0x1ae   : > { %1707 = vmatmul.f32.gmra.mxu0 %v1579_v22  ;;  %v1981_v28 = vpop.f32.mrf.mxu1 }
 0x1af   : > { %v1021_v23 = vpop.f32.mrf.mxu2  ;;  %v2123_v52 = vadd.f32 %v1981_v28, %v1802_v27  ;;  %v844_v27 = vadd.f32 %v8064_v33, %v8061_v30  ;;  %v1584_v30 = vld [vmem:[%s7602_s24 + $0x118] sm:$0xff] }
 0x1b0   : > { %v1161_v55 = vadd.f32 %v1021_v23, %v840_v26  ;;  %v1342_v35 = vpop.f32.mrf.mxu3  ;;  %v1904_v26 = vld [vmem:[%s7602_s24 + $0x111] sm:$0xff] }
 0x1b1   : > { %2164 = vst [vmem:[%s7866_s26 + $0x58] sm:$0xff] %v2123_v52  ;;  %2028 = vmatmul.f32.gmra.mxu1 %v1900_v20 }
 0x1b2   : > { %v1482_v24 = vadd.f32 %v1342_v35, %v1161_v55  ;;  %v7329_v55 = vld [vmem:[%s10594_s2 + $0x410] sm:$0xff] }
 0x1b3   : > { %v1663_v21 = vpop.f32.mrf.mxu0  ;;  %2907 = vmatpush.msra.mxu0 %v7329_v55 }
 0x1b4   : > { %1071 = vmatmul.f32.gmra.mxu2 %v1258_v11  ;;  %v1803_v0 = vadd.f32 %v1663_v21, %v1482_v24  ;;  %v1264_v24 = vld [vmem:[%s7602_s24 + $0x11f] sm:$0xff]  ;;  %v7312_v21 = vld [vmem:[%s10594_s2 + $0x388] sm:$0xff] }
 0x1b5   : > { %1392 = vmatmul.f32.gmra.mxu3 %v1260_v36 }
 0x1b6   : > { %1710 = vmatmul.f32.gmra.mxu0 %v1580_v46  ;;  %v1984_v40 = vpop.f32.mrf.mxu1  ;;  %v845_v46 = vadd.f32 %v8078_v51, %v8075_v48  ;;  %2587 = vmatpush.msra.mxu3 %v7312_v21  ;;  %v846_v48 = vadd.f32 %v8092_v8, %v8086_v2  ;;  %v1586_v2 = vld [vmem:[%s7602_s24 + $0x128] sm:$0xff] }
 0x1b7   : > { %v1024_v57 = vpop.f32.mrf.mxu2  ;;  %v2124_v38 = vadd.f32 %v1984_v40, %v1803_v0 }
 0x1b8   : > { %v1162_v32 = vadd.f32 %v1024_v57, %v841_v37  ;;  %v1345_v34 = vpop.f32.mrf.mxu3  ;;  %v1905_v37 = vld [vmem:[%s7602_s24 + $0x119] sm:$0xff] }
 0x1b9   : > { %2165 = vst [vmem:[%s7866_s26 + $0x60] sm:$0xff] %v2124_v38  ;;  %2031 = vmatmul.f32.gmra.mxu1 %v1901_v3 }
 0x1ba   : > { %v1483_v4 = vadd.f32 %v1345_v34, %v1162_v32  ;;  %v1265_v34 = vld [vmem:[%s7602_s24 + $0x127] sm:$0xff] }
 0x1bb   : > { %v1666_v44 = vpop.f32.mrf.mxu0 }
 0x1bc   : > { %1074 = vmatmul.f32.gmra.mxu2 %v1259_v17  ;;  %v1804_v54 = vadd.f32 %v1666_v44, %v1483_v4  ;;  %v1585_v4 = vld [vmem:[%s7602_s24 + $0x120] sm:$0xff] }
 0x1bd   : > { %1395 = vmatmul.f32.gmra.mxu3 %v1261_v39  ;;  %v1906_v44 = vld [vmem:[%s7602_s24 + $0x121] sm:$0xff] }
 0x1be   : > { %1713 = vmatmul.f32.gmra.mxu0 %v1581_v50  ;;  %v1987_v60 = vpop.f32.mrf.mxu1 }
 0x1bf   : > { %v1027_v5 = vpop.f32.mrf.mxu2  ;;  %v2125_v47 = vadd.f32 %v1987_v60, %v1804_v54  ;;  %v7295_v60 = vld [vmem:[%s10594_s2 + $0x300] sm:$0xff] }
 0x1c0   : > { %v1163_v62 = vadd.f32 %v1027_v5, %v842_v59  ;;  %v1348_v11 = vpop.f32.mrf.mxu3  ;;  %2267 = vmatpush.msra.mxu2 %v7295_v60  ;;  %v1266_v5 = vld [vmem:[%s7602_s24 + $0x12f] sm:$0xff]  ;;  %v950_v60 = vld [vmem:[%s7602_s24 + $0x147] sm:$0xf] }
 0x1c1   : > { %2166 = vst [vmem:[%s7866_s26 + $0x68] sm:$0xff] %v2125_v47  ;;  %2034 = vmatmul.f32.gmra.mxu1 %v1902_v61 }
 0x1c2   : > { %v1484_v10 = vadd.f32 %v1348_v11, %v1163_v62  ;;  %v7328_v62 = vld [vmem:[%s10594_s2 + $0x408] sm:$0xff]  ;;  %v847_v11 = vadd.f32 %v8106_v31, %v8100_v25  ;;  %v1587_v25 = vld [vmem:[%s7602_s24 + $0x130] sm:$0xff] }
 0x1c3   : > { %v1669_v29 = vpop.f32.mrf.mxu0  ;;  %2908 = vmatpush.msra.mxu0 %v7328_v62 }
 0x1c4   : > { %1077 = vmatmul.f32.gmra.mxu2 %v1260_v36  ;;  %v1805_v6 = vadd.f32 %v1669_v29, %v1484_v10  ;;  %v1907_v10 = vld [vmem:[%s7602_s24 + $0x129] sm:$0xff] }
 0x1c5   : > { %1398 = vmatmul.f32.gmra.mxu3 %v1262_v15 }
 0x1c6   : > { %1716 = vmatmul.f32.gmra.mxu0 %v1582_v1  ;;  %v1990_v7 = vpop.f32.mrf.mxu1 }
 0x1c7   : > { %v1030_v42 = vpop.f32.mrf.mxu2  ;;  %v2126_v45 = vadd.f32 %v1990_v7, %v1805_v6 }
 0x1c8   : > { %v1164_v14 = vadd.f32 %v1030_v42, %v843_v12  ;;  %v1351_v53 = vpop.f32.mrf.mxu3  ;;  %v7311_v12 = vld [vmem:[%s10594_s2 + $0x380] sm:$0xff] }
 0x1c9   : > { %2167 = vst [vmem:[%s7866_s26 + $0x70] sm:$0xff] %v2126_v45  ;;  %2037 = vmatmul.f32.gmra.mxu1 %v1903_v41  ;;  %2588 = vmatpush.msra.mxu3 %v7311_v12  ;;  %v1267_v41 = vld [vmem:[%s7602_s24 + $0x137] sm:$0xff]  ;;  %v848_v45 = vadd.f32 %v8116_v49, %v8111_v43 }
 0x1ca   : > { %v1485_v17 = vadd.f32 %v1351_v53, %v1164_v14  ;;  %v1908_v53 = vld [vmem:[%s7602_s24 + $0x131] sm:$0xff]  ;;  %v1909_v49 = vld [vmem:[%s7602_s24 + $0x139] sm:$0xff] }
 0x1cb   : > { %v1672_v22 = vpop.f32.mrf.mxu0 }
 0x1cc   : > { %1080 = vmatmul.f32.gmra.mxu2 %v1261_v39  ;;  %v1806_v18 = vadd.f32 %v1672_v22, %v1485_v17 }
 0x1cd   : > { %1401 = vmatmul.f32.gmra.mxu3 %v1263_v19 }
 0x1ce   : > { %1719 = vmatmul.f32.gmra.mxu0 %v1583_v16  ;;  %v1993_v9 = vpop.f32.mrf.mxu1 }
 0x1cf   : > { %v1033_v28 = vpop.f32.mrf.mxu2  ;;  %v2127_v20 = vadd.f32 %v1993_v9, %v1806_v18  ;;  %v1268_v18 = vld [vmem:[%s7602_s24 + $0x13f] sm:$0xff] }
 0x1d0   : > { %v1165_v23 = vadd.f32 %v1033_v28, %v844_v27  ;;  %v1354_v52 = vpop.f32.mrf.mxu3  ;;  %v1588_v9 = vld [vmem:[%s7602_s24 + $0x138] sm:$0xff] }
 0x1d1   : > { %2168 = vst [vmem:[%s7866_s26 + $0x78] sm:$0xff] %v2127_v20  ;;  %2040 = vmatmul.f32.gmra.mxu1 %v1904_v26  ;;  %v1129_v20 = vld [vmem:[%s7866_s26 + $0xa8] sm:$0xff] }
 0x1d2   : > { %v1486_v35 = vadd.f32 %v1354_v52, %v1165_v23 }
 0x1d3   : > { %v1675_v36 = vpop.f32.mrf.mxu0 }
 0x1d4   : > { %1083 = vmatmul.f32.gmra.mxu2 %v1262_v15  ;;  %v1807_v33 = vadd.f32 %v1675_v36, %v1486_v35  ;;  %v7327_v35 = vld [vmem:[%s10594_s2 + $0x400] sm:$0xff] }
 0x1d5   : > { %1404 = vmatmul.f32.gmra.mxu3 %v1264_v24  ;;  %2909 = vmatpush.msra.mxu0 %v7327_v35  ;;  %v1269_v36 = vld [vmem:[%s7602_s24 + $0x147] sm:$0xff] }
 0x1d6   : > { %1722 = vmatmul.f32.gmra.mxu0 %v1584_v30  ;;  %v1996_v0 = vpop.f32.mrf.mxu1 }
 0x1d7   : > { %v1036_v40 = vpop.f32.mrf.mxu2  ;;  %v2128_v3 = vadd.f32 %v1996_v0, %v1807_v33  ;;  %v1589_v33 = vld [vmem:[%s7602_s24 + $0x140] sm:$0xff] }
 0x1d8   : > { %v1166_v57 = vadd.f32 %v1036_v40, %v845_v46  ;;  %v1357_v38 = vpop.f32.mrf.mxu3  ;;  %v1910_v0 = vld [vmem:[%s7602_s24 + $0x141] sm:$0xff]  ;;  %v1130_v40 = vld [vmem:[%s7866_s26 + $0xb0] sm:$0xff] }
 0x1d9   : > { %2169 = vst [vmem:[%s7866_s26 + $0x80] sm:$0xff] %v2128_v3  ;;  %2043 = vmatmul.f32.gmra.mxu1 %v1905_v37 }
 0x1da   : > { %v1487_v32 = vadd.f32 %v1357_v38, %v1166_v57 }
 0x1db   : > { %v1678_v63 = vpop.f32.mrf.mxu0 }
 0x1dc   : > { %1086 = vmatmul.f32.gmra.mxu2 %v1263_v19  ;;  %v1808_v39 = vadd.f32 %v1678_v63, %v1487_v32 }
 0x1dd   : > { %1407 = vmatmul.f32.gmra.mxu3 %v1265_v34 }
 0x1de   : > { %1725 = vmatmul.f32.gmra.mxu0 %v1585_v4  ;;  %v1999_v51 = vpop.f32.mrf.mxu1  ;;  %v1590_v4 = vld [vmem:[%s7602_s24 + $0x148] sm:$0xff] }
 0x1df   : > { %v1039_v50 = vpop.f32.mrf.mxu2  ;;  %v2129_v54 = vadd.f32 %v1999_v51, %v1808_v39  ;;  %v1911_v51 = vld [vmem:[%s7602_s24 + $0x149] sm:$0xff] }
 0x1e0   : > { %v1167_v58 = vadd.f32 %v1039_v50, %v846_v48  ;;  %v1360_v59 = vpop.f32.mrf.mxu3  ;;  %v1131_v50 = vld [vmem:[%s7866_s26 + $0xb8] sm:$0xff] }
 0x1e1   : > { %2170 = vst [vmem:[%s7866_s26 + $0x88] sm:$0xff] %v2129_v54  ;;  %2046 = vmatmul.f32.gmra.mxu1 %v1906_v44 }
 0x1e2   : > { %v1488_v61 = vadd.f32 %v1360_v59, %v1167_v58 }
 0x1e3   : > { %v1681_v47 = vpop.f32.mrf.mxu0 }
 0x1e4   : > { %1089 = vmatmul.f32.gmra.mxu2 %v1264_v24  ;;  %v1809_v8 = vadd.f32 %v1681_v47, %v1488_v61  ;;  %v269_v47 = vld [vmem:[%s10592_s0] sm:$0xff] }
 0x1e5   : > { %1410 = vmatmul.f32.gmra.mxu3 %v1266_v5  ;;  %vm310_vm0 = vcmp.ne.f32.partialorder %v269_v47, 0.0  ;;  %v1136_v47 = vld [vmem:[%s7866_s26 + $0xe0] sm:$0xff] }
 0x1e6   : > { %1728 = vmatmul.f32.gmra.mxu0 %v1586_v2  ;;  %v2002_v13 = vpop.f32.mrf.mxu1 }
 0x1e7   : > { %v1042_v15 = vpop.f32.mrf.mxu2  ;;  %v2130_v29 = vadd.f32 %v2002_v13, %v1809_v8  ;;  %v1591_v8 = vld [vmem:[%s7602_s24 + $0x150] sm:$0xff] }
 0x1e8   : > { %v1168_v1 = vadd.f32 %v1042_v15, %v847_v11  ;;  %v1363_v6 = vpop.f32.mrf.mxu3  ;;  %v7456_v11 = vmov 0   ;;  %v1912_v15 = vld [vmem:[%s7602_s24 + $0x151] sm:$0xff] }
 0x1e9   : > { %2171 = vst [vmem:[%s7866_s26 + $0x90] sm:$0xff] %v2130_v29  ;;  %2049 = vmatmul.f32.gmra.mxu1 %v1907_v10  ;;  %7402 = vset.pattern.permute.xlu0 %v7456_v11  ;;  %v3243_v13 = vsel %vm310_vm0, 1, %v7456_v11 }
 0x1ea   : > { %v1489_v7 = vadd.f32 %v1363_v6, %v1168_v1  ;;  %3285 = vperm.xlu0 %7402, %v3243_v13   ;;  %7403 = vset.pattern.permute.xlu1 %v7456_v11  ;;  %v1132_v1 = vld [vmem:[%s7866_s26 + $0xc0] sm:$0xff]  ;;  %v2198_v13 = vld [vmem:[%s7602_s24 + $0x49] sm:$0xff] }
 0x1eb   : > { %v1684_v42 = vpop.f32.mrf.mxu0  ;;  %7404 = vset.pattern.permute.xlu2 %v7456_v11 }
 0x1ec   : > { %1092 = vmatmul.f32.gmra.mxu2 %v1265_v34  ;;  %v1810_v31 = vadd.f32 %v1684_v42, %v1489_v7  ;;  %v1270_v34 = vld [vmem:[%s7602_s24 + $0x14f] sm:$0xff] }
 0x1ed   : > { %1413 = vmatmul.f32.gmra.mxu3 %v1267_v41 }
 0x1ee   : > { %1731 = vmatmul.f32.gmra.mxu0 %v1587_v25  ;;  %v2005_v14 = vpop.f32.mrf.mxu1  ;;  %v2515_v25 = vld [vmem:[%s7602_s24 + $0x2a] sm:$0xff] }
 0x1ef   : > { %v1045_v56 = vpop.f32.mrf.mxu2  ;;  %v2131_v17 = vadd.f32 %v2005_v14, %v1810_v31  ;;  %v270_v31 = vld [vmem:[%s10592_s0 + $0x8] sm:$0xff]  ;;  %v1592_v14 = vld [vmem:[%s7602_s24 + $0x158] sm:$0xf] }
 0x1f0   : > { %v1169_v19 = vadd.f32 %v1045_v56, %v848_v45  ;;  %v1366_v22 = vpop.f32.mrf.mxu3  ;;  %vm311_vm1 = vcmp.ne.f32.partialorder %v270_v31, 0.0 }
 0x1f1   : > { %2172 = vst [vmem:[%s7866_s26 + $0x98] sm:$0xff] %v2131_v17  ;;  %2052 = vmatmul.f32.gmra.mxu1 %v1908_v53  ;;  %v3244_v56 = vsel %vm311_vm1, 1, %v7456_v11 }
 0x1f2   : > { %v1490_v16 = vadd.f32 %v1366_v22, %v1169_v19  ;;  %3288 = vperm.xlu0 %7402, %v3244_v56   ;;  %v1913_v19 = vld [vmem:[%s7602_s24 + $0x159] sm:$0xf]  ;;  %v275_v56 = vld [vmem:[%s10592_s0 + $0x30] sm:$0xff] }
 0x1f3   : > { %v1687_v27 = vpop.f32.mrf.mxu0  ;;  %vm316_vm4 = vcmp.ne.f32.partialorder %v275_v56, 0.0 }
 0x1f4   : > { %1095 = vmatmul.f32.gmra.mxu2 %v1266_v5  ;;  %v1811_v26 = vadd.f32 %v1687_v27, %v1490_v16  ;;  %v1271_v5 = vld [vmem:[%s7602_s24 + $0x157] sm:$0xf]  ;;  %v1133_v16 = vld [vmem:[%s7866_s26 + $0xc8] sm:$0xff] }
 0x1f5   : > { %1416 = vmatmul.f32.gmra.mxu3 %v1268_v18 }
 0x1f6   : > { %1734 = vmatmul.f32.gmra.mxu0 %v1588_v9  ;;  %v2008_v43 = vpop.f32.mrf.mxu1 }
 0x1f7   : > { %v1048_v28 = vpop.f32.mrf.mxu2  ;;  %v2132_v23 = vadd.f32 %v2008_v43, %v1811_v26  ;;  %v2195_v26 = vld [vmem:[%s7602_s24 + $0x31] sm:$0xff] }
 0x1f8   : > { %v1170_v52 = vadd.f32 %v1129_v20, %v1048_v28  ;;  %v1369_v55 = vpop.f32.mrf.mxu3  ;;  %v271_v28 = vld [vmem:[%s10592_s0 + $0x10] sm:$0xff] }
 0x1f9   : > { %2173 = vst [vmem:[%s7866_s26 + $0xa0] sm:$0xff] %v2132_v23  ;;  %2055 = vmatmul.f32.gmra.mxu1 %v1909_v49  ;;  %v2516_v49 = vld [vmem:[%s7602_s24 + $0x32] sm:$0xff]  ;;  %vm312_vm2 = vcmp.ne.f32.partialorder %v271_v28, 0.0 }
 0x1fa   : > { %v1491_v24 = vadd.f32 %v1369_v55, %v1170_v52  ;;  %v2836_v23 = vld [vmem:[%s7602_s24 + $0x2b] sm:$0xff]  ;;  %v3245_v55 = vsel %vm312_vm2, 1, %v7456_v11  ;;  %v2200_v28 = vld [vmem:[%s7602_s24 + $0x59] sm:$0xff] }
 0x1fb   : > { %v1690_v30 = vpop.f32.mrf.mxu0  ;;  %3291 = vperm.xlu1 %7403, %v3245_v55   ;;  %v276_v55 = vld [vmem:[%s10592_s0 + $0x38] sm:$0xff] }
 0x1fc   : > { %1098 = vmatmul.f32.gmra.mxu2 %v1267_v41  ;;  %v1812_v21 = vadd.f32 %v1690_v30, %v1491_v24  ;;  %v2194_v41 = vld [vmem:[%s7602_s24 + $0x29] sm:$0xff]  ;;  %vm317_vm6 = vcmp.ne.f32.partialorder %v276_v55, 0.0 }
 0x1fd   : > { %1419 = vmatmul.f32.gmra.mxu3 %v1269_v36  ;;  %v1134_v36 = vld [vmem:[%s7866_s26 + $0xd0] sm:$0xff] }
 0x1fe   : > { %1737 = vmatmul.f32.gmra.mxu0 %v1589_v33  ;;  %v2011_v46 = vpop.f32.mrf.mxu1 }
 0x1ff   : > { %v1051_v37 = vpop.f32.mrf.mxu2  ;;  %v2133_v3 = vadd.f32 %v2011_v46, %v1812_v21  ;;  %v2196_v46 = vld [vmem:[%s7602_s24 + $0x39] sm:$0xff] }
 0x200   : > { %v1171_v57 = vadd.f32 %v1130_v40, %v1051_v37  ;;  %v1372_v38 = vpop.f32.mrf.mxu3  ;;  %v2517_v37 = vld [vmem:[%s7602_s24 + $0x3a] sm:$0xff] }
 0x201   : > { %2174 = vst [vmem:[%s7866_s26 + $0xa8] sm:$0xff] %v2133_v3  ;;  %2058 = vmatmul.f32.gmra.mxu1 %v1910_v0  ;;  %v272_v40 = vld [vmem:[%s10592_s0 + $0x18] sm:$0xff] }
 0x202   : > { %v1492_v32 = vadd.f32 %v1372_v38, %v1171_v57  ;;  %v2837_v57 = vld [vmem:[%s7602_s24 + $0x33] sm:$0xff]  ;;  %vm313_vm3 = vcmp.ne.f32.partialorder %v272_v40, 0.0 }
 0x203   : > { %v1693_v63 = vpop.f32.mrf.mxu0 }
 0x204   : > { %1101 = vmatmul.f32.gmra.mxu2 %v1268_v18  ;;  %v1813_v39 = vadd.f32 %v1693_v63, %v1492_v32  ;;  %v3246_v32 = vsel %vm313_vm3, 1, %v7456_v11 }
 0x205   : > { %1422 = vmatmul.f32.gmra.mxu3 %v1270_v34  ;;  %3294 = vperm.xlu1 %7403, %v3246_v32   ;;  %v2522_v32 = vld [vmem:[%s7602_s24 + $0x62] sm:$0xff] }
 0x206   : > { %1740 = vmatmul.f32.gmra.mxu0 %v1590_v4  ;;  %v2014_v48 = vpop.f32.mrf.mxu1  ;;  %v1135_v4 = vld [vmem:[%s7866_s26 + $0xd8] sm:$0xff] }
 0x207   : > { %v1054_v44 = vpop.f32.mrf.mxu2  ;;  %v2134_v54 = vadd.f32 %v2014_v48, %v1813_v39 }
 0x208   : > { %v1172_v58 = vadd.f32 %v1131_v50, %v1054_v44  ;;  %v1375_v59 = vpop.f32.mrf.mxu3  ;;  %v2197_v44 = vld [vmem:[%s7602_s24 + $0x41] sm:$0xff] }
 0x209   : > { %2175 = vst [vmem:[%s7866_s26 + $0xb0] sm:$0xff] %v2134_v54  ;;  %2061 = vmatmul.f32.gmra.mxu1 %v1911_v51  ;;  %v2518_v54 = vld [vmem:[%s7602_s24 + $0x42] sm:$0xff] }
 0x20a   : > { %v1493_v61 = vadd.f32 %v1375_v59, %v1172_v58  ;;  %v2838_v59 = vld [vmem:[%s7602_s24 + $0x3b] sm:$0xff] }
 0x20b   : > { %v1696_v2 = vpop.f32.mrf.mxu0 }
 0x20c   : > { %1104 = vmatmul.f32.gmra.mxu2 %v950_v60  ;;  %v1814_v62 = vadd.f32 %v1696_v2, %v1493_v61 }
 0x20d   : > { %1425 = vmatmul.f32.gmra.mxu3 %v1271_v5 }
 0x20e   : > { %1743 = vmatmul.f32.gmra.mxu0 %v1591_v8  ;;  %v2017_v10 = vpop.f32.mrf.mxu1 }
 0x20f   : > { %v1057_v29 = vpop.f32.mrf.mxu2  ;;  %v2135_v6 = vadd.f32 %v2017_v10, %v1814_v62 }
 0x210   : > { %v1173_v12 = vadd.f32 %v1132_v1, %v1057_v29  ;;  %v1378_v7 = vpop.f32.mrf.mxu3  ;;  %v2839_v1 = vld [vmem:[%s7602_s24 + $0x43] sm:$0xff] }
 0x211   : > { %2176 = vst [vmem:[%s7866_s26 + $0xb8] sm:$0xff] %v2135_v6  ;;  %2064 = vmatmul.f32.gmra.mxu1 %v1912_v15  ;;  %v2519_v15 = vld [vmem:[%s7602_s24 + $0x4a] sm:$0xff] }
 0x212   : > { %v1494_v42 = vadd.f32 %v1378_v7, %v1173_v12 }
 0x213   : > { %v1699_v45 = vpop.f32.mrf.mxu0 }
 0x214   : > { %2268 = vmatmul.f32.vlgmr.msra.gmra.mxu2 %v2194_v41  ;;  %v1815_v53 = vadd.f32 %v1699_v45, %v1494_v42  ;;  %v1137_v41 = vld [vmem:[%s7866_s26 + $0xe8] sm:$0xff]  ;;  %v2199_v45 = vld [vmem:[%s7602_s24 + $0x51] sm:$0xff] }
 0x215   : > { %2589 = vmatmul.f32.vlgmr.msra.gmra.mxu3 %v2515_v25 }
 0x216   : > { %1746 = vmatmul.f32.gmra.mxu0 %v1592_v14  ;;  %v2020_v17 = vpop.f32.mrf.mxu1 }
 0x217   : > { %v1060_v22 = vpop.f32.mrf.mxu2  ;;  %v2136_v18 = vadd.f32 %v2020_v17, %v1815_v53  ;;  %v2520_v53 = vld [vmem:[%s7602_s24 + $0x52] sm:$0xff] }
 0x218   : > { %v1174_v27 = vadd.f32 %v1133_v16, %v1060_v22  ;;  %v1381_v9 = vpop.f32.mrf.mxu3  ;;  %v3249_v16 = vsel %vm316_vm4, 1, %v7456_v11 }
 0x219   : > { %2177 = vst [vmem:[%s7866_s26 + $0xc0] sm:$0xff] %v2136_v18  ;;  %2067 = vmatmul.f32.gmra.mxu1 %v1913_v19  ;;  %v2840_v19 = vld [vmem:[%s7602_s24 + $0x4b] sm:$0xff]  ;;  %3303 = vperm.xlu0 %7402, %v3249_v16  }
 0x21a   : > { %v1495_v43 = vadd.f32 %v1381_v9, %v1174_v27  ;;  %v1138_v9 = vld [vmem:[%s7866_s26 + $0xf0] sm:$0xff] }
 0x21b   : > { %v1702_v20 = vpop.f32.mrf.mxu0 }
 0x21c   : > { %2271 = vmatmul.f32.gmra.mxu2 %v2195_v26  ;;  %v1816_v52 = vadd.f32 %v1702_v20, %v1495_v43 }
 0x21d   : > { %2592 = vmatmul.f32.gmra.mxu3 %v2516_v49 }
 0x21e   : > { %2910 = vmatmul.f32.vlgmr.msra.gmra.mxu0 %v2836_v23  ;;  %v2023_v35 = vpop.f32.mrf.mxu1  ;;  %v2521_v23 = vld [vmem:[%s7602_s24 + $0x5a] sm:$0xff] }
 0x21f   : > { %v1063_v24 = vpop.f32.mrf.mxu2  ;;  %v2137_v30 = vadd.f32 %v2023_v35, %v1816_v52  ;;  %v273_v52 = vld [vmem:[%s10592_s0 + $0x20] sm:$0xff] }
 0x220   : > { %v1175_v33 = vadd.f32 %v1134_v36, %v1063_v24  ;;  %v1384_v21 = vpop.f32.mrf.mxu3  ;;  %v2841_v24 = vld [vmem:[%s7602_s24 + $0x53] sm:$0xff]  ;;  %vm314_vm5 = vcmp.ne.f32.partialorder %v273_v52, 0.0 }
 0x221   : > { %2178 = vst [vmem:[%s7866_s26 + $0xc8] sm:$0xff] %v2137_v30  ;;  %v3247_v30 = vsel %vm314_vm5, 1, %v7456_v11 }
 0x222   : > { %v1496_v0 = vadd.f32 %v1384_v21, %v1175_v33  ;;  %v3250_v33 = vsel %vm317_vm6, 1, %v7456_v11  ;;  %3297 = vperm.xlu2 %7404, %v3247_v30  }
 0x223   : > { %v1705_v3 = vpop.f32.mrf.mxu0  ;;  %3306 = vperm.xlu1 %7403, %v3250_v33   ;;  %v2205_v33 = vld [vmem:[%s7602_s24 + $0x81] sm:$0xff] }
 0x224   : > { %2274 = vmatmul.f32.gmra.mxu2 %v2196_v46  ;;  %v1817_v38 = vadd.f32 %v1705_v3, %v1496_v0  ;;  %v1139_v0 = vld [vmem:[%s7866_s26 + $0xf8] sm:$0xff] }
 0x225   : > { %2595 = vmatmul.f32.gmra.mxu3 %v2517_v37 }
 0x226   : > { %2913 = vmatmul.f32.gmra.mxu0 %v2837_v57  ;;  %v2026_v34 = vpop.f32.mrf.mxu1  ;;  %v2201_v57 = vld [vmem:[%s7602_s24 + $0x61] sm:$0xff] }
 0x227   : > { %v1066_v63 = vpop.f32.mrf.mxu2  ;;  %v2138_v39 = vadd.f32 %v2026_v34, %v1817_v38  ;;  %v274_v34 = vld [vmem:[%s10592_s0 + $0x28] sm:$0xff] }
 0x228   : > { %v1176_v48 = vadd.f32 %v1135_v4, %v1066_v63  ;;  %v1387_v51 = vpop.f32.mrf.mxu3  ;;  %v2842_v4 = vld [vmem:[%s7602_s24 + $0x5b] sm:$0xff]  ;;  %vm315_vm7 = vcmp.ne.f32.partialorder %v274_v34, 0.0 }
 0x229   : > { %2179 = vst [vmem:[%s7866_s26 + $0xd0] sm:$0xff] %v2138_v39  ;;  %v1144_v34 = vld [vmem:[%s7866_s26 + $0x120] sm:$0xff] }
 0x22a   : > { %v1497_v50 = vadd.f32 %v1387_v51, %v1176_v48  ;;  %v3248_v48 = vsel %vm315_vm7, 1, %v7456_v11 }
 0x22b   : > { %v1708_v58 = vpop.f32.mrf.mxu0  ;;  %3300 = vperm.xlu2 %7404, %v3248_v48   ;;  %v2206_v48 = vld [vmem:[%s7602_s24 + $0x89] sm:$0xff] }
 0x22c   : > { %2277 = vmatmul.f32.gmra.mxu2 %v2197_v44  ;;  %v1818_v60 = vadd.f32 %v1708_v58, %v1497_v50  ;;  %v1140_v50 = vld [vmem:[%s7866_s26 + $0x100] sm:$0xff] }
 0x22d   : > { %2598 = vmatmul.f32.gmra.mxu3 %v2518_v54 }
 0x22e   : > { %2916 = vmatmul.f32.gmra.mxu0 %v2838_v59  ;;  %v2029_v61 = vpop.f32.mrf.mxu1 }
 0x22f   : > { %v1069_v5 = vpop.f32.mrf.mxu2  ;;  %v2139_v2 = vadd.f32 %v2029_v61, %v1818_v60  ;;  %v2202_v60 = vld [vmem:[%s7602_s24 + $0x69] sm:$0xff] }
 0x230   : > { %v1177_v8 = vadd.f32 %v1136_v47, %v1069_v5  ;;  %v1390_v62 = vpop.f32.mrf.mxu3  ;;  %v2523_v5 = vld [vmem:[%s7602_s24 + $0x6a] sm:$0xff] }
 0x231   : > { %2180 = vst [vmem:[%s7866_s26 + $0xd8] sm:$0xff] %v2139_v2  ;;  %v278_v47 = vld [vmem:[%s10592_s0 + $0x48] sm:$0xff] }
 0x232   : > { %v1498_v10 = vadd.f32 %v1390_v62, %v1177_v8  ;;  %v2843_v8 = vld [vmem:[%s7602_s24 + $0x63] sm:$0xff]  ;;  %vm319_vm8 = vcmp.ne.f32.partialorder %v278_v47, 0.0 }
 0x233   : > { %v1711_v29 = vpop.f32.mrf.mxu0  ;;  %v1145_v47 = vld [vmem:[%s7866_s26 + $0x128] sm:$0xff] }
 0x234   : > { %2280 = vmatmul.f32.gmra.mxu2 %v2198_v13  ;;  %v1819_v6 = vadd.f32 %v1711_v29, %v1498_v10  ;;  %v3252_v13 = vsel %vm319_vm8, 1, %v7456_v11  ;;  %v1141_v29 = vld [vmem:[%s7866_s26 + $0x108] sm:$0xff] }
 0x235   : > { %2601 = vmatmul.f32.gmra.mxu3 %v2519_v15  ;;  %3312 = vperm.xlu0 %7402, %v3252_v13   ;;  %v2207_v13 = vld [vmem:[%s7602_s24 + $0x91] sm:$0xff] }
 0x236   : > { %2919 = vmatmul.f32.gmra.mxu0 %v2839_v1  ;;  %v2032_v12 = vpop.f32.mrf.mxu1 }
 0x237   : > { %v1072_v7 = vpop.f32.mrf.mxu2  ;;  %v2140_v42 = vadd.f32 %v2032_v12, %v1819_v6 }
 0x238   : > { %v1178_v25 = vadd.f32 %v1137_v41, %v1072_v7  ;;  %v1393_v31 = vpop.f32.mrf.mxu3  ;;  %v2203_v7 = vld [vmem:[%s7602_s24 + $0x71] sm:$0xff] }
 0x239   : > { %2181 = vst [vmem:[%s7866_s26 + $0xe0] sm:$0xff] %v2140_v42  ;;  %v2524_v42 = vld [vmem:[%s7602_s24 + $0x72] sm:$0xff] }
 0x23a   : > { %v1499_v14 = vadd.f32 %v1393_v31, %v1178_v25  ;;  %v279_v25 = vld [vmem:[%s10592_s0 + $0x50] sm:$0xff] }
 0x23b   : > { %v1714_v17 = vpop.f32.mrf.mxu0  ;;  %vm320_vm9 = vcmp.ne.f32.partialorder %v279_v25, 0.0  ;;  %v1146_v25 = vld [vmem:[%s7866_s26 + $0x130] sm:$0xff] }
 0x23c   : > { %2283 = vmatmul.f32.gmra.mxu2 %v2199_v45  ;;  %v1820_v22 = vadd.f32 %v1714_v17, %v1499_v14  ;;  %v2844_v45 = vld [vmem:[%s7602_s24 + $0x6b] sm:$0xff] }
 0x23d   : > { %2604 = vmatmul.f32.gmra.mxu3 %v2520_v53  ;;  %v3253_v53 = vsel %vm320_vm9, 1, %v7456_v11 }
 0x23e   : > { %2922 = vmatmul.f32.gmra.mxu0 %v2840_v19  ;;  %v2035_v18 = vpop.f32.mrf.mxu1  ;;  %3315 = vperm.xlu1 %7403, %v3253_v53   ;;  %v1142_v19 = vld [vmem:[%s7866_s26 + $0x110] sm:$0xff]  ;;  %v2208_v53 = vld [vmem:[%s7602_s24 + $0x99] sm:$0xff] }
 0x23f   : > { %v1075_v27 = vpop.f32.mrf.mxu2  ;;  %v2141_v26 = vadd.f32 %v2035_v18, %v1820_v22 }
 0x240   : > { %v1179_v43 = vadd.f32 %v1138_v9, %v1075_v27  ;;  %v1396_v49 = vpop.f32.mrf.mxu3  ;;  %v2204_v27 = vld [vmem:[%s7602_s24 + $0x79] sm:$0xff] }
 0x241   : > { %2182 = vst [vmem:[%s7866_s26 + $0xe8] sm:$0xff] %v2141_v26  ;;  %v2525_v26 = vld [vmem:[%s7602_s24 + $0x7a] sm:$0xff] }
 0x242   : > { %v1500_v20 = vadd.f32 %v1396_v49, %v1179_v43  ;;  %v277_v43 = vld [vmem:[%s10592_s0 + $0x40] sm:$0xff] }
 0x243   : > { %v1717_v35 = vpop.f32.mrf.mxu0  ;;  %vm318_vm10 = vcmp.ne.f32.partialorder %v277_v43, 0.0  ;;  %v1147_v43 = vld [vmem:[%s7866_s26 + $0x138] sm:$0xff] }
 0x244   : > { %2286 = vmatmul.f32.gmra.mxu2 %v2200_v28  ;;  %v1821_v36 = vadd.f32 %v1717_v35, %v1500_v20  ;;  %v2845_v28 = vld [vmem:[%s7602_s24 + $0x73] sm:$0xff] }
 0x245   : > { %2607 = vmatmul.f32.gmra.mxu3 %v2521_v23  ;;  %v3251_v23 = vsel %vm318_vm10, 1, %v7456_v11  ;;  %v1143_v35 = vld [vmem:[%s7866_s26 + $0x118] sm:$0xff] }
 0x246   : > { %2925 = vmatmul.f32.gmra.mxu0 %v2841_v24  ;;  %v2038_v21 = vpop.f32.mrf.mxu1  ;;  %3309 = vperm.xlu2 %7404, %v3251_v23   ;;  %v2209_v23 = vld [vmem:[%s7602_s24 + $0xa1] sm:$0xff] }
 0x247   : > { %v1078_v46 = vpop.f32.mrf.mxu2  ;;  %v2142_v37 = vadd.f32 %v2038_v21, %v1821_v36 }
 0x248   : > { %v1180_v40 = vadd.f32 %v1139_v0, %v1078_v46  ;;  %v1399_v3 = vpop.f32.mrf.mxu3  ;;  %v2526_v46 = vld [vmem:[%s7602_s24 + $0x82] sm:$0xff] }
 0x249   : > { %2183 = vst [vmem:[%s7866_s26 + $0xf0] sm:$0xff] %v2142_v37  ;;  %v281_v0 = vld [vmem:[%s10592_s0 + $0x60] sm:$0xff] }
 0x24a   : > { %v1501_v38 = vadd.f32 %v1399_v3, %v1180_v40  ;;  %v2846_v40 = vld [vmem:[%s7602_s24 + $0x7b] sm:$0xff]  ;;  %vm322_vm11 = vcmp.ne.f32.partialorder %v281_v0, 0.0 }
 0x24b   : > { %v1720_v63 = vpop.f32.mrf.mxu0 }
 0x24c   : > { %2289 = vmatmul.f32.gmra.mxu2 %v2201_v57  ;;  %v1822_v39 = vadd.f32 %v1720_v63, %v1501_v38  ;;  %v3255_v57 = vsel %vm322_vm11, 1, %v7456_v11 }
 0x24d   : > { %2610 = vmatmul.f32.gmra.mxu3 %v2522_v32  ;;  %3321 = vperm.xlu0 %7402, %v3255_v57   ;;  %v2210_v57 = vld [vmem:[%s7602_s24 + $0xa9] sm:$0xff] }
 0x24e   : > { %2928 = vmatmul.f32.gmra.mxu0 %v2842_v4  ;;  %v2041_v51 = vpop.f32.mrf.mxu1 }
 0x24f   : > { %v1081_v44 = vpop.f32.mrf.mxu2  ;;  %v2143_v54 = vadd.f32 %v2041_v51, %v1822_v39 }
 0x250   : > { %v1181_v58 = vadd.f32 %v1140_v50, %v1081_v44  ;;  %v1402_v59 = vpop.f32.mrf.mxu3  ;;  %v2527_v44 = vld [vmem:[%s7602_s24 + $0x8a] sm:$0xff] }
 0x251   : > { %2184 = vst [vmem:[%s7866_s26 + $0xf8] sm:$0xff] %v2143_v54  ;;  %v282_v50 = vld [vmem:[%s10592_s0 + $0x68] sm:$0xff] }
 0x252   : > { %v1502_v61 = vadd.f32 %v1402_v59, %v1181_v58  ;;  %v2847_v58 = vld [vmem:[%s7602_s24 + $0x83] sm:$0xff]  ;;  %vm323_vm12 = vcmp.ne.f32.partialorder %v282_v50, 0.0 }
 0x253   : > { %v1723_v2 = vpop.f32.mrf.mxu0 }
 0x254   : > { %2292 = vmatmul.f32.gmra.mxu2 %v2202_v60  ;;  %v1823_v62 = vadd.f32 %v1723_v2, %v1502_v61  ;;  %v3256_v60 = vsel %vm323_vm12, 1, %v7456_v11 }
 0x255   : > { %2613 = vmatmul.f32.gmra.mxu3 %v2523_v5  ;;  %3324 = vperm.xlu1 %7403, %v3256_v60   ;;  %v2532_v60 = vld [vmem:[%s7602_s24 + $0xb2] sm:$0xff] }
 0x256   : > { %2931 = vmatmul.f32.gmra.mxu0 %v2843_v8  ;;  %v2044_v10 = vpop.f32.mrf.mxu1 }
 0x257   : > { %v1084_v15 = vpop.f32.mrf.mxu2  ;;  %v2144_v1 = vadd.f32 %v2044_v10, %v1823_v62 }
 0x258   : > { %v1182_v6 = vadd.f32 %v1141_v29, %v1084_v15  ;;  %v1405_v12 = vpop.f32.mrf.mxu3  ;;  %v2528_v15 = vld [vmem:[%s7602_s24 + $0x92] sm:$0xff] }
 0x259   : > { %2185 = vst [vmem:[%s7866_s26 + $0x100] sm:$0xff] %v2144_v1  ;;  %v280_v29 = vld [vmem:[%s10592_s0 + $0x58] sm:$0xff] }
 0x25a   : > { %v1503_v41 = vadd.f32 %v1405_v12, %v1182_v6  ;;  %v2848_v6 = vld [vmem:[%s7602_s24 + $0x8b] sm:$0xff]  ;;  %vm321_vm13 = vcmp.ne.f32.partialorder %v280_v29, 0.0 }
 0x25b   : > { %v1726_v31 = vpop.f32.mrf.mxu0 }
 0x25c   : > { %2295 = vmatmul.f32.gmra.mxu2 %v2203_v7  ;;  %v1824_v14 = vadd.f32 %v1726_v31, %v1503_v41  ;;  %v3254_v7 = vsel %vm321_vm13, 1, %v7456_v11 }
 0x25d   : > { %2616 = vmatmul.f32.gmra.mxu3 %v2524_v42  ;;  %3318 = vperm.xlu2 %7404, %v3254_v7   ;;  %v2853_v7 = vld [vmem:[%s7602_s24 + $0xb3] sm:$0xff] }
 0x25e   : > { %2934 = vmatmul.f32.gmra.mxu0 %v2844_v45  ;;  %v2047_v56 = vpop.f32.mrf.mxu1 }
 0x25f   : > { %v1087_v17 = vpop.f32.mrf.mxu2  ;;  %v2145_v22 = vadd.f32 %v2047_v56, %v1824_v14 }
 0x260   : > { %v1183_v16 = vadd.f32 %v1142_v19, %v1087_v17  ;;  %v1408_v18 = vpop.f32.mrf.mxu3  ;;  %v2529_v17 = vld [vmem:[%s7602_s24 + $0x9a] sm:$0xff] }
 0x261   : > { %2186 = vst [vmem:[%s7866_s26 + $0x108] sm:$0xff] %v2145_v22  ;;  %v2849_v22 = vld [vmem:[%s7602_s24 + $0x93] sm:$0xff] }
 0x262   : > { %v1504_v9 = vadd.f32 %v1408_v18, %v1183_v16  ;;  %v284_v16 = vld [vmem:[%s10592_s0 + $0x78] sm:$0xff] }
 0x263   : > { %v1729_v49 = vpop.f32.mrf.mxu0  ;;  %vm325_vm14 = vcmp.ne.f32.partialorder %v284_v16, 0.0 }
 0x264   : > { %2298 = vmatmul.f32.gmra.mxu2 %v2204_v27  ;;  %v1825_v20 = vadd.f32 %v1729_v49, %v1504_v9  ;;  %v3258_v27 = vsel %vm325_vm14, 1, %v7456_v11 }
 0x265   : > { %2619 = vmatmul.f32.gmra.mxu3 %v2525_v26  ;;  %3330 = vperm.xlu0 %7402, %v3258_v27   ;;  %v286_v27 = vld [vmem:[%s10592_s0 + $0x88] sm:$0xff] }
 0x266   : > { %2937 = vmatmul.f32.gmra.mxu0 %v2845_v28  ;;  %v2050_v52 = vpop.f32.mrf.mxu1  ;;  %vm327_vm3 = vcmp.ne.f32.partialorder %v286_v27, 0.0 }
 0x267   : > { %v1090_v55 = vpop.f32.mrf.mxu2  ;;  %v2146_v24 = vadd.f32 %v2050_v52, %v1825_v20 }
 0x268   : > { %v1184_v36 = vadd.f32 %v1143_v35, %v1090_v55  ;;  %v1411_v30 = vpop.f32.mrf.mxu3  ;;  %v2530_v55 = vld [vmem:[%s7602_s24 + $0xa2] sm:$0xff] }
 0x269   : > { %2187 = vst [vmem:[%s7866_s26 + $0x110] sm:$0xff] %v2146_v24  ;;  %v2850_v24 = vld [vmem:[%s7602_s24 + $0x9b] sm:$0xff] }
 0x26a   : > { %v1505_v21 = vadd.f32 %v1411_v30, %v1184_v36  ;;  %v285_v36 = vld [vmem:[%s10592_s0 + $0x80] sm:$0xff] }
 0x26b   : > { %v1732_v37 = vpop.f32.mrf.mxu0  ;;  %vm326_vm15 = vcmp.ne.f32.partialorder %v285_v36, 0.0  ;;  %v2855_v36 = vld [vmem:[%s7602_s24 + $0xc3] sm:$0xff] }
 0x26c   : > { %2301 = vmatmul.f32.gmra.mxu2 %v2205_v33  ;;  %v1826_v3 = vadd.f32 %v1732_v37, %v1505_v21  ;;  %v3259_v33 = vsel %vm326_vm15, 1, %v7456_v11 }
 0x26d   : > { %2622 = vmatmul.f32.gmra.mxu3 %v2526_v46  ;;  %3333 = vperm.xlu1 %7403, %v3259_v33   ;;  %v1148_v46 = vld [vmem:[%s7866_s26 + $0x140] sm:$0xf] }
 0x26e   : > { %2940 = vmatmul.f32.gmra.mxu0 %v2846_v40  ;;  %v2053_v38 = vpop.f32.mrf.mxu1 }
 0x26f   : > { %v1093_v32 = vpop.f32.mrf.mxu2  ;;  %v2147_v63 = vadd.f32 %v2053_v38, %v1826_v3  ;;  %v2531_v38 = vld [vmem:[%s7602_s24 + $0xaa] sm:$0xff] }
 0x270   : > { %v1185_v4 = vadd.f32 %v1144_v34, %v1093_v32  ;;  %v1414_v39 = vpop.f32.mrf.mxu3  ;;  %v2851_v34 = vld [vmem:[%s7602_s24 + $0xa3] sm:$0xff] }
 0x271   : > { %2188 = vst [vmem:[%s7866_s26 + $0x118] sm:$0xff] %v2147_v63  ;;  %v283_v63 = vld [vmem:[%s10592_s0 + $0x70] sm:$0xff] }
 0x272   : > { %v1506_v51 = vadd.f32 %v1414_v39, %v1185_v4  ;;  %vm324_vm0 = vcmp.ne.f32.partialorder %v283_v63, 0.0  ;;  %v291_v63 = vld [vmem:[%s10592_s0 + $0xb0] sm:$0xff] }
 0x273   : > { %v1735_v54 = vpop.f32.mrf.mxu0  ;;  %v3257_v4 = vsel %vm324_vm0, 1, %v7456_v11  ;;  %vm332_vm5 = vcmp.ne.f32.partialorder %v291_v63, 0.0 }
 0x274   : > { %2304 = vmatmul.f32.gmra.mxu2 %v2206_v48  ;;  %v1827_v59 = vadd.f32 %v1735_v54, %v1506_v51  ;;  %3327 = vperm.xlu2 %7404, %v3257_v4   ;;  %v2392_v48 = vld [vmem:[%s7866_s26] sm:$0xff]  ;;  %v2211_v54 = vld [vmem:[%s7602_s24 + $0xb1] sm:$0xff]  ;;  %v3265_v4 = vsel %vm332_vm5, 1, %v7456_v11 }
 0x275   : > { %2625 = vmatmul.f32.gmra.mxu3 %v2527_v44 }
 0x276   : > { %2943 = vmatmul.f32.gmra.mxu0 %v2847_v58  ;;  %v2056_v61 = vpop.f32.mrf.mxu1 }
 0x277   : > { %v1096_v5 = vpop.f32.mrf.mxu2  ;;  %v2148_v2 = vadd.f32 %v2056_v61, %v1827_v59 }
 0x278   : > { %v1186_v8 = vadd.f32 %v1145_v47, %v1096_v5  ;;  %v1417_v62 = vpop.f32.mrf.mxu3  ;;  %v2852_v5 = vld [vmem:[%s7602_s24 + $0xab] sm:$0xff] }
 0x279   : > { %2189 = vst [vmem:[%s7866_s26 + $0x120] sm:$0xff] %v2148_v2  ;;  %v287_v47 = vld [vmem:[%s10592_s0 + $0x90] sm:$0xff] }
 0x27a   : > { %v1507_v10 = vadd.f32 %v1417_v62, %v1186_v8  ;;  %vm328_vm1 = vcmp.ne.f32.partialorder %v287_v47, 0.0  ;;  %v2393_v62 = vld [vmem:[%s7866_s26 + $0x8] sm:$0xff]  ;;  %v289_v47 = vld [vmem:[%s10592_s0 + $0xa0] sm:$0xff] }
 0x27b   : > { %v1738_v1 = vpop.f32.mrf.mxu0  ;;  %v3261_v2 = vsel %vm328_vm1, 1, %v7456_v11  ;;  %vm330_vm6 = vcmp.ne.f32.partialorder %v289_v47, 0.0  ;;  %v2861_v47 = vld [vmem:[%s7602_s24 + $0xf3] sm:$0xff] }
 0x27c   : > { %2307 = vmatmul.f32.gmra.mxu2 %v2207_v13  ;;  %v1828_v12 = vadd.f32 %v1738_v1, %v1507_v10  ;;  %3339 = vperm.xlu0 %7402, %v3261_v2   ;;  %v2533_v1 = vld [vmem:[%s7602_s24 + $0xba] sm:$0xff]  ;;  %v3263_v2 = vsel %vm330_vm6, 1, %v7456_v11 }
 0x27d   : > { %2628 = vmatmul.f32.gmra.mxu3 %v2528_v15  ;;  %v2212_v15 = vld [vmem:[%s7602_s24 + $0xb9] sm:$0xff] }
 0x27e   : > { %2946 = vmatmul.f32.gmra.mxu0 %v2848_v6  ;;  %v2059_v41 = vpop.f32.mrf.mxu1 }
 0x27f   : > { %v1099_v42 = vpop.f32.mrf.mxu2  ;;  %v2149_v31 = vadd.f32 %v2059_v41, %v1828_v12  ;;  %v288_v41 = vld [vmem:[%s10592_s0 + $0x98] sm:$0xff] }
 0x280   : > { %v1187_v45 = vadd.f32 %v1146_v25, %v1099_v42  ;;  %v1420_v14 = vpop.f32.mrf.mxu3  ;;  %vm329_vm2 = vcmp.ne.f32.partialorder %v288_v41, 0.0  ;;  %v2858_v41 = vld [vmem:[%s7602_s24 + $0xdb] sm:$0xff] }
 0x281   : > { %2190 = vst [vmem:[%s7866_s26 + $0x128] sm:$0xff] %v2149_v31  ;;  %v3262_v25 = vsel %vm329_vm2, 1, %v7456_v11 }
 0x282   : > { %v1508_v56 = vadd.f32 %v1420_v14, %v1187_v45  ;;  %3342 = vperm.xlu1 %7403, %v3262_v25   ;;  %v2394_v45 = vld [vmem:[%s7866_s26 + $0x10] sm:$0xff]  ;;  %v3906_v25 = vld [vmem:[#allocation3 + $0x70] sm:$0xff] }
 0x283   : > { %v1741_v19 = vpop.f32.mrf.mxu0 }
 0x284   : > { %2310 = vmatmul.f32.gmra.mxu2 %v2208_v53  ;;  %v1829_v18 = vadd.f32 %v1741_v19, %v1508_v56  ;;  %v2213_v56 = vld [vmem:[%s7602_s24 + $0xc1] sm:$0xff] }
 0x285   : > { %2631 = vmatmul.f32.gmra.mxu3 %v2529_v17  ;;  %v2534_v19 = vld [vmem:[%s7602_s24 + $0xc2] sm:$0xff] }
 0x286   : > { %2949 = vmatmul.f32.gmra.mxu0 %v2849_v22  ;;  %v2062_v9 = vpop.f32.mrf.mxu1 }
 0x287   : > { %v1102_v26 = vpop.f32.mrf.mxu2  ;;  %v2150_v49 = vadd.f32 %v2062_v9, %v1829_v18  ;;  %v2854_v18 = vld [vmem:[%s7602_s24 + $0xbb] sm:$0xff] }
 0x288   : > { %v1188_v28 = vadd.f32 %v1147_v43, %v1102_v26  ;;  %v1423_v20 = vpop.f32.mrf.mxu3  ;;  %v3260_v26 = vsel %vm327_vm3, 1, %v7456_v11 }
 0x289   : > { %2191 = vst [vmem:[%s7866_s26 + $0x130] sm:$0xff] %v2150_v49  ;;  %3336 = vperm.xlu2 %7404, %v3260_v26   ;;  %v294_v26 = vld [vmem:[%s10592_s0 + $0xc8] sm:$0xff] }
 0x28a   : > { %v1509_v52 = vadd.f32 %v1423_v20, %v1188_v28  ;;  %v2395_v28 = vld [vmem:[%s7866_s26 + $0x18] sm:$0xff]  ;;  %3351 = vperm.xlu1 %7403, %v3265_v4   ;;  %vm335_vm8 = vcmp.ne.f32.partialorder %v294_v26, 0.0 }
 0x28b   : > { %v1744_v35 = vpop.f32.mrf.mxu0 }
 0x28c   : > { %2313 = vmatmul.f32.gmra.mxu2 %v2209_v23  ;;  %v1830_v30 = vadd.f32 %v1744_v35, %v1509_v52  ;;  %v2214_v52 = vld [vmem:[%s7602_s24 + $0xc9] sm:$0xff] }
 0x28d   : > { %2634 = vmatmul.f32.gmra.mxu3 %v2530_v55  ;;  %v2535_v35 = vld [vmem:[%s7602_s24 + $0xca] sm:$0xff] }
 0x28e   : > { %2952 = vmatmul.f32.gmra.mxu0 %v2850_v24  ;;  %v2065_v21 = vpop.f32.mrf.mxu1 }
 0x28f   : > { %v1105_v0 = vpop.f32.mrf.mxu2  ;;  %v2151_v37 = vadd.f32 %v2065_v21, %v1830_v30  ;;  %v290_v30 = vld [vmem:[%s10592_s0 + $0xa8] sm:$0xff] }
 0x290   : > { %v1189_v40 = vadd.f32 %v1148_v46, %v1105_v0  ;;  %v1426_v3 = vpop.f32.mrf.mxu3  ;;  %vm331_vm4 = vcmp.ne.f32.partialorder %v290_v30, 0.0  ;;  %v2396_v46 = vld [vmem:[%s7866_s26 + $0x20] sm:$0xff]  ;;  %v2540_v30 = vld [vmem:[%s7602_s24 + $0xf2] sm:$0xff] }
 0x291   : > { %2192 = vst [vmem:[%s7866_s26 + $0x138] sm:$0xff] %v2151_v37  ;;  %v3264_v33 = vsel %vm331_vm4, 1, %v7456_v11  ;;  %3345 = vperm.xlu2 %7404, %v3263_v2   ;;  %v300_v2 = vld [vmem:[%s10592_s0 + $0xf8] sm:$0xff] }
 0x292   : > { %1230 = vst [vmem:[%s7866_s26 + $0x140] sm:$0xf] %v1189_v40  ;;  %3348 = vperm.xlu0 %7402, %v3264_v33   ;;  %v3907_v40 = vld [vmem:[#allocation3 + $0x78] sm:$0xff]  ;;  %vm341_vm13 = vcmp.ne.f32.partialorder %v300_v2, 0.0 }
 0x293   : > { %v1747_v32 = vpop.f32.mrf.mxu0  ;;  %3908 = vmatpush.msra.mxu1 %v3907_v40 }
 0x294   : > { %2316 = vmatmul.f32.gmra.mxu2 %v2210_v57 }
 0x295   : > { %2637 = vmatmul.f32.gmra.mxu3 %v2531_v38  ;;  %v2536_v38 = vld [vmem:[%s7602_s24 + $0xd2] sm:$0xff]  ;;  %3909 = vmatpush.msra.mxu1 %v3906_v25  ;;  %v2542_v25 = vld [vmem:[%s7602_s24 + $0x102] sm:$0xff] }
 0x296   : > { %2955 = vmatmul.f32.gmra.mxu0 %v2851_v34  ;;  %v2068_v22 = vpop.f32.mrf.mxu1  ;;  %v2856_v34 = vld [vmem:[%s7602_s24 + $0xcb] sm:$0xff] }
 0x297   : > { %v2269_v39 = vpop.f32.mrf.mxu2 }
 0x298   : > { %v2433_v51 = vadd.f32 %v2392_v48, %v2269_v39  ;;  %v2590_v44 = vpop.f32.mrf.mxu3  ;;  %v2397_v48 = vld [vmem:[%s7866_s26 + $0x28] sm:$0xff] }
 0x299   : > { %v1469_v50 = vld [vmem:[%s7866_s26 + $0x140] sm:$0xf] }
 0x29a   : > { %v1510_v58 = vadd.f32 %v1469_v50, %v1426_v3  ;;  %v8496_v59 = vadd.f32 %v2590_v44, %v2433_v51  ;;  %v2215_v3 = vld [vmem:[%s7602_s24 + $0xd1] sm:$0xff]  ;;  %v2216_v50 = vld [vmem:[%s7602_s24 + $0xd9] sm:$0xff] }
 0x29b   : > { %v8499_v61 = vpop.f32.mrf.mxu0 }
 0x29c   : > { %1551 = vst [vmem:[%s7866_s26 + $0x140] sm:$0xf] %v1510_v58  ;;  %2319 = vmatmul.f32.gmra.mxu2 %v2211_v54  ;;  %v2537_v58 = vld [vmem:[%s7602_s24 + $0xda] sm:$0xff] }
 0x29d   : > { %2640 = vmatmul.f32.gmra.mxu3 %v2532_v60 }
 0x29e   : > { %2958 = vmatmul.f32.gmra.mxu0 %v2852_v5  ;;  %v2857_v5 = vld [vmem:[%s7602_s24 + $0xd3] sm:$0xff] }
 0x29f   : > { %v2272_v8 = vpop.f32.mrf.mxu2 }
 0x2a0   : > { %v2434_v13 = vadd.f32 %v2393_v62, %v2272_v8  ;;  %v2593_v10 = vpop.f32.mrf.mxu3  ;;  %v2398_v62 = vld [vmem:[%s7866_s26 + $0x30] sm:$0xff] }
 0x2a2   : > { %v8509_v29 = vadd.f32 %v2593_v10, %v2434_v13 }
 0x2a3   : > { %v1790_v6 = vld [vmem:[%s7866_s26 + $0x140] sm:$0xf]  ;;  %v8513_v12 = vpop.f32.mrf.mxu0 }
 0x2a4   : > { %v1831_v42 = vadd.f32 %v1790_v6, %v1747_v32  ;;  %2322 = vmatmul.f32.gmra.mxu2 %v2212_v15  ;;  %v2217_v15 = vld [vmem:[%s7602_s24 + $0xe1] sm:$0xff] }
 0x2a5   : > { %2643 = vmatmul.f32.gmra.mxu3 %v2533_v1  ;;  %v2538_v6 = vld [vmem:[%s7602_s24 + $0xe2] sm:$0xff] }
 0x2a6   : > { %1872 = vst [vmem:[%s7866_s26 + $0x140] sm:$0xf] %v1831_v42  ;;  %2961 = vmatmul.f32.gmra.mxu0 %v2853_v7  ;;  %v293_v42 = vld [vmem:[%s10592_s0 + $0xc0] sm:$0xff] }
 0x2a7   : > { %v2275_v31 = vpop.f32.mrf.mxu2  ;;  %vm334_vm7 = vcmp.ne.f32.partialorder %v293_v42, 0.0 }
 0x2a8   : > { %v2435_v14 = vadd.f32 %v2394_v45, %v2275_v31  ;;  %v2596_v53 = vpop.f32.mrf.mxu3  ;;  %v3267_v31 = vsel %vm334_vm7, 1, %v7456_v11 }
 0x2a9   : > { %3357 = vperm.xlu0 %7402, %v3267_v31  }
 0x2aa   : > { %v8523_v17 = vadd.f32 %v2596_v53, %v2435_v14  ;;  %v2399_v14 = vld [vmem:[%s7866_s26 + $0x38] sm:$0xff] }
 0x2ab   : > { %v8526_v16 = vpop.f32.mrf.mxu0 }
 0x2ac   : > { %2325 = vmatmul.f32.gmra.mxu2 %v2213_v56 }
 0x2ad   : > { %v2111_v9 = vld [vmem:[%s7866_s26 + $0x140] sm:$0xf]  ;;  %2646 = vmatmul.f32.gmra.mxu3 %v2534_v19  ;;  %v2218_v19 = vld [vmem:[%s7602_s24 + $0xe9] sm:$0xff] }
 0x2ae   : > { %v2152_v43 = vadd.f32 %v2111_v9, %v2068_v22  ;;  %2964 = vmatmul.f32.gmra.mxu0 %v2854_v18  ;;  %v2539_v18 = vld [vmem:[%s7602_s24 + $0xea] sm:$0xff] }
 0x2af   : > { %v2278_v49 = vpop.f32.mrf.mxu2  ;;  %v2859_v9 = vld [vmem:[%s7602_s24 + $0xe3] sm:$0xff] }
 0x2b0   : > { %2193 = vst [vmem:[%s7866_s26 + $0x140] sm:$0xf] %v2152_v43  ;;  %v2436_v20 = vadd.f32 %v2395_v28, %v2278_v49  ;;  %v2599_v23 = vpop.f32.mrf.mxu3  ;;  %v3268_v43 = vsel %vm335_vm8, 1, %v7456_v11  ;;  %v2400_v28 = vld [vmem:[%s7866_s26 + $0x40] sm:$0xff] }
 0x2b1   : > { %3360 = vperm.xlu1 %7403, %v3268_v43   ;;  %v305_v43 = vld [vmem:[%s10592_s0 + $0x120] sm:$0xff] }
 0x2b2   : > { %v8537_v55 = vadd.f32 %v2599_v23, %v2436_v20  ;;  %vm346_vm0 = vcmp.ne.f32.partialorder %v305_v43, 0.0  ;;  %v301_v43 = vld [vmem:[%s10592_s0 + $0x100] sm:$0xff] }
 0x2b3   : > { %v8540_v24 = vpop.f32.mrf.mxu0  ;;  %vm342_vm6 = vcmp.ne.f32.partialorder %v301_v43, 0.0 }
 0x2b4   : > { %2328 = vmatmul.f32.gmra.mxu2 %v2214_v52  ;;  %v296_v52 = vld [vmem:[%s10592_s0 + $0xd8] sm:$0xff] }
 0x2b5   : > { %2649 = vmatmul.f32.gmra.mxu3 %v2535_v35  ;;  %v2219_v35 = vld [vmem:[%s7602_s24 + $0xf1] sm:$0xff]  ;;  %vm337_vm9 = vcmp.ne.f32.partialorder %v296_v52, 0.0 }
 0x2b6   : > { %2967 = vmatmul.f32.gmra.mxu0 %v2855_v36  ;;  %v3270_v33 = vsel %vm337_vm9, 1, %v7456_v11 }
 0x2b7   : > { %v2281_v21 = vpop.f32.mrf.mxu2  ;;  %3366 = vperm.xlu0 %7402, %v3270_v33   ;;  %v295_v33 = vld [vmem:[%s10592_s0 + $0xd0] sm:$0xff] }
 0x2b8   : > { %v2437_v0 = vadd.f32 %v2396_v46, %v2281_v21  ;;  %v2602_v37 = vpop.f32.mrf.mxu3  ;;  %v2860_v46 = vld [vmem:[%s7602_s24 + $0xeb] sm:$0xff]  ;;  %vm336_vm2 = vcmp.ne.f32.partialorder %v295_v33, 0.0  ;;  %v2866_v33 = vld [vmem:[%s7602_s24 + $0x11b] sm:$0xff] }
 0x2ba   : > { %v8549_v57 = vadd.f32 %v2602_v37, %v2437_v0  ;;  %v297_v0 = vld [vmem:[%s10592_s0 + $0xe0] sm:$0xff]  ;;  %v292_v37 = vld [vmem:[%s10592_s0 + $0xb8] sm:$0xff] }
 0x2bb   : > { %v8552_v32 = vpop.f32.mrf.mxu0  ;;  %vm338_vm10 = vcmp.ne.f32.partialorder %v297_v0, 0.0  ;;  %vm333_vm11 = vcmp.ne.f32.partialorder %v292_v37, 0.0  ;;  %v3269_v37 = vsel %vm336_vm2, 1, %v7456_v11 }
 0x2bc   : > { %2331 = vmatmul.f32.gmra.mxu2 %v2215_v3  ;;  %v3271_v40 = vsel %vm338_vm10, 1, %v7456_v11  ;;  %v3266_v3 = vsel %vm333_vm11, 1, %v7456_v11 }
 0x2bd   : > { %2652 = vmatmul.f32.gmra.mxu3 %v2536_v38  ;;  %3369 = vperm.xlu1 %7403, %v3271_v40  }
 0x2be   : > { %2970 = vmatmul.f32.gmra.mxu0 %v2856_v34  ;;  %v2401_v34 = vld [vmem:[%s7866_s26 + $0x48] sm:$0xff]  ;;  %3354 = vperm.xlu2 %7404, %v3266_v3   ;;  %v2404_v3 = vld [vmem:[%s7866_s26 + $0x60] sm:$0xff] }
 0x2bf   : > { %v2284_v39 = vpop.f32.mrf.mxu2 }
 0x2c0   : > { %v2438_v51 = vadd.f32 %v2397_v48, %v2284_v39  ;;  %v2605_v44 = vpop.f32.mrf.mxu3  ;;  %v3905_v39 = vld [vmem:[#allocation3 + $0x68] sm:$0xff]  ;;  %v299_v48 = vld [vmem:[%s10592_s0 + $0xf0] sm:$0xff] }
 0x2c1   : > { %3910 = vmatpush.msra.mxu1 %v3905_v39  ;;  %vm340_vm12 = vcmp.ne.f32.partialorder %v299_v48, 0.0  ;;  %v2544_v48 = vld [vmem:[%s7602_s24 + $0x112] sm:$0xff] }
 0x2c2   : > { %v8561_v54 = vadd.f32 %v2605_v44, %v2438_v51  ;;  %v2220_v51 = vld [vmem:[%s7602_s24 + $0xf9] sm:$0xff] }
 0x2c3   : > { %v8564_v60 = vpop.f32.mrf.mxu0 }
 0x2c4   : > { %2334 = vmatmul.f32.gmra.mxu2 %v2216_v50  ;;  %v2541_v50 = vld [vmem:[%s7602_s24 + $0xfa] sm:$0xff] }
 0x2c5   : > { %2655 = vmatmul.f32.gmra.mxu3 %v2537_v58  ;;  %v3273_v58 = vsel %vm340_vm12, 1, %v7456_v11 }
 0x2c6   : > { %2973 = vmatmul.f32.gmra.mxu0 %v2857_v5  ;;  %3375 = vperm.xlu0 %7402, %v3273_v58   ;;  %v2864_v58 = vld [vmem:[%s7602_s24 + $0x10b] sm:$0xff] }
 0x2c7   : > { %v2287_v8 = vpop.f32.mrf.mxu2  ;;  %3363 = vperm.xlu2 %7404, %v3269_v37  }
 0x2c8   : > { %v2439_v13 = vadd.f32 %v2398_v62, %v2287_v8  ;;  %v2608_v10 = vpop.f32.mrf.mxu3  ;;  %v3274_v8 = vsel %vm341_vm13, 1, %v7456_v11 }
 0x2c9   : > { %3378 = vperm.xlu1 %7403, %v3274_v8  }
 0x2ca   : > { %v8573_v1 = vadd.f32 %v2608_v10, %v2439_v13  ;;  %v2402_v13 = vld [vmem:[%s7866_s26 + $0x50] sm:$0xff] }
 0x2cb   : > { %v8576_v7 = vpop.f32.mrf.mxu0 }
 0x2cc   : > { %2337 = vmatmul.f32.gmra.mxu2 %v2217_v15 }
 0x2cd   : > { %2658 = vmatmul.f32.gmra.mxu3 %v2538_v6  ;;  %v302_v6 = vld [vmem:[%s10592_s0 + $0x108] sm:$0xff] }
 0x2ce   : > { %2976 = vmatmul.f32.gmra.mxu0 %v2858_v41  ;;  %v2221_v41 = vld [vmem:[%s7602_s24 + $0x101] sm:$0xff]  ;;  %vm343_vm14 = vcmp.ne.f32.partialorder %v302_v6, 0.0  ;;  %v2224_v6 = vld [vmem:[%s7602_s24 + $0x119] sm:$0xff] }
 0x2cf   : > { %v2290_v45 = vpop.f32.mrf.mxu2  ;;  %v3276_v31 = vsel %vm343_vm14, 1, %v7456_v11 }
 0x2d0   : > { %v2440_v53 = vadd.f32 %v2399_v14, %v2290_v45  ;;  %v2611_v56 = vpop.f32.mrf.mxu3  ;;  %v2862_v14 = vld [vmem:[%s7602_s24 + $0xfb] sm:$0xff]  ;;  %3384 = vperm.xlu0 %7402, %v3276_v31  }
 0x2d2   : > { %v8585_v22 = vadd.f32 %v2611_v56, %v2440_v53  ;;  %v303_v53 = vld [vmem:[%s10592_s0 + $0x110] sm:$0xff] }
 0x2d3   : > { %v8588_v27 = vpop.f32.mrf.mxu0  ;;  %vm344_vm15 = vcmp.ne.f32.partialorder %v303_v53, 0.0  ;;  %v2865_v53 = vld [vmem:[%s7602_s24 + $0x113] sm:$0xff] }
 0x2d4   : > { %2340 = vmatmul.f32.gmra.mxu2 %v2218_v19  ;;  %v3277_v56 = vsel %vm344_vm15, 1, %v7456_v11 }
 0x2d5   : > { %2661 = vmatmul.f32.gmra.mxu3 %v2539_v18  ;;  %3387 = vperm.xlu1 %7403, %v3277_v56   ;;  %v2403_v18 = vld [vmem:[%s7866_s26 + $0x58] sm:$0xff] }
 0x2d6   : > { %2979 = vmatmul.f32.gmra.mxu0 %v2859_v9 }
 0x2d7   : > { %v2293_v49 = vpop.f32.mrf.mxu2 }
 0x2d8   : > { %v2441_v20 = vadd.f32 %v2400_v28, %v2293_v49  ;;  %v2614_v23 = vpop.f32.mrf.mxu3  ;;  %v2222_v49 = vld [vmem:[%s7602_s24 + $0x109] sm:$0xff] }
 0x2da   : > { %v8600_v36 = vadd.f32 %v2614_v23, %v2441_v20  ;;  %v2543_v20 = vld [vmem:[%s7602_s24 + $0x10a] sm:$0xff]  ;;  %v3279_v23 = vsel %vm346_vm0, 1, %v7456_v11 }
 0x2db   : > { %v8604_v21 = vpop.f32.mrf.mxu0  ;;  %3393 = vperm.xlu0 %7402, %v3279_v23   ;;  %v2546_v23 = vld [vmem:[%s7602_s24 + $0x122] sm:$0xff] }
 0x2dc   : > { %2343 = vmatmul.f32.gmra.mxu2 %v2219_v35  ;;  %v2863_v35 = vld [vmem:[%s7602_s24 + $0x103] sm:$0xff] }
 0x2dd   : > { %2664 = vmatmul.f32.gmra.mxu3 %v2540_v30  ;;  %v306_v30 = vld [vmem:[%s10592_s0 + $0x128] sm:$0xff] }
 0x2de   : > { %2982 = vmatmul.f32.gmra.mxu0 %v2860_v46  ;;  %vm347_vm1 = vcmp.ne.f32.partialorder %v306_v30, 0.0  ;;  %v3904_v46 = vld [vmem:[#allocation3 + $0x60] sm:$0xff] }
 0x2df   : > { %v2296_v38 = vpop.f32.mrf.mxu2  ;;  %v3280_v0 = vsel %vm347_vm1, 1, %v7456_v11  ;;  %3911 = vmatpush.msra.mxu1 %v3904_v46 }
 0x2e0   : > { %v2442_v63 = vadd.f32 %v2401_v34, %v2296_v38  ;;  %v2617_v4 = vpop.f32.mrf.mxu3  ;;  %3396 = vperm.xlu1 %7403, %v3280_v0   ;;  %v2407_v0 = vld [vmem:[%s7866_s26 + $0x78] sm:$0xff] }
 0x2e2   : > { %v8620_v44 = vadd.f32 %v2617_v4, %v2442_v63  ;;  %v308_v63 = vld [vmem:[%s10592_s0 + $0x138] sm:$0xff] }
 0x2e3   : > { %v8624_v5 = vpop.f32.mrf.mxu0  ;;  %v2223_v4 = vld [vmem:[%s7602_s24 + $0x111] sm:$0xff]  ;;  %vm349_vm3 = vcmp.ne.f32.partialorder %v308_v63, 0.0 }
 0x2e4   : > { %2346 = vmatmul.f32.gmra.mxu2 %v2220_v51  ;;  %v3282_v51 = vsel %vm349_vm3, 1, %v7456_v11  ;;  %v2547_v63 = vld [vmem:[%s7602_s24 + $0x12a] sm:$0xff] }
 0x2e5   : > { %2667 = vmatmul.f32.gmra.mxu3 %v2541_v50  ;;  %3402 = vperm.xlu0 %7402, %v3282_v51   ;;  %v2867_v51 = vld [vmem:[%s7602_s24 + $0x123] sm:$0xff] }
 0x2e6   : > { %2985 = vmatmul.f32.gmra.mxu0 %v2861_v47  ;;  %v309_v47 = vld [vmem:[%s10592_s0 + $0x140] sm:$0xf] }
 0x2e7   : > { %v2299_v62 = vpop.f32.mrf.mxu2  ;;  %vm350_vm4 = vcmp.ne.f32.partialorder %v309_v47, 0.0  ;;  %v2408_v47 = vld [vmem:[%s7866_s26 + $0x80] sm:$0xff] }
 0x2e8   : > { %v2443_v10 = vadd.f32 %v2402_v13, %v2299_v62  ;;  %v2620_v15 = vpop.f32.mrf.mxu3  ;;  %v3283_v2 = vsel %vm350_vm4, 1, %v7456_v11  ;;  %v2405_v62 = vld [vmem:[%s7866_s26 + $0x68] sm:$0xff] }
 0x2e9   : > { %3405 = vperm.xlu1 %7403, %v3283_v2  }
 0x2ea   : > { %v8636_v42 = vadd.f32 %v2620_v15, %v2443_v10  ;;  %v298_v15 = vld [vmem:[%s10592_s0 + $0xe8] sm:$0xff] }
 0x2eb   : > { %v8640_v45 = vpop.f32.mrf.mxu0  ;;  %vm339_vm5 = vcmp.ne.f32.partialorder %v298_v15, 0.0  ;;  %v2548_v15 = vld [vmem:[%s7602_s24 + $0x132] sm:$0xff] }
 0x2ec   : > { %2349 = vmatmul.f32.gmra.mxu2 %v2221_v41  ;;  %v3272_v31 = vsel %vm339_vm5, 1, %v7456_v11 }
 0x2ed   : > { %2670 = vmatmul.f32.gmra.mxu3 %v2542_v25  ;;  %v2545_v25 = vld [vmem:[%s7602_s24 + $0x11a] sm:$0xff]  ;;  %3372 = vperm.xlu2 %7404, %v3272_v31   ;;  %v2868_v31 = vld [vmem:[%s7602_s24 + $0x12b] sm:$0xff] }
 0x2ee   : > { %2988 = vmatmul.f32.gmra.mxu0 %v2862_v14 }
 0x2ef   : > { %v2302_v19 = vpop.f32.mrf.mxu2 }
 0x2f0   : > { %v2444_v9 = vadd.f32 %v2403_v18, %v2302_v19  ;;  %v2623_v26 = vpop.f32.mrf.mxu3  ;;  %v2406_v19 = vld [vmem:[%s7866_s26 + $0x70] sm:$0xff] }
 0x2f2   : > { %v8652_v28 = vadd.f32 %v2623_v26, %v2444_v9  ;;  %v3903_v26 = vld [vmem:[#allocation3 + $0x58] sm:$0xff] }
 0x2f3   : > { %v8656_v52 = vpop.f32.mrf.mxu0  ;;  %3912 = vmatpush.msra.mxu1 %v3903_v26 }
 0x2f4   : > { %2352 = vmatmul.f32.gmra.mxu2 %v2222_v49  ;;  %v2225_v49 = vld [vmem:[%s7602_s24 + $0x121] sm:$0xff] }
 0x2f5   : > { %2673 = vmatmul.f32.gmra.mxu3 %v2543_v20 }
 0x2f6   : > { %2991 = vmatmul.f32.gmra.mxu0 %v2863_v35  ;;  %v3275_v35 = vsel %vm342_vm6, 1, %v7456_v11 }
 0x2f7   : > { %v2305_v40 = vpop.f32.mrf.mxu2  ;;  %3381 = vperm.xlu2 %7404, %v3275_v35   ;;  %v2550_v35 = vld [vmem:[%s7602_s24 + $0x142] sm:$0xff] }
 0x2f8   : > { %v2445_v38 = vadd.f32 %v2404_v3, %v2305_v40  ;;  %v2626_v34 = vpop.f32.mrf.mxu3  ;;  %v304_v3 = vld [vmem:[%s10592_s0 + $0x118] sm:$0xff] }
 0x2f9   : > { %vm345_vm7 = vcmp.ne.f32.partialorder %v304_v3, 0.0  ;;  %v2230_v3 = vld [vmem:[%s7602_s24 + $0x149] sm:$0xff] }
 0x2fa   : > { %v8672_v39 = vadd.f32 %v2626_v34, %v2445_v38  ;;  %v2226_v38 = vld [vmem:[%s7602_s24 + $0x129] sm:$0xff] }
 0x2fb   : > { %v8676_v50 = vpop.f32.mrf.mxu0 }
 0x2fc   : > { %2355 = vmatmul.f32.gmra.mxu2 %v2223_v4  ;;  %v3278_v4 = vsel %vm345_vm7, 1, %v7456_v11 }
 0x2fd   : > { %2676 = vmatmul.f32.gmra.mxu3 %v2544_v48 }
 0x2fe   : > { %2994 = vmatmul.f32.gmra.mxu0 %v2864_v58 }
 0x2ff   : > { %v2308_v8 = vpop.f32.mrf.mxu2  ;;  %3390 = vperm.xlu2 %7404, %v3278_v4   ;;  %v2871_v4 = vld [vmem:[%s7602_s24 + $0x143] sm:$0xff] }
 0x300   : > { %v2446_v13 = vadd.f32 %v2405_v62, %v2308_v8  ;;  %v2629_v10 = vpop.f32.mrf.mxu3  ;;  %v307_v62 = vld [vmem:[%s10592_s0 + $0x130] sm:$0xff] }
 0x301   : > { %vm348_vm8 = vcmp.ne.f32.partialorder %v307_v62, 0.0  ;;  %v2872_v62 = vld [vmem:[%s7602_s24 + $0x14b] sm:$0xff] }
 0x302   : > { %v8688_v41 = vadd.f32 %v2629_v10, %v2446_v13  ;;  %v2227_v13 = vld [vmem:[%s7602_s24 + $0x131] sm:$0xff] }
 0x303   : > { %v8692_v14 = vpop.f32.mrf.mxu0 }
 0x304   : > { %2358 = vmatmul.f32.gmra.mxu2 %v2224_v6  ;;  %v3281_v6 = vsel %vm348_vm8, 1, %v7456_v11  ;;  %v2869_v11 = vld [vmem:[%s7602_s24 + $0x133] sm:$0xff] }
 0x305   : > { %2679 = vmatmul.f32.gmra.mxu3 %v2545_v25 }
 0x306   : > { %2997 = vmatmul.f32.gmra.mxu0 %v2865_v53  ;;  %v3902_v53 = vld [vmem:[#allocation3 + $0x50] sm:$0xff] }
 0x307   : > { %v2311_v56 = vpop.f32.mrf.mxu2  ;;  %3399 = vperm.xlu2 %7404, %v3281_v6   ;;  %3913 = vmatpush.msra.mxu1 %v3902_v53  ;;  %v2232_v6 = vld [vmem:[%s7602_s24 + $0x159] sm:$0xff] }
 0x308   : > { %v2447_v18 = vadd.f32 %v2406_v19, %v2311_v56  ;;  %v2632_v9 = vpop.f32.mrf.mxu3 }
 0x30a   : > { %v8700_v20 = vadd.f32 %v2632_v9, %v2447_v18  ;;  %v2228_v18 = vld [vmem:[%s7602_s24 + $0x139] sm:$0xff] }
 0x30b   : > { %v8704_v30 = vpop.f32.mrf.mxu0  ;;  %v2549_v9 = vld [vmem:[%s7602_s24 + $0x13a] sm:$0xff] }
 0x30c   : > { %2361 = vmatmul.f32.gmra.mxu2 %v2225_v49 }
 0x30d   : > { %2682 = vmatmul.f32.gmra.mxu3 %v2546_v23  ;;  %v2229_v23 = vld [vmem:[%s7602_s24 + $0x141] sm:$0xff] }
 0x30e   : > { %3000 = vmatmul.f32.gmra.mxu0 %v2866_v33 }
 0x30f   : > { %v2314_v46 = vpop.f32.mrf.mxu2 }
 0x310   : > { %v2448_v37 = vadd.f32 %v2407_v0, %v2314_v46  ;;  %v2635_v40 = vpop.f32.mrf.mxu3  ;;  %v2870_v46 = vld [vmem:[%s7602_s24 + $0x13b] sm:$0xff] }
 0x312   : > { %v8712_v34 = vadd.f32 %v2635_v40, %v2448_v37  ;;  %v3901_v40 = vld [vmem:[#allocation3 + $0x48] sm:$0xff] }
 0x313   : > { %v8716_v48 = vpop.f32.mrf.mxu0  ;;  %3914 = vmatpush.msra.mxu1 %v3901_v40 }
 0x314   : > { %2364 = vmatmul.f32.gmra.mxu2 %v2226_v38  ;;  %v2551_v38 = vld [vmem:[%s7602_s24 + $0x14a] sm:$0xff] }
 0x315   : > { %2685 = vmatmul.f32.gmra.mxu3 %v2547_v63 }
 0x316   : > { %3003 = vmatmul.f32.gmra.mxu0 %v2867_v51 }
 0x317   : > { %v2317_v58 = vpop.f32.mrf.mxu2 }
 0x318   : > { %v2449_v2 = vadd.f32 %v2408_v47, %v2317_v58  ;;  %v2638_v8 = vpop.f32.mrf.mxu3  ;;  %v2231_v47 = vld [vmem:[%s7602_s24 + $0x151] sm:$0xff] }
 0x31a   : > { %v8724_v10 = vadd.f32 %v2638_v8, %v2449_v2  ;;  %v2552_v2 = vld [vmem:[%s7602_s24 + $0x152] sm:$0xff] }
 0x31b   : > { %v8728_v25 = vpop.f32.mrf.mxu0 }
 0x31c   : > { %2367 = vmatmul.f32.gmra.mxu2 %v2227_v13 }
 0x31d   : > { %2688 = vmatmul.f32.gmra.mxu3 %v2548_v15 }
 0x31e   : > { %3006 = vmatmul.f32.gmra.mxu0 %v2868_v31  ;;  %v2553_v31 = vld [vmem:[%s7602_s24 + $0x15a] sm:$0xff] }
 0x31f   : > { %v8731_v56 = vpop.f32.mrf.mxu2 }
 0x320   : > { %v8733_v19 = vpop.f32.mrf.mxu3 }
 0x323   : > { %v8737_v26 = vpop.f32.mrf.mxu0 }
 0x324   : > { %2370 = vmatmul.f32.gmra.mxu2 %v2228_v18  ;;  %v2873_v18 = vld [vmem:[%s7602_s24 + $0x153] sm:$0xff] }
 0x325   : > { %2691 = vmatmul.f32.gmra.mxu3 %v2549_v9 }
 0x326   : > { %3009 = vmatmul.f32.gmra.mxu0 %v2869_v11 }
 0x327   : > { %v8740_v43 = vpop.f32.mrf.mxu2 }
 0x328   : > { %v8742_v49 = vpop.f32.mrf.mxu3 }
 0x32b   : > { %v8746_v33 = vpop.f32.mrf.mxu0 }
 0x32c   : > { %2373 = vmatmul.f32.gmra.mxu2 %v2229_v23  ;;  %v3900_v23 = vld [vmem:[#allocation3 + $0x40] sm:$0xff] }
 0x32d   : > { %2694 = vmatmul.f32.gmra.mxu3 %v2550_v35  ;;  %v2233_v35 = vld [vmem:[%s7602_s24 + $0x161] sm:$0xff]  ;;  %3915 = vmatpush.msra.mxu1 %v3900_v23  ;;  %v3899_v23 = vld [vmem:[#allocation3 + $0x38] sm:$0xff] }
 0x32e   : > { %3012 = vmatmul.f32.gmra.mxu0 %v2870_v46  ;;  %v2554_v46 = vld [vmem:[%s7602_s24 + $0x162] sm:$0xff] }
 0x32f   : > { %v8749_v0 = vpop.f32.mrf.mxu2  ;;  %3916 = vmatpush.msra.mxu1 %v3899_v23  ;;  %v3898_v23 = vld [vmem:[#allocation3 + $0x30] sm:$0xff] }
 0x330   : > { %v8751_v37 = vpop.f32.mrf.mxu3 }
 0x331   : > { %3917 = vmatpush.msra.mxu1 %v3898_v23  ;;  %v8835_v23 = vpop.permute.xlu2 %3297 }
 0x332   : > { %10739 = vst [vmem:[#allocation34_spill] sm:$0xff] %v8835_v23  ;;  %vm3411_vm13 = vcmp.eq.s32.totalorder %v8835_v23, 1 }
 0x333   : > { %v8755_v63 = vpop.f32.mrf.mxu0 }
 0x334   : > { %2376 = vmatmul.f32.gmra.mxu2 %v2230_v3  ;;  %v2874_v3 = vld [vmem:[%s7602_s24 + $0x15b] sm:$0xff] }
 0x335   : > { %2697 = vmatmul.f32.gmra.mxu3 %v2551_v38 }
 0x336   : > { %3015 = vmatmul.f32.gmra.mxu0 %v2871_v4 }
 0x337   : > { %v8758_v51 = vpop.f32.mrf.mxu2 }
 0x338   : > { %v8760_v58 = vpop.f32.mrf.mxu3 }
 0x33b   : > { %v8764_v8 = vpop.f32.mrf.mxu0 }
 0x33c   : > { %10711 = vst [vmem:[#allocation6_spill] sm:$0xff] %v8764_v8  ;;  %2379 = vmatmul.f32.gmra.mxu2 %v2231_v47  ;;  %v2234_v47 = vld [vmem:[%s7602_s24 + $0x169] sm:$0xf] }
 0x33d   : > { %2700 = vmatmul.f32.gmra.mxu3 %v2552_v2  ;;  %v2555_v2 = vld [vmem:[%s7602_s24 + $0x16a] sm:$0xf] }
 0x33e   : > { %3018 = vmatmul.f32.gmra.mxu0 %v2872_v62 }
 0x33f   : > { %v8767_v13 = vpop.f32.mrf.mxu2 }
 0x340   : > { %v8769_v15 = vpop.f32.mrf.mxu3 }
 0x341   : > { %10712 = vst [vmem:[#allocation7_spill] sm:$0xff] %v8769_v15 }
 0x343   : > { %v8773_v53 = vpop.f32.mrf.mxu0 }
 0x344   : > { %10713 = vst [vmem:[#allocation8_spill] sm:$0xff] %v8773_v53  ;;  %2382 = vmatmul.f32.gmra.mxu2 %v2232_v6  ;;  %v2875_v6 = vld [vmem:[%s7602_s24 + $0x163] sm:$0xff]  ;;  %v8849_v53 = vpop.permute.xlu2 %3300 }
 0x345   : > { %2703 = vmatmul.f32.gmra.mxu3 %v2553_v31  ;;  %10746 = vst [vmem:[#allocation41_spill] sm:$0xff] %v8849_v53  ;;  %vm3412_vm14 = vcmp.eq.s32.totalorder %v8849_v53, 1 }
 0x346   : > { %3021 = vmatmul.f32.gmra.mxu0 %v2873_v18 }
 0x347   : > { %v8776_v9 = vpop.f32.mrf.mxu2 }
 0x348   : > { %v8778_v11 = vpop.f32.mrf.mxu3 }
 0x349   : > { %10714 = vst [vmem:[#allocation9_spill] sm:$0xff] %v8778_v11 }
 0x34b   : > { %v8782_v40 = vpop.f32.mrf.mxu0 }
 0x34c   : > { %10715 = vst [vmem:[#allocation10_spill] sm:$0xff] %v8782_v40  ;;  %2385 = vmatmul.f32.gmra.mxu2 %v2233_v35 }
 0x34d   : > { %2706 = vmatmul.f32.gmra.mxu3 %v2554_v46  ;;  %v2876_v46 = vld [vmem:[%s7602_s24 + $0x16b] sm:$0xf] }
 0x34e   : > { %3024 = vmatmul.f32.gmra.mxu0 %v2874_v3 }
 0x34f   : > { %v8785_v38 = vpop.f32.mrf.mxu2 }
 0x350   : > { %10716 = vst [vmem:[#allocation11_spill] sm:$0xff] %v8785_v38  ;;  %v8787_v4 = vpop.f32.mrf.mxu3 }
 0x351   : > { %10717 = vst [vmem:[#allocation12_spill] sm:$0xff] %v8787_v4 }
 0x353   : > { %v8791_v62 = vpop.f32.mrf.mxu0 }
 0x354   : > { %10718 = vst [vmem:[#allocation13_spill] sm:$0xff] %v8791_v62  ;;  %2388 = vmatmul.f32.gmra.mxu2 %v2234_v47 }
 0x355   : > { %2709 = vmatmul.f32.gmra.mxu3 %v2555_v2 }
 0x356   : > { %3027 = vmatmul.f32.gmra.mxu0 %v2875_v6 }
 0x357   : > { %v8794_v31 = vpop.f32.mrf.mxu2 }
 0x358   : > { %10719 = vst [vmem:[#allocation14_spill] sm:$0xff] %v8794_v31  ;;  %v8796_v18 = vpop.f32.mrf.mxu3 }
 0x359   : > { %10720 = vst [vmem:[#allocation15_spill] sm:$0xff] %v8796_v18 }
 0x35b   : > { %v8798_v35 = vpop.f32.mrf.mxu0 }
 0x35c   : > { %10721 = vst [vmem:[#allocation16_spill] sm:$0xff] %v8798_v35 }
 0x35e   : > { %3030 = vmatmul.f32.gmra.mxu0 %v2876_v46 }
 0x35f   : > { %v8801_v3 = vpop.f32.mrf.mxu2 }
 0x360   : > { %10722 = vst [vmem:[#allocation17_spill] sm:$0xff] %v8801_v3  ;;  %v8803_v40 = vpop.f32.mrf.mxu3 }
 0x361   : > { %10723 = vst [vmem:[#allocation18_spill] sm:$0xff] %v8803_v40 }
 0x363   : > { %v8805_v4 = vpop.f32.mrf.mxu0 }
 0x364   : > { %10724 = vst [vmem:[#allocation19_spill] sm:$0xff] %v8805_v4  ;;  %v8825_v4 = vpop.permute.xlu0 %3285 }
 0x365   : > { %10734 = vst [vmem:[#allocation29_spill] sm:$0xff] %v8825_v4  ;;  %vm3407_vm10 = vcmp.eq.s32.totalorder %v8825_v4, 1  ;;  %v3083_v4 = vadd.f32 %v8604_v21, %v8600_v36 }
 0x367   : > { %v8807_v62 = vpop.f32.mrf.mxu2 }
 0x368   : > { %10725 = vst [vmem:[#allocation20_spill] sm:$0xff] %v8807_v62  ;;  %v8809_v47 = vpop.f32.mrf.mxu3 }
 0x369   : > { %10726 = vst [vmem:[#allocation21_spill] sm:$0xff] %v8809_v47  ;;  %v8829_v47 = vpop.permute.xlu1 %3291 }
 0x36a   : > { %10736 = vst [vmem:[#allocation31_spill] sm:$0xff] %v8829_v47  ;;  %vm3409_vm11 = vcmp.eq.s32.totalorder %v8829_v47, 1 }
 0x36b   : > { %v8811_v2 = vpop.f32.mrf.mxu0 }
 0x36c   : > { %10727 = vst [vmem:[#allocation22_spill] sm:$0xff] %v8811_v2 }
 0x36f   : > { %v8813_v6 = vpop.f32.mrf.mxu2 }
 0x370   : > { %10728 = vst [vmem:[#allocation23_spill] sm:$0xff] %v8813_v6  ;;  %v8815_v18 = vpop.f32.mrf.mxu3  ;;  %v3897_v6 = vld [vmem:[#allocation3 + $0x28] sm:$0xff] }
 0x371   : > { %10729 = vst [vmem:[#allocation24_spill] sm:$0xff] %v8815_v18  ;;  %3918 = vmatpush.msra.mxu1 %v3897_v6 }
 0x373   : > { %v8817_v35 = vpop.f32.mrf.mxu0 }
 0x374   : > { %10730 = vst [vmem:[#allocation25_spill] sm:$0xff] %v8817_v35  ;;  %v8837_v35 = vpop.permute.xlu0 %3288 }
 0x375   : > { %10740 = vst [vmem:[#allocation35_spill] sm:$0xff] %v8837_v35  ;;  %vm3408_vm9 = vcmp.eq.s32.totalorder %v8837_v35, 1 }
 0x377   : > { %v8819_v46 = vpop.f32.mrf.mxu2 }
 0x378   : > { %10731 = vst [vmem:[#allocation26_spill] sm:$0xff] %v8819_v46  ;;  %v8821_v3 = vpop.f32.mrf.mxu3 }
 0x379   : > { %10732 = vst [vmem:[#allocation27_spill] sm:$0xff] %v8821_v3 }
 0x37b   : > { %v8823_v40 = vpop.f32.mrf.mxu0 }
 0x37c   : > { %10733 = vst [vmem:[#allocation28_spill] sm:$0xff] %v8823_v40  ;;  %v8843_v40 = vpop.permute.xlu1 %3294 }
 0x37d   : > { %10743 = vst [vmem:[#allocation38_spill] sm:$0xff] %v8843_v40  ;;  %vm3410_vm12 = vcmp.eq.s32.totalorder %v8843_v40, 1 }
 0x37f   : > { %v8827_v62 = vpop.f32.mrf.mxu2 }
 0x380   : > { %10735 = vst [vmem:[#allocation30_spill] sm:$0xff] %v8827_v62  ;;  %v8831_v2 = vpop.f32.mrf.mxu3  ;;  %v8847_v62 = vpop.permute.xlu0 %3303 }
 0x381   : > { %10737 = vst [vmem:[#allocation32_spill] sm:$0xff] %v8831_v2  ;;  %vm3413_vm15 = vcmp.eq.s32.totalorder %v8847_v62, 1 }
 0x382   : > { %10745 = vst [vmem:[#allocation40_spill] sm:$0xff] %v8847_v62 }
 0x383   : > { %v8833_v18 = vpop.f32.mrf.mxu0 }
 0x384   : > { %10738 = vst [vmem:[#allocation33_spill] sm:$0xff] %v8833_v18  ;;  %v8855_v18 = vpop.permute.xlu1 %3306 }
 0x385   : > { %10749 = vst [vmem:[#allocation44_spill] sm:$0xff] %v8855_v18  ;;  %vm3414_vm0 = vcmp.eq.s32.totalorder %v8855_v18, 1 }
 0x387   : > { %v8839_v46 = vpop.f32.mrf.mxu2 }
 0x388   : > { %10741 = vst [vmem:[#allocation36_spill] sm:$0xff] %v8839_v46  ;;  %v8841_v3 = vpop.f32.mrf.mxu3  ;;  %v3076_v46 = vadd.f32 %v8513_v12, %v8509_v29  ;;  %v8870_v38 = vpop.permute.xlu0 %3312  ;;  %v3078_v29 = vadd.f32 %v8540_v24, %v8537_v55 }
 0x389   : > { %10742 = vst [vmem:[#allocation37_spill] sm:$0xff] %v8841_v3  ;;  %v3075_v3 = vadd.f32 %v8499_v61, %v8496_v59  ;;  %v3896_v61 = vld [vmem:[#allocation3 + $0x20] sm:$0xff]  ;;  %vm3416_vm2 = vcmp.eq.s32.totalorder %v8870_v38, 1 }
 0x38a   : > { %10751 = vst [vmem:[#allocation46_spill] sm:$0xff] %v8870_v38  ;;  %3919 = vmatpush.msra.mxu1 %v3896_v61  ;;  %v2410_v38 = vld [vmem:[%s7866_s26 + $0x90] sm:$0xff] }
 0x38b   : > { %v8845_v31 = vpop.f32.mrf.mxu0 }
 0x38c   : > { %10744 = vst [vmem:[#allocation39_spill] sm:$0xff] %v8845_v31  ;;  %v8866_v31 = vld [vmem:[%s10595_s3] ss:$0 sm:$0xff]  ;;  %v8886_v15 = vpop.permute.xlu1 %3315 }
 0x38d   : > { %v3202_v12 = vadd.f32 %v8866_v31, %v3075_v3  ;;  %10753 = vst [vmem:[#allocation48_spill] sm:$0xff] %v8886_v15  ;;  %v3080_v3 = vadd.f32 %v8564_v60, %v8561_v54  ;;  %vm3417_vm3 = vcmp.eq.s32.totalorder %v8886_v15, 1 }
 0x38f   : > { %v8851_v2 = vpop.f32.mrf.mxu2 }
 0x390   : > { %10747 = vst [vmem:[#allocation42_spill] sm:$0xff] %v8851_v2  ;;  %v8853_v6 = vpop.f32.mrf.mxu3  ;;  %v3077_v2 = vadd.f32 %v8526_v16, %v8523_v17  ;;  %v3079_v16 = vadd.f32 %v8552_v32, %v8549_v57  ;;  %v8902_v57 = vsel %vm3407_vm10, %v3202_v12, 0.0  ;;  %v8911_v61 = vpop.permute.xlu0 %3321 }
 0x391   : > { %10748 = vst [vmem:[#allocation43_spill] sm:$0xff] %v8853_v6  ;;  %v8872_v6 = vpop.permute.xlu2 %3309  ;;  %vm10666_vm5 = vcmp.eq.s32.totalorder %v8911_v61, 1 }
 0x392   : > { %10752 = vst [vmem:[#allocation47_spill] sm:$0xff] %v8872_v6  ;;  %v3204_v17 = vadd.f32 %v8866_v31, %v3077_v2  ;;  %v3206_v2 = vadd.f32 %v8866_v31, %v3079_v16  ;;  %v3537_v16 = vmul.f32 %v8902_v57, %v8902_v57  ;;  %vm3415_vm1 = vcmp.eq.s32.totalorder %v8872_v6, 1 }
 0x393   : > { %v8857_v11 = vpop.f32.mrf.mxu0  ;;  %10756 = vst [vmem:[#allocation51_spill] sm:$0xff] %v8911_v61 }
 0x394   : > { %10750 = vst [vmem:[#allocation45_spill] sm:$0xff] %v8857_v11  ;;  %v3203_v11 = vadd.f32 %v8866_v31, %v3076_v46  ;;  %v3205_v46 = vadd.f32 %v8866_v31, %v3078_v29  ;;  %v8906_v32 = vsel %vm3409_vm11, %v3204_v17, 0.0  ;;  %v3207_v17 = vadd.f32 %v8866_v31, %v3080_v3 }
 0x395   : > { %v3539_v47 = vmul.f32 %v8906_v32, %v8906_v32 }
 0x396   : > { %v8894_v24 = vsel %vm3408_vm9, %v3203_v11, 0.0  ;;  %v3081_v11 = vadd.f32 %v8576_v7, %v8573_v1  ;;  %v8922_v12 = vsel %vm3410_vm12, %v3205_v46, 0.0  ;;  %v3082_v1 = vadd.f32 %v8588_v27, %v8585_v22  ;;  %v8941_v22 = vpop.permute.xlu1 %3324 }
 0x397   : > { %v8874_v8 = vpop.f32.mrf.mxu2  ;;  %10755 = vst [vmem:[#allocation50_spill] sm:$0xff] %v8894_v24  ;;  %v3538_v54 = vmul.f32 %v8894_v24, %v8894_v24  ;;  %v3489_v40 = vadd.f32 %v8894_v24, %v8902_v57  ;;  %v8938_v46 = vsel %vm3411_vm13, %v3206_v2, 0.0  ;;  %v3540_v35 = vmul.f32 %v8922_v12, %v8922_v12 }
 0x398   : > { %v8879_v59 = vpop.f32.mrf.mxu3  ;;  %v3208_v3 = vadd.f32 %v8866_v31, %v3081_v11  ;;  %10758 = vst [vmem:[#allocation53_spill] sm:$0xff] %v8941_v22  ;;  %v8951_v23 = vsel %vm3412_vm14, %v3207_v17, 0.0  ;;  %v3209_v2 = vadd.f32 %v8866_v31, %v3082_v1  ;;  %v8965_v21 = vpop.permute.xlu0 %3330  ;;  %v3210_v1 = vadd.f32 %v8866_v31, %v3083_v4 }
 0x399   : > { %v8916_v60 = vpop.permute.xlu2 %3318  ;;  %v3578_v27 = vadd.f32 %v3538_v54, %v3537_v16  ;;  %v3541_v54 = vmul.f32 %v8938_v46, %v8938_v46  ;;  %v3084_v16 = vadd.f32 %v8624_v5, %v8620_v44  ;;  %10759 = vst [vmem:[#allocation54_spill] sm:$0xff] %v8965_v21  ;;  %v3085_v5 = vadd.f32 %v8640_v45, %v8636_v42 }
 0x39a   : > { %10757 = vst [vmem:[#allocation52_spill] sm:$0xff] %v8916_v60  ;;  %v8963_v36 = vsel %vm3413_vm15, %v3208_v3, 0.0  ;;  %v8977_v44 = vsel %vm3414_vm0, %v3209_v2, 0.0  ;;  %v3086_v2 = vadd.f32 %v8656_v52, %v8652_v28  ;;  %vm3418_vm4 = vcmp.eq.s32.totalorder %v8916_v60, 1  ;;  %v2418_v60 = vld [vmem:[%s7866_s26 + $0xd0] sm:$0xff] }
 0x39b   : > { %v8890_v55 = vpop.f32.mrf.mxu0  ;;  %v3579_v24 = vadd.f32 %v3578_v27, %v3539_v47  ;;  %v3542_v47 = vmul.f32 %v8951_v23, %v8951_v23  ;;  %v3543_v4 = vmul.f32 %v8963_v36, %v8963_v36  ;;  %v3211_v62 = vadd.f32 %v8866_v31, %v3084_v16 }
 0x39c   : > { %10754 = vst [vmem:[#allocation49_spill] sm:$0xff] %v8890_v55  ;;  %v3490_v55 = vadd.f32 %v3489_v40, %v8906_v32  ;;  %v3212_v16 = vadd.f32 %v8866_v31, %v3085_v5  ;;  %v3088_v5 = vadd.f32 %v8692_v14, %v8688_v41  ;;  %vm10623_vm6 = vcmp.eq.s32.totalorder %v8941_v22, 1  ;;  %v2417_v22 = vld [vmem:[%s7866_s26 + $0xc8] sm:$0xff] }
 0x39d   : > { %v3580_v17 = vadd.f32 %v3579_v24, %v3540_v35  ;;  %v3895_v35 = vld [vmem:[#allocation3 + $0x18] sm:$0xff]  ;;  %vm10624_vm8 = vcmp.eq.s32.totalorder %v8965_v21, 1  ;;  %v2416_v21 = vld [vmem:[%s7866_s26 + $0xc0] sm:$0xff] }
 0x39e   : > { %v3491_v40 = vadd.f32 %v3490_v55, %v8922_v12  ;;  %3920 = vmatpush.msra.mxu1 %v3895_v35  ;;  %v8991_v18 = vpop.permute.xlu1 %3333  ;;  %v9006_v35 = vsel %vm3416_vm2, %v3211_v62, 0.0  ;;  %v2409_v62 = vld [vmem:[%s7866_s26 + $0x88] sm:$0xff]  ;;  %v9029_v41 = vsel %vm3417_vm3, %v3212_v16, 0.0 }
 0x39f   : > { %v8918_v29 = vpop.f32.mrf.mxu2  ;;  %v3581_v3 = vadd.f32 %v3580_v17, %v3541_v54  ;;  %10761 = vst [vmem:[#allocation56_spill] sm:$0xff] %v8991_v18  ;;  %v8998_v54 = vsel %vm3415_vm1, %v3210_v1, 0.0  ;;  %v3087_v17 = vadd.f32 %v8676_v50, %v8672_v39  ;;  %v3213_v1 = vadd.f32 %v8866_v31, %v3086_v2 }
 0x3a0   : > { %v8927_v7 = vpop.f32.mrf.mxu3  ;;  %v3492_v24 = vadd.f32 %v3491_v40, %v8938_v46  ;;  %v3544_v40 = vmul.f32 %v8977_v44, %v8977_v44  ;;  %v3546_v2 = vmul.f32 %v9006_v35, %v9006_v35  ;;  %v3547_v15 = vmul.f32 %v9029_v41, %v9029_v41 }
 0x3a1   : > { %v8971_v27 = vpop.permute.xlu2 %3327  ;;  %v3582_v45 = vadd.f32 %v3581_v3, %v3542_v47  ;;  %v3545_v47 = vmul.f32 %v8998_v54, %v8998_v54  ;;  %v3214_v14 = vadd.f32 %v8866_v31, %v3087_v17  ;;  %v9042_v16 = vsel %vm3418_vm4, %v3213_v1, 0.0 }
 0x3a2   : > { %10760 = vst [vmem:[#allocation55_spill] sm:$0xff] %v8971_v27  ;;  %v3493_v42 = vadd.f32 %v3492_v24, %v8951_v23  ;;  %v9014_v24 = vpop.permute.xlu0 %3339  ;;  %v3215_v17 = vadd.f32 %v8866_v31, %v3088_v5  ;;  %v3548_v5 = vmul.f32 %v9042_v16, %v9042_v16  ;;  %vm10622_vm7 = vcmp.eq.s32.totalorder %v8971_v27, 1 }
 0x3a3   : > { %v8954_v11 = vpop.f32.mrf.mxu0  ;;  %v3583_v52 = vadd.f32 %v3582_v45, %v3543_v4  ;;  %10762 = vst [vmem:[#allocation57_spill] sm:$0xff] %v9014_v24  ;;  %v2450_v45 = vadd.f32 %v2409_v62, %v8731_v56  ;;  %v2451_v56 = vadd.f32 %v2410_v38, %v8740_v43  ;;  %v2411_v38 = vld [vmem:[%s7866_s26 + $0x98] sm:$0xff] }
 0x3a4   : > { %v3494_v28 = vadd.f32 %v3493_v42, %v8963_v36  ;;  %10764 = vst [vmem:[#allocation59_spill] sm:$0xff] %v9042_v16 }
 0x3a5   : > { %v3584_v3 = vadd.f32 %v3583_v52, %v3544_v40  ;;  %v3089_v52 = vadd.f32 %v8704_v30, %v8700_v20  ;;  %v9054_v30 = vsel %vm10666_vm5, %v3214_v14, 0.0  ;;  %v2771_v43 = vadd.f32 %v8733_v19, %v2450_v45 }
 0x3a6   : > { %v3495_v50 = vadd.f32 %v3494_v28, %v8977_v44  ;;  %v9046_v62 = vpop.permute.xlu1 %3342  ;;  %10766 = vst [vmem:[#allocation61_spill] sm:$0xff] %v9054_v30 }
 0x3a7   : > { %v8973_v53 = vpop.f32.mrf.mxu2  ;;  %v3585_v6 = vadd.f32 %v3584_v3, %v3545_v47  ;;  %10765 = vst [vmem:[#allocation60_spill] sm:$0xff] %v9046_v62  ;;  %v3090_v47 = vadd.f32 %v8716_v48, %v8712_v34  ;;  %v3216_v3 = vadd.f32 %v8866_v31, %v3089_v52  ;;  %v3091_v34 = vadd.f32 %v8728_v25, %v8724_v10 }
 0x3a8   : > { %v8982_v55 = vpop.f32.mrf.mxu3  ;;  %v3496_v40 = vadd.f32 %v3495_v50, %v8998_v54  ;;  %v2772_v48 = vadd.f32 %v8742_v49, %v2451_v56  ;;  %v3092_v10 = vadd.f32 %v8737_v26, %v2771_v43 }
 0x3a9   : > { %v9021_v4 = vpop.permute.xlu2 %3336  ;;  %v3586_v20 = vadd.f32 %v3585_v6, %v3546_v2  ;;  %v2452_v6 = vadd.f32 %v2411_v38, %v8749_v0  ;;  %v9067_v2 = vsel %vm10623_vm6, %v3215_v17, 0.0  ;;  %v3549_v0 = vmul.f32 %v9054_v30, %v9054_v30 }
 0x3aa   : > { %10763 = vst [vmem:[#allocation58_spill] sm:$0xff] %v9021_v4  ;;  %v3497_v50 = vadd.f32 %v3496_v40, %v9006_v35  ;;  %v9073_v19 = vpop.permute.xlu0 %3348  ;;  %v2412_v40 = vld [vmem:[%s7866_s26 + $0xa0] sm:$0xff]  ;;  %v3550_v56 = vmul.f32 %v9067_v2, %v9067_v2  ;;  %v3218_v26 = vadd.f32 %v8866_v31, %v3091_v34  ;;  %vm10649_vm6 = vcmp.eq.s32.totalorder %v9021_v4, 1  ;;  %v10782_v4 = vld [vmem:[#allocation8_spill] sm:$0xff] }
 0x3ab   : > { %v9016_v39 = vpop.f32.mrf.mxu0  ;;  %10767 = vst [vmem:[#allocation62_spill] sm:$0xff] %v9067_v2  ;;  %v3587_v14 = vadd.f32 %v3586_v20, %v3547_v15  ;;  %v2453_v25 = vadd.f32 %v2412_v40, %v8758_v51  ;;  %v9093_v20 = vsel %vm10622_vm7, %v3216_v3, 0.0  ;;  %v2773_v38 = vadd.f32 %v8751_v37, %v2452_v6 }
 0x3ac   : > { %v3498_v1 = vadd.f32 %v3497_v50, %v9029_v41  ;;  %10768 = vst [vmem:[#allocation63_spill] sm:$0xff] %v9073_v19  ;;  %v3217_v50 = vadd.f32 %v8866_v31, %v3090_v47  ;;  %v3093_v51 = vadd.f32 %v8746_v33, %v2772_v48  ;;  %vm10627_vm7 = vcmp.eq.s32.totalorder %v8991_v18, 1 }
 0x3ad   : > { %v3588_v15 = vadd.f32 %v3587_v14, %v3548_v5  ;;  %10770 = vst [vmem:[#allocation65_spill] sm:$0xff] %v9093_v20  ;;  %v3551_v37 = vmul.f32 %v9093_v20, %v9093_v20  ;;  %v3219_v6 = vadd.f32 %v8866_v31, %v3092_v10  ;;  %v2774_v33 = vadd.f32 %v8760_v58, %v2453_v25 }
 0x3ae   : > { %v3499_v45 = vadd.f32 %v3498_v1, %v9042_v16  ;;  %v2413_v1 = vld [vmem:[%s7866_s26 + $0xa8] sm:$0xff]  ;;  %v9102_v5 = vpop.permute.xlu1 %3351  ;;  %v9110_v3 = vsel %vm10624_vm8, %v3217_v50, 0.0  ;;  %v3094_v48 = vadd.f32 %v8755_v63, %v2773_v38  ;;  %v3220_v50 = vadd.f32 %v8866_v31, %v3093_v51  ;;  %v2415_v63 = vld [vmem:[%s7866_s26 + $0xb8] sm:$0xff] }
 0x3af   : > { %v9023_v42 = vpop.f32.mrf.mxu2  ;;  %v2454_v43 = vadd.f32 %v2413_v1, %v8767_v13  ;;  %10771 = vst [vmem:[#allocation66_spill] sm:$0xff] %v9102_v5  ;;  %v3589_v40 = vadd.f32 %v3588_v15, %v3549_v0  ;;  %v9120_v0 = vsel %vm10627_vm7, %v3218_v26, 0.0  ;;  %v10774_v1 = vld [vmem:[#allocation7_spill] sm:$0xff]  ;;  %vm10640_vm8 = vcmp.eq.s32.totalorder %v9014_v24, 1  ;;  %v2427_v16 = vld [vmem:[%s7866_s26 + $0x118] sm:$0xff] }
 0x3b0   : > { %v9033_v28 = vpop.f32.mrf.mxu3  ;;  %v3500_v14 = vadd.f32 %v3499_v45, %v9054_v30  ;;  %10772 = vst [vmem:[#allocation67_spill] sm:$0xff] %v9110_v3  ;;  %v2414_v45 = vld [vmem:[%s7866_s26 + $0xb0] sm:$0xff]  ;;  %v3221_v18 = vadd.f32 %v8866_v31, %v3094_v48  ;;  %vm10647_vm7 = vcmp.eq.s32.totalorder %v9046_v62, 1 }
 0x3b1   : > { %v9079_v52 = vpop.permute.xlu2 %3345  ;;  %v3590_v34 = vadd.f32 %v3589_v40, %v3550_v56  ;;  %10773 = vst [vmem:[#allocation68_spill] sm:$0xff] %v9120_v0  ;;  %v2455_v15 = vadd.f32 %v2414_v45, %v8776_v9  ;;  %v2775_v10 = vadd.f32 %v10774_v1, %v2454_v43  ;;  %v3552_v56 = vmul.f32 %v9110_v3, %v9110_v3  ;;  %v10778_v43 = vld [vmem:[#allocation6_spill] sm:$0xff]  ;;  %v10779_v40 = vld [vmem:[#allocation11_spill] sm:$0xff]  ;;  %v2422_v30 = vld [vmem:[%s7866_s26 + $0xf0] sm:$0xff] }
 0x3b2   : > { %10769 = vst [vmem:[#allocation64_spill] sm:$0xff] %v9079_v52  ;;  %v3501_v13 = vadd.f32 %v3500_v14, %v9067_v2  ;;  %v9125_v58 = vpop.permute.xlu0 %3357  ;;  %v9138_v9 = vsel %vm10649_vm6, %v3219_v6, 0.0  ;;  %v3095_v14 = vadd.f32 %v10778_v43, %v2774_v33  ;;  %v3553_v1 = vmul.f32 %v9120_v0, %v9120_v0  ;;  %v10781_v6 = vld [vmem:[#allocation9_spill] sm:$0xff]  ;;  %v10783_v43 = vld [vmem:[#allocation14_spill] sm:$0xff] }
 0x3b3   : > { %v9087_v49 = vpop.f32.mrf.mxu0  ;;  %10775 = vst [vmem:[#allocation7_spill] sm:$0xff] %v9125_v58  ;;  %v3591_v51 = vadd.f32 %v3590_v34, %v3551_v37  ;;  %v9150_v37 = vsel %vm10640_vm8, %v3220_v50, 0.0  ;;  %v2776_v34 = vadd.f32 %v10781_v6, %v2455_v15  ;;  %v3096_v33 = vadd.f32 %v10782_v4, %v2775_v10  ;;  %v10785_v4 = vld [vmem:[#allocation12_spill] sm:$0xff] }
 0x3b4   : > { %v3502_v25 = vadd.f32 %v3501_v13, %v9093_v20  ;;  %10777 = vst [vmem:[#allocation70_spill] sm:$0xff] %v9138_v9  ;;  %v2456_v13 = vadd.f32 %v2415_v63, %v10779_v40  ;;  %v2457_v63 = vadd.f32 %v2416_v21, %v10783_v43  ;;  %v3554_v48 = vmul.f32 %v9138_v9, %v9138_v9  ;;  %v10786_v21 = vld [vmem:[#allocation17_spill] sm:$0xff]  ;;  %v3894_v43 = vld [vmem:[#allocation3 + $0x10] sm:$0xff] }
 0x3b5   : > { %10780 = vst [vmem:[#allocation6_spill] sm:$0xff] %v9150_v37  ;;  %v3592_v27 = vadd.f32 %v3591_v51, %v3552_v56  ;;  %v3222_v15 = vadd.f32 %v8866_v31, %v3095_v14  ;;  %v2458_v6 = vadd.f32 %v2417_v22, %v10786_v21  ;;  %v3555_v56 = vmul.f32 %v9150_v37, %v9150_v37  ;;  %v10790_v22 = vld [vmem:[#allocation20_spill] sm:$0xff] }
 0x3b6   : > { %v3503_v45 = vadd.f32 %v3502_v25, %v9110_v3  ;;  %v9155_v25 = vpop.permute.xlu1 %3360  ;;  %v2777_v10 = vadd.f32 %v10785_v4, %v2456_v13  ;;  %v9172_v51 = vsel %vm10647_vm7, %v3221_v18, 0.0  ;;  %vm10658_vm8 = vcmp.eq.s32.totalorder %v9079_v52, 1  ;;  %3921 = vmatpush.msra.mxu1 %v3894_v43  ;;  %v10789_v13 = vld [vmem:[#allocation15_spill] sm:$0xff]  ;;  %v10801_v52 = vld [vmem:[#allocation24_spill] sm:$0xff] }
 0x3b7   : > { %v9081_v17 = vpop.f32.mrf.mxu2  ;;  %10784 = vst [vmem:[#allocation11_spill] sm:$0xff] %v9155_v25  ;;  %v3593_v24 = vadd.f32 %v3592_v27, %v3553_v1  ;;  %v3223_v14 = vadd.f32 %v8866_v31, %v3096_v33  ;;  %v2778_v4 = vadd.f32 %v10789_v13, %v2457_v63  ;;  %v2459_v21 = vadd.f32 %v2418_v60, %v10790_v22  ;;  %v2419_v1 = vld [vmem:[%s7866_s26 + $0xd8] sm:$0xff]  ;;  %v10792_v18 = vld [vmem:[#allocation23_spill] sm:$0xff]  ;;  %v10795_v60 = vld [vmem:[#allocation13_spill] sm:$0xff] }
 0x3b8   : > { %v9097_v47 = vpop.f32.mrf.mxu3  ;;  %v3504_v50 = vadd.f32 %v3503_v45, %v9120_v0  ;;  %10787 = vst [vmem:[#allocation9_spill] sm:$0xff] %v9172_v51  ;;  %v10788_v45 = vld [vmem:[#allocation10_spill] sm:$0xff]  ;;  %vm10657_vm7 = vcmp.eq.s32.totalorder %v9073_v19, 1  ;;  %v2460_v20 = vadd.f32 %v2419_v1, %v10792_v18  ;;  %v9192_v33 = vsel %vm10658_vm8, %v3222_v15, 0.0  ;;  %v10798_v15 = vld [vmem:[#allocation16_spill] sm:$0xff] }
 0x3b9   : > { %v9132_v38 = vpop.permute.xlu2 %3354  ;;  %v3097_v0 = vadd.f32 %v10788_v45, %v2776_v34  ;;  %v3594_v62 = vadd.f32 %v3593_v24, %v3554_v48  ;;  %10794 = vst [vmem:[#allocation12_spill] sm:$0xff] %v9192_v33  ;;  %v3098_v63 = vadd.f32 %v10795_v60, %v2777_v10  ;;  %v10796_v45 = vld [vmem:[#allocation18_spill] sm:$0xff]  ;;  %v3556_v48 = vmul.f32 %v9172_v51, %v9172_v51  ;;  %v10799_v10 = vld [vmem:[#allocation21_spill] sm:$0xff] }
 0x3ba   : > { %10776 = vst [vmem:[#allocation69_spill] sm:$0xff] %v9132_v38  ;;  %v9180_v27 = vpop.permute.xlu0 %3366  ;;  %v3505_v3 = vadd.f32 %v3504_v50, %v9138_v9  ;;  %v2779_v13 = vadd.f32 %v10796_v45, %v2458_v6  ;;  %vm10664_vm6 = vcmp.eq.s32.totalorder %v9102_v5, 1  ;;  %v9202_v22 = vsel %vm10657_vm7, %v3223_v14, 0.0  ;;  %v2420_v6 = vld [vmem:[%s7866_s26 + $0xe0] sm:$0xff] }
 0x3bb   : > { %v9157_v40 = vpop.f32.mrf.mxu0  ;;  %10791 = vst [vmem:[#allocation8_spill] sm:$0xff] %v9180_v27  ;;  %v3595_v24 = vadd.f32 %v3594_v62, %v3555_v56  ;;  %v3224_v1 = vadd.f32 %v8866_v31, %v3097_v0  ;;  %v3099_v18 = vadd.f32 %v10798_v15, %v2778_v4  ;;  %v2780_v60 = vadd.f32 %v10799_v10, %v2459_v21  ;;  %v10800_v56 = vld [vmem:[#allocation26_spill] sm:$0xff]  ;;  %v10802_v0 = vld [vmem:[#allocation19_spill] sm:$0xff]  ;;  %v2421_v15 = vld [vmem:[%s7866_s26 + $0xe8] sm:$0xff] }
 0x3bc   : > { %v3506_v50 = vadd.f32 %v3505_v3, %v9150_v37  ;;  %10797 = vst [vmem:[#allocation17_spill] sm:$0xff] %v9202_v22  ;;  %v3557_v62 = vmul.f32 %v9192_v33, %v9192_v33  ;;  %v2461_v45 = vadd.f32 %v2420_v6, %v10800_v56  ;;  %v2781_v37 = vadd.f32 %v10801_v52, %v2460_v20  ;;  %v10806_v56 = vld [vmem:[#allocation27_spill] sm:$0xff] }
 0x3bd   : > { %v3225_v14 = vadd.f32 %v8866_v31, %v3098_v63  ;;  %v3100_v9 = vadd.f32 %v10802_v0, %v2779_v13  ;;  %v3596_v4 = vadd.f32 %v3595_v24, %v3556_v48  ;;  %vm10665_vm7 = vcmp.eq.s32.totalorder %v9132_v38, 1  ;;  %v10804_v63 = vld [vmem:[#allocation22_spill] sm:$0xff] }
 0x3be   : > { %v3507_v3 = vadd.f32 %v3506_v50, %v9172_v51  ;;  %v9214_v19 = vpop.permute.xlu1 %3369  ;;  %v3558_v50 = vmul.f32 %v9202_v22, %v9202_v22  ;;  %v9228_v52 = vsel %vm10664_vm6, %v3224_v1, 0.0  ;;  %v3226_v20 = vadd.f32 %v8866_v31, %v3099_v18  ;;  %v10805_v24 = vld [vmem:[#allocation30_spill] sm:$0xff] }
 0x3bf   : > { %v9134_v26 = vpop.f32.mrf.mxu2  ;;  %10803 = vst [vmem:[#allocation10_spill] sm:$0xff] %v9228_v52  ;;  %v3101_v13 = vadd.f32 %v10804_v63, %v2780_v60  ;;  %v2462_v48 = vadd.f32 %v2421_v15, %v10805_v24  ;;  %v3597_v6 = vadd.f32 %v3596_v4, %v3557_v62  ;;  %vm10671_vm8 = vcmp.eq.s32.totalorder %v9125_v58, 1  ;;  %v10809_v62 = vld [vmem:[#allocation36_spill] sm:$0xff]  ;;  %v2423_v15 = vld [vmem:[%s7866_s26 + $0xf8] sm:$0xff]  ;;  %v10814_v58 = vld [vmem:[#allocation37_spill] sm:$0xff] }
 0x3c0   : > { %v9162_v61 = vpop.f32.mrf.mxu3  ;;  %v3508_v21 = vadd.f32 %v3507_v3, %v9192_v33  ;;  %v2782_v0 = vadd.f32 %v10806_v56, %v2461_v45  ;;  %v10807_v33 = vld [vmem:[#allocation25_spill] sm:$0xff]  ;;  %v9244_v18 = vsel %vm10665_vm7, %v3225_v14, 0.0  ;;  %v3227_v60 = vadd.f32 %v8866_v31, %v3100_v9  ;;  %v10812_v9 = vld [vmem:[#allocation32_spill] sm:$0xff] }
 0x3c1   : > { %v9186_v43 = vpop.permute.xlu2 %3363  ;;  %v3102_v51 = vadd.f32 %v10807_v33, %v2781_v37  ;;  %10808 = vst [vmem:[#allocation15_spill] sm:$0xff] %v9244_v18  ;;  %v2463_v4 = vadd.f32 %v2422_v30, %v10809_v62  ;;  %v3598_v63 = vadd.f32 %v3597_v6, %v3558_v50  ;;  %v3559_v45 = vmul.f32 %v9228_v52, %v9228_v52  ;;  %v10811_v33 = vld [vmem:[#allocation42_spill] sm:$0xff]  ;;  %v10813_v56 = vld [vmem:[#allocation28_spill] sm:$0xff] }
 0x3c2   : > { %10793 = vst [vmem:[#allocation14_spill] sm:$0xff] %v9186_v43  ;;  %v3509_v1 = vadd.f32 %v3508_v21, %v9202_v22  ;;  %vm3432_vm6 = vcmp.eq.s32.totalorder %v9155_v25, 1  ;;  %v9252_v37 = vpop.permute.xlu0 %3375  ;;  %v2464_v21 = vadd.f32 %v2423_v15, %v10811_v33  ;;  %v9257_v14 = vsel %vm10671_vm8, %v3226_v20, 0.0  ;;  %v2424_v15 = vld [vmem:[%s7866_s26 + $0x100] sm:$0xff] }
 0x3c3   : > { %v9217_v2 = vpop.f32.mrf.mxu0  ;;  %10810 = vst [vmem:[#allocation20_spill] sm:$0xff] %v9252_v37  ;;  %vm10682_vm7 = vcmp.eq.s32.totalorder %v9180_v27, 1  ;;  %v3228_v30 = vadd.f32 %v8866_v31, %v3101_v13  ;;  %v2783_v50 = vadd.f32 %v10812_v9, %v2462_v48  ;;  %v3560_v24 = vmul.f32 %v9244_v18, %v9244_v18 }
 0x3c4   : > { %vm10683_vm5 = vcmp.eq.s32.totalorder %v9186_v43, 1  ;;  %v3229_v6 = vadd.f32 %v8866_v31, %v3102_v51  ;;  %v3103_v62 = vadd.f32 %v10813_v56, %v2782_v0  ;;  %v3510_v20 = vadd.f32 %v3509_v1, %v9228_v52  ;;  %v10815_v51 = vld [vmem:[#allocation43_spill] sm:$0xff]  ;;  %v2425_v56 = vld [vmem:[%s7866_s26 + $0x108] sm:$0xff]  ;;  %v10820_v52 = vld [vmem:[#allocation45_spill] sm:$0xff] }
 0x3c5   : > { %v9271_v33 = vsel %vm3432_vm6, %v3227_v60, 0.0  ;;  %v2784_v13 = vadd.f32 %v10814_v58, %v2463_v4  ;;  %v2465_v48 = vadd.f32 %v2424_v15, %v8874_v8  ;;  %v3599_v9 = vadd.f32 %v3598_v63, %v3559_v45  ;;  %v10817_v8 = vld [vmem:[#allocation33_spill] sm:$0xff]  ;;  %v2432_v43 = vld [vmem:[%s7866_s26 + $0x140] sm:$0xf] }
 0x3c6   : > { %v3561_v38 = vmul.f32 %v9257_v14, %v9257_v14  ;;  %vm10684_vm8 = vcmp.eq.s32.totalorder %v9214_v19, 1  ;;  %v2785_v0 = vadd.f32 %v10815_v51, %v2464_v21  ;;  %v3511_v1 = vadd.f32 %v3510_v20, %v9244_v18  ;;  %v9281_v25 = vpop.permute.xlu1 %3378  ;;  %v2426_v51 = vld [vmem:[%s7866_s26 + $0x110] sm:$0xff] }
 0x3c7   : > { %v9188_v34 = vpop.f32.mrf.mxu2  ;;  %10816 = vst [vmem:[#allocation23_spill] sm:$0xff] %v9281_v25  ;;  %v9285_v58 = vsel %vm10683_vm5, %v3228_v30, 0.0  ;;  %v3104_v60 = vadd.f32 %v10817_v8, %v2783_v50  ;;  %v2466_v4 = vadd.f32 %v2425_v56, %v8918_v29  ;;  %v3600_v45 = vadd.f32 %v3599_v9, %v3560_v24  ;;  %v10818_v29 = vld [vmem:[#allocation39_spill] sm:$0xff] }
 0x3c8   : > { %v9224_v10 = vpop.f32.mrf.mxu3  ;;  %v3562_v15 = vmul.f32 %v9271_v33, %v9271_v33  ;;  %v9295_v21 = vsel %vm10682_vm7, %v3229_v6, 0.0  ;;  %v3230_v20 = vadd.f32 %v8866_v31, %v3103_v62  ;;  %v3105_v56 = vadd.f32 %v10818_v29, %v2784_v13 }
 0x3c9   : > { %v9234_v3 = vpop.permute.xlu2 %3372  ;;  %v2786_v24 = vadd.f32 %v8879_v59, %v2465_v48  ;;  %v2467_v9 = vadd.f32 %v2426_v51, %v8973_v53  ;;  %v3512_v27 = vadd.f32 %v3511_v1, %v9257_v14  ;;  %v3601_v6 = vadd.f32 %v3600_v45, %v3561_v38  ;;  %v2429_v51 = vld [vmem:[%s7866_s26 + $0x128] sm:$0xff] }
 0x3ca   : > { %v3563_v62 = vmul.f32 %v9285_v58, %v9285_v58  ;;  %v3106_v22 = vadd.f32 %v10820_v52, %v2785_v0  ;;  %vm10697_vm7 = vcmp.eq.s32.totalorder %v9234_v3, 1  ;;  %v3231_v13 = vadd.f32 %v8866_v31, %v3104_v60  ;;  %v9318_v48 = vpop.permute.xlu0 %3384  ;;  %v2428_v0 = vld [vmem:[%s7866_s26 + $0x120] sm:$0xff] }
 0x3cb   : > { %v9289_v63 = vpop.f32.mrf.mxu0  ;;  %v2787_v59 = vadd.f32 %v8927_v7, %v2466_v4  ;;  %v2468_v53 = vadd.f32 %v2427_v16, %v9023_v42  ;;  %v3513_v38 = vadd.f32 %v3512_v27, %v9271_v33  ;;  %10821 = vst [vmem:[#allocation18_spill] sm:$0xff] %v9318_v48  ;;  %v3564_v1 = vmul.f32 %v9295_v21, %v9295_v21  ;;  %v10822_v7 = vld [vmem:[#allocation49_spill] sm:$0xff] }
 0x3cc   : > { %v9324_v52 = vsel %vm10684_vm8, %v3230_v20, 0.0  ;;  %v3232_v60 = vadd.f32 %v8866_v31, %v3105_v56  ;;  %v3107_v4 = vadd.f32 %v10822_v7, %v2786_v24  ;;  %v2788_v42 = vadd.f32 %v8982_v55, %v2467_v9 }
 0x3cd   : > { %v2469_v16 = vadd.f32 %v2428_v0, %v9081_v17  ;;  %vm10685_vm5 = vcmp.eq.s32.totalorder %v9252_v37, 1  ;;  %v3514_v27 = vadd.f32 %v3513_v38, %v9285_v58  ;;  %v9337_v20 = vsel %vm10697_vm7, %v3231_v13, 0.0  ;;  %v2431_v0 = vld [vmem:[%s7866_s26 + $0x138] sm:$0xff] }
 0x3ce   : > { %v2789_v29 = vadd.f32 %v9033_v28, %v2468_v53  ;;  %v2470_v55 = vadd.f32 %v2429_v51, %v9134_v26  ;;  %vm10686_vm8 = vcmp.eq.s32.totalorder %v9281_v25, 1  ;;  %v9346_v9 = vpop.permute.xlu1 %3387  ;;  %v3234_v28 = vadd.f32 %v8866_v31, %v3107_v4 }
 0x3cf   : > { %v9239_v5 = vpop.f32.mrf.mxu2  ;;  %v3515_v17 = vadd.f32 %v3514_v27, %v9295_v21  ;;  %10823 = vst [vmem:[#allocation16_spill] sm:$0xff] %v9346_v9  ;;  %v3109_v26 = vadd.f32 %v9016_v39, %v2788_v42  ;;  %v3566_v13 = vmul.f32 %v9337_v20, %v9337_v20 }
 0x3d0   : > { %v9300_v50 = vpop.f32.mrf.mxu3  ;;  %v3110_v39 = vadd.f32 %v9087_v49, %v2789_v29 }
 0x3d1   : > { %v9308_v18 = vpop.permute.xlu2 %3381 }
 0x3d2   : > { %10819 = vst [vmem:[#allocation13_spill] sm:$0xff] %v9308_v18 }
 0x3d7   : > { %v2389_v30 = vpop.f32.mrf.mxu2 }
 0x3d8   : > { %v2473_v8 = vadd.f32 %v2432_v43, %v2389_v30  ;;  %v3602_v43 = vadd.f32 %v3601_v6, %v3562_v15  ;;  %v3233_v15 = vadd.f32 %v8866_v31, %v3106_v22  ;;  %v3108_v30 = vadd.f32 %v8954_v11, %v2787_v59  ;;  %v2710_v24 = vpop.f32.mrf.mxu3  ;;  %v2430_v6 = vld [vmem:[%s7866_s26 + $0x130] sm:$0xff] }
 0x3d9   : > { %v3565_v22 = vmul.f32 %v9324_v52, %v9324_v52  ;;  %v9350_v11 = vsel %vm10685_vm5, %v3232_v60, 0.0  ;;  %v2471_v53 = vadd.f32 %v2430_v6, %v9188_v34  ;;  %vm10687_vm5 = vcmp.eq.s32.totalorder %v9308_v18, 1  ;;  %v9370_v4 = vpop.permute.xlu2 %3390 }
 0x3da   : > { %2514 = vst [vmem:[%s7866_s26 + $0x140] sm:$0xf] %v2473_v8  ;;  %v3603_v45 = vadd.f32 %v3602_v43, %v3563_v62  ;;  %v2790_v8 = vadd.f32 %v9097_v47, %v2469_v16  ;;  %v3516_v62 = vadd.f32 %v3515_v17, %v9324_v52  ;;  %v9361_v59 = vsel %vm10686_vm8, %v3233_v15, 0.0  ;;  %v3028_v43 = vpop.f32.mrf.mxu0 }
 0x3db   : > { %v2791_v47 = vadd.f32 %v9162_v61, %v2470_v55  ;;  %10824 = vst [vmem:[#allocation21_spill] sm:$0xff] %v9370_v4  ;;  %v3567_v42 = vmul.f32 %v9350_v11, %v9350_v11  ;;  %v2472_v34 = vadd.f32 %v2431_v0, %v9239_v5  ;;  %v9378_v27 = vsel %vm10687_vm5, %v3234_v28, 0.0 }
 0x3dc   : > { %v3604_v56 = vadd.f32 %v3603_v45, %v3564_v1  ;;  %v3235_v1 = vadd.f32 %v8866_v31, %v3108_v30  ;;  %v3517_v16 = vadd.f32 %v3516_v62, %v9337_v20  ;;  %v3236_v61 = vadd.f32 %v8866_v31, %v3109_v26  ;;  %v9384_v45 = vpop.permute.xlu0 %3393  ;;  %v9410_v62 = vpop.permute.xlu1 %3396 }
 0x3dd   : > { %v3111_v49 = vadd.f32 %v9157_v40, %v2790_v8  ;;  %vm10688_vm8 = vcmp.eq.s32.totalorder %v9318_v48, 1  ;;  %10825 = vst [vmem:[#allocation26_spill] sm:$0xff] %v9384_v45  ;;  %v3568_v51 = vmul.f32 %v9361_v59, %v9361_v59  ;;  %v2792_v5 = vadd.f32 %v9224_v10, %v2471_v53 }
 0x3de   : > { %v3605_v7 = vadd.f32 %v3604_v56, %v3565_v22  ;;  %v3518_v30 = vadd.f32 %v3517_v16, %v9350_v11  ;;  %v9392_v29 = vsel %vm10688_vm8, %v3235_v1, 0.0  ;;  %v3237_v55 = vadd.f32 %v8866_v31, %v3110_v39  ;;  %10826 = vst [vmem:[#allocation24_spill] sm:$0xff] %v9410_v62 }
 0x3df   : > { %v3112_v40 = vadd.f32 %v9217_v2, %v2791_v47  ;;  %vm10689_vm5 = vcmp.eq.s32.totalorder %v9346_v9, 1  ;;  %v3569_v56 = vmul.f32 %v9378_v27, %v9378_v27  ;;  %v2793_v22 = vadd.f32 %v9300_v50, %v2472_v34 }
 0x3e0   : > { %v3606_v15 = vadd.f32 %v3605_v7, %v3566_v13  ;;  %v3519_v10 = vadd.f32 %v3518_v30, %v9361_v59  ;;  %v3238_v28 = vadd.f32 %v8866_v31, %v3111_v49  ;;  %vm10690_vm8 = vcmp.eq.s32.totalorder %v9370_v4, 1 }
 0x3e1   : > { %v2753_v38 = vld [vmem:[%s7866_s26 + $0x140] sm:$0xf]  ;;  %v3570_v26 = vmul.f32 %v9392_v29, %v9392_v29  ;;  %v3113_v8 = vadd.f32 %v9289_v63, %v2792_v5  ;;  %v9415_v13 = vsel %vm10690_vm8, %v3237_v55, 0.0  ;;  %v3239_v53 = vadd.f32 %v8866_v31, %v3112_v40  ;;  %v9428_v7 = vpop.permute.xlu2 %3399 }
 0x3e2   : > { %v2794_v60 = vadd.f32 %v2753_v38, %v2710_v24  ;;  %v3607_v17 = vadd.f32 %v3606_v15, %v3567_v42  ;;  %v9403_v24 = vsel %vm10689_vm5, %v3236_v61, 0.0  ;;  %v3031_v6 = vpop.f32.mrf.mxu0  ;;  %v3520_v50 = vadd.f32 %v3519_v10, %v9378_v27  ;;  %10827 = vst [vmem:[#allocation19_spill] sm:$0xff] %v9428_v7 }
 0x3e3   : > { %vm10691_vm5 = vcmp.eq.s32.totalorder %v9384_v45, 1  ;;  %v3571_v1 = vmul.f32 %v9403_v24, %v9403_v24  ;;  %v3114_v39 = vadd.f32 %v3028_v43, %v2793_v22  ;;  %vm10692_vm8 = vcmp.eq.s32.totalorder %v9410_v62, 1 }
 0x3e4   : > { %2835 = vst [vmem:[%s7866_s26 + $0x140] sm:$0xf] %v2794_v60  ;;  %v3608_v2 = vadd.f32 %v3607_v17, %v3568_v51  ;;  %v3521_v47 = vadd.f32 %v3520_v50, %v9392_v29  ;;  %v9425_v0 = vsel %vm10691_vm5, %v3238_v28, 0.0  ;;  %v3572_v34 = vmul.f32 %v9415_v13, %v9415_v13  ;;  %v9439_v49 = vpop.permute.xlu0 %3402  ;;  %v9458_v28 = vpop.permute.xlu1 %3405 }
 0x3e5   : > { %v3240_v16 = vadd.f32 %v8866_v31, %v3113_v8  ;;  %v9436_v61 = vsel %vm10692_vm8, %v3239_v53, 0.0  ;;  %10828 = vst [vmem:[#allocation22_spill] sm:$0xff] %v9439_v49  ;;  %v3573_v51 = vmul.f32 %v9425_v0, %v9425_v0  ;;  %v3241_v5 = vadd.f32 %v8866_v31, %v3114_v39 }
 0x3e6   : > { %v3609_v38 = vadd.f32 %v3608_v2, %v3569_v56  ;;  %v3522_v43 = vadd.f32 %v3521_v47, %v9403_v24  ;;  %vm10693_vm5 = vcmp.eq.s32.totalorder %v9428_v7, 1  ;;  %v3574_v40 = vmul.f32 %v9436_v61, %v9436_v61  ;;  %10829 = vst [vmem:[#allocation30_spill] sm:$0xff] %v9458_v28 }
 0x3e7   : > { %v9450_v17 = vsel %vm10693_vm5, %v3240_v16, 0.0  ;;  %vm10694_vm8 = vcmp.eq.s32.totalorder %v9439_v49, 1  ;;  %vm10695_vm5 = vcmask 1043456   ;;  %v4146_v16 = vld [vmem:[#allocation3 + $0xf8] sm:$0xff] }
 0x3e8   : > { %v3610_v42 = vadd.f32 %v3609_v38, %v3570_v26  ;;  %v3523_v30 = vadd.f32 %v3522_v43, %v9415_v13  ;;  %v9456_v10 = vsel %vm10694_vm8, %v3241_v5, 0.0  ;;  %v3575_v26 = vmul.f32 %v9450_v17, %v9450_v17  ;;  %4147 = vmatpush.msrb.mxu2 %v4146_v16  ;;  %v4467_v5 = vld [vmem:[#allocation3 + $0x178] sm:$0xff]  ;;  %v4140_v16 = vld [vmem:[#allocation3 + $0xc8] sm:$0xff] }
 0x3e9   : > { %v3576_v53 = vmul.f32 %v9456_v10, %v9456_v10  ;;  %vm10696_vm8 = vcmp.eq.s32.totalorder %v9458_v28, 1  ;;  %4468 = vmatpush.msrb.mxu3 %v4467_v5  ;;  %v4461_v5 = vld [vmem:[#allocation3 + $0x148] sm:$0xff] }
 0x3ea   : > { %v3611_v15 = vadd.f32 %v3610_v42, %v3571_v1  ;;  %v3524_v56 = vadd.f32 %v3523_v30, %v9425_v0 }
 0x3eb   : > { %v3074_v63 = vld [vmem:[%s7866_s26 + $0x140] sm:$0xf] }
 0x3ec   : > { %v3115_v60 = vadd.f32 %v3074_v63, %v3031_v6  ;;  %v3612_v55 = vadd.f32 %v3611_v15, %v3572_v34  ;;  %v3525_v2 = vadd.f32 %v3524_v56, %v9436_v61  ;;  %v4466_v56 = vld [vmem:[#allocation3 + $0x170] sm:$0xff] }
 0x3ed   : > { %4469 = vmatpush.msrb.mxu3 %v4466_v56  ;;  %v4460_v56 = vld [vmem:[#allocation3 + $0x140] sm:$0xff] }
 0x3ee   : > { %3156 = vst [vmem:[%s7866_s26 + $0x140] sm:$0xf] %v3115_v60  ;;  %v3613_v22 = vadd.f32 %v3612_v55, %v3573_v51  ;;  %v3526_v50 = vadd.f32 %v3525_v2, %v9450_v17  ;;  %v4145_v51 = vld [vmem:[#allocation3 + $0xf0] sm:$0xff] }
 0x3ef   : > { %4148 = vmatpush.msrb.mxu2 %v4145_v51  ;;  %v4139_v51 = vld [vmem:[#allocation3 + $0xc0] sm:$0xff] }
 0x3f0   : > { %v3614_v8 = vadd.f32 %v3613_v22, %v3574_v40  ;;  %v3527_v39 = vadd.f32 %v3526_v50, %v9456_v10  ;;  %v4144_v40 = vld [vmem:[#allocation3 + $0xe8] sm:$0xff] }
 0x3f1   : > { %4149 = vmatpush.msrb.mxu2 %v4144_v40  ;;  %v4138_v40 = vld [vmem:[#allocation3 + $0xb8] sm:$0xff] }
 0x3f2   : > { %v3615_v1 = vadd.f32 %v3614_v8, %v3575_v26  ;;  %v4143_v26 = vld [vmem:[#allocation3 + $0xe0] sm:$0xff]  ;;  %v4465_v8 = vld [vmem:[#allocation3 + $0x168] sm:$0xff] }
 0x3f3   : > { %4150 = vmatpush.msrb.mxu2 %v4143_v26  ;;  %4470 = vmatpush.msrb.mxu3 %v4465_v8  ;;  %v4459_v26 = vld [vmem:[#allocation3 + $0x138] sm:$0xff] }
 0x3f4   : > { %v3616_v42 = vadd.f32 %v3615_v1, %v3576_v53  ;;  %v4142_v53 = vld [vmem:[#allocation3 + $0xd8] sm:$0xff] }
 0x3f5   : > { %v3197_v6 = vld [vmem:[%s7866_s26 + $0x140] sm:$0xf]  ;;  %4151 = vmatpush.msrb.mxu2 %v4142_v53  ;;  %v4135_v53 = vld [vmem:[#allocation3 + $0xa0] sm:$0xff] }
 0x3f6   : > { %v3242_v38 = vadd.f32 %v8866_v31, %v3197_v6 }
 0x3f8   : > { %v9472_v63 = vsel %vm10696_vm8, %v3242_v38, 0.0  ;;  %v4464_v38 = vld [vmem:[#allocation3 + $0x160] sm:$0xff] }
 0x3f9   : > { %v3529_v47 = vsel %vm10695_vm5, %v9472_v63, 0.0  ;;  %v3577_v60 = vmul.f32 %v9472_v63, %v9472_v63  ;;  %4471 = vmatpush.msrb.mxu3 %v4464_v38  ;;  %v4788_v38 = vld [vmem:[#allocation3 + $0x1f8] sm:$0xff] }
 0x3fa   : > { %v3530_v34 = vadd.f32 %v3529_v47, %v3527_v39  ;;  %v4141_v47 = vld [vmem:[#allocation3 + $0xd0] sm:$0xff]  ;;  %4789 = vmatpush.msrb.mxu0 %v4788_v38 }
 0x3fb   : > { %v3617_v31 = vsel %vm10695_vm5, %v3577_v60, 0.0  ;;  %v4463_v60 = vld [vmem:[#allocation3 + $0x158] sm:$0xff]  ;;  %4152 = vmatpush.msrb.mxu2 %v4141_v47  ;;  %v4787_v47 = vld [vmem:[#allocation3 + $0x1f0] sm:$0xff] }
 0x3fc   : > { %v3531_v43 = vrot.slane %v3530_v34, 4  ;;  %v3618_v15 = vadd.f32 %v3617_v31, %v3616_v42  ;;  %4472 = vmatpush.msrb.mxu3 %v4463_v60  ;;  %v4462_v31 = vld [vmem:[#allocation3 + $0x150] sm:$0xff]  ;;  %v7457_v60 = vmov 0.0   ;;  %4790 = vmatpush.msrb.mxu0 %v4787_v47 }
 0x3fd   : > { %4153 = vmatpush.msrb.mxu2 %v4140_v16  ;;  %3804 = vst [vmem:[#allocation2] sm:$0xff] %v7457_v60  ;;  %v4786_v16 = vld [vmem:[#allocation3 + $0x1e8] sm:$0xff] }
 0x3fe   : > { %v3532_v30 = vadd.f32 %v3531_v43, %v3530_v34  ;;  %v3619_v55 = vrot.slane %v3618_v15, 4  ;;  %4473 = vmatpush.msrb.mxu3 %v4462_v31  ;;  %3805 = vst [vmem:[#allocation2 + $0x8] sm:$0xff] %v7457_v60  ;;  %v4455_v31 = vld [vmem:[#allocation3 + $0x118] sm:$0xff]  ;;  %4791 = vmatpush.msrb.mxu0 %v4786_v16 }
 0x3ff   : > { %4154 = vmatpush.msrb.mxu2 %v4139_v51  ;;  %3806 = vst [vmem:[#allocation2 + $0x10] sm:$0xff] %v7457_v60  ;;  %v4132_v51 = vld [vmem:[#allocation3 + $0x88] sm:$0xff] }
 0x400   : > { %v3533_v22 = vrot.slane %v3532_v30, 2  ;;  %v3620_v2 = vadd.f32 %v3619_v55, %v3618_v15  ;;  %4474 = vmatpush.msrb.mxu3 %v4461_v5  ;;  %3807 = vst [vmem:[#allocation2 + $0x15c] sm:$0xff] %v7457_v60  ;;  %v4785_v5 = vld [vmem:[#allocation3 + $0x1e0] sm:$0xff] }
 0x401   : > { %4155 = vmatpush.msrb.mxu2 %v4138_v40  ;;  %3808 = vst [vmem:[#allocation2 + $0x164] sm:$0xff] %v7457_v60  ;;  %4792 = vmatpush.msrb.mxu0 %v4785_v5  ;;  %v4131_v40 = vld [vmem:[#allocation3 + $0x80] sm:$0xff]  ;;  %v4779_v5 = vld [vmem:[#allocation3 + $0x1b0] sm:$0xff] }
 0x402   : > { %v3534_v6 = vadd.f32 %v3533_v22, %v3532_v30  ;;  %v3621_v50 = vrot.slane %v3620_v2, 2  ;;  %4475 = vmatpush.msrb.mxu3 %v4460_v56  ;;  %3809 = vst [vmem:[#allocation2 + $0x16c] sm:$0xff] %v7457_v60  ;;  %v4784_v56 = vld [vmem:[#allocation3 + $0x1d8] sm:$0xff]  ;;  %v3892_v60 = vld [vmem:[#allocation3] sm:$0xff] }
 0x403   : > { %4793 = vmatpush.msrb.mxu0 %v4784_v56 }
 0x404   : > { %v3535_v1 = vrot.slane %v3534_v6, 1  ;;  %v3622_v39 = vadd.f32 %v3621_v50, %v3620_v2  ;;  %v4137_v2 = vld [vmem:[#allocation3 + $0xb0] sm:$0xff]  ;;  %4476 = vmatpush.msrb.mxu3 %v4459_v26 }
 0x405   : > { %4156 = vmatpush.msrb.mxu2 %v4137_v2  ;;  %v4458_v50 = vld [vmem:[#allocation3 + $0x130] sm:$0xff]  ;;  %v4453_v2 = vld [vmem:[#allocation3 + $0x108] sm:$0xff] }
 0x406   : > { %v3536_v42 = vadd.f32 %v3535_v1, %v3534_v6  ;;  %v3623_v34 = vrot.slane %v3622_v39, 1  ;;  %v4136_v6 = vld [vmem:[#allocation3 + $0xa8] sm:$0xff]  ;;  %4477 = vmatpush.msrb.mxu3 %v4458_v50  ;;  %v4452_v50 = vld [vmem:[#allocation3 + $0x100] sm:$0xff] }
 0x407   : > { %4157 = vmatpush.msrb.mxu2 %v4136_v6  ;;  %v4457_v1 = vld [vmem:[#allocation3 + $0x128] sm:$0xff]  ;;  %v4783_v6 = vld [vmem:[#allocation3 + $0x1d0] sm:$0xff] }
 0x408   : > { %v3624_v43 = vadd.f32 %v3623_v34, %v3622_v39  ;;  %v9479_v15 = vmul.f32 0.00390625, %v3536_v42  ;;  %v4134_v39 = vld [vmem:[#allocation3 + $0x98] sm:$0xff]  ;;  %4478 = vmatpush.msrb.mxu3 %v4457_v1  ;;  %v4456_v42 = vld [vmem:[#allocation3 + $0x120] sm:$0xff]  ;;  %v4133_v34 = vld [vmem:[#allocation3 + $0x90] sm:$0xff]  ;;  %4794 = vmatpush.msrb.mxu0 %v4783_v6 }
 0x409   : > { %4158 = vmatpush.msrb.mxu2 %v4135_v53  ;;  %v4089_v26 = vld [vmem:[#allocation2 + $0x6] sm:$0xff]  ;;  %v4777_v6 = vld [vmem:[#allocation3 + $0x1a0] sm:$0xff] }
 0x40a   : > { %v3626_v30 = vmul.f32 0.00390625, %v3624_v43  ;;  %v3627_v55 = vmul.f32 %v9479_v15, %v9479_v15  ;;  %4479 = vmatpush.msrb.mxu3 %v4456_v42  ;;  %v4410_v38 = vld [vmem:[#allocation2 + $0x7] sm:$0xff]  ;;  %v4781_v42 = vld [vmem:[#allocation3 + $0x1c0] sm:$0xff]  ;;  %v3629_v56 = vsub.f32 %v8902_v57, %v9479_v15  ;;  %v3634_v57 = vsub.f32 %v8951_v23, %v9479_v15 }
 0x40b   : > { %4159 = vmatpush.msrb.mxu2 %v4134_v39  ;;  %v3893_v1 = vld [vmem:[#allocation3 + $0x8] sm:$0xff]  ;;  %v3637_v23 = vsub.f32 %v8998_v54, %v9479_v15 }
 0x40c   : > { %v3628_v22 = vsub.f32 %v3626_v30, %v3627_v55  ;;  %4480 = vmatpush.msrb.mxu3 %v4455_v31  ;;  %v4454_v30 = vld [vmem:[#allocation3 + $0x110] sm:$0xff]  ;;  %v4782_v39 = vld [vmem:[#allocation3 + $0x1c8] sm:$0xff]  ;;  %3922 = vmatpush.msra.mxu1 %v3893_v1  ;;  %v4780_v31 = vld [vmem:[#allocation3 + $0x1b8] sm:$0xff] }
 0x40d   : > { %4160 = vmatpush.msrb.mxu2 %v4133_v34  ;;  %4795 = vmatpush.msrb.mxu0 %v4782_v39  ;;  %v3851_v34 = vld [vmem:[#allocation2 + $0x5] sm:$0xff]  ;;  %v4776_v39 = vld [vmem:[#allocation3 + $0x198] sm:$0xff] }
 0x40e   : > { %v9483_v8 = vadd.f32 1e-05, %v3628_v22  ;;  %4481 = vmatpush.msrb.mxu3 %v4454_v30  ;;  %3923 = vmatpush.msra.mxu1 %v3892_v60  ;;  %v4775_v60 = vld [vmem:[#allocation3 + $0x190] sm:$0xff] }
 0x40f   : > { %4161 = vmatpush.msrb.mxu2 %v4132_v51  ;;  %4796 = vmatpush.msrb.mxu0 %v4781_v42  ;;  %v4090_v51 = vld [vmem:[#allocation2 + $0xe] sm:$0xff]  ;;  %v3636_v42 = vsub.f32 %v8977_v44, %v9479_v15  ;;  %v3639_v44 = vsub.f32 %v9029_v41, %v9479_v15 }
 0x410   : > { %7407 = vrsqrt.f32 %v9483_v8  ;;  %4482 = vmatpush.msrb.mxu3 %v4453_v2  ;;  %3924 = vmatmul.f32.vlgmr.msra.gmra.mxu1 %v3851_v34  ;;  %vm3677_vm8 = vweird.f32 %v9483_v8 }
 0x411   : > { %4162 = vmatpush.msrb.mxu2 %v4131_v40  ;;  %4797 = vmatpush.msrb.mxu0 %v4780_v31  ;;  %v4411_v40 = vld [vmem:[#allocation2 + $0xf] sm:$0xff]  ;;  %v3638_v31 = vsub.f32 %v9006_v35, %v9479_v15 }
 0x412   : > { %4163 = vmatmul.f32.vlgmr.msrb.gmra.mxu2 %v4089_v26  ;;  %4483 = vmatpush.msrb.mxu3 %v4452_v50  ;;  %v3631_v26 = vsub.f32 %v8906_v32, %v9479_v15 }
 0x413   : > { %4484 = vmatmul.f32.vlgmr.msrb.gmra.mxu3 %v4410_v38  ;;  %4798 = vmatpush.msrb.mxu0 %v4779_v5  ;;  %v3852_v38 = vld [vmem:[#allocation2 + $0xd] sm:$0xff] }
 0x416   : > { %v7408_v43 = vpop.eup %7407 }
 0x417   : > { %v3672_v55 = vmul.f32 %v7408_v43, %v9483_v8  ;;  %vm3678_vm5 = vweird.f32 %v7408_v43  ;;  %v3632_v8 = vsub.f32 %v8922_v12, %v9479_v15  ;;  %v5109_v12 = vld [vmem:[#allocation3 + $0x278] sm:$0xff] }
 0x418   : > { %vm3679_vm7 = vmor %vm3677_vm8, %vm3678_vm5  ;;  %3927 = vmatmul.f32.gmra.mxu1 %v3852_v38 }
 0x419   : > { %v3673_v22 = vmul.f32 %v7408_v43, %v3672_v55  ;;  %v4778_v55 = vld [vmem:[#allocation3 + $0x1a8] sm:$0xff]  ;;  %5110 = vmatpush.msrb.mxu1 %v5109_v12 }
 0x41a   : > { %4166 = vmatmul.f32.gmra.mxu2 %v4090_v51  ;;  %4799 = vmatpush.msrb.mxu0 %v4778_v55 }
 0x41b   : > { %v3674_v53 = vmul.f32 0.5, %v3673_v22  ;;  %v10830_v22 = vld [vmem:[#allocation50_spill] sm:$0xff]  ;;  %4487 = vmatmul.f32.gmra.mxu3 %v4411_v40 }
 0x41c   : > { %v3630_v2 = vsub.f32 %v10830_v22, %v9479_v15  ;;  %4800 = vmatpush.msrb.mxu0 %v4777_v6 }
 0x41d   : > { %v3675_v47 = vsub.f32 1.5, %v3674_v53 }
 0x41e   : > { %4801 = vmatpush.msrb.mxu0 %v4776_v39 }
 0x41f   : > { %v3676_v16 = vmul.f32 %v7408_v43, %v3675_v47 }
 0x420   : > { %4802 = vmatpush.msrb.mxu0 %v4775_v60 }
 0x421   : > { %v9488_v30 = vsel %vm3679_vm7, %v7408_v43, %v3676_v16  ;;  %v3633_v43 = vsub.f32 %v8938_v46, %v9479_v15  ;;  %v3635_v46 = vsub.f32 %v8963_v36, %v9479_v15  ;;  %v5108_v16 = vld [vmem:[#allocation3 + $0x270] sm:$0xff] }
 0x422   : > { %v3681_v50 = vmul.f32 %v9488_v30, %v3629_v56  ;;  %v3682_v53 = vmul.f32 %v9488_v30, %v3630_v2  ;;  %v3683_v1 = vmul.f32 %v9488_v30, %v3631_v26  ;;  %v3684_v32 = vmul.f32 %v9488_v30, %v3632_v8  ;;  %v4774_v56 = vld [vmem:[#allocation3 + $0x188] sm:$0xff]  ;;  %5111 = vmatpush.msrb.mxu1 %v5108_v16 }
 0x423   : > { %v3685_v47 = vmul.f32 %v9488_v30, %v3633_v43  ;;  %v3686_v34 = vmul.f32 %v9488_v30, %v3634_v57  ;;  %v3687_v51 = vmul.f32 %v9488_v30, %v3635_v46  ;;  %v3688_v54 = vmul.f32 %v9488_v30, %v3636_v42  ;;  %v10835_v8 = vld [vmem:[#allocation59_spill] sm:$0xff]  ;;  %v10836_v43 = vld [vmem:[#allocation61_spill] sm:$0xff]  ;;  %v4773_v57 = vld [vmem:[#allocation3 + $0x180] sm:$0xff]  ;;  %4803 = vmatpush.msrb.mxu0 %v4774_v56 }
 0x424   : > { %v3722_v5 = vsel %vm3407_vm10, %v3681_v50, 0.0  ;;  %v3723_v40 = vsel %vm3408_vm9, %v3682_v53, 0.0  ;;  %v3724_v2 = vsel %vm3409_vm11, %v3683_v1, 0.0  ;;  %v3725_v35 = vsel %vm3410_vm12, %v3684_v32, 0.0 }
 0x425   : > { %v3640_v6 = vsub.f32 %v10835_v8, %v9479_v15  ;;  %v3641_v50 = vsub.f32 %v10836_v43, %v9479_v15  ;;  %v3689_v53 = vmul.f32 %v9488_v30, %v3637_v23  ;;  %v3726_v41 = vsel %vm3411_vm13, %v3685_v47, 0.0  ;;  %v10840_v23 = vld [vmem:[#allocation62_spill] sm:$0xff]  ;;  %4804 = vmatpush.msrb.mxu0 %v4773_v57 }
 0x426   : > { %v3690_v12 = vmul.f32 %v9488_v30, %v3638_v31  ;;  %v3727_v1 = vsel %vm3412_vm14, %v3686_v34, 0.0  ;;  %v3763_v46 = vmax.f32 %v3722_v5, 0.0  ;;  %v3764_v32 = vmax.f32 %v3723_v40, 0.0  ;;  %v10842_v34 = vld [vmem:[#allocation65_spill] sm:$0xff] }
 0x427   : > { %v3691_v60 = vmul.f32 %v9488_v30, %v3639_v44  ;;  %v3728_v16 = vsel %vm3413_vm15, %v3687_v51, 0.0  ;;  %v3765_v8 = vmax.f32 %v3724_v2, 0.0  ;;  %v3766_v43 = vmax.f32 %v3725_v35, 0.0  ;;  %v5107_v2 = vld [vmem:[#allocation3 + $0x268] sm:$0xff] }
 0x428   : > { %v3642_v38 = vsub.f32 %v10840_v23, %v9479_v15  ;;  %v3692_v47 = vmul.f32 %v9488_v30, %v3640_v6  ;;  %v3729_v31 = vsel %vm3414_vm0, %v3688_v54, 0.0  ;;  %v3767_v39 = vmax.f32 %v3726_v41, 0.0  ;;  %3810 = vst [vmem:[#allocation2 + $0x18] sm:$0xff] %v3763_v46  ;;  %v10844_v35 = vld [vmem:[#allocation67_spill] sm:$0xff]  ;;  %5112 = vmatpush.msrb.mxu1 %v5107_v2  ;;  %v10846_v46 = vld [vmem:[#allocation68_spill] sm:$0xff] }
 0x429   : > { %v3643_v5 = vsub.f32 %v10842_v34, %v9479_v15  ;;  %v3693_v40 = vmul.f32 %v9488_v30, %v3641_v50  ;;  %v3730_v51 = vsel %vm3415_vm1, %v3689_v53, 0.0  ;;  %v3768_v44 = vmax.f32 %v3727_v1, 0.0  ;;  %3811 = vst [vmem:[#allocation2 + $0x20] sm:$0xff] %v3764_v32  ;;  %v10854_v53 = vld [vmem:[#allocation53_spill] sm:$0xff]  ;;  %v10857_v54 = vld [vmem:[#allocation55_spill] sm:$0xff] }
 0x42a   : > { %v3644_v6 = vsub.f32 %v10844_v35, %v9479_v15  ;;  %v3694_v23 = vmul.f32 %v9488_v30, %v3642_v38  ;;  %v3731_v41 = vsel %vm3416_vm2, %v3690_v12, 0.0  ;;  %v3769_v57 = vmax.f32 %v3728_v16, 0.0  ;;  %3812 = vst [vmem:[#allocation2 + $0x28] sm:$0xff] %v3765_v8  ;;  %v10848_v35 = vld [vmem:[#allocation70_spill] sm:$0xff] }
 0x42b   : > { %v3645_v50 = vsub.f32 %v10846_v46, %v9479_v15  ;;  %v3695_v34 = vmul.f32 %v9488_v30, %v3643_v5  ;;  %v3732_v1 = vsel %vm3417_vm3, %v3691_v60, 0.0  ;;  %v3770_v32 = vmax.f32 %v3729_v31, 0.0  ;;  %3813 = vst [vmem:[#allocation2 + $0x30] sm:$0xff] %v3766_v43  ;;  %v10850_v8 = vld [vmem:[#allocation6_spill] sm:$0xff]  ;;  %v10851_v46 = vld [vmem:[#allocation51_spill] sm:$0xff]  ;;  %v10853_v43 = vld [vmem:[#allocation9_spill] sm:$0xff] }
 0x42c   : > { %v3646_v56 = vsub.f32 %v10848_v35, %v9479_v15  ;;  %v3696_v38 = vmul.f32 %v9488_v30, %v3644_v6  ;;  %v3733_v12 = vsel %vm3418_vm4, %v3692_v47, 0.0  ;;  %v3771_v16 = vmax.f32 %v3730_v51, 0.0  ;;  %3814 = vst [vmem:[#allocation2 + $0x38] sm:$0xff] %v3767_v39  ;;  %v10856_v39 = vld [vmem:[#allocation12_spill] sm:$0xff] }
 0x42d   : > { %v3647_v2 = vsub.f32 %v10850_v8, %v9479_v15  ;;  %v3697_v5 = vmul.f32 %v9488_v30, %v3645_v50  ;;  %vm10852_vm5 = vcmp.eq.s32.totalorder %v10851_v46, 1  ;;  %v3772_v31 = vmax.f32 %v3731_v41, 0.0  ;;  %3815 = vst [vmem:[#allocation2 + $0x40] sm:$0xff] %v3768_v44 }
 0x42e   : > { %v3734_v60 = vsel %vm10852_vm5, %v3693_v40, 0.0  ;;  %v3648_v35 = vsub.f32 %v10853_v43, %v9479_v15  ;;  %v3698_v6 = vmul.f32 %v9488_v30, %v3646_v56  ;;  %vm10855_vm7 = vcmp.eq.s32.totalorder %v10854_v53, 1  ;;  %3816 = vst [vmem:[#allocation2 + $0x48] sm:$0xff] %v3769_v57  ;;  %v10859_v56 = vld [vmem:[#allocation17_spill] sm:$0xff] }
 0x42f   : > { %v3735_v47 = vsel %vm10855_vm7, %v3694_v23, 0.0  ;;  %v3773_v51 = vmax.f32 %v3732_v1, 0.0  ;;  %v3649_v8 = vsub.f32 %v10856_v39, %v9479_v15  ;;  %v3699_v50 = vmul.f32 %v9488_v30, %v3647_v2  ;;  %3817 = vst [vmem:[#allocation2 + $0x50] sm:$0xff] %v3770_v32  ;;  %v3853_v44 = vld [vmem:[#allocation2 + $0x15] sm:$0xff] }
 0x430   : > { %vm10858_vm8 = vcmp.eq.s32.totalorder %v10857_v54, 1  ;;  %v3774_v41 = vmax.f32 %v3733_v12, 0.0  ;;  %v4091_v46 = vld [vmem:[#allocation2 + $0x16] sm:$0xff]  ;;  %v3650_v26 = vsub.f32 %v10859_v56, %v9479_v15  ;;  %v3700_v23 = vmul.f32 %v9488_v30, %v3648_v35  ;;  %3818 = vst [vmem:[#allocation2 + $0x58] sm:$0xff] %v3771_v16  ;;  %3930 = vmatmul.f32.gmra.mxu1 %v3853_v44  ;;  %v10863_v12 = vld [vmem:[#allocation56_spill] sm:$0xff]  ;;  %v10865_v35 = vld [vmem:[#allocation15_spill] sm:$0xff] }
 0x431   : > { %v3736_v40 = vsel %vm10858_vm8, %v3695_v34, 0.0  ;;  %v4412_v43 = vld [vmem:[#allocation2 + $0x17] sm:$0xff]  ;;  %v3775_v53 = vmax.f32 %v3734_v60, 0.0  ;;  %4169 = vmatmul.f32.gmra.mxu2 %v4091_v46  ;;  %v3701_v32 = vmul.f32 %v9488_v30, %v3649_v8  ;;  %vm10864_vm7 = vcmp.eq.s32.totalorder %v10863_v12, 1  ;;  %3819 = vst [vmem:[#allocation2 + $0x60] sm:$0xff] %v3772_v31 }
 0x432   : > { %v10860_v1 = vld [vmem:[#allocation54_spill] sm:$0xff]  ;;  %v3738_v39 = vsel %vm10864_vm7, %v3697_v5, 0.0  ;;  %v3776_v54 = vmax.f32 %v3735_v47, 0.0  ;;  %4490 = vmatmul.f32.gmra.mxu3 %v4412_v43  ;;  %4805 = vmatmul.f32.vlgmr.msrb.gmra.mxu0 %v4412_v43  ;;  %v3652_v56 = vsub.f32 %v10865_v35, %v9479_v15  ;;  %v3777_v60 = vmax.f32 %v3736_v40, 0.0  ;;  %3820 = vst [vmem:[#allocation2 + $0x68] sm:$0xff] %v3773_v51  ;;  %v10868_v5 = vld [vmem:[#allocation57_spill] sm:$0xff] }
 0x433   : > { %vm10861_vm5 = vcmp.eq.s32.totalorder %v10860_v1, 1  ;;  %v10862_v2 = vld [vmem:[#allocation10_spill] sm:$0xff]  ;;  %v3653_v8 = vsub.f32 %v9257_v14, %v9479_v15  ;;  %3821 = vst [vmem:[#allocation2 + $0x70] sm:$0xff] %v3774_v41  ;;  %v3779_v35 = vmax.f32 %v3738_v39, 0.0  ;;  %v10872_v14 = vld [vmem:[#allocation64_spill] sm:$0xff]  ;;  %v10874_v41 = vld [vmem:[#allocation63_spill] sm:$0xff] }
 0x434   : > { %v3737_v57 = vsel %vm10861_vm5, %v3696_v38, 0.0  ;;  %v3651_v34 = vsub.f32 %v10862_v2, %v9479_v15  ;;  %v3702_v38 = vmul.f32 %v9488_v30, %v3650_v26  ;;  %v10866_v16 = vld [vmem:[#allocation58_spill] sm:$0xff]  ;;  %vm10869_vm5 = vcmp.eq.s32.totalorder %v10868_v5, 1  ;;  %v10870_v2 = vld [vmem:[#allocation60_spill] sm:$0xff]  ;;  %3822 = vst [vmem:[#allocation2 + $0x78] sm:$0xff] %v3775_v53 }
 0x435   : > { %vm10867_vm8 = vcmp.eq.s32.totalorder %v10866_v16, 1  ;;  %v3740_v31 = vsel %vm10869_vm5, %v3699_v50, 0.0  ;;  %v3778_v47 = vmax.f32 %v3737_v57, 0.0  ;;  %v3704_v43 = vmul.f32 %v9488_v30, %v3652_v56  ;;  %3823 = vst [vmem:[#allocation2 + $0x80] sm:$0xff] %v3776_v54  ;;  %v4092_v54 = vld [vmem:[#allocation2 + $0x1e] sm:$0xff] }
 0x436   : > { %v3739_v46 = vsel %vm10867_vm8, %v3698_v6, 0.0  ;;  %v3703_v44 = vmul.f32 %v9488_v30, %v3651_v34  ;;  %vm10871_vm7 = vcmp.eq.s32.totalorder %v10870_v2, 1  ;;  %v3654_v6 = vsub.f32 %v9271_v33, %v9479_v15  ;;  %3824 = vst [vmem:[#allocation2 + $0x88] sm:$0xff] %v3777_v60 }
 0x437   : > { %v3741_v26 = vsel %vm10871_vm7, %v3700_v23, 0.0  ;;  %v3705_v51 = vmul.f32 %v9488_v30, %v3653_v8  ;;  %vm10873_vm8 = vcmp.eq.s32.totalorder %v10872_v14, 1  ;;  %v3780_v34 = vmax.f32 %v3739_v46, 0.0  ;;  %v10876_v23 = vld [vmem:[#allocation66_spill] sm:$0xff]  ;;  %3825 = vst [vmem:[#allocation2 + $0x90] sm:$0xff] %v3778_v47  ;;  %v10880_v47 = vld [vmem:[#allocation7_spill] sm:$0xff] }
 0x438   : > { %v3742_v40 = vsel %vm10873_vm8, %v3701_v32, 0.0  ;;  %v3655_v50 = vsub.f32 %v9285_v58, %v9479_v15  ;;  %vm10875_vm5 = vcmp.eq.s32.totalorder %v10874_v41, 1  ;;  %v3781_v56 = vmax.f32 %v3740_v31, 0.0  ;;  %v3854_v32 = vld [vmem:[#allocation2 + $0x1d] sm:$0xff]  ;;  %3826 = vst [vmem:[#allocation2 + $0x98] sm:$0xff] %v3779_v35 }
 0x439   : > { %v3743_v57 = vsel %vm10875_vm5, %v3702_v38, 0.0  ;;  %v3706_v53 = vmul.f32 %v9488_v30, %v3654_v6  ;;  %v3656_v33 = vsub.f32 %v9295_v21, %v9479_v15  ;;  %vm10877_vm7 = vcmp.eq.s32.totalorder %v10876_v23, 1  ;;  %v10878_v38 = vld [vmem:[#allocation69_spill] sm:$0xff]  ;;  %3933 = vmatmul.f32.gmra.mxu1 %v3854_v32  ;;  %4172 = vmatmul.f32.gmra.mxu2 %v4092_v54  ;;  %v4413_v21 = vld [vmem:[#allocation2 + $0x1f] sm:$0xff]  ;;  %3827 = vst [vmem:[#allocation2 + $0xa0] sm:$0xff] %v3780_v34 }
 0x43a   : > { %v3744_v39 = vsel %vm10877_vm7, %v3703_v44, 0.0  ;;  %v3782_v8 = vmax.f32 %v3741_v26, 0.0  ;;  %v3707_v46 = vmul.f32 %v9488_v30, %v3655_v50  ;;  %v3657_v58 = vsub.f32 %v9324_v52, %v9479_v15  ;;  %4493 = vmatmul.f32.gmra.mxu3 %v4413_v21  ;;  %4808 = vmatmul.f32.gmra.mxu0 %v4413_v21  ;;  %v5106_v52 = vld [vmem:[#allocation3 + $0x260] sm:$0xff]  ;;  %3828 = vst [vmem:[#allocation2 + $0xa8] sm:$0xff] %v3781_v56 }
 0x43b   : > { %vm10879_vm8 = vcmp.eq.s32.totalorder %v10878_v38, 1  ;;  %v3783_v31 = vmax.f32 %v3742_v40, 0.0  ;;  %v3708_v6 = vmul.f32 %v9488_v30, %v3656_v33  ;;  %v3658_v44 = vsub.f32 %v9337_v20, %v9479_v15  ;;  %5113 = vmatpush.msrb.mxu1 %v5106_v52 }
 0x43c   : > { %v3745_v60 = vsel %vm10879_vm8, %v3704_v43, 0.0  ;;  %vm10881_vm5 = vcmp.eq.s32.totalorder %v10880_v47, 1  ;;  %v3784_v50 = vmax.f32 %v3743_v57, 0.0  ;;  %v3709_v43 = vmul.f32 %v9488_v30, %v3657_v58  ;;  %3829 = vst [vmem:[#allocation2 + $0xb0] sm:$0xff] %v3782_v8  ;;  %v10883_v57 = vld [vmem:[#allocation14_spill] sm:$0xff] }
 0x43d   : > { %v3746_v26 = vsel %vm10881_vm5, %v3705_v51, 0.0  ;;  %v3659_v35 = vsub.f32 %v9350_v11, %v9479_v15  ;;  %v3785_v40 = vmax.f32 %v3744_v39, 0.0  ;;  %v3747_v32 = vsel %vm3432_vm6, %v3706_v53, 0.0  ;;  %3830 = vst [vmem:[#allocation2 + $0xb8] sm:$0xff] %v3783_v31  ;;  %v10885_v39 = vld [vmem:[#allocation8_spill] sm:$0xff] }
 0x43e   : > { %v3710_v20 = vmul.f32 %v9488_v30, %v3658_v44  ;;  %v3660_v51 = vsub.f32 %v9361_v59, %v9479_v15  ;;  %v3786_v34 = vmax.f32 %v3745_v60, 0.0  ;;  %vm10884_vm7 = vcmp.eq.s32.totalorder %v10883_v57, 1  ;;  %3831 = vst [vmem:[#allocation2 + $0xc0] sm:$0xff] %v3784_v50  ;;  %v4093_v50 = vld [vmem:[#allocation2 + $0x26] sm:$0xff] }
 0x43f   : > { %v3748_v54 = vsel %vm10884_vm7, %v3707_v46, 0.0  ;;  %v3711_v58 = vmul.f32 %v9488_v30, %v3659_v35  ;;  %v3661_v11 = vsub.f32 %v9378_v27, %v9479_v15  ;;  %v3787_v56 = vmax.f32 %v3746_v26, 0.0  ;;  %3832 = vst [vmem:[#allocation2 + $0xc8] sm:$0xff] %v3785_v40  ;;  %v3855_v26 = vld [vmem:[#allocation2 + $0x25] sm:$0xff] }
 0x440   : > { %vm10886_vm8 = vcmp.eq.s32.totalorder %v10885_v39, 1  ;;  %v3712_v21 = vmul.f32 %v9488_v30, %v3660_v51  ;;  %v3662_v59 = vsub.f32 %v9392_v29, %v9479_v15  ;;  %v3788_v8 = vmax.f32 %v3747_v32, 0.0  ;;  %3833 = vst [vmem:[#allocation2 + $0xd0] sm:$0xff] %v3786_v34  ;;  %v4414_v40 = vld [vmem:[#allocation2 + $0x27] sm:$0xff] }
 0x441   : > { %v3749_v53 = vsel %vm10886_vm8, %v3708_v6, 0.0  ;;  %vm10887_vm5 = vcmp.eq.s32.totalorder %v9214_v19, 1  ;;  %v3713_v60 = vmul.f32 %v9488_v30, %v3661_v11  ;;  %v3663_v27 = vsub.f32 %v9403_v24, %v9479_v15  ;;  %3834 = vst [vmem:[#allocation2 + $0xd8] sm:$0xff] %v3787_v56  ;;  %3936 = vmatmul.f32.gmra.mxu1 %v3855_v26  ;;  %4175 = vmatmul.f32.gmra.mxu2 %v4093_v50 }
 0x442   : > { %v3750_v46 = vsel %vm10887_vm5, %v3709_v43, 0.0  ;;  %v3789_v31 = vmax.f32 %v3748_v54, 0.0  ;;  %vm10888_vm7 = vcmp.eq.s32.totalorder %v9234_v3, 1  ;;  %v3714_v44 = vmul.f32 %v9488_v30, %v3662_v59  ;;  %4496 = vmatmul.f32.gmra.mxu3 %v4414_v40  ;;  %4811 = vmatmul.f32.gmra.mxu0 %v4414_v40  ;;  %3835 = vst [vmem:[#allocation2 + $0xe0] sm:$0xff] %v3788_v8 }
 0x443   : > { %v3751_v6 = vsel %vm10888_vm7, %v3710_v20, 0.0  ;;  %v3664_v29 = vsub.f32 %v9415_v13, %v9479_v15  ;;  %v3790_v52 = vmax.f32 %v3749_v53, 0.0  ;;  %vm10889_vm8 = vcmp.eq.s32.totalorder %v9252_v37, 1 }
 0x444   : > { %v3752_v43 = vsel %vm10889_vm8, %v3711_v58, 0.0  ;;  %v3715_v35 = vmul.f32 %v9488_v30, %v3663_v27  ;;  %v3665_v24 = vsub.f32 %v9425_v0, %v9479_v15  ;;  %v3791_v32 = vmax.f32 %v3750_v46, 0.0  ;;  %3836 = vst [vmem:[#allocation2 + $0xe8] sm:$0xff] %v3789_v31 }
 0x445   : > { %vm10890_vm5 = vcmp.eq.s32.totalorder %v9281_v25, 1  ;;  %v3716_v20 = vmul.f32 %v9488_v30, %v3664_v29  ;;  %v3666_v51 = vsub.f32 %v9436_v61, %v9479_v15  ;;  %v3792_v34 = vmax.f32 %v3751_v6, 0.0  ;;  %3837 = vst [vmem:[#allocation2 + $0xf0] sm:$0xff] %v3790_v52  ;;  %v4415_v52 = vld [vmem:[#allocation2 + $0x2f] sm:$0xff] }
 0x446   : > { %v3753_v13 = vsel %vm10890_vm5, %v3712_v21, 0.0  ;;  %vm10891_vm7 = vcmp.eq.s32.totalorder %v9308_v18, 1  ;;  %v3717_v54 = vmul.f32 %v9488_v30, %v3665_v24  ;;  %v3667_v58 = vsub.f32 %v9450_v17, %v9479_v15  ;;  %3838 = vst [vmem:[#allocation2 + $0xf8] sm:$0xff] %v3791_v32 }
 0x447   : > { %v3754_v0 = vsel %vm10891_vm7, %v3713_v60, 0.0  ;;  %v3793_v11 = vmax.f32 %v3752_v43, 0.0  ;;  %vm10892_vm8 = vcmp.eq.s32.totalorder %v9318_v48, 1  ;;  %v3718_v53 = vmul.f32 %v9488_v30, %v3666_v51  ;;  %3839 = vst [vmem:[#allocation2 + $0x100] sm:$0xff] %v3792_v34  ;;  %v4095_v51 = vld [vmem:[#allocation2 + $0x36] sm:$0xff] }
 0x448   : > { %v3755_v56 = vsel %vm10892_vm8, %v3714_v44, 0.0  ;;  %v3668_v61 = vsub.f32 %v9456_v10, %v9479_v15  ;;  %v3794_v21 = vmax.f32 %v3753_v13, 0.0  ;;  %vm10893_vm5 = vcmp.eq.s32.totalorder %v9346_v9, 1  ;;  %v4416_v34 = vld [vmem:[#allocation2 + $0x37] sm:$0xff] }
 0x449   : > { %v3756_v59 = vsel %vm10893_vm5, %v3715_v35, 0.0  ;;  %v3719_v8 = vmul.f32 %v9488_v30, %v3667_v58  ;;  %v3669_v17 = vsub.f32 %v9472_v63, %v9479_v15  ;;  %v3795_v46 = vmax.f32 %v3754_v0, 0.0  ;;  %3840 = vst [vmem:[#allocation2 + $0x108] sm:$0xff] %v3793_v11  ;;  %v3856_v63 = vld [vmem:[#allocation2 + $0x2d] sm:$0xff]  ;;  %v4096_v58 = vld [vmem:[#allocation2 + $0x3e] sm:$0xff] }
 0x44a   : > { %vm10894_vm7 = vcmp.eq.s32.totalorder %v9370_v4, 1  ;;  %v3720_v27 = vmul.f32 %v9488_v30, %v3668_v61  ;;  %v3796_v31 = vmax.f32 %v3755_v56, 0.0  ;;  %vm10895_vm8 = vcmp.eq.s32.totalorder %v9384_v45, 1  ;;  %v4094_v15 = vld [vmem:[#allocation2 + $0x2e] sm:$0xff]  ;;  %3841 = vst [vmem:[#allocation2 + $0x110] sm:$0xff] %v3794_v21  ;;  %3939 = vmatmul.f32.gmra.mxu1 %v3856_v63  ;;  %4499 = vmatmul.f32.gmra.mxu3 %v4415_v52  ;;  %v4417_v11 = vld [vmem:[#allocation2 + $0x3f] sm:$0xff] }
 0x44b   : > { %v3757_v60 = vsel %vm10894_vm7, %v3716_v20, 0.0  ;;  %v3758_v10 = vsel %vm10895_vm8, %v3717_v54, 0.0  ;;  %v3721_v6 = vmul.f32 %v9488_v30, %v3669_v17  ;;  %v3797_v44 = vmax.f32 %v3756_v59, 0.0  ;;  %4178 = vmatmul.f32.gmra.mxu2 %v4094_v15  ;;  %3842 = vst [vmem:[#allocation2 + $0x118] sm:$0xff] %v3795_v46  ;;  %4814 = vmatmul.f32.gmra.mxu0 %v4415_v52  ;;  %v3857_v20 = vld [vmem:[#allocation2 + $0x35] sm:$0xff]  ;;  %v3858_v54 = vld [vmem:[#allocation2 + $0x3d] sm:$0xff] }
 0x44c   : > { %vm10896_vm5 = vcmp.eq.s32.totalorder %v9410_v62, 1  ;;  %v3798_v26 = vmax.f32 %v3757_v60, 0.0  ;;  %vm10897_vm7 = vcmp.eq.s32.totalorder %v9428_v7, 1  ;;  %v3799_v43 = vmax.f32 %v3758_v10, 0.0  ;;  %3843 = vst [vmem:[#allocation2 + $0x120] sm:$0xff] %v3796_v31  ;;  %v5105_v0 = vld [vmem:[#allocation3 + $0x258] sm:$0xff] }
 0x44d   : > { %v3759_v29 = vsel %vm10896_vm5, %v3718_v53, 0.0  ;;  %v3760_v50 = vsel %vm10897_vm7, %v3719_v8, 0.0  ;;  %vm10898_vm8 = vcmp.eq.s32.totalorder %v9439_v49, 1  ;;  %vm10899_vm5 = vcmp.eq.s32.totalorder %v9458_v28, 1  ;;  %3844 = vst [vmem:[#allocation2 + $0x128] sm:$0xff] %v3797_v44  ;;  %5114 = vmatpush.msrb.mxu1 %v5105_v0  ;;  %v3859_v56 = vld [vmem:[#allocation2 + $0x45] sm:$0xff] }
 0x44e   : > { %v3761_v30 = vsel %vm10898_vm8, %v3720_v27, 0.0  ;;  %v3800_v35 = vmax.f32 %v3759_v29, 0.0  ;;  %v3762_v24 = vsel %vm10899_vm5, %v3721_v6, 0.0  ;;  %v3801_v40 = vmax.f32 %v3760_v50, 0.0  ;;  %3845 = vst [vmem:[#allocation2 + $0x130] sm:$0xff] %v3798_v26  ;;  %v4097_v53 = vld [vmem:[#allocation2 + $0x46] sm:$0xff] }
 0x44f   : > { %v3802_v32 = vmax.f32 %v3761_v30, 0.0  ;;  %3846 = vst [vmem:[#allocation2 + $0x138] sm:$0xff] %v3799_v43  ;;  %v3803_v13 = vmax.f32 %v3762_v24, 0.0  ;;  %v4418_v61 = vld [vmem:[#allocation2 + $0x47] sm:$0xff]  ;;  %v4419_v17 = vld [vmem:[#allocation2 + $0x4f] sm:$0xff]  ;;  %v4420_v27 = vld [vmem:[#allocation2 + $0x57] sm:$0xff] }
 0x450   : > { %3847 = vst [vmem:[#allocation2 + $0x140] sm:$0xff] %v3800_v35  ;;  %v5104_v21 = vld [vmem:[#allocation3 + $0x250] sm:$0xff]  ;;  %v3861_v46 = vld [vmem:[#allocation2 + $0x55] sm:$0xff]  ;;  %v3862_v31 = vld [vmem:[#allocation2 + $0x5d] sm:$0xff]  ;;  %vm10931_vm7 = vcmp.eq.s32.totalorder %v10880_v47, 1  ;;  %vm10932_vm8 = vcmp.eq.s32.totalorder %v10883_v57, 1 }
 0x451   : > { %3848 = vst [vmem:[#allocation2 + $0x148] sm:$0xff] %v3801_v40  ;;  %5115 = vmatpush.msrb.mxu1 %v5104_v21  ;;  %v3860_v59 = vld [vmem:[#allocation2 + $0x4d] sm:$0xff]  ;;  %v4099_v60 = vld [vmem:[#allocation2 + $0x56] sm:$0xff]  ;;  %v4100_v10 = vld [vmem:[#allocation2 + $0x5e] sm:$0xff]  ;;  %vm10934_vm5 = vcmp.eq.s32.totalorder %v9214_v19, 1 }
 0x452   : > { %3849 = vst [vmem:[#allocation2 + $0x150] sm:$0xff] %v3802_v32  ;;  %3942 = vmatmul.f32.gmra.mxu1 %v3857_v20  ;;  %4502 = vmatmul.f32.gmra.mxu3 %v4416_v34  ;;  %v4098_v8 = vld [vmem:[#allocation2 + $0x4e] sm:$0xff]  ;;  %v4421_v6 = vld [vmem:[#allocation2 + $0x5f] sm:$0xff]  ;;  %v4103_v30 = vld [vmem:[#allocation2 + $0x76] sm:$0xff] }
 0x453   : > { %4181 = vmatmul.f32.gmra.mxu2 %v4095_v51  ;;  %3850 = vst [vmem:[#allocation2 + $0x158] sm:$0xf] %v3803_v13  ;;  %4817 = vmatmul.f32.gmra.mxu0 %v4416_v34  ;;  %v5103_v44 = vld [vmem:[#allocation3 + $0x248] sm:$0xff]  ;;  %v3864_v26 = vld [vmem:[#allocation2 + $0x6d] sm:$0xff]  ;;  %v3865_v43 = vld [vmem:[#allocation2 + $0x75] sm:$0xff] }
 0x454   : > { %5116 = vmatpush.msrb.mxu1 %v5103_v44  ;;  %v3863_v29 = vld [vmem:[#allocation2 + $0x65] sm:$0xff]  ;;  %v4102_v50 = vld [vmem:[#allocation2 + $0x6e] sm:$0xff]  ;;  %v4424_v35 = vld [vmem:[#allocation2 + $0x77] sm:$0xff] }
 0x455   : > { %v4101_v63 = vld [vmem:[#allocation2 + $0x66] sm:$0xff]  ;;  %v4423_v52 = vld [vmem:[#allocation2 + $0x6f] sm:$0xff]  ;;  %v5102_v24 = vld [vmem:[#allocation3 + $0x240] sm:$0xff] }
 0x456   : > { %v4422_v15 = vld [vmem:[#allocation2 + $0x67] sm:$0xff]  ;;  %5117 = vmatpush.msrb.mxu1 %v5102_v24  ;;  %v3866_v40 = vld [vmem:[#allocation2 + $0x7d] sm:$0xff]  ;;  %v4427_v21 = vld [vmem:[#allocation2 + $0x8f] sm:$0xff] }
 0x457   : > { %v4104_v32 = vld [vmem:[#allocation2 + $0x7e] sm:$0xff]  ;;  %v4105_v34 = vld [vmem:[#allocation2 + $0x86] sm:$0xff] }
 0x458   : > { %v4425_v13 = vld [vmem:[#allocation2 + $0x7f] sm:$0xff]  ;;  %v4426_v0 = vld [vmem:[#allocation2 + $0x87] sm:$0xff]  ;;  %v4428_v44 = vld [vmem:[#allocation2 + $0x97] sm:$0xff] }
 0x459   : > { %v3867_v51 = vld [vmem:[#allocation2 + $0x85] sm:$0xff] }
 0x45a   : > { %3945 = vmatmul.f32.gmra.mxu1 %v3858_v54  ;;  %4505 = vmatmul.f32.gmra.mxu3 %v4417_v11  ;;  %v4429_v24 = vld [vmem:[#allocation2 + $0x9f] sm:$0xff]  ;;  %v6372_v49 = vld [vmem:[#allocation2 + $0x14b] sm:$0xff] }
 0x45b   : > { %4184 = vmatmul.f32.gmra.mxu2 %v4096_v58  ;;  %4820 = vmatmul.f32.gmra.mxu0 %v4417_v11  ;;  %v6371_v28 = vld [vmem:[#allocation2 + $0x143] sm:$0xff] }
 0x45c   : > { %v6375_v7 = vld [vmem:[#allocation2 + $0x163] sm:$0xff] }
 0x462   : > { %3948 = vmatmul.f32.gmra.mxu1 %v3859_v56  ;;  %4508 = vmatmul.f32.gmra.mxu3 %v4418_v61  ;;  %v5101_v56 = vld [vmem:[#allocation3 + $0x238] sm:$0xff] }
 0x463   : > { %4187 = vmatmul.f32.gmra.mxu2 %v4097_v53  ;;  %4823 = vmatmul.f32.gmra.mxu0 %v4418_v61  ;;  %v3868_v53 = vld [vmem:[#allocation2 + $0x8d] sm:$0xff] }
 0x464   : > { %v4106_v61 = vld [vmem:[#allocation2 + $0x8e] sm:$0xff]  ;;  %5118 = vmatpush.msrb.mxu1 %v5101_v56 }
 0x465   : > { %v4430_v56 = vld [vmem:[#allocation2 + $0xa7] sm:$0xff] }
 0x46a   : > { %3951 = vmatmul.f32.gmra.mxu1 %v3860_v59  ;;  %4511 = vmatmul.f32.gmra.mxu3 %v4419_v17 }
 0x46b   : > { %4190 = vmatmul.f32.gmra.mxu2 %v4098_v8  ;;  %4826 = vmatmul.f32.gmra.mxu0 %v4419_v17 }
 0x472   : > { %3954 = vmatmul.f32.gmra.mxu1 %v3861_v46  ;;  %4514 = vmatmul.f32.gmra.mxu3 %v4420_v27 }
 0x473   : > { %4193 = vmatmul.f32.gmra.mxu2 %v4099_v60  ;;  %4829 = vmatmul.f32.gmra.mxu0 %v4420_v27 }
 0x47a   : > { %3957 = vmatmul.f32.gmra.mxu1 %v3862_v31  ;;  %4517 = vmatmul.f32.gmra.mxu3 %v4421_v6 }
 0x47b   : > { %4196 = vmatmul.f32.gmra.mxu2 %v4100_v10  ;;  %4832 = vmatmul.f32.gmra.mxu0 %v4421_v6  ;;  %v3869_v10 = vld [vmem:[#allocation2 + $0x95] sm:$0xff] }
 0x47c   : > { %v4107_v6 = vld [vmem:[#allocation2 + $0x96] sm:$0xff] }
 0x482   : > { %3960 = vmatmul.f32.gmra.mxu1 %v3863_v29  ;;  %4520 = vmatmul.f32.gmra.mxu3 %v4422_v15 }
 0x483   : > { %4199 = vmatmul.f32.gmra.mxu2 %v4101_v63  ;;  %4835 = vmatmul.f32.gmra.mxu0 %v4422_v15 }
 0x48a   : > { %3963 = vmatmul.f32.gmra.mxu1 %v3864_v26  ;;  %4523 = vmatmul.f32.gmra.mxu3 %v4423_v52 }
 0x48b   : > { %4202 = vmatmul.f32.gmra.mxu2 %v4102_v50  ;;  %4838 = vmatmul.f32.gmra.mxu0 %v4423_v52 }
 0x48d   : > { %v3925_v20 = vpop.f32.mrf.mxu1 }
 0x492   : > { %3966 = vmatmul.f32.gmra.mxu1 %v3865_v43  ;;  %4526 = vmatmul.f32.gmra.mxu3 %v4424_v35 }
 0x493   : > { %4205 = vmatmul.f32.gmra.mxu2 %v4103_v30  ;;  %4841 = vmatmul.f32.gmra.mxu0 %v4424_v35  ;;  %v3870_v30 = vld [vmem:[#allocation2 + $0x9d] sm:$0xff] }
 0x494   : > { %v4108_v35 = vld [vmem:[#allocation2 + $0x9e] sm:$0xff] }
 0x495   : > { %v4164_v54 = vpop.f32.mrf.mxu2  ;;  %v3928_v11 = vpop.f32.mrf.mxu1 }
 0x496   : > { %v4485_v58 = vpop.f32.mrf.mxu3  ;;  %v4328_v59 = vadd.f32 %v4164_v54, %v3925_v20 }
 0x498   : > { %v4649_v46 = vadd.f32 %v4485_v58, %v4328_v59  ;;  %v3871_v58 = vld [vmem:[#allocation2 + $0xa5] sm:$0xff] }
 0x49a   : > { %3969 = vmatmul.f32.gmra.mxu1 %v3866_v40  ;;  %4529 = vmatmul.f32.gmra.mxu3 %v4425_v13 }
 0x49b   : > { %4208 = vmatmul.f32.gmra.mxu2 %v4104_v32  ;;  %4844 = vmatmul.f32.gmra.mxu0 %v4425_v13  ;;  %v5100_v32 = vld [vmem:[#allocation3 + $0x230] sm:$0xff] }
 0x49c   : > { %5119 = vmatpush.msrb.mxu1 %v5100_v32 }
 0x49d   : > { %v4167_v8 = vpop.f32.mrf.mxu2 }
 0x49e   : > { %v4488_v17 = vpop.f32.mrf.mxu3  ;;  %v4329_v29 = vadd.f32 %v4167_v8, %v3928_v11  ;;  %v4109_v11 = vld [vmem:[#allocation2 + $0xa6] sm:$0xff] }
 0x4a0   : > { %v4650_v26 = vadd.f32 %v4488_v17, %v4329_v29 }
 0x4a2   : > { %3972 = vmatmul.f32.gmra.mxu1 %v3867_v51  ;;  %4532 = vmatmul.f32.gmra.mxu3 %v4426_v0 }
 0x4a3   : > { %4211 = vmatmul.f32.gmra.mxu2 %v4105_v34  ;;  %4847 = vmatmul.f32.gmra.mxu0 %v4426_v0 }
 0x4aa   : > { %3975 = vmatmul.f32.gmra.mxu1 %v3868_v53  ;;  %4535 = vmatmul.f32.gmra.mxu3 %v4427_v21 }
 0x4ab   : > { %4214 = vmatmul.f32.gmra.mxu2 %v4106_v61  ;;  %4850 = vmatmul.f32.gmra.mxu0 %v4427_v21 }
 0x4ad   : > { %v3931_v60 = vpop.f32.mrf.mxu1 }
 0x4af   : > { %v4806_v27 = vpop.f32.mrf.mxu0 }
 0x4b0   : > { %v4970_v31 = vadd.f32 %v4806_v27, %v4649_v46  ;;  %v4110_v27 = vld [vmem:[#allocation2 + $0xae] sm:$0xff] }
 0x4b2   : > { %3978 = vmatmul.f32.gmra.mxu1 %v3869_v10  ;;  %5011 = vst [vmem:[%s7866_s26] sm:$0xff] %v4970_v31  ;;  %4538 = vmatmul.f32.gmra.mxu3 %v4428_v44  ;;  %v4431_v31 = vld [vmem:[#allocation2 + $0xaf] sm:$0xff] }
 0x4b3   : > { %4217 = vmatmul.f32.gmra.mxu2 %v4107_v6  ;;  %4853 = vmatmul.f32.gmra.mxu0 %v4428_v44 }
 0x4b4   : > { %v4170_v63 = vpop.f32.mrf.mxu2 }
 0x4b5   : > { %v4491_v15 = vpop.f32.mrf.mxu3  ;;  %v4330_v40 = vadd.f32 %v4170_v63, %v3931_v60  ;;  %v3872_v60 = vld [vmem:[#allocation2 + $0xad] sm:$0xff] }
 0x4b6   : > { %v3934_v50 = vpop.f32.mrf.mxu1 }
 0x4b7   : > { %v4809_v52 = vpop.f32.mrf.mxu0  ;;  %v4651_v51 = vadd.f32 %v4491_v15, %v4330_v40 }
 0x4b8   : > { %v4971_v43 = vadd.f32 %v4809_v52, %v4650_v26  ;;  %v4111_v52 = vld [vmem:[#allocation2 + $0xb6] sm:$0xff] }
 0x4ba   : > { %3981 = vmatmul.f32.gmra.mxu1 %v3870_v30  ;;  %5012 = vst [vmem:[%s7866_s26 + $0x8] sm:$0xff] %v4971_v43  ;;  %4541 = vmatmul.f32.gmra.mxu3 %v4429_v24  ;;  %v4432_v43 = vld [vmem:[#allocation2 + $0xb7] sm:$0xff] }
 0x4bb   : > { %4220 = vmatmul.f32.gmra.mxu2 %v4108_v35  ;;  %4856 = vmatmul.f32.gmra.mxu0 %v4429_v24  ;;  %v5099_v35 = vld [vmem:[#allocation3 + $0x228] sm:$0xff] }
 0x4bc   : > { %v4173_v13 = vpop.f32.mrf.mxu2  ;;  %5120 = vmatpush.msrb.mxu1 %v5099_v35 }
 0x4bd   : > { %v4494_v20 = vpop.f32.mrf.mxu3  ;;  %v4331_v53 = vadd.f32 %v4173_v13, %v3934_v50  ;;  %v3873_v50 = vld [vmem:[#allocation2 + $0xb5] sm:$0xff] }
 0x4be   : > { %v3937_v34 = vpop.f32.mrf.mxu1 }
 0x4bf   : > { %v4812_v0 = vpop.f32.mrf.mxu0  ;;  %v4652_v59 = vadd.f32 %v4494_v20, %v4331_v53 }
 0x4c0   : > { %v4972_v54 = vadd.f32 %v4812_v0, %v4651_v51  ;;  %v4112_v0 = vld [vmem:[#allocation2 + $0xbe] sm:$0xff] }
 0x4c2   : > { %3984 = vmatmul.f32.gmra.mxu1 %v3871_v58  ;;  %5013 = vst [vmem:[%s7866_s26 + $0x10] sm:$0xff] %v4972_v54  ;;  %4544 = vmatmul.f32.gmra.mxu3 %v4430_v56  ;;  %v4433_v54 = vld [vmem:[#allocation2 + $0xbf] sm:$0xff] }
 0x4c3   : > { %4223 = vmatmul.f32.gmra.mxu2 %v4109_v11  ;;  %4859 = vmatmul.f32.gmra.mxu0 %v4430_v56 }
 0x4c4   : > { %v4176_v61 = vpop.f32.mrf.mxu2 }
 0x4c5   : > { %v4497_v21 = vpop.f32.mrf.mxu3  ;;  %v4332_v10 = vadd.f32 %v4176_v61, %v3937_v34  ;;  %v3874_v34 = vld [vmem:[#allocation2 + $0xbd] sm:$0xff] }
 0x4c7   : > { %v3940_v8 = vpop.f32.mrf.mxu1  ;;  %v4653_v29 = vadd.f32 %v4497_v21, %v4332_v10 }
 0x4c8   : > { %v4815_v17 = vpop.f32.mrf.mxu0 }
 0x4c9   : > { %v4973_v46 = vadd.f32 %v4815_v17, %v4652_v59  ;;  %v4113_v17 = vld [vmem:[#allocation2 + $0xc6] sm:$0xff] }
 0x4ca   : > { %3987 = vmatmul.f32.gmra.mxu1 %v3872_v60  ;;  %4547 = vmatmul.f32.gmra.mxu3 %v4431_v31 }
 0x4cb   : > { %4226 = vmatmul.f32.gmra.mxu2 %v4110_v27  ;;  %5014 = vst [vmem:[%s7866_s26 + $0x18] sm:$0xff] %v4973_v46  ;;  %4862 = vmatmul.f32.gmra.mxu0 %v4431_v31  ;;  %v4434_v46 = vld [vmem:[#allocation2 + $0xc7] sm:$0xff]  ;;  %v5098_v27 = vld [vmem:[#allocation3 + $0x220] sm:$0xff] }
 0x4cc   : > { %5121 = vmatpush.msrb.mxu1 %v5098_v27 }
 0x4cd   : > { %v4500_v44 = vpop.f32.mrf.mxu3 }
 0x4ce   : > { %v4179_v6 = vpop.f32.mrf.mxu2 }
 0x4cf   : > { %v3943_v63 = vpop.f32.mrf.mxu1  ;;  %v4333_v30 = vadd.f32 %v4179_v6, %v3940_v8  ;;  %v3875_v8 = vld [vmem:[#allocation2 + $0xc5] sm:$0xff] }
 0x4d0   : > { %v4818_v15 = vpop.f32.mrf.mxu0 }
 0x4d1   : > { %v4974_v26 = vadd.f32 %v4818_v15, %v4653_v29  ;;  %v4654_v32 = vadd.f32 %v4500_v44, %v4333_v30  ;;  %v3876_v15 = vld [vmem:[#allocation2 + $0xcd] sm:$0xff] }
 0x4d2   : > { %3990 = vmatmul.f32.gmra.mxu1 %v3873_v50  ;;  %4550 = vmatmul.f32.gmra.mxu3 %v4432_v43  ;;  %v4435_v50 = vld [vmem:[#allocation2 + $0xcf] sm:$0xff] }
 0x4d3   : > { %4229 = vmatmul.f32.gmra.mxu2 %v4111_v52  ;;  %5015 = vst [vmem:[%s7866_s26 + $0x20] sm:$0xff] %v4974_v26  ;;  %4865 = vmatmul.f32.gmra.mxu0 %v4432_v43  ;;  %v4114_v26 = vld [vmem:[#allocation2 + $0xce] sm:$0xff] }
 0x4d5   : > { %v4503_v40 = vpop.f32.mrf.mxu3 }
 0x4d6   : > { %v4182_v24 = vpop.f32.mrf.mxu2 }
 0x4d7   : > { %v3946_v13 = vpop.f32.mrf.mxu1  ;;  %v4334_v58 = vadd.f32 %v4182_v24, %v3943_v63 }
 0x4d8   : > { %v4821_v20 = vpop.f32.mrf.mxu0 }
 0x4d9   : > { %v4975_v51 = vadd.f32 %v4821_v20, %v4654_v32  ;;  %v4655_v53 = vadd.f32 %v4503_v40, %v4334_v58  ;;  %v4115_v20 = vld [vmem:[#allocation2 + $0xd6] sm:$0xff] }
 0x4da   : > { %3993 = vmatmul.f32.gmra.mxu1 %v3874_v34  ;;  %4553 = vmatmul.f32.gmra.mxu3 %v4433_v54 }
 0x4db   : > { %4232 = vmatmul.f32.gmra.mxu2 %v4112_v0  ;;  %5016 = vst [vmem:[%s7866_s26 + $0x28] sm:$0xff] %v4975_v51  ;;  %4868 = vmatmul.f32.gmra.mxu0 %v4433_v54  ;;  %v4436_v51 = vld [vmem:[#allocation2 + $0xd7] sm:$0xff] }
 0x4dd   : > { %v4506_v56 = vpop.f32.mrf.mxu3 }
 0x4de   : > { %v4185_v11 = vpop.f32.mrf.mxu2 }
 0x4df   : > { %v3949_v61 = vpop.f32.mrf.mxu1  ;;  %v4335_v60 = vadd.f32 %v4185_v11, %v3946_v13  ;;  %v3877_v13 = vld [vmem:[#allocation2 + $0xd5] sm:$0xff] }
 0x4e0   : > { %v4824_v21 = vpop.f32.mrf.mxu0 }
 0x4e1   : > { %v4976_v59 = vadd.f32 %v4824_v21, %v4655_v53  ;;  %v4656_v6 = vadd.f32 %v4506_v56, %v4335_v60  ;;  %v4116_v21 = vld [vmem:[#allocation2 + $0xde] sm:$0xff] }
 0x4e2   : > { %3996 = vmatmul.f32.gmra.mxu1 %v3875_v8  ;;  %4556 = vmatmul.f32.gmra.mxu3 %v4434_v46 }
 0x4e3   : > { %4235 = vmatmul.f32.gmra.mxu2 %v4113_v17  ;;  %5017 = vst [vmem:[%s7866_s26 + $0x30] sm:$0xff] %v4976_v59  ;;  %4871 = vmatmul.f32.gmra.mxu0 %v4434_v46  ;;  %v4437_v59 = vld [vmem:[#allocation2 + $0xdf] sm:$0xff]  ;;  %v5097_v17 = vld [vmem:[#allocation3 + $0x218] sm:$0xff] }
 0x4e4   : > { %5122 = vmatpush.msrb.mxu1 %v5097_v17 }
 0x4e5   : > { %v4509_v10 = vpop.f32.mrf.mxu3 }
 0x4e6   : > { %v4188_v31 = vpop.f32.mrf.mxu2 }
 0x4e7   : > { %v3952_v44 = vpop.f32.mrf.mxu1  ;;  %v4336_v52 = vadd.f32 %v4188_v31, %v3949_v61  ;;  %v3878_v61 = vld [vmem:[#allocation2 + $0xdd] sm:$0xff] }
 0x4e8   : > { %v4827_v29 = vpop.f32.mrf.mxu0 }
 0x4e9   : > { %v4977_v63 = vadd.f32 %v4827_v29, %v4656_v6  ;;  %v4657_v35 = vadd.f32 %v4509_v10, %v4336_v52  ;;  %v4117_v29 = vld [vmem:[#allocation2 + $0xe6] sm:$0xff] }
 0x4ea   : > { %3999 = vmatmul.f32.gmra.mxu1 %v3876_v15  ;;  %4559 = vmatmul.f32.gmra.mxu3 %v4435_v50 }
 0x4eb   : > { %4238 = vmatmul.f32.gmra.mxu2 %v4114_v26  ;;  %5018 = vst [vmem:[%s7866_s26 + $0x38] sm:$0xff] %v4977_v63  ;;  %4874 = vmatmul.f32.gmra.mxu0 %v4435_v50  ;;  %v4438_v63 = vld [vmem:[#allocation2 + $0xe7] sm:$0xff] }
 0x4ed   : > { %v4512_v30 = vpop.f32.mrf.mxu3 }
 0x4ee   : > { %v4191_v43 = vpop.f32.mrf.mxu2 }
 0x4ef   : > { %v3955_v24 = vpop.f32.mrf.mxu1  ;;  %v4337_v34 = vadd.f32 %v4191_v43, %v3952_v44  ;;  %v3879_v44 = vld [vmem:[#allocation2 + $0xe5] sm:$0xff] }
 0x4f0   : > { %v4830_v40 = vpop.f32.mrf.mxu0 }
 0x4f1   : > { %v4978_v32 = vadd.f32 %v4830_v40, %v4657_v35  ;;  %v4658_v58 = vadd.f32 %v4512_v30, %v4337_v34  ;;  %v4118_v40 = vld [vmem:[#allocation2 + $0xee] sm:$0xff] }
 0x4f2   : > { %4002 = vmatmul.f32.gmra.mxu1 %v3877_v13  ;;  %4562 = vmatmul.f32.gmra.mxu3 %v4436_v51 }
 0x4f3   : > { %4241 = vmatmul.f32.gmra.mxu2 %v4115_v20  ;;  %5019 = vst [vmem:[%s7866_s26 + $0x40] sm:$0xff] %v4978_v32  ;;  %4877 = vmatmul.f32.gmra.mxu0 %v4436_v51  ;;  %v4439_v32 = vld [vmem:[#allocation2 + $0xef] sm:$0xff] }
 0x4f5   : > { %v4515_v54 = vpop.f32.mrf.mxu3 }
 0x4f6   : > { %v4194_v0 = vpop.f32.mrf.mxu2 }
 0x4f7   : > { %v3958_v11 = vpop.f32.mrf.mxu1  ;;  %v4338_v8 = vadd.f32 %v4194_v0, %v3955_v24  ;;  %v3880_v24 = vld [vmem:[#allocation2 + $0xed] sm:$0xff] }
 0x4f8   : > { %v4833_v56 = vpop.f32.mrf.mxu0 }
 0x4f9   : > { %v4979_v53 = vadd.f32 %v4833_v56, %v4658_v58  ;;  %v4659_v27 = vadd.f32 %v4515_v54, %v4338_v8  ;;  %v5096_v58 = vld [vmem:[#allocation3 + $0x210] sm:$0xff]  ;;  %v3881_v56 = vld [vmem:[#allocation2 + $0xf5] sm:$0xff] }
 0x4fa   : > { %4005 = vmatmul.f32.gmra.mxu1 %v3878_v61  ;;  %4565 = vmatmul.f32.gmra.mxu3 %v4437_v59  ;;  %v4440_v61 = vld [vmem:[#allocation2 + $0xf7] sm:$0xff] }
 0x4fb   : > { %4244 = vmatmul.f32.gmra.mxu2 %v4116_v21  ;;  %5020 = vst [vmem:[%s7866_s26 + $0x48] sm:$0xff] %v4979_v53  ;;  %4880 = vmatmul.f32.gmra.mxu0 %v4437_v59  ;;  %v4119_v53 = vld [vmem:[#allocation2 + $0xf6] sm:$0xff] }
 0x4fc   : > { %5123 = vmatpush.msrb.mxu1 %v5096_v58  ;;  %v3884_v58 = vld [vmem:[#allocation2 + $0x10d] sm:$0xff] }
 0x4fd   : > { %v4518_v60 = vpop.f32.mrf.mxu3 }
 0x4fe   : > { %v4197_v46 = vpop.f32.mrf.mxu2 }
 0x4ff   : > { %v3961_v31 = vpop.f32.mrf.mxu1  ;;  %v4339_v15 = vadd.f32 %v4197_v46, %v3958_v11 }
 0x500   : > { %v4836_v10 = vpop.f32.mrf.mxu0 }
 0x501   : > { %v4980_v6 = vadd.f32 %v4836_v10, %v4659_v27  ;;  %v4660_v52 = vadd.f32 %v4518_v60, %v4339_v15  ;;  %v4120_v10 = vld [vmem:[#allocation2 + $0xfe] sm:$0xff] }
 0x502   : > { %4008 = vmatmul.f32.gmra.mxu1 %v3879_v44  ;;  %4568 = vmatmul.f32.gmra.mxu3 %v4438_v63 }
 0x503   : > { %4247 = vmatmul.f32.gmra.mxu2 %v4117_v29  ;;  %5021 = vst [vmem:[%s7866_s26 + $0x50] sm:$0xff] %v4980_v6  ;;  %4883 = vmatmul.f32.gmra.mxu0 %v4438_v63  ;;  %v4441_v6 = vld [vmem:[#allocation2 + $0xff] sm:$0xff] }
 0x505   : > { %v4521_v50 = vpop.f32.mrf.mxu3 }
 0x506   : > { %v4200_v26 = vpop.f32.mrf.mxu2 }
 0x507   : > { %v3964_v43 = vpop.f32.mrf.mxu1  ;;  %v4340_v13 = vadd.f32 %v4200_v26, %v3961_v31  ;;  %v3882_v31 = vld [vmem:[#allocation2 + $0xfd] sm:$0xff] }
 0x508   : > { %v4839_v30 = vpop.f32.mrf.mxu0 }
 0x509   : > { %v4981_v35 = vadd.f32 %v4839_v30, %v4660_v52  ;;  %v4661_v34 = vadd.f32 %v4521_v50, %v4340_v13  ;;  %v4121_v30 = vld [vmem:[#allocation2 + $0x106] sm:$0xff] }
 0x50a   : > { %4011 = vmatmul.f32.gmra.mxu1 %v3880_v24  ;;  %4571 = vmatmul.f32.gmra.mxu3 %v4439_v32 }
 0x50b   : > { %4250 = vmatmul.f32.gmra.mxu2 %v4118_v40  ;;  %5022 = vst [vmem:[%s7866_s26 + $0x58] sm:$0xff] %v4981_v35  ;;  %4886 = vmatmul.f32.gmra.mxu0 %v4439_v32  ;;  %v4442_v35 = vld [vmem:[#allocation2 + $0x107] sm:$0xff] }
 0x50c   : > { %v5095_v40 = vld [vmem:[#allocation3 + $0x208] sm:$0xff] }
 0x50d   : > { %v4524_v51 = vpop.f32.mrf.mxu3  ;;  %5124 = vmatpush.msrb.mxu1 %v5095_v40 }
 0x50e   : > { %v4203_v20 = vpop.f32.mrf.mxu2 }
 0x50f   : > { %v3967_v0 = vpop.f32.mrf.mxu1  ;;  %v4341_v21 = vadd.f32 %v4203_v20, %v3964_v43  ;;  %v3883_v43 = vld [vmem:[#allocation2 + $0x105] sm:$0xff] }
 0x510   : > { %v4842_v54 = vpop.f32.mrf.mxu0 }
 0x511   : > { %v4982_v11 = vadd.f32 %v4842_v54, %v4661_v34  ;;  %v4662_v17 = vadd.f32 %v4524_v51, %v4341_v21 }
 0x512   : > { %4014 = vmatmul.f32.gmra.mxu1 %v3881_v56  ;;  %4574 = vmatmul.f32.gmra.mxu3 %v4440_v61  ;;  %v4443_v56 = vld [vmem:[#allocation2 + $0x10f] sm:$0xff] }
 0x513   : > { %4253 = vmatmul.f32.gmra.mxu2 %v4119_v53  ;;  %5023 = vst [vmem:[%s7866_s26 + $0x60] sm:$0xff] %v4982_v11  ;;  %4889 = vmatmul.f32.gmra.mxu0 %v4440_v61  ;;  %v4122_v11 = vld [vmem:[#allocation2 + $0x10e] sm:$0xff] }
 0x514   : > { %v5751_v61 = vld [vmem:[#allocation3 + $0x378] sm:$0xff] }
 0x515   : > { %v4527_v8 = vpop.f32.mrf.mxu3  ;;  %5752 = vmatpush.msra.mxu3 %v5751_v61 }
 0x516   : > { %v4206_v59 = vpop.f32.mrf.mxu2 }
 0x517   : > { %v3970_v46 = vpop.f32.mrf.mxu1  ;;  %v4342_v44 = vadd.f32 %v4206_v59, %v3967_v0  ;;  %v5430_v0 = vld [vmem:[#allocation3 + $0x2f8] sm:$0xff] }
 0x518   : > { %v4845_v60 = vpop.f32.mrf.mxu0  ;;  %5431 = vmatpush.msra.mxu2 %v5430_v0  ;;  %v5425_v0 = vld [vmem:[#allocation3 + $0x2d0] sm:$0xff] }
 0x519   : > { %v4983_v27 = vadd.f32 %v4845_v60, %v4662_v17  ;;  %v4663_v15 = vadd.f32 %v4527_v8, %v4342_v44  ;;  %v5429_v60 = vld [vmem:[#allocation3 + $0x2f0] sm:$0xff]  ;;  %v4444_v44 = vld [vmem:[#allocation2 + $0x117] sm:$0xff] }
 0x51a   : > { %4017 = vmatmul.f32.gmra.mxu1 %v3882_v31  ;;  %4577 = vmatmul.f32.gmra.mxu3 %v4441_v6 }
 0x51b   : > { %4256 = vmatmul.f32.gmra.mxu2 %v4120_v10  ;;  %5024 = vst [vmem:[%s7866_s26 + $0x68] sm:$0xff] %v4983_v27  ;;  %4892 = vmatmul.f32.gmra.mxu0 %v4441_v6  ;;  %v5750_v27 = vld [vmem:[#allocation3 + $0x370] sm:$0xff]  ;;  %v3885_v10 = vld [vmem:[#allocation2 + $0x115] sm:$0xff] }
 0x51c   : > { %v4123_v6 = vld [vmem:[#allocation2 + $0x116] sm:$0xff]  ;;  %5432 = vmatpush.msra.mxu2 %v5429_v60  ;;  %5753 = vmatpush.msra.mxu3 %v5750_v27 }
 0x51d   : > { %v4530_v63 = vpop.f32.mrf.mxu3 }
 0x51e   : > { %v4209_v29 = vpop.f32.mrf.mxu2 }
 0x51f   : > { %v3973_v26 = vpop.f32.mrf.mxu1  ;;  %v4343_v24 = vadd.f32 %v4209_v29, %v3970_v46 }
 0x520   : > { %v4848_v50 = vpop.f32.mrf.mxu0 }
 0x521   : > { %v4984_v52 = vadd.f32 %v4848_v50, %v4663_v15  ;;  %v4664_v20 = vadd.f32 %v4530_v63, %v4343_v24  ;;  %v5428_v63 = vld [vmem:[#allocation3 + $0x2e8] sm:$0xff]  ;;  %v5748_v50 = vld [vmem:[#allocation3 + $0x360] sm:$0xff] }
 0x522   : > { %4020 = vmatmul.f32.gmra.mxu1 %v3883_v43  ;;  %4580 = vmatmul.f32.gmra.mxu3 %v4442_v35  ;;  %v5749_v15 = vld [vmem:[#allocation3 + $0x368] sm:$0xff]  ;;  %v5426_v43 = vld [vmem:[#allocation3 + $0x2d8] sm:$0xff] }
 0x523   : > { %4259 = vmatmul.f32.gmra.mxu2 %v4121_v30  ;;  %5025 = vst [vmem:[%s7866_s26 + $0x70] sm:$0xff] %v4984_v52  ;;  %4895 = vmatmul.f32.gmra.mxu0 %v4442_v35  ;;  %v5747_v30 = vld [vmem:[#allocation3 + $0x358] sm:$0xff] }
 0x524   : > { %5433 = vmatpush.msra.mxu2 %v5428_v63  ;;  %5754 = vmatpush.msra.mxu3 %v5749_v15  ;;  %v5743_v63 = vld [vmem:[#allocation3 + $0x338] sm:$0xff]  ;;  %v4446_v15 = vld [vmem:[#allocation2 + $0x127] sm:$0xff] }
 0x525   : > { %v4533_v13 = vpop.f32.mrf.mxu3 }
 0x526   : > { %v4212_v32 = vpop.f32.mrf.mxu2  ;;  %5755 = vmatpush.msra.mxu3 %v5748_v50  ;;  %v5421_v50 = vld [vmem:[#allocation3 + $0x2b0] sm:$0xff] }
 0x527   : > { %v3976_v51 = vpop.f32.mrf.mxu1  ;;  %v4344_v53 = vadd.f32 %v4212_v32, %v3973_v26  ;;  %v5427_v26 = vld [vmem:[#allocation3 + $0x2e0] sm:$0xff] }
 0x528   : > { %v4851_v34 = vpop.f32.mrf.mxu0  ;;  %5434 = vmatpush.msra.mxu2 %v5427_v26  ;;  %5756 = vmatpush.msra.mxu3 %v5747_v30  ;;  %v6069_v30 = vld [vmem:[#allocation3 + $0x3e0] sm:$0xff] }
 0x529   : > { %v4985_v54 = vadd.f32 %v4851_v34, %v4664_v20  ;;  %v4665_v8 = vadd.f32 %v4533_v13, %v4344_v53  ;;  %v3886_v13 = vld [vmem:[#allocation2 + $0x11d] sm:$0xff] }
 0x52a   : > { %4023 = vmatmul.f32.gmra.mxu1 %v3884_v58  ;;  %4583 = vmatmul.f32.gmra.mxu3 %v4443_v56  ;;  %v5094_v20 = vld [vmem:[#allocation3 + $0x200] sm:$0xff]  ;;  %v5745_v53 = vld [vmem:[#allocation3 + $0x348] sm:$0xff] }
 0x52b   : > { %4262 = vmatmul.f32.gmra.mxu2 %v4122_v11  ;;  %5026 = vst [vmem:[%s7866_s26 + $0x78] sm:$0xff] %v4985_v54  ;;  %4898 = vmatmul.f32.gmra.mxu0 %v4443_v56  ;;  %v4124_v34 = vld [vmem:[#allocation2 + $0x11e] sm:$0xff]  ;;  %v5746_v54 = vld [vmem:[#allocation3 + $0x350] sm:$0xff] }
 0x52c   : > { %5435 = vmatpush.msra.mxu2 %v5426_v43  ;;  %5125 = vmatpush.msrb.mxu1 %v5094_v20  ;;  %v4445_v58 = vld [vmem:[#allocation2 + $0x11f] sm:$0xff]  ;;  %v6068_v20 = vld [vmem:[#allocation3 + $0x3d8] sm:$0xff] }
 0x52d   : > { %v4536_v59 = vpop.f32.mrf.mxu3  ;;  %v5424_v56 = vld [vmem:[#allocation3 + $0x2c8] sm:$0xff]  ;;  %5757 = vmatpush.msra.mxu3 %v5746_v54 }
 0x52e   : > { %v4215_v21 = vpop.f32.mrf.mxu2  ;;  %5436 = vmatpush.msra.mxu2 %v5425_v0  ;;  %v6070_v43 = vld [vmem:[#allocation3 + $0x3e8] sm:$0xff]  ;;  %v3888_v0 = vld [vmem:[#allocation2 + $0x12d] sm:$0xff] }
 0x52f   : > { %v3979_v17 = vpop.f32.mrf.mxu1  ;;  %v4345_v29 = vadd.f32 %v4215_v21, %v3976_v51  ;;  %v5423_v21 = vld [vmem:[#allocation3 + $0x2c0] sm:$0xff]  ;;  %5758 = vmatpush.msra.mxu3 %v5745_v53  ;;  %v4447_v53 = vld [vmem:[#allocation2 + $0x12f] sm:$0xff] }
 0x530   : > { %v4854_v46 = vpop.f32.mrf.mxu0  ;;  %5437 = vmatpush.msra.mxu2 %v5424_v56  ;;  %v5740_v56 = vld [vmem:[#allocation3 + $0x320] sm:$0xff] }
 0x531   : > { %v4986_v31 = vadd.f32 %v4854_v46, %v4665_v8  ;;  %v4666_v24 = vadd.f32 %v4536_v59, %v4345_v29  ;;  %v5744_v59 = vld [vmem:[#allocation3 + $0x340] sm:$0xff]  ;;  %v6072_v8 = vld [vmem:[#allocation3 + $0x3f8] sm:$0xff] }
 0x532   : > { %4026 = vmatmul.f32.gmra.mxu1 %v3885_v10  ;;  %4586 = vmatmul.f32.gmra.mxu3 %v4444_v44  ;;  %v6071_v10 = vld [vmem:[#allocation3 + $0x3f0] sm:$0xff]  ;;  %v5422_v29 = vld [vmem:[#allocation3 + $0x2b8] sm:$0xff] }
 0x533   : > { %4265 = vmatmul.f32.gmra.mxu2 %v4123_v6  ;;  %5027 = vst [vmem:[%s7866_s26 + $0x80] sm:$0xff] %v4986_v31  ;;  %4901 = vmatmul.f32.gmra.mxu0 %v4444_v44  ;;  %v4125_v44 = vld [vmem:[#allocation2 + $0x126] sm:$0xff] }
 0x534   : > { %6073 = vmatpush.msra.mxu0 %v6072_v8  ;;  %5438 = vmatpush.msra.mxu2 %v5423_v21  ;;  %v5739_v8 = vld [vmem:[#allocation3 + $0x318] sm:$0xff] }
 0x535   : > { %v4539_v35 = vpop.f32.mrf.mxu3  ;;  %5759 = vmatpush.msra.mxu3 %v5744_v59  ;;  %v5418_v59 = vld [vmem:[#allocation3 + $0x298] sm:$0xff] }
 0x536   : > { %v4218_v52 = vpop.f32.mrf.mxu2  ;;  %6074 = vmatpush.msra.mxu0 %v6071_v10  ;;  %5439 = vmatpush.msra.mxu2 %v5422_v29  ;;  %v6393_v10 = vld [vmem:[#allocation3 + $0x478] sm:$0xff] }
 0x537   : > { %v3982_v40 = vpop.f32.mrf.mxu1  ;;  %v4346_v11 = vadd.f32 %v4218_v52, %v3979_v17  ;;  %v3887_v17 = vld [vmem:[#allocation2 + $0x125] sm:$0xff]  ;;  %5760 = vmatpush.msra.mxu3 %v5743_v63  ;;  %6394 = vmatpush.msra.mxu1 %v6393_v10 }
 0x538   : > { %v4857_v32 = vpop.f32.mrf.mxu0  ;;  %v5742_v52 = vld [vmem:[#allocation3 + $0x330] sm:$0xff]  ;;  %6075 = vmatpush.msra.mxu0 %v6070_v43  ;;  %5440 = vmatpush.msra.mxu2 %v5421_v50  ;;  %v4127_v50 = vld [vmem:[#allocation2 + $0x136] sm:$0xff]  ;;  %v5737_v43 = vld [vmem:[#allocation3 + $0x308] sm:$0xff] }
 0x539   : > { %v4987_v51 = vadd.f32 %v4857_v32, %v4666_v24  ;;  %v4667_v60 = vadd.f32 %v4539_v35, %v4346_v11  ;;  %v5420_v24 = vld [vmem:[#allocation3 + $0x2a8] sm:$0xff]  ;;  %5761 = vmatpush.msra.mxu3 %v5742_v52  ;;  %v5419_v11 = vld [vmem:[#allocation3 + $0x2a0] sm:$0xff] }
 0x53a   : > { %4029 = vmatmul.f32.gmra.mxu1 %v3886_v13  ;;  %4589 = vmatmul.f32.gmra.mxu3 %v4445_v58  ;;  %v5741_v32 = vld [vmem:[#allocation3 + $0x328] sm:$0xff] }
 0x53b   : > { %4268 = vmatmul.f32.gmra.mxu2 %v4124_v34  ;;  %5028 = vst [vmem:[%s7866_s26 + $0x88] sm:$0xff] %v4987_v51  ;;  %4904 = vmatmul.f32.gmra.mxu0 %v4445_v58  ;;  %v4126_v58 = vld [vmem:[#allocation2 + $0x12e] sm:$0xff]  ;;  %v5416_v52 = vld [vmem:[#allocation3 + $0x288] sm:$0xff] }
 0x53c   : > { %6076 = vmatpush.msra.mxu0 %v6069_v30  ;;  %5441 = vmatpush.msra.mxu2 %v5420_v24  ;;  %v4448_v30 = vld [vmem:[#allocation2 + $0x137] sm:$0xff] }
 0x53d   : > { %v4542_v46 = vpop.f32.mrf.mxu3  ;;  %5762 = vmatpush.msra.mxu3 %v5741_v32  ;;  %v5415_v32 = vld [vmem:[#allocation3 + $0x280] sm:$0xff] }
 0x53e   : > { %v4221_v61 = vpop.f32.mrf.mxu2  ;;  %6077 = vmatpush.msra.mxu0 %v6068_v20  ;;  %5442 = vmatpush.msra.mxu2 %v5419_v11  ;;  %v6063_v20 = vld [vmem:[#allocation3 + $0x3b0] sm:$0xff] }
 0x53f   : > { %v3985_v27 = vpop.f32.mrf.mxu1  ;;  %v4347_v26 = vadd.f32 %v4221_v61, %v3982_v40  ;;  %v6067_v61 = vld [vmem:[#allocation3 + $0x3d0] sm:$0xff]  ;;  %5763 = vmatpush.msra.mxu3 %v5740_v56  ;;  %v3890_v56 = vld [vmem:[#allocation2 + $0x13d] sm:$0xff] }
 0x540   : > { %v4860_v31 = vpop.f32.mrf.mxu0  ;;  %6078 = vmatpush.msra.mxu0 %v6067_v61  ;;  %5443 = vmatpush.msra.mxu2 %v5418_v59  ;;  %v6061_v61 = vld [vmem:[#allocation3 + $0x3a0] sm:$0xff] }
 0x541   : > { %v4988_v6 = vadd.f32 %v4860_v31, %v4667_v60  ;;  %v4668_v51 = vadd.f32 %v4542_v46, %v4347_v26  ;;  %v6066_v46 = vld [vmem:[#allocation3 + $0x3c8] sm:$0xff]  ;;  %v5417_v31 = vld [vmem:[#allocation3 + $0x290] sm:$0xff]  ;;  %5764 = vmatpush.msra.mxu3 %v5739_v8  ;;  %v6060_v8 = vld [vmem:[#allocation3 + $0x398] sm:$0xff] }
 0x542   : > { %4032 = vmatmul.f32.gmra.mxu1 %v3887_v17  ;;  %4592 = vmatmul.f32.gmra.mxu3 %v4446_v15  ;;  %v5738_v17 = vld [vmem:[#allocation3 + $0x310] sm:$0xff] }
 0x543   : > { %4271 = vmatmul.f32.gmra.mxu2 %v4125_v44  ;;  %5029 = vst [vmem:[%s7866_s26 + $0x90] sm:$0xff] %v4988_v6  ;;  %4907 = vmatmul.f32.gmra.mxu0 %v4446_v15  ;;  %v6065_v44 = vld [vmem:[#allocation3 + $0x3c0] sm:$0xff] }
 0x544   : > { %6079 = vmatpush.msra.mxu0 %v6066_v46  ;;  %v3889_v15 = vld [vmem:[#allocation2 + $0x135] sm:$0xff]  ;;  %5444 = vmatpush.msra.mxu2 %v5417_v31 }
 0x545   : > { %v4545_v13 = vpop.f32.mrf.mxu3  ;;  %5765 = vmatpush.msra.mxu3 %v5738_v17 }
 0x546   : > { %v4224_v35 = vpop.f32.mrf.mxu2  ;;  %6080 = vmatpush.msra.mxu0 %v6065_v44  ;;  %5445 = vmatpush.msra.mxu2 %v5416_v52  ;;  %v6057_v52 = vld [vmem:[#allocation3 + $0x380] sm:$0xff] }
 0x547   : > { %v3988_v34 = vpop.f32.mrf.mxu1  ;;  %v4348_v21 = vadd.f32 %v4224_v35, %v3985_v27  ;;  %v6064_v35 = vld [vmem:[#allocation3 + $0x3b8] sm:$0xff]  ;;  %5766 = vmatpush.msra.mxu3 %v5737_v43  ;;  %v6392_v43 = vld [vmem:[#allocation3 + $0x470] sm:$0xff] }
 0x548   : > { %v4863_v40 = vpop.f32.mrf.mxu0  ;;  %6081 = vmatpush.msra.mxu0 %v6064_v35  ;;  %5446 = vmatpush.msra.mxu2 %v5415_v32 }
 0x549   : > { %v4989_v54 = vadd.f32 %v4863_v40, %v4668_v51  ;;  %v4669_v29 = vadd.f32 %v4545_v13, %v4348_v21  ;;  %v5736_v13 = vld [vmem:[#allocation3 + $0x300] sm:$0xff]  ;;  %6395 = vmatpush.msra.mxu1 %v6392_v43 }
 0x54a   : > { %4035 = vmatmul.f32.gmra.mxu1 %v3888_v0  ;;  %4595 = vmatmul.f32.gmra.mxu3 %v4447_v53  ;;  %v6062_v0 = vld [vmem:[#allocation3 + $0x3a8] sm:$0xff] }
 0x54b   : > { %4274 = vmatmul.f32.gmra.mxu2 %v4126_v58  ;;  %5030 = vst [vmem:[%s7866_s26 + $0x98] sm:$0xff] %v4989_v54  ;;  %4910 = vmatmul.f32.gmra.mxu0 %v4447_v53  ;;  %v4128_v53 = vld [vmem:[#allocation2 + $0x13e] sm:$0xff] }
 0x54c   : > { %5767 = vmatpush.msra.mxu3 %v5736_v13  ;;  %6082 = vmatpush.msra.mxu0 %v6063_v20  ;;  %v4449_v21 = vld [vmem:[#allocation2 + $0x13f] sm:$0xff] }
 0x54d   : > { %v4548_v6 = vpop.f32.mrf.mxu3 }
 0x54e   : > { %v4227_v60 = vpop.f32.mrf.mxu2  ;;  %6083 = vmatpush.msra.mxu0 %v6062_v0  ;;  %v4770_v0 = vld [vmem:[#allocation2 + $0x14f] sm:$0xff] }
 0x54f   : > { %v3991_v63 = vpop.f32.mrf.mxu1  ;;  %v4349_v24 = vadd.f32 %v4227_v60, %v3988_v34  ;;  %v6059_v60 = vld [vmem:[#allocation3 + $0x390] sm:$0xff] }
 0x550   : > { %v4866_v27 = vpop.f32.mrf.mxu0  ;;  %6084 = vmatpush.msra.mxu0 %v6061_v61 }
 0x551   : > { %v4990_v26 = vadd.f32 %v4866_v27, %v4669_v29  ;;  %v4670_v54 = vadd.f32 %v4548_v6, %v4349_v24  ;;  %v3891_v29 = vld [vmem:[#allocation2 + $0x145] sm:$0xf] }
 0x552   : > { %4038 = vmatmul.f32.gmra.mxu1 %v3889_v15  ;;  %4598 = vmatmul.f32.gmra.mxu3 %v4448_v30  ;;  %v4129_v27 = vld [vmem:[#allocation2 + $0x146] sm:$0xf] }
 0x553   : > { %4277 = vmatmul.f32.gmra.mxu2 %v4127_v50  ;;  %5031 = vst [vmem:[%s7866_s26 + $0xa0] sm:$0xff] %v4990_v26  ;;  %4913 = vmatmul.f32.gmra.mxu0 %v4448_v30  ;;  %v6058_v15 = vld [vmem:[#allocation3 + $0x388] sm:$0xff] }
 0x554   : > { %6085 = vmatpush.msra.mxu0 %v6060_v8  ;;  %v4769_v26 = vld [vmem:[#allocation2 + $0x147] sm:$0xff] }
 0x555   : > { %v4551_v40 = vpop.f32.mrf.mxu3  ;;  %v5374_v8 = vld [vmem:[#allocation2 + $0x21] sm:$0xff] }
 0x556   : > { %v4230_v51 = vpop.f32.mrf.mxu2  ;;  %6086 = vmatpush.msra.mxu0 %v6059_v60  ;;  %v5695_v60 = vld [vmem:[#allocation2 + $0x31] sm:$0xff] }
 0x557   : > { %v3994_v58 = vpop.f32.mrf.mxu1  ;;  %v4350_v59 = vadd.f32 %v4230_v51, %v3991_v63  ;;  %v4450_v63 = vld [vmem:[#allocation2 + $0x147] sm:$0xf]  ;;  %v5052_v51 = vld [vmem:[#allocation2 + $0x18] sm:$0xff] }
 0x558   : > { %v4869_v11 = vpop.f32.mrf.mxu0  ;;  %6087 = vmatpush.msra.mxu0 %v6058_v15 }
 0x559   : > { %v4991_v34 = vadd.f32 %v4869_v11, %v4670_v54  ;;  %v4671_v17 = vadd.f32 %v4551_v40, %v4350_v59  ;;  %v5373_v40 = vld [vmem:[#allocation2 + $0x19] sm:$0xff]  ;;  %v5694_v54 = vld [vmem:[#allocation2 + $0x29] sm:$0xff] }
 0x55a   : > { %4041 = vmatmul.f32.gmra.mxu1 %v3890_v56  ;;  %4601 = vmatmul.f32.gmra.mxu3 %v4449_v21  ;;  %v5053_v59 = vld [vmem:[#allocation2 + $0x20] sm:$0xff] }
 0x55b   : > { %4280 = vmatmul.f32.gmra.mxu2 %v4128_v53  ;;  %5032 = vst [vmem:[%s7866_s26 + $0xa8] sm:$0xff] %v4991_v34  ;;  %4916 = vmatmul.f32.gmra.mxu0 %v4449_v21 }
 0x55c   : > { %6088 = vmatpush.msra.mxu0 %v6057_v52 }
 0x55d   : > { %v4554_v31 = vpop.f32.mrf.mxu3 }
 0x55e   : > { %v4233_v46 = vpop.f32.mrf.mxu2 }
 0x55f   : > { %v3997_v10 = vpop.f32.mrf.mxu1  ;;  %v4351_v50 = vadd.f32 %v4233_v46, %v3994_v58  ;;  %v4771_v46 = vld [vmem:[#allocation2 + $0x157] sm:$0xf] }
 0x560   : > { %v4872_v6 = vpop.f32.mrf.mxu0 }
 0x561   : > { %v4992_v44 = vadd.f32 %v4872_v6, %v4671_v17  ;;  %v4672_v24 = vadd.f32 %v4554_v31, %v4351_v50  ;;  %v6391_v17 = vld [vmem:[#allocation3 + $0x468] sm:$0xff]  ;;  %v6015_v50 = vld [vmem:[#allocation2 + $0x2a] sm:$0xff] }
 0x562   : > { %4044 = vmatmul.f32.gmra.mxu1 %v3891_v29  ;;  %4604 = vmatmul.f32.gmra.mxu3 %v4450_v63  ;;  %v5054_v63 = vld [vmem:[#allocation2 + $0x28] sm:$0xff] }
 0x563   : > { %4283 = vmatmul.f32.gmra.mxu2 %v4129_v27  ;;  %5033 = vst [vmem:[%s7866_s26 + $0xb0] sm:$0xff] %v4992_v44  ;;  %4919 = vmatmul.f32.gmra.mxu0 %v4769_v26  ;;  %v5696_v26 = vld [vmem:[#allocation2 + $0x39] sm:$0xff] }
 0x564   : > { %6396 = vmatpush.msra.mxu1 %v6391_v17 }
 0x565   : > { %v4557_v35 = vpop.f32.mrf.mxu3 }
 0x566   : > { %v4236_v30 = vpop.f32.mrf.mxu2 }
 0x567   : > { %v4000_v32 = vpop.f32.mrf.mxu1  ;;  %v4352_v58 = vadd.f32 %v4236_v30, %v3997_v10 }
 0x568   : > { %v4875_v13 = vpop.f32.mrf.mxu0 }
 0x569   : > { %v4993_v20 = vadd.f32 %v4875_v13, %v4672_v24  ;;  %v4673_v56 = vadd.f32 %v4557_v35, %v4352_v58 }
 0x56a   : > { %5126 = vmatmul.f32.vlgmr.msrb.gmra.mxu1 %v5052_v51  ;;  %5768 = vmatmul.f32.vlgmr.msra.gmra.mxu3 %v5694_v54  ;;  %v5697_v51 = vld [vmem:[#allocation2 + $0x41] sm:$0xff] }
 0x56b   : > { %5447 = vmatmul.f32.vlgmr.msra.gmra.mxu2 %v5373_v40  ;;  %5034 = vst [vmem:[%s7866_s26 + $0xb8] sm:$0xff] %v4993_v20  ;;  %4922 = vmatmul.f32.gmra.mxu0 %v4770_v0  ;;  %v5055_v20 = vld [vmem:[#allocation2 + $0x30] sm:$0xff] }
 0x56c   : > { %v6016_v40 = vld [vmem:[#allocation2 + $0x32] sm:$0xff] }
 0x56d   : > { %v4560_v34 = vpop.f32.mrf.mxu3 }
 0x56e   : > { %v4239_v11 = vpop.f32.mrf.mxu2 }
 0x56f   : > { %v4003_v53 = vpop.f32.mrf.mxu1  ;;  %v4353_v31 = vadd.f32 %v4239_v11, %v4000_v32 }
 0x570   : > { %v4878_v61 = vpop.f32.mrf.mxu0 }
 0x571   : > { %v4994_v21 = vadd.f32 %v4878_v61, %v4673_v56  ;;  %v4674_v44 = vadd.f32 %v4560_v34, %v4353_v31  ;;  %v5056_v61 = vld [vmem:[#allocation2 + $0x38] sm:$0xff] }
 0x572   : > { %5129 = vmatmul.f32.gmra.mxu1 %v5053_v59  ;;  %5771 = vmatmul.f32.gmra.mxu3 %v5695_v60  ;;  %v6017_v59 = vld [vmem:[#allocation2 + $0x3a] sm:$0xff] }
 0x573   : > { %5450 = vmatmul.f32.gmra.mxu2 %v5374_v8  ;;  %5035 = vst [vmem:[%s7866_s26 + $0xc0] sm:$0xff] %v4994_v21  ;;  %4925 = vmatmul.f32.gmra.mxu0 %v4771_v46  ;;  %v5698_v21 = vld [vmem:[#allocation2 + $0x49] sm:$0xff]  ;;  %v6390_v46 = vld [vmem:[#allocation3 + $0x460] sm:$0xff] }
 0x574   : > { %6397 = vmatpush.msra.mxu1 %v6390_v46 }
 0x575   : > { %v4563_v6 = vpop.f32.mrf.mxu3 }
 0x576   : > { %v4242_v10 = vpop.f32.mrf.mxu2 }
 0x577   : > { %v4006_v29 = vpop.f32.mrf.mxu1  ;;  %v4354_v52 = vadd.f32 %v4242_v10, %v4003_v53 }
 0x578   : > { %v4881_v27 = vpop.f32.mrf.mxu0 }
 0x579   : > { %v4995_v15 = vadd.f32 %v4881_v27, %v4674_v44  ;;  %v4675_v35 = vadd.f32 %v4563_v6, %v4354_v52  ;;  %v5699_v27 = vld [vmem:[#allocation2 + $0x51] sm:$0xff] }
 0x57a   : > { %5132 = vmatmul.f32.gmra.mxu1 %v5054_v63  ;;  %5774 = vmatmul.f32.gmra.mxu3 %v5696_v26 }
 0x57b   : > { %5453 = vmatmul.f32.gmra.mxu2 %v5694_v54  ;;  %5036 = vst [vmem:[%s7866_s26 + $0xc8] sm:$0xff] %v4995_v15  ;;  %6089 = vmatmul.f32.vlgmr.msra.gmra.mxu0 %v6015_v50  ;;  %v6018_v15 = vld [vmem:[#allocation2 + $0x42] sm:$0xff] }
 0x57d   : > { %v4566_v30 = vpop.f32.mrf.mxu3 }
 0x57e   : > { %v4245_v43 = vpop.f32.mrf.mxu2 }
 0x57f   : > { %v4009_v24 = vpop.f32.mrf.mxu1  ;;  %v4355_v0 = vadd.f32 %v4245_v43, %v4006_v29  ;;  %v5057_v29 = vld [vmem:[#allocation2 + $0x40] sm:$0xff] }
 0x580   : > { %v4884_v32 = vpop.f32.mrf.mxu0 }
 0x581   : > { %v4996_v13 = vadd.f32 %v4884_v32, %v4675_v35  ;;  %v4676_v11 = vadd.f32 %v4566_v30, %v4355_v0  ;;  %v5700_v32 = vld [vmem:[#allocation2 + $0x59] sm:$0xff] }
 0x582   : > { %5135 = vmatmul.f32.gmra.mxu1 %v5055_v20  ;;  %5777 = vmatmul.f32.gmra.mxu3 %v5697_v51 }
 0x583   : > { %5456 = vmatmul.f32.gmra.mxu2 %v5695_v60  ;;  %5037 = vst [vmem:[%s7866_s26 + $0xd0] sm:$0xff] %v4996_v13  ;;  %6092 = vmatmul.f32.gmra.mxu0 %v6016_v40  ;;  %v6019_v13 = vld [vmem:[#allocation2 + $0x4a] sm:$0xff] }
 0x585   : > { %v4569_v58 = vpop.f32.mrf.mxu3 }
 0x586   : > { %v4248_v54 = vpop.f32.mrf.mxu2 }
 0x587   : > { %v4012_v34 = vpop.f32.mrf.mxu1  ;;  %v4356_v8 = vadd.f32 %v4248_v54, %v4009_v24  ;;  %v5058_v24 = vld [vmem:[#allocation2 + $0x48] sm:$0xff] }
 0x588   : > { %v4887_v56 = vpop.f32.mrf.mxu0 }
 0x589   : > { %v4997_v53 = vadd.f32 %v4887_v56, %v4676_v11  ;;  %v4677_v17 = vadd.f32 %v4569_v58, %v4356_v8  ;;  %v5059_v56 = vld [vmem:[#allocation2 + $0x50] sm:$0xff] }
 0x58a   : > { %5138 = vmatmul.f32.gmra.mxu1 %v5056_v61  ;;  %5780 = vmatmul.f32.gmra.mxu3 %v5698_v21  ;;  %v6020_v61 = vld [vmem:[#allocation2 + $0x52] sm:$0xff] }
 0x58b   : > { %5459 = vmatmul.f32.gmra.mxu2 %v5696_v26  ;;  %5038 = vst [vmem:[%s7866_s26 + $0xd8] sm:$0xff] %v4997_v53  ;;  %6095 = vmatmul.f32.gmra.mxu0 %v6017_v59  ;;  %v5701_v53 = vld [vmem:[#allocation2 + $0x61] sm:$0xff] }
 0x58d   : > { %v4572_v31 = vpop.f32.mrf.mxu3 }
 0x58e   : > { %v4251_v60 = vpop.f32.mrf.mxu2 }
 0x58f   : > { %v4015_v10 = vpop.f32.mrf.mxu1  ;;  %v4357_v63 = vadd.f32 %v4251_v60, %v4012_v34 }
 0x590   : > { %v4890_v6 = vpop.f32.mrf.mxu0 }
 0x591   : > { %v4998_v44 = vadd.f32 %v4890_v6, %v4677_v17  ;;  %v4678_v52 = vadd.f32 %v4572_v31, %v4357_v63  ;;  %v5702_v6 = vld [vmem:[#allocation2 + $0x69] sm:$0xff] }
 0x592   : > { %5141 = vmatmul.f32.gmra.mxu1 %v5057_v29  ;;  %5783 = vmatmul.f32.gmra.mxu3 %v5699_v27 }
 0x593   : > { %5462 = vmatmul.f32.gmra.mxu2 %v5697_v51  ;;  %5039 = vst [vmem:[%s7866_s26 + $0xe0] sm:$0xff] %v4998_v44  ;;  %6098 = vmatmul.f32.gmra.mxu0 %v6018_v15  ;;  %v6389_v51 = vld [vmem:[#allocation3 + $0x458] sm:$0xff]  ;;  %v6021_v44 = vld [vmem:[#allocation2 + $0x5a] sm:$0xff] }
 0x594   : > { %6398 = vmatpush.msra.mxu1 %v6389_v51 }
 0x595   : > { %v4575_v50 = vpop.f32.mrf.mxu3 }
 0x596   : > { %v4254_v26 = vpop.f32.mrf.mxu2 }
 0x597   : > { %v4018_v43 = vpop.f32.mrf.mxu1  ;;  %v4358_v20 = vadd.f32 %v4254_v26, %v4015_v10  ;;  %v5060_v10 = vld [vmem:[#allocation2 + $0x58] sm:$0xff] }
 0x598   : > { %v4893_v30 = vpop.f32.mrf.mxu0 }
 0x599   : > { %v4999_v35 = vadd.f32 %v4893_v30, %v4678_v52  ;;  %v4679_v54 = vadd.f32 %v4575_v50, %v4358_v20  ;;  %v5703_v30 = vld [vmem:[#allocation2 + $0x71] sm:$0xff] }
 0x59a   : > { %5144 = vmatmul.f32.gmra.mxu1 %v5058_v24  ;;  %5786 = vmatmul.f32.gmra.mxu3 %v5700_v32 }
 0x59b   : > { %5465 = vmatmul.f32.gmra.mxu2 %v5698_v21  ;;  %5040 = vst [vmem:[%s7866_s26 + $0xe8] sm:$0xff] %v4999_v35  ;;  %6101 = vmatmul.f32.gmra.mxu0 %v6019_v13  ;;  %v6022_v35 = vld [vmem:[#allocation2 + $0x62] sm:$0xff] }
 0x59d   : > { %v4578_v0 = vpop.f32.mrf.mxu3 }
 0x59e   : > { %v4257_v40 = vpop.f32.mrf.mxu2 }
 0x59f   : > { %v4021_v58 = vpop.f32.mrf.mxu1  ;;  %v4359_v21 = vadd.f32 %v4257_v40, %v4018_v43  ;;  %v5061_v43 = vld [vmem:[#allocation2 + $0x60] sm:$0xff] }
 0x5a0   : > { %v4896_v11 = vpop.f32.mrf.mxu0 }
 0x5a1   : > { %v5000_v34 = vadd.f32 %v4896_v11, %v4679_v54  ;;  %v4680_v46 = vadd.f32 %v4578_v0, %v4359_v21  ;;  %v5704_v11 = vld [vmem:[#allocation2 + $0x79] sm:$0xff] }
 0x5a2   : > { %5147 = vmatmul.f32.gmra.mxu1 %v5059_v56  ;;  %5789 = vmatmul.f32.gmra.mxu3 %v5701_v53 }
 0x5a3   : > { %5468 = vmatmul.f32.gmra.mxu2 %v5699_v27  ;;  %5041 = vst [vmem:[%s7866_s26 + $0xf0] sm:$0xff] %v5000_v34  ;;  %6104 = vmatmul.f32.gmra.mxu0 %v6020_v61  ;;  %v6023_v34 = vld [vmem:[#allocation2 + $0x6a] sm:$0xff] }
 0x5a5   : > { %v4581_v8 = vpop.f32.mrf.mxu3 }
 0x5a6   : > { %v4260_v59 = vpop.f32.mrf.mxu2 }
 0x5a7   : > { %v4024_v60 = vpop.f32.mrf.mxu1  ;;  %v4360_v29 = vadd.f32 %v4260_v59, %v4021_v58  ;;  %v5062_v58 = vld [vmem:[#allocation2 + $0x68] sm:$0xff] }
 0x5a8   : > { %v4899_v31 = vpop.f32.mrf.mxu0 }
 0x5a9   : > { %v5001_v17 = vadd.f32 %v4899_v31, %v4680_v46  ;;  %v4681_v63 = vadd.f32 %v4581_v8, %v4360_v29  ;;  %v5705_v31 = vld [vmem:[#allocation2 + $0x81] sm:$0xff] }
 0x5aa   : > { %5150 = vmatmul.f32.gmra.mxu1 %v5060_v10  ;;  %5792 = vmatmul.f32.gmra.mxu3 %v5702_v6 }
 0x5ab   : > { %5471 = vmatmul.f32.gmra.mxu2 %v5700_v32  ;;  %5042 = vst [vmem:[%s7866_s26 + $0xf8] sm:$0xff] %v5001_v17  ;;  %6107 = vmatmul.f32.gmra.mxu0 %v6021_v44  ;;  %v6388_v32 = vld [vmem:[#allocation3 + $0x450] sm:$0xff]  ;;  %v6024_v17 = vld [vmem:[#allocation2 + $0x72] sm:$0xff] }
 0x5ac   : > { %6399 = vmatpush.msra.mxu1 %v6388_v32 }
 0x5ad   : > { %v4584_v15 = vpop.f32.mrf.mxu3 }
 0x5ae   : > { %v4263_v27 = vpop.f32.mrf.mxu2 }
 0x5af   : > { %v4027_v26 = vpop.f32.mrf.mxu1  ;;  %v4361_v24 = vadd.f32 %v4263_v27, %v4024_v60  ;;  %v5063_v60 = vld [vmem:[#allocation2 + $0x70] sm:$0xff] }
 0x5b0   : > { %v4902_v50 = vpop.f32.mrf.mxu0 }
 0x5b1   : > { %v5002_v52 = vadd.f32 %v4902_v50, %v4681_v63  ;;  %v4682_v51 = vadd.f32 %v4584_v15, %v4361_v24  ;;  %v5706_v50 = vld [vmem:[#allocation2 + $0x89] sm:$0xff] }
 0x5b2   : > { %5153 = vmatmul.f32.gmra.mxu1 %v5061_v43  ;;  %5795 = vmatmul.f32.gmra.mxu3 %v5703_v30 }
 0x5b3   : > { %5474 = vmatmul.f32.gmra.mxu2 %v5701_v53  ;;  %5043 = vst [vmem:[%s7866_s26 + $0x100] sm:$0xff] %v5002_v52  ;;  %6110 = vmatmul.f32.gmra.mxu0 %v6022_v35  ;;  %v6025_v52 = vld [vmem:[#allocation2 + $0x7a] sm:$0xff] }
 0x5b5   : > { %v4587_v20 = vpop.f32.mrf.mxu3 }
 0x5b6   : > { %v4266_v13 = vpop.f32.mrf.mxu2 }
 0x5b7   : > { %v4030_v40 = vpop.f32.mrf.mxu1  ;;  %v4362_v56 = vadd.f32 %v4266_v13, %v4027_v26  ;;  %v5064_v26 = vld [vmem:[#allocation2 + $0x78] sm:$0xff] }
 0x5b8   : > { %v4905_v0 = vpop.f32.mrf.mxu0 }
 0x5b9   : > { %v5003_v54 = vadd.f32 %v4905_v0, %v4682_v51  ;;  %v4683_v21 = vadd.f32 %v4587_v20, %v4362_v56  ;;  %v5065_v51 = vld [vmem:[#allocation2 + $0x80] sm:$0xff] }
 0x5ba   : > { %5156 = vmatmul.f32.gmra.mxu1 %v5062_v58  ;;  %5798 = vmatmul.f32.gmra.mxu3 %v5704_v11  ;;  %v6026_v0 = vld [vmem:[#allocation2 + $0x82] sm:$0xff] }
 0x5bb   : > { %5477 = vmatmul.f32.gmra.mxu2 %v5702_v6  ;;  %5044 = vst [vmem:[%s7866_s26 + $0x108] sm:$0xff] %v5003_v54  ;;  %6113 = vmatmul.f32.gmra.mxu0 %v6023_v34  ;;  %v6387_v58 = vld [vmem:[#allocation3 + $0x448] sm:$0xff] }
 0x5bc   : > { %6400 = vmatpush.msra.mxu1 %v6387_v58 }
 0x5bd   : > { %v4590_v61 = vpop.f32.mrf.mxu3 }
 0x5be   : > { %v4269_v53 = vpop.f32.mrf.mxu2 }
 0x5bf   : > { %v4033_v59 = vpop.f32.mrf.mxu1  ;;  %v4363_v10 = vadd.f32 %v4269_v53, %v4030_v40  ;;  %v5707_v40 = vld [vmem:[#allocation2 + $0x91] sm:$0xff] }
 0x5c0   : > { %v4908_v8 = vpop.f32.mrf.mxu0 }
 0x5c1   : > { %v5004_v46 = vadd.f32 %v4908_v8, %v4683_v21  ;;  %v4684_v29 = vadd.f32 %v4590_v61, %v4363_v10  ;;  %v5708_v8 = vld [vmem:[#allocation2 + $0x99] sm:$0xff] }
 0x5c2   : > { %5159 = vmatmul.f32.gmra.mxu1 %v5063_v60  ;;  %5801 = vmatmul.f32.gmra.mxu3 %v5705_v31  ;;  %v6386_v10 = vld [vmem:[#allocation3 + $0x440] sm:$0xff] }
 0x5c3   : > { %5480 = vmatmul.f32.gmra.mxu2 %v5703_v30  ;;  %5045 = vst [vmem:[%s7866_s26 + $0x110] sm:$0xff] %v5004_v46  ;;  %6116 = vmatmul.f32.gmra.mxu0 %v6024_v17  ;;  %v6027_v46 = vld [vmem:[#allocation2 + $0x8a] sm:$0xff] }
 0x5c4   : > { %6401 = vmatpush.msra.mxu1 %v6386_v10 }
 0x5c5   : > { %v4593_v44 = vpop.f32.mrf.mxu3 }
 0x5c6   : > { %v4272_v6 = vpop.f32.mrf.mxu2 }
 0x5c7   : > { %v4036_v27 = vpop.f32.mrf.mxu1  ;;  %v4364_v43 = vadd.f32 %v4272_v6, %v4033_v59  ;;  %v5066_v59 = vld [vmem:[#allocation2 + $0x88] sm:$0xff] }
 0x5c8   : > { %v4911_v15 = vpop.f32.mrf.mxu0 }
 0x5c9   : > { %v5005_v63 = vadd.f32 %v4911_v15, %v4684_v29  ;;  %v4685_v24 = vadd.f32 %v4593_v44, %v4364_v43  ;;  %v5067_v15 = vld [vmem:[#allocation2 + $0x90] sm:$0xff] }
 0x5ca   : > { %5162 = vmatmul.f32.gmra.mxu1 %v5064_v26  ;;  %5804 = vmatmul.f32.gmra.mxu3 %v5706_v50  ;;  %v6028_v26 = vld [vmem:[#allocation2 + $0x92] sm:$0xff] }
 0x5cb   : > { %5483 = vmatmul.f32.gmra.mxu2 %v5704_v11  ;;  %5046 = vst [vmem:[%s7866_s26 + $0x118] sm:$0xff] %v5005_v63  ;;  %6119 = vmatmul.f32.gmra.mxu0 %v6025_v52  ;;  %v5709_v63 = vld [vmem:[#allocation2 + $0xa1] sm:$0xff] }
 0x5cd   : > { %v4596_v35 = vpop.f32.mrf.mxu3 }
 0x5ce   : > { %v4275_v30 = vpop.f32.mrf.mxu2 }
 0x5cf   : > { %v4039_v32 = vpop.f32.mrf.mxu1  ;;  %v4365_v54 = vadd.f32 %v4275_v30, %v4036_v27 }
 0x5d0   : > { %v4914_v13 = vpop.f32.mrf.mxu0 }
 0x5d1   : > { %v5006_v20 = vadd.f32 %v4914_v13, %v4685_v24  ;;  %v4686_v56 = vadd.f32 %v4596_v35, %v4365_v54 }
 0x5d2   : > { %5165 = vmatmul.f32.gmra.mxu1 %v5065_v51  ;;  %5807 = vmatmul.f32.gmra.mxu3 %v5707_v40  ;;  %v5068_v51 = vld [vmem:[#allocation2 + $0x98] sm:$0xff] }
 0x5d3   : > { %5486 = vmatmul.f32.gmra.mxu2 %v5705_v31  ;;  %5047 = vst [vmem:[%s7866_s26 + $0x120] sm:$0xff] %v5006_v20  ;;  %6122 = vmatmul.f32.gmra.mxu0 %v6026_v0  ;;  %v6029_v0 = vld [vmem:[#allocation2 + $0x9a] sm:$0xff] }
 0x5d5   : > { %v4599_v34 = vpop.f32.mrf.mxu3 }
 0x5d6   : > { %v4278_v11 = vpop.f32.mrf.mxu2 }
 0x5d7   : > { %v4042_v53 = vpop.f32.mrf.mxu1  ;;  %v4366_v60 = vadd.f32 %v4278_v11, %v4039_v32 }
 0x5d8   : > { %v4917_v61 = vpop.f32.mrf.mxu0 }
 0x5d9   : > { %v5007_v21 = vadd.f32 %v4917_v61, %v4686_v56  ;;  %v4687_v6 = vadd.f32 %v4599_v34, %v4366_v60  ;;  %v5250_v34 = vld [vmem:[%s7866_s26] sm:$0xff] }
 0x5da   : > { %5168 = vmatmul.f32.gmra.mxu1 %v5066_v59  ;;  %5810 = vmatmul.f32.gmra.mxu3 %v5708_v8  ;;  %v5069_v59 = vld [vmem:[#allocation2 + $0xa0] sm:$0xff] }
 0x5db   : > { %5489 = vmatmul.f32.gmra.mxu2 %v5706_v50  ;;  %5048 = vst [vmem:[%s7866_s26 + $0x128] sm:$0xff] %v5007_v21  ;;  %6125 = vmatmul.f32.gmra.mxu0 %v6027_v46  ;;  %v6030_v60 = vld [vmem:[#allocation2 + $0xa2] sm:$0xff] }
 0x5dd   : > { %v4602_v17 = vpop.f32.mrf.mxu3 }
 0x5de   : > { %v4281_v31 = vpop.f32.mrf.mxu2 }
 0x5df   : > { %v4045_v44 = vpop.f32.mrf.mxu1  ;;  %v4367_v50 = vadd.f32 %v4281_v31, %v4042_v53  ;;  %v6385_v53 = vld [vmem:[#allocation3 + $0x438] sm:$0xff] }
 0x5e0   : > { %4088 = vst [vmem:[%s7866_s26 + $0x140] sm:$0xf] %v4045_v44  ;;  %v4920_v29 = vpop.f32.mrf.mxu0  ;;  %6402 = vmatpush.msra.mxu1 %v6385_v53 }
 0x5e1   : > { %v5008_v27 = vadd.f32 %v4920_v29, %v4687_v6  ;;  %v4688_v30 = vadd.f32 %v4602_v17, %v4367_v50  ;;  %v5251_v29 = vld [vmem:[%s7866_s26 + $0x8] sm:$0xff] }
 0x5e2   : > { %5171 = vmatmul.f32.gmra.mxu1 %v5067_v15  ;;  %5813 = vmatmul.f32.gmra.mxu3 %v5709_v63  ;;  %v5070_v50 = vld [vmem:[#allocation2 + $0xa8] sm:$0xff] }
 0x5e3   : > { %5492 = vmatmul.f32.gmra.mxu2 %v5707_v40  ;;  %5049 = vst [vmem:[%s7866_s26 + $0x130] sm:$0xff] %v5008_v27  ;;  %6128 = vmatmul.f32.gmra.mxu0 %v6028_v26  ;;  %v5710_v40 = vld [vmem:[#allocation2 + $0xa9] sm:$0xff] }
 0x5e5   : > { %v4605_v43 = vpop.f32.mrf.mxu3 }
 0x5e6   : > { %v4284_v52 = vpop.f32.mrf.mxu2 }
 0x5e7   : > { %v4327_v35 = vld [vmem:[%s7866_s26 + $0x140] sm:$0xf]  ;;  %v5127_v24 = vpop.f32.mrf.mxu1 }
 0x5e8   : > { %v4368_v32 = vadd.f32 %v4327_v35, %v4284_v52  ;;  %v4923_v13 = vpop.f32.mrf.mxu0  ;;  %v5291_v21 = vadd.f32 %v5250_v34, %v5127_v24  ;;  %v6031_v52 = vld [vmem:[#allocation2 + $0xaa] sm:$0xff]  ;;  %v6032_v34 = vld [vmem:[#allocation2 + $0xb2] sm:$0xff] }
 0x5e9   : > { %v5009_v20 = vadd.f32 %v4923_v13, %v4688_v30 }
 0x5ea   : > { %4409 = vst [vmem:[%s7866_s26 + $0x140] sm:$0xf] %v4368_v32  ;;  %5174 = vmatmul.f32.gmra.mxu1 %v5068_v51  ;;  %5816 = vmatmul.f32.gmra.mxu3 %v5710_v40  ;;  %v5252_v51 = vld [vmem:[%s7866_s26 + $0x10] sm:$0xff] }
 0x5eb   : > { %5495 = vmatmul.f32.gmra.mxu2 %v5708_v8  ;;  %5050 = vst [vmem:[%s7866_s26 + $0x138] sm:$0xff] %v5009_v20  ;;  %6131 = vmatmul.f32.gmra.mxu0 %v6029_v0  ;;  %v5711_v8 = vld [vmem:[#allocation2 + $0xb1] sm:$0xff] }
 0x5ed   : > { %v5769_v58 = vpop.f32.mrf.mxu3 }
 0x5ee   : > { %v5448_v54 = vpop.f32.mrf.mxu2 }
 0x5ef   : > { %v5130_v11 = vpop.f32.mrf.mxu1  ;;  %v5612_v31 = vadd.f32 %v5448_v54, %v5291_v21 }
 0x5f0   : > { %v4926_v56 = vpop.f32.mrf.mxu0  ;;  %v5292_v15 = vadd.f32 %v5251_v29, %v5130_v11  ;;  %v5713_v11 = vld [vmem:[#allocation2 + $0xc1] sm:$0xff] }
 0x5f1   : > { %v4648_v61 = vld [vmem:[%s7866_s26 + $0x140] sm:$0xf]  ;;  %v5933_v6 = vadd.f32 %v5769_v58, %v5612_v31 }
 0x5f2   : > { %v4689_v46 = vadd.f32 %v4648_v61, %v4605_v43  ;;  %5177 = vmatmul.f32.gmra.mxu1 %v5069_v59  ;;  %5819 = vmatmul.f32.gmra.mxu3 %v5711_v8 }
 0x5f3   : > { %5498 = vmatmul.f32.gmra.mxu2 %v5709_v63  ;;  %6134 = vmatmul.f32.gmra.mxu0 %v6030_v60  ;;  %v5712_v63 = vld [vmem:[#allocation2 + $0xb9] sm:$0xff] }
 0x5f4   : > { %4730 = vst [vmem:[%s7866_s26 + $0x140] sm:$0xf] %v4689_v46  ;;  %v5253_v60 = vld [vmem:[%s7866_s26 + $0x18] sm:$0xff] }
 0x5f5   : > { %v5772_v10 = vpop.f32.mrf.mxu3 }
 0x5f6   : > { %v5451_v17 = vpop.f32.mrf.mxu2 }
 0x5f7   : > { %v5133_v44 = vpop.f32.mrf.mxu1  ;;  %v5613_v30 = vadd.f32 %v5451_v17, %v5292_v15 }
 0x5f8   : > { %v6090_v27 = vpop.f32.mrf.mxu0  ;;  %v5293_v54 = vadd.f32 %v5252_v51, %v5133_v44  ;;  %v6033_v44 = vld [vmem:[#allocation2 + $0xba] sm:$0xff] }
 0x5f9   : > { %v6254_v26 = vadd.f32 %v6090_v27, %v5933_v6  ;;  %v5934_v13 = vadd.f32 %v5772_v10, %v5613_v30  ;;  %v5072_v6 = vld [vmem:[#allocation2 + $0xb8] sm:$0xff] }
 0x5fa   : > { %5180 = vmatmul.f32.gmra.mxu1 %v5070_v50  ;;  %5822 = vmatmul.f32.gmra.mxu3 %v5712_v63 }
 0x5fb   : > { %5501 = vmatmul.f32.gmra.mxu2 %v5710_v40  ;;  %v4969_v43 = vld [vmem:[%s7866_s26 + $0x140] sm:$0xf]  ;;  %6295 = vst [vmem:[%s7866_s26] sm:$0xff] %v6254_v26  ;;  %6137 = vmatmul.f32.gmra.mxu0 %v6031_v52  ;;  %v5071_v40 = vld [vmem:[#allocation2 + $0xb0] sm:$0xff] }
 0x5fc   : > { %v5010_v35 = vadd.f32 %v4969_v43, %v4926_v56  ;;  %v6384_v56 = vld [vmem:[#allocation3 + $0x430] sm:$0xff]  ;;  %v5254_v52 = vld [vmem:[%s7866_s26 + $0x20] sm:$0xff] }
 0x5fd   : > { %v5775_v32 = vpop.f32.mrf.mxu3  ;;  %6403 = vmatpush.msra.mxu1 %v6384_v56  ;;  %v5074_v56 = vld [vmem:[#allocation2 + $0xc8] sm:$0xff] }
 0x5fe   : > { %v5454_v24 = vpop.f32.mrf.mxu2  ;;  %5051 = vst [vmem:[%s7866_s26 + $0x140] sm:$0xf] %v5010_v35 }
 0x5ff   : > { %v5136_v20 = vpop.f32.mrf.mxu1  ;;  %v5614_v53 = vadd.f32 %v5454_v24, %v5293_v54  ;;  %v5073_v24 = vld [vmem:[#allocation2 + $0xc0] sm:$0xff] }
 0x600   : > { %v6093_v0 = vpop.f32.mrf.mxu0  ;;  %v5294_v17 = vadd.f32 %v5253_v60, %v5136_v20 }
 0x601   : > { %v6255_v58 = vadd.f32 %v6093_v0, %v5934_v13  ;;  %v5935_v59 = vadd.f32 %v5775_v32, %v5614_v53  ;;  %v6034_v32 = vld [vmem:[#allocation2 + $0xc2] sm:$0xff] }
 0x602   : > { %5183 = vmatmul.f32.gmra.mxu1 %v5071_v40  ;;  %5825 = vmatmul.f32.gmra.mxu3 %v5713_v11  ;;  %v6534_v4 = vld [vmem:[%s7866_s26] sm:$0xff] }
 0x603   : > { %5504 = vmatmul.f32.gmra.mxu2 %v5711_v8  ;;  %6296 = vst [vmem:[%s7866_s26 + $0x8] sm:$0xff] %v6255_v58  ;;  %6140 = vmatmul.f32.gmra.mxu0 %v6032_v34  ;;  %v5714_v8 = vld [vmem:[#allocation2 + $0xc9] sm:$0xff] }
 0x604   : > { %v5255_v58 = vld [vmem:[%s7866_s26 + $0x28] sm:$0xff] }
 0x605   : > { %v5778_v21 = vpop.f32.mrf.mxu3 }
 0x606   : > { %v5457_v61 = vpop.f32.mrf.mxu2 }
 0x607   : > { %v5139_v46 = vpop.f32.mrf.mxu1  ;;  %v5615_v29 = vadd.f32 %v5457_v61, %v5294_v17  ;;  %v6035_v61 = vld [vmem:[#allocation2 + $0xca] sm:$0xff] }
 0x608   : > { %v6096_v31 = vpop.f32.mrf.mxu0  ;;  %v5295_v30 = vadd.f32 %v5254_v52, %v5139_v46 }
 0x609   : > { %v6256_v10 = vadd.f32 %v6096_v31, %v5935_v59  ;;  %v5936_v26 = vadd.f32 %v5778_v21, %v5615_v29  ;;  %v6383_v59 = vld [vmem:[#allocation3 + $0x428] sm:$0xff] }
 0x60a   : > { %5186 = vmatmul.f32.gmra.mxu1 %v5072_v6  ;;  %5828 = vmatmul.f32.gmra.mxu3 %v5714_v8  ;;  %v6535_v45 = vld [vmem:[%s7866_s26 + $0x8] sm:$0xff] }
 0x60b   : > { %5507 = vmatmul.f32.gmra.mxu2 %v5712_v63  ;;  %6297 = vst [vmem:[%s7866_s26 + $0x10] sm:$0xff] %v6256_v10  ;;  %6143 = vmatmul.f32.gmra.mxu0 %v6033_v44  ;;  %v5715_v63 = vld [vmem:[#allocation2 + $0xd1] sm:$0xff] }
 0x60c   : > { %6404 = vmatpush.msra.mxu1 %v6383_v59  ;;  %v5256_v10 = vld [vmem:[%s7866_s26 + $0x30] sm:$0xff] }
 0x60d   : > { %v5781_v15 = vpop.f32.mrf.mxu3 }
 0x60e   : > { %v5460_v27 = vpop.f32.mrf.mxu2 }
 0x60f   : > { %v5142_v50 = vpop.f32.mrf.mxu1  ;;  %v5616_v13 = vadd.f32 %v5460_v27, %v5295_v30  ;;  %v5075_v27 = vld [vmem:[#allocation2 + $0xd0] sm:$0xff] }
 0x610   : > { %v6099_v43 = vpop.f32.mrf.mxu0  ;;  %v5296_v34 = vadd.f32 %v5255_v58, %v5142_v50 }
 0x611   : > { %v6257_v35 = vadd.f32 %v6099_v43, %v5936_v26  ;;  %v5937_v0 = vadd.f32 %v5781_v15, %v5616_v13  ;;  %v6036_v15 = vld [vmem:[#allocation2 + $0xd2] sm:$0xff] }
 0x612   : > { %5189 = vmatmul.f32.gmra.mxu1 %v5073_v24  ;;  %5831 = vmatmul.f32.gmra.mxu3 %v5715_v63 }
 0x613   : > { %5510 = vmatmul.f32.gmra.mxu2 %v5713_v11  ;;  %6298 = vst [vmem:[%s7866_s26 + $0x18] sm:$0xff] %v6257_v35  ;;  %6146 = vmatmul.f32.gmra.mxu0 %v6034_v32  ;;  %v5716_v11 = vld [vmem:[#allocation2 + $0xd9] sm:$0xff] }
 0x614   : > { %v5257_v35 = vld [vmem:[%s7866_s26 + $0x38] sm:$0xff] }
 0x615   : > { %v5784_v51 = vpop.f32.mrf.mxu3 }
 0x616   : > { %v5463_v20 = vpop.f32.mrf.mxu2 }
 0x617   : > { %v5145_v54 = vpop.f32.mrf.mxu1  ;;  %v5617_v21 = vadd.f32 %v5463_v20, %v5296_v34  ;;  %v5076_v20 = vld [vmem:[#allocation2 + $0xd8] sm:$0xff] }
 0x618   : > { %v6102_v40 = vpop.f32.mrf.mxu0  ;;  %v5297_v44 = vadd.f32 %v5256_v10, %v5145_v54  ;;  %v6382_v54 = vld [vmem:[#allocation3 + $0x420] sm:$0xff] }
 0x619   : > { %v6258_v53 = vadd.f32 %v6102_v40, %v5937_v0  ;;  %v5938_v31 = vadd.f32 %v5784_v51, %v5617_v21  ;;  %v6037_v51 = vld [vmem:[#allocation2 + $0xda] sm:$0xff]  ;;  %6405 = vmatpush.msra.mxu1 %v6382_v54  ;;  %v5079_v54 = vld [vmem:[#allocation2 + $0xf0] sm:$0xff] }
 0x61a   : > { %5192 = vmatmul.f32.gmra.mxu1 %v5074_v56  ;;  %5834 = vmatmul.f32.gmra.mxu3 %v5716_v11  ;;  %v5258_v56 = vld [vmem:[%s7866_s26 + $0x40] sm:$0xff] }
 0x61b   : > { %5513 = vmatmul.f32.gmra.mxu2 %v5714_v8  ;;  %6299 = vst [vmem:[%s7866_s26 + $0x20] sm:$0xff] %v6258_v53  ;;  %6149 = vmatmul.f32.gmra.mxu0 %v6035_v61  ;;  %v5717_v8 = vld [vmem:[#allocation2 + $0xe1] sm:$0xff] }
 0x61d   : > { %v5787_v60 = vpop.f32.mrf.mxu3 }
 0x61e   : > { %v5466_v46 = vpop.f32.mrf.mxu2 }
 0x61f   : > { %v5148_v17 = vpop.f32.mrf.mxu1  ;;  %v5618_v26 = vadd.f32 %v5466_v46, %v5297_v44  ;;  %v5077_v46 = vld [vmem:[#allocation2 + $0xe0] sm:$0xff] }
 0x620   : > { %v6105_v6 = vpop.f32.mrf.mxu0  ;;  %v5298_v32 = vadd.f32 %v5257_v35, %v5148_v17 }
 0x621   : > { %v6259_v29 = vadd.f32 %v6105_v6, %v5938_v31  ;;  %v5939_v43 = vadd.f32 %v5787_v60, %v5618_v26  ;;  %v6038_v60 = vld [vmem:[#allocation2 + $0xe2] sm:$0xff] }
 0x622   : > { %5195 = vmatmul.f32.gmra.mxu1 %v5075_v27  ;;  %5837 = vmatmul.f32.gmra.mxu3 %v5717_v8 }
 0x623   : > { %5516 = vmatmul.f32.gmra.mxu2 %v5715_v63  ;;  %6300 = vst [vmem:[%s7866_s26 + $0x28] sm:$0xff] %v6259_v29  ;;  %6152 = vmatmul.f32.gmra.mxu0 %v6036_v15  ;;  %v5718_v63 = vld [vmem:[#allocation2 + $0xe9] sm:$0xff] }
 0x624   : > { %v5259_v29 = vld [vmem:[%s7866_s26 + $0x48] sm:$0xff] }
 0x625   : > { %v5790_v52 = vpop.f32.mrf.mxu3 }
 0x626   : > { %v5469_v50 = vpop.f32.mrf.mxu2 }
 0x627   : > { %v5151_v30 = vpop.f32.mrf.mxu1  ;;  %v5619_v0 = vadd.f32 %v5469_v50, %v5298_v32  ;;  %v5078_v50 = vld [vmem:[#allocation2 + $0xe8] sm:$0xff] }
 0x628   : > { %v6108_v24 = vpop.f32.mrf.mxu0  ;;  %v5299_v21 = vadd.f32 %v5258_v56, %v5151_v30 }
 0x629   : > { %v6260_v13 = vadd.f32 %v6108_v24, %v5939_v43  ;;  %v5940_v34 = vadd.f32 %v5790_v52, %v5619_v0  ;;  %v6039_v52 = vld [vmem:[#allocation2 + $0xea] sm:$0xff] }
 0x62a   : > { %5198 = vmatmul.f32.gmra.mxu1 %v5076_v20  ;;  %5840 = vmatmul.f32.gmra.mxu3 %v5718_v63 }
 0x62b   : > { %5519 = vmatmul.f32.gmra.mxu2 %v5716_v11  ;;  %6301 = vst [vmem:[%s7866_s26 + $0x30] sm:$0xff] %v6260_v13  ;;  %6155 = vmatmul.f32.gmra.mxu0 %v6037_v51  ;;  %v5719_v11 = vld [vmem:[#allocation2 + $0xf1] sm:$0xff] }
 0x62c   : > { %v5260_v13 = vld [vmem:[%s7866_s26 + $0x50] sm:$0xff] }
 0x62d   : > { %v5793_v40 = vpop.f32.mrf.mxu3 }
 0x62e   : > { %v5472_v58 = vpop.f32.mrf.mxu2 }
 0x62f   : > { %v5154_v53 = vpop.f32.mrf.mxu1  ;;  %v5620_v31 = vadd.f32 %v5472_v58, %v5299_v21  ;;  %v6040_v58 = vld [vmem:[#allocation2 + $0xf2] sm:$0xff] }
 0x630   : > { %v6111_v61 = vpop.f32.mrf.mxu0  ;;  %v5300_v15 = vadd.f32 %v5259_v29, %v5154_v53 }
 0x631   : > { %v6261_v59 = vadd.f32 %v6111_v61, %v5940_v34  ;;  %v5941_v6 = vadd.f32 %v5793_v40, %v5620_v31  ;;  %v6381_v34 = vld [vmem:[#allocation3 + $0x418] sm:$0xff] }
 0x632   : > { %5201 = vmatmul.f32.gmra.mxu1 %v5077_v46  ;;  %5843 = vmatmul.f32.gmra.mxu3 %v5719_v11 }
 0x633   : > { %5522 = vmatmul.f32.gmra.mxu2 %v5717_v8  ;;  %6302 = vst [vmem:[%s7866_s26 + $0x38] sm:$0xff] %v6261_v59  ;;  %6158 = vmatmul.f32.gmra.mxu0 %v6038_v60  ;;  %v5720_v8 = vld [vmem:[#allocation2 + $0xf9] sm:$0xff] }
 0x634   : > { %6406 = vmatpush.msra.mxu1 %v6381_v34  ;;  %v5261_v59 = vld [vmem:[%s7866_s26 + $0x58] sm:$0xff] }
 0x635   : > { %v5796_v10 = vpop.f32.mrf.mxu3 }
 0x636   : > { %v5475_v17 = vpop.f32.mrf.mxu2 }
 0x637   : > { %v5157_v44 = vpop.f32.mrf.mxu1  ;;  %v5621_v43 = vadd.f32 %v5475_v17, %v5300_v15  ;;  %v5080_v17 = vld [vmem:[#allocation2 + $0xf8] sm:$0xff] }
 0x638   : > { %v6114_v27 = vpop.f32.mrf.mxu0  ;;  %v5301_v51 = vadd.f32 %v5260_v13, %v5157_v44 }
 0x639   : > { %v6262_v26 = vadd.f32 %v6114_v27, %v5941_v6  ;;  %v5942_v24 = vadd.f32 %v5796_v10, %v5621_v43  ;;  %v6041_v10 = vld [vmem:[#allocation2 + $0xfa] sm:$0xff] }
 0x63a   : > { %5204 = vmatmul.f32.gmra.mxu1 %v5078_v50  ;;  %5846 = vmatmul.f32.gmra.mxu3 %v5720_v8 }
 0x63b   : > { %5525 = vmatmul.f32.gmra.mxu2 %v5718_v63  ;;  %6303 = vst [vmem:[%s7866_s26 + $0x40] sm:$0xff] %v6262_v26  ;;  %6161 = vmatmul.f32.gmra.mxu0 %v6039_v52  ;;  %v5721_v63 = vld [vmem:[#allocation2 + $0x101] sm:$0xff] }
 0x63c   : > { %v5262_v26 = vld [vmem:[%s7866_s26 + $0x60] sm:$0xff] }
 0x63d   : > { %v5799_v35 = vpop.f32.mrf.mxu3 }
 0x63e   : > { %v5478_v30 = vpop.f32.mrf.mxu2 }
 0x63f   : > { %v5160_v32 = vpop.f32.mrf.mxu1  ;;  %v5622_v40 = vadd.f32 %v5478_v30, %v5301_v51  ;;  %v5081_v30 = vld [vmem:[#allocation2 + $0x100] sm:$0xff] }
 0x640   : > { %v6117_v20 = vpop.f32.mrf.mxu0  ;;  %v5302_v60 = vadd.f32 %v5261_v59, %v5160_v32 }
 0x641   : > { %v6263_v0 = vadd.f32 %v6117_v20, %v5942_v24  ;;  %v5943_v61 = vadd.f32 %v5799_v35, %v5622_v40  ;;  %v6042_v35 = vld [vmem:[#allocation2 + $0x102] sm:$0xff] }
 0x642   : > { %5207 = vmatmul.f32.gmra.mxu1 %v5079_v54  ;;  %5849 = vmatmul.f32.gmra.mxu3 %v5721_v63 }
 0x643   : > { %5528 = vmatmul.f32.gmra.mxu2 %v5719_v11  ;;  %6304 = vst [vmem:[%s7866_s26 + $0x48] sm:$0xff] %v6263_v0  ;;  %6164 = vmatmul.f32.gmra.mxu0 %v6040_v58  ;;  %v5722_v11 = vld [vmem:[#allocation2 + $0x109] sm:$0xff] }
 0x644   : > { %v5263_v0 = vld [vmem:[%s7866_s26 + $0x68] sm:$0xff] }
 0x645   : > { %v5802_v56 = vpop.f32.mrf.mxu3  ;;  %v6380_v58 = vld [vmem:[#allocation3 + $0x410] sm:$0xff] }
 0x646   : > { %v5481_v53 = vpop.f32.mrf.mxu2  ;;  %6407 = vmatpush.msra.mxu1 %v6380_v58 }
 0x647   : > { %v5163_v21 = vpop.f32.mrf.mxu1  ;;  %v5623_v6 = vadd.f32 %v5481_v53, %v5302_v60  ;;  %v5082_v53 = vld [vmem:[#allocation2 + $0x108] sm:$0xff] }
 0x648   : > { %v6120_v46 = vpop.f32.mrf.mxu0  ;;  %v5303_v52 = vadd.f32 %v5262_v26, %v5163_v21 }
 0x649   : > { %v6264_v31 = vadd.f32 %v6120_v46, %v5943_v61  ;;  %v5944_v27 = vadd.f32 %v5802_v56, %v5623_v6  ;;  %v6043_v56 = vld [vmem:[#allocation2 + $0x10a] sm:$0xff] }
 0x64a   : > { %5210 = vmatmul.f32.gmra.mxu1 %v5080_v17  ;;  %5852 = vmatmul.f32.gmra.mxu3 %v5722_v11 }
 0x64b   : > { %5531 = vmatmul.f32.gmra.mxu2 %v5720_v8  ;;  %6305 = vst [vmem:[%s7866_s26 + $0x50] sm:$0xff] %v6264_v31  ;;  %6167 = vmatmul.f32.gmra.mxu0 %v6041_v10  ;;  %v5723_v8 = vld [vmem:[#allocation2 + $0x111] sm:$0xff] }
 0x64c   : > { %v5264_v31 = vld [vmem:[%s7866_s26 + $0x70] sm:$0xff] }
 0x64d   : > { %v5805_v29 = vpop.f32.mrf.mxu3 }
 0x64e   : > { %v5484_v44 = vpop.f32.mrf.mxu2 }
 0x64f   : > { %v5166_v15 = vpop.f32.mrf.mxu1  ;;  %v5624_v24 = vadd.f32 %v5484_v44, %v5303_v52  ;;  %v5083_v44 = vld [vmem:[#allocation2 + $0x110] sm:$0xff] }
 0x650   : > { %v6123_v50 = vpop.f32.mrf.mxu0  ;;  %v5304_v40 = vadd.f32 %v5263_v0, %v5166_v15 }
 0x651   : > { %v6265_v43 = vadd.f32 %v6123_v50, %v5944_v27  ;;  %v5945_v20 = vadd.f32 %v5805_v29, %v5624_v24  ;;  %v6044_v29 = vld [vmem:[#allocation2 + $0x112] sm:$0xff] }
 0x652   : > { %5213 = vmatmul.f32.gmra.mxu1 %v5081_v30  ;;  %5855 = vmatmul.f32.gmra.mxu3 %v5723_v8 }
 0x653   : > { %5534 = vmatmul.f32.gmra.mxu2 %v5721_v63  ;;  %6306 = vst [vmem:[%s7866_s26 + $0x58] sm:$0xff] %v6265_v43  ;;  %6170 = vmatmul.f32.gmra.mxu0 %v6042_v35  ;;  %v5724_v63 = vld [vmem:[#allocation2 + $0x119] sm:$0xff] }
 0x654   : > { %v5265_v43 = vld [vmem:[%s7866_s26 + $0x78] sm:$0xff] }
 0x655   : > { %v5808_v13 = vpop.f32.mrf.mxu3 }
 0x656   : > { %v5487_v32 = vpop.f32.mrf.mxu2 }
 0x657   : > { %v5169_v51 = vpop.f32.mrf.mxu1  ;;  %v5625_v61 = vadd.f32 %v5487_v32, %v5304_v40  ;;  %v5084_v32 = vld [vmem:[#allocation2 + $0x118] sm:$0xff] }
 0x658   : > { %v6126_v54 = vpop.f32.mrf.mxu0  ;;  %v5305_v10 = vadd.f32 %v5264_v31, %v5169_v51  ;;  %v6379_v51 = vld [vmem:[#allocation3 + $0x408] sm:$0xff] }
 0x659   : > { %v6266_v34 = vadd.f32 %v6126_v54, %v5945_v20  ;;  %v5946_v46 = vadd.f32 %v5808_v13, %v5625_v61  ;;  %v6045_v13 = vld [vmem:[#allocation2 + $0x11a] sm:$0xff]  ;;  %6408 = vmatpush.msra.mxu1 %v6379_v51 }
 0x65a   : > { %5216 = vmatmul.f32.gmra.mxu1 %v5082_v53  ;;  %5858 = vmatmul.f32.gmra.mxu3 %v5724_v63 }
 0x65b   : > { %5537 = vmatmul.f32.gmra.mxu2 %v5722_v11  ;;  %6307 = vst [vmem:[%s7866_s26 + $0x60] sm:$0xff] %v6266_v34  ;;  %6173 = vmatmul.f32.gmra.mxu0 %v6043_v56  ;;  %v5725_v11 = vld [vmem:[#allocation2 + $0x121] sm:$0xff] }
 0x65c   : > { %v5266_v34 = vld [vmem:[%s7866_s26 + $0x80] sm:$0xff] }
 0x65d   : > { %v5811_v59 = vpop.f32.mrf.mxu3 }
 0x65e   : > { %v5490_v21 = vpop.f32.mrf.mxu2 }
 0x65f   : > { %v5172_v60 = vpop.f32.mrf.mxu1  ;;  %v5626_v27 = vadd.f32 %v5490_v21, %v5305_v10  ;;  %v5085_v21 = vld [vmem:[#allocation2 + $0x120] sm:$0xff] }
 0x660   : > { %v6129_v17 = vpop.f32.mrf.mxu0  ;;  %v5306_v35 = vadd.f32 %v5265_v43, %v5172_v60 }
 0x661   : > { %v6267_v6 = vadd.f32 %v6129_v17, %v5946_v46  ;;  %v5947_v50 = vadd.f32 %v5811_v59, %v5626_v27  ;;  %v6046_v59 = vld [vmem:[#allocation2 + $0x122] sm:$0xff] }
 0x662   : > { %5219 = vmatmul.f32.gmra.mxu1 %v5083_v44  ;;  %5861 = vmatmul.f32.gmra.mxu3 %v5725_v11 }
 0x663   : > { %5540 = vmatmul.f32.gmra.mxu2 %v5723_v8  ;;  %6308 = vst [vmem:[%s7866_s26 + $0x68] sm:$0xff] %v6267_v6  ;;  %6176 = vmatmul.f32.gmra.mxu0 %v6044_v29  ;;  %v5726_v8 = vld [vmem:[#allocation2 + $0x129] sm:$0xff] }
 0x664   : > { %v5267_v6 = vld [vmem:[%s7866_s26 + $0x88] sm:$0xff] }
 0x665   : > { %v5814_v26 = vpop.f32.mrf.mxu3 }
 0x666   : > { %v5493_v15 = vpop.f32.mrf.mxu2 }
 0x667   : > { %v5175_v52 = vpop.f32.mrf.mxu1  ;;  %v5627_v20 = vadd.f32 %v5493_v15, %v5306_v35  ;;  %v5086_v15 = vld [vmem:[#allocation2 + $0x128] sm:$0xff] }
 0x668   : > { %v6132_v30 = vpop.f32.mrf.mxu0  ;;  %v5307_v56 = vadd.f32 %v5266_v34, %v5175_v52 }
 0x669   : > { %v6268_v24 = vadd.f32 %v6132_v30, %v5947_v50  ;;  %v5948_v58 = vadd.f32 %v5814_v26, %v5627_v20  ;;  %v6047_v26 = vld [vmem:[#allocation2 + $0x12a] sm:$0xff] }
 0x66a   : > { %5222 = vmatmul.f32.gmra.mxu1 %v5084_v32  ;;  %5864 = vmatmul.f32.gmra.mxu3 %v5726_v8 }
 0x66b   : > { %5543 = vmatmul.f32.gmra.mxu2 %v5724_v63  ;;  %6309 = vst [vmem:[%s7866_s26 + $0x70] sm:$0xff] %v6268_v24  ;;  %6179 = vmatmul.f32.gmra.mxu0 %v6045_v13  ;;  %v5727_v63 = vld [vmem:[#allocation2 + $0x131] sm:$0xff] }
 0x66c   : > { %v5268_v24 = vld [vmem:[%s7866_s26 + $0x90] sm:$0xff]  ;;  %v6378_v13 = vld [vmem:[#allocation3 + $0x400] sm:$0xff] }
 0x66d   : > { %v5817_v54 = vpop.f32.mrf.mxu3  ;;  %6409 = vmatpush.msra.mxu1 %v6378_v13 }
 0x66e   : > { %v5496_v0 = vpop.f32.mrf.mxu2 }
 0x66f   : > { %v5178_v40 = vpop.f32.mrf.mxu1  ;;  %v5628_v46 = vadd.f32 %v5496_v0, %v5307_v56  ;;  %v5087_v0 = vld [vmem:[#allocation2 + $0x130] sm:$0xff] }
 0x670   : > { %v6135_v53 = vpop.f32.mrf.mxu0  ;;  %v5308_v29 = vadd.f32 %v5267_v6, %v5178_v40 }
 0x671   : > { %v6269_v61 = vadd.f32 %v6135_v53, %v5948_v58  ;;  %v5949_v17 = vadd.f32 %v5817_v54, %v5628_v46  ;;  %v6048_v54 = vld [vmem:[#allocation2 + $0x132] sm:$0xff] }
 0x672   : > { %5225 = vmatmul.f32.gmra.mxu1 %v5085_v21  ;;  %5867 = vmatmul.f32.gmra.mxu3 %v5727_v63 }
 0x673   : > { %5546 = vmatmul.f32.gmra.mxu2 %v5725_v11  ;;  %6310 = vst [vmem:[%s7866_s26 + $0x78] sm:$0xff] %v6269_v61  ;;  %6182 = vmatmul.f32.gmra.mxu0 %v6046_v59  ;;  %v5728_v11 = vld [vmem:[#allocation2 + $0x139] sm:$0xff] }
 0x674   : > { %v5269_v61 = vld [vmem:[%s7866_s26 + $0x98] sm:$0xff] }
 0x675   : > { %v5820_v31 = vpop.f32.mrf.mxu3 }
 0x676   : > { %v5499_v60 = vpop.f32.mrf.mxu2 }
 0x677   : > { %v5181_v10 = vpop.f32.mrf.mxu1  ;;  %v5629_v50 = vadd.f32 %v5499_v60, %v5308_v29  ;;  %v5088_v60 = vld [vmem:[#allocation2 + $0x138] sm:$0xff] }
 0x678   : > { %v6138_v44 = vpop.f32.mrf.mxu0  ;;  %v5309_v20 = vadd.f32 %v5268_v24, %v5181_v10 }
 0x679   : > { %v6270_v27 = vadd.f32 %v6138_v44, %v5949_v17  ;;  %v5950_v30 = vadd.f32 %v5820_v31, %v5629_v50  ;;  %v6049_v31 = vld [vmem:[#allocation2 + $0x13a] sm:$0xff] }
 0x67a   : > { %5228 = vmatmul.f32.gmra.mxu1 %v5086_v15  ;;  %5870 = vmatmul.f32.gmra.mxu3 %v5728_v11 }
 0x67b   : > { %5549 = vmatmul.f32.gmra.mxu2 %v5726_v8  ;;  %6311 = vst [vmem:[%s7866_s26 + $0x80] sm:$0xff] %v6270_v27  ;;  %6185 = vmatmul.f32.gmra.mxu0 %v6047_v26  ;;  %v5729_v8 = vld [vmem:[#allocation2 + $0x141] sm:$0xff] }
 0x67c   : > { %v5270_v27 = vld [vmem:[%s7866_s26 + $0xa0] sm:$0xff] }
 0x67d   : > { %v5823_v43 = vpop.f32.mrf.mxu3 }
 0x67e   : > { %v5502_v52 = vpop.f32.mrf.mxu2 }
 0x67f   : > { %v5184_v35 = vpop.f32.mrf.mxu1  ;;  %v5630_v58 = vadd.f32 %v5502_v52, %v5309_v20  ;;  %v5089_v52 = vld [vmem:[#allocation2 + $0x140] sm:$0xff]  ;;  %v5271_v20 = vld [vmem:[%s7866_s26 + $0xa8] sm:$0xff] }
 0x680   : > { %v6141_v32 = vpop.f32.mrf.mxu0  ;;  %v5310_v59 = vadd.f32 %v5269_v61, %v5184_v35 }
 0x681   : > { %v6271_v51 = vadd.f32 %v6141_v32, %v5950_v30  ;;  %v5951_v53 = vadd.f32 %v5823_v43, %v5630_v58  ;;  %v6050_v43 = vld [vmem:[#allocation2 + $0x142] sm:$0xff] }
 0x682   : > { %5231 = vmatmul.f32.gmra.mxu1 %v5087_v0  ;;  %5873 = vmatmul.f32.gmra.mxu3 %v5729_v8  ;;  %v5090_v58 = vld [vmem:[#allocation2 + $0x148] sm:$0xff] }
 0x683   : > { %5552 = vmatmul.f32.gmra.mxu2 %v5727_v63  ;;  %6312 = vst [vmem:[%s7866_s26 + $0x88] sm:$0xff] %v6271_v51  ;;  %6188 = vmatmul.f32.gmra.mxu0 %v6048_v54  ;;  %v5730_v63 = vld [vmem:[#allocation2 + $0x149] sm:$0xff] }
 0x685   : > { %v5826_v34 = vpop.f32.mrf.mxu3 }
 0x686   : > { %v5505_v40 = vpop.f32.mrf.mxu2 }
 0x687   : > { %v5187_v56 = vpop.f32.mrf.mxu1  ;;  %v5631_v17 = vadd.f32 %v5505_v40, %v5310_v59  ;;  %v6051_v40 = vld [vmem:[#allocation2 + $0x14a] sm:$0xff] }
 0x688   : > { %v6144_v21 = vpop.f32.mrf.mxu0  ;;  %v5311_v26 = vadd.f32 %v5270_v27, %v5187_v56  ;;  %v5272_v59 = vld [vmem:[%s7866_s26 + $0xb0] sm:$0xff] }
 0x689   : > { %v6272_v46 = vadd.f32 %v6144_v21, %v5951_v53  ;;  %v5952_v44 = vadd.f32 %v5826_v34, %v5631_v17 }
 0x68a   : > { %5234 = vmatmul.f32.gmra.mxu1 %v5088_v60  ;;  %5876 = vmatmul.f32.gmra.mxu3 %v5730_v63  ;;  %v5733_v60 = vld [vmem:[#allocation2 + $0x161] sm:$0xff] }
 0x68b   : > { %5555 = vmatmul.f32.gmra.mxu2 %v5728_v11  ;;  %6313 = vst [vmem:[%s7866_s26 + $0x90] sm:$0xff] %v6272_v46  ;;  %6191 = vmatmul.f32.gmra.mxu0 %v6049_v31  ;;  %v5731_v11 = vld [vmem:[#allocation2 + $0x151] sm:$0xff] }
 0x68d   : > { %v5829_v6 = vpop.f32.mrf.mxu3 }
 0x68e   : > { %v5508_v10 = vpop.f32.mrf.mxu2 }
 0x68f   : > { %v5190_v29 = vpop.f32.mrf.mxu1  ;;  %v5632_v30 = vadd.f32 %v5508_v10, %v5311_v26  ;;  %v5091_v10 = vld [vmem:[#allocation2 + $0x150] sm:$0xff]  ;;  %v5273_v26 = vld [vmem:[%s7866_s26 + $0xb8] sm:$0xff] }
 0x690   : > { %v6147_v15 = vpop.f32.mrf.mxu0  ;;  %v5312_v0 = vadd.f32 %v5271_v20, %v5190_v29 }
 0x691   : > { %v6273_v50 = vadd.f32 %v6147_v15, %v5952_v44  ;;  %v5953_v32 = vadd.f32 %v5829_v6, %v5632_v30 }
 0x692   : > { %5237 = vmatmul.f32.gmra.mxu1 %v5089_v52  ;;  %5879 = vmatmul.f32.gmra.mxu3 %v5731_v11  ;;  %v5734_v52 = vld [vmem:[#allocation2 + $0x169] sm:$0xf] }
 0x693   : > { %5558 = vmatmul.f32.gmra.mxu2 %v5729_v8  ;;  %6314 = vst [vmem:[%s7866_s26 + $0x98] sm:$0xff] %v6273_v50  ;;  %6194 = vmatmul.f32.gmra.mxu0 %v6050_v43  ;;  %v5732_v8 = vld [vmem:[#allocation2 + $0x159] sm:$0xff] }
 0x695   : > { %v5832_v24 = vpop.f32.mrf.mxu3 }
 0x696   : > { %v5511_v35 = vpop.f32.mrf.mxu2 }
 0x697   : > { %v5193_v13 = vpop.f32.mrf.mxu1  ;;  %v5633_v34 = vadd.f32 %v5511_v35, %v5312_v0  ;;  %v5092_v35 = vld [vmem:[#allocation2 + $0x158] sm:$0xf] }
 0x698   : > { %v6150_v51 = vpop.f32.mrf.mxu0  ;;  %v5313_v31 = vadd.f32 %v5272_v59, %v5193_v13 }
 0x699   : > { %v6274_v54 = vadd.f32 %v6150_v51, %v5953_v32  ;;  %v5954_v61 = vadd.f32 %v5832_v24, %v5633_v34  ;;  %v5413_v24 = vld [vmem:[#allocation2 + $0x159] sm:$0xf] }
 0x69a   : > { %5240 = vmatmul.f32.gmra.mxu1 %v5090_v58  ;;  %5882 = vmatmul.f32.gmra.mxu3 %v5732_v8  ;;  %v6054_v8 = vld [vmem:[#allocation2 + $0x162] sm:$0xff] }
 0x69b   : > { %5561 = vmatmul.f32.gmra.mxu2 %v5730_v63  ;;  %6315 = vst [vmem:[%s7866_s26 + $0xa0] sm:$0xff] %v6274_v54  ;;  %6197 = vmatmul.f32.gmra.mxu0 %v6051_v40  ;;  %v6052_v63 = vld [vmem:[#allocation2 + $0x152] sm:$0xff]  ;;  %v5274_v54 = vld [vmem:[%s7866_s26 + $0xc0] sm:$0xff] }
 0x69d   : > { %v5835_v56 = vpop.f32.mrf.mxu3 }
 0x69e   : > { %v5514_v53 = vpop.f32.mrf.mxu2 }
 0x69f   : > { %v5196_v21 = vpop.f32.mrf.mxu1  ;;  %v5634_v6 = vadd.f32 %v5514_v53, %v5313_v31  ;;  %v6336_v53 = vld [vmem:[#allocation2 + $0x2b] sm:$0xff] }
 0x6a0   : > { %v6153_v46 = vpop.f32.mrf.mxu0  ;;  %v5314_v43 = vadd.f32 %v5273_v26, %v5196_v21 }
 0x6a1   : > { %v6275_v17 = vadd.f32 %v6153_v46, %v5954_v61  ;;  %v5955_v27 = vadd.f32 %v5835_v56, %v5634_v6  ;;  %v6337_v6 = vld [vmem:[#allocation2 + $0x33] sm:$0xff] }
 0x6a2   : > { %5243 = vmatmul.f32.gmra.mxu1 %v5091_v10  ;;  %5885 = vmatmul.f32.gmra.mxu3 %v5733_v60  ;;  %v5275_v60 = vld [vmem:[%s7866_s26 + $0xc8] sm:$0xff] }
 0x6a3   : > { %5564 = vmatmul.f32.gmra.mxu2 %v5731_v11  ;;  %6316 = vst [vmem:[%s7866_s26 + $0xa8] sm:$0xff] %v6275_v17  ;;  %6200 = vmatmul.f32.gmra.mxu0 %v6052_v63  ;;  %v6053_v11 = vld [vmem:[#allocation2 + $0x15a] sm:$0xff]  ;;  %v6055_v17 = vld [vmem:[#allocation2 + $0x16a] sm:$0xf] }
 0x6a5   : > { %v5838_v29 = vpop.f32.mrf.mxu3 }
 0x6a6   : > { %v5517_v44 = vpop.f32.mrf.mxu2 }
 0x6a7   : > { %v5199_v15 = vpop.f32.mrf.mxu1  ;;  %v5635_v32 = vadd.f32 %v5517_v44, %v5314_v43 }
 0x6a8   : > { %v6156_v50 = vpop.f32.mrf.mxu0  ;;  %v5315_v40 = vadd.f32 %v5274_v54, %v5199_v15 }
 0x6a9   : > { %v6276_v30 = vadd.f32 %v6156_v50, %v5955_v27  ;;  %v5956_v51 = vadd.f32 %v5838_v29, %v5635_v32  ;;  %v5276_v50 = vld [vmem:[%s7866_s26 + $0xd0] sm:$0xff] }
 0x6aa   : > { %5246 = vmatmul.f32.gmra.mxu1 %v5092_v35  ;;  %5888 = vmatmul.f32.gmra.mxu3 %v5734_v52  ;;  %v6338_v35 = vld [vmem:[#allocation2 + $0x3b] sm:$0xff] }
 0x6ab   : > { %5567 = vmatmul.f32.gmra.mxu2 %v5413_v24  ;;  %6317 = vst [vmem:[%s7866_s26 + $0xb0] sm:$0xff] %v6276_v30  ;;  %6203 = vmatmul.f32.gmra.mxu0 %v6053_v11 }
 0x6ad   : > { %v5841_v20 = vpop.f32.mrf.mxu3 }
 0x6ae   : > { %v5520_v13 = vpop.f32.mrf.mxu2 }
 0x6af   : > { %v5202_v0 = vpop.f32.mrf.mxu1  ;;  %v5636_v56 = vadd.f32 %v5520_v13, %v5315_v40 }
 0x6b0   : > { %v6159_v58 = vpop.f32.mrf.mxu0  ;;  %v5316_v10 = vadd.f32 %v5275_v60, %v5202_v0 }
 0x6b1   : > { %v6277_v34 = vadd.f32 %v6159_v58, %v5956_v51  ;;  %v5957_v59 = vadd.f32 %v5841_v20, %v5636_v56  ;;  %v5277_v51 = vld [vmem:[%s7866_s26 + $0xd8] sm:$0xff] }
 0x6b2   : > { %6410 = vmatmul.f32.vlgmr.msra.gmra.mxu1 %v6336_v53 }
 0x6b3   : > { %6318 = vst [vmem:[%s7866_s26 + $0xb8] sm:$0xff] %v6277_v34  ;;  %6206 = vmatmul.f32.gmra.mxu0 %v6054_v8  ;;  %v6339_v8 = vld [vmem:[#allocation2 + $0x43] sm:$0xff] }
 0x6b5   : > { %v5844_v21 = vpop.f32.mrf.mxu3 }
 0x6b6   : > { %v5523_v61 = vpop.f32.mrf.mxu2 }
 0x6b7   : > { %v5205_v46 = vpop.f32.mrf.mxu1  ;;  %v5637_v44 = vadd.f32 %v5523_v61, %v5316_v10 }
 0x6b8   : > { %v6162_v31 = vpop.f32.mrf.mxu0  ;;  %v5317_v43 = vadd.f32 %v5276_v50, %v5205_v46  ;;  %v6341_v50 = vld [vmem:[#allocation2 + $0x53] sm:$0xff] }
 0x6b9   : > { %v6278_v63 = vadd.f32 %v6162_v31, %v5957_v59  ;;  %v5958_v15 = vadd.f32 %v5844_v21, %v5637_v44  ;;  %v5278_v21 = vld [vmem:[%s7866_s26 + $0xe0] sm:$0xff]  ;;  %v6340_v31 = vld [vmem:[#allocation2 + $0x4b] sm:$0xff] }
 0x6ba   : > { %6413 = vmatmul.f32.gmra.mxu1 %v6337_v6 }
 0x6bb   : > { %6319 = vst [vmem:[%s7866_s26 + $0xc0] sm:$0xff] %v6278_v63  ;;  %6209 = vmatmul.f32.gmra.mxu0 %v6055_v17 }
 0x6bd   : > { %v5847_v27 = vpop.f32.mrf.mxu3 }
 0x6be   : > { %v5526_v29 = vpop.f32.mrf.mxu2 }
 0x6bf   : > { %v5208_v26 = vpop.f32.mrf.mxu1  ;;  %v5638_v24 = vadd.f32 %v5526_v29, %v5317_v43  ;;  %v5279_v29 = vld [vmem:[%s7866_s26 + $0xe8] sm:$0xff] }
 0x6c0   : > { %v6165_v52 = vpop.f32.mrf.mxu0  ;;  %v5318_v54 = vadd.f32 %v5277_v51, %v5208_v26  ;;  %v6342_v51 = vld [vmem:[#allocation2 + $0x5b] sm:$0xff] }
 0x6c1   : > { %v6279_v30 = vadd.f32 %v6165_v52, %v5958_v15  ;;  %v5959_v13 = vadd.f32 %v5847_v27, %v5638_v24 }
 0x6c2   : > { %6416 = vmatmul.f32.gmra.mxu1 %v6338_v35 }
 0x6c3   : > { %6320 = vst [vmem:[%s7866_s26 + $0xc8] sm:$0xff] %v6279_v30 }
 0x6c5   : > { %v5850_v32 = vpop.f32.mrf.mxu3 }
 0x6c6   : > { %v5529_v11 = vpop.f32.mrf.mxu2 }
 0x6c7   : > { %v5211_v20 = vpop.f32.mrf.mxu1  ;;  %v5639_v40 = vadd.f32 %v5529_v11, %v5318_v54  ;;  %v5280_v11 = vld [vmem:[%s7866_s26 + $0xf0] sm:$0xff]  ;;  %v5281_v54 = vld [vmem:[%s7866_s26 + $0xf8] sm:$0xff] }
 0x6c8   : > { %v6168_v0 = vpop.f32.mrf.mxu0  ;;  %v5319_v46 = vadd.f32 %v5278_v21, %v5211_v20 }
 0x6c9   : > { %v6280_v58 = vadd.f32 %v6168_v0, %v5959_v13  ;;  %v5960_v56 = vadd.f32 %v5850_v32, %v5639_v40 }
 0x6ca   : > { %6419 = vmatmul.f32.gmra.mxu1 %v6339_v8 }
 0x6cb   : > { %6321 = vst [vmem:[%s7866_s26 + $0xd0] sm:$0xff] %v6280_v58 }
 0x6cd   : > { %v5853_v53 = vpop.f32.mrf.mxu3 }
 0x6ce   : > { %v5532_v34 = vpop.f32.mrf.mxu2 }
 0x6cf   : > { %v5214_v61 = vpop.f32.mrf.mxu1  ;;  %v5640_v17 = vadd.f32 %v5532_v34, %v5319_v46  ;;  %v6343_v46 = vld [vmem:[#allocation2 + $0x63] sm:$0xff] }
 0x6d0   : > { %v6171_v59 = vpop.f32.mrf.mxu0  ;;  %v5320_v15 = vadd.f32 %v5279_v29, %v5214_v61 }
 0x6d1   : > { %v6281_v60 = vadd.f32 %v6171_v59, %v5960_v56  ;;  %v5961_v6 = vadd.f32 %v5853_v53, %v5640_v17 }
 0x6d2   : > { %6422 = vmatmul.f32.gmra.mxu1 %v6340_v31 }
 0x6d3   : > { %6322 = vst [vmem:[%s7866_s26 + $0xd8] sm:$0xff] %v6281_v60  ;;  %v5282_v60 = vld [vmem:[%s7866_s26 + $0x100] sm:$0xff] }
 0x6d5   : > { %v5856_v63 = vpop.f32.mrf.mxu3 }
 0x6d6   : > { %v5535_v10 = vpop.f32.mrf.mxu2 }
 0x6d7   : > { %v5217_v44 = vpop.f32.mrf.mxu1  ;;  %v5641_v52 = vadd.f32 %v5535_v10, %v5320_v15  ;;  %v6344_v15 = vld [vmem:[#allocation2 + $0x6b] sm:$0xff] }
 0x6d8   : > { %v6174_v27 = vpop.f32.mrf.mxu0  ;;  %v5321_v13 = vadd.f32 %v5280_v11, %v5217_v44 }
 0x6d9   : > { %v6282_v26 = vadd.f32 %v6174_v27, %v5961_v6  ;;  %v5962_v35 = vadd.f32 %v5856_v63, %v5641_v52 }
 0x6da   : > { %6425 = vmatmul.f32.gmra.mxu1 %v6341_v50 }
 0x6db   : > { %6323 = vst [vmem:[%s7866_s26 + $0xe0] sm:$0xff] %v6282_v26  ;;  %v5283_v26 = vld [vmem:[%s7866_s26 + $0x108] sm:$0xff] }
 0x6dd   : > { %v5859_v30 = vpop.f32.mrf.mxu3 }
 0x6de   : > { %v5538_v43 = vpop.f32.mrf.mxu2 }
 0x6df   : > { %v5220_v24 = vpop.f32.mrf.mxu1  ;;  %v5642_v0 = vadd.f32 %v5538_v43, %v5321_v13  ;;  %v6345_v13 = vld [vmem:[#allocation2 + $0x73] sm:$0xff] }
 0x6e0   : > { %v6177_v32 = vpop.f32.mrf.mxu0  ;;  %v5322_v58 = vadd.f32 %v5281_v54, %v5220_v24 }
 0x6e1   : > { %v6283_v20 = vadd.f32 %v6177_v32, %v5962_v35  ;;  %v5963_v53 = vadd.f32 %v5859_v30, %v5642_v0 }
 0x6e2   : > { %6428 = vmatmul.f32.gmra.mxu1 %v6342_v51 }
 0x6e3   : > { %6324 = vst [vmem:[%s7866_s26 + $0xe8] sm:$0xff] %v6283_v20  ;;  %v5284_v20 = vld [vmem:[%s7866_s26 + $0x110] sm:$0xff] }
 0x6e5   : > { %v5862_v34 = vpop.f32.mrf.mxu3 }
 0x6e6   : > { %v5541_v8 = vpop.f32.mrf.mxu2 }
 0x6e7   : > { %v5643_v40 = vadd.f32 %v5541_v8, %v5322_v58  ;;  %v5223_v56 = vpop.f32.mrf.mxu1 }
 0x6e8   : > { %v6180_v21 = vpop.f32.mrf.mxu0  ;;  %v5323_v31 = vadd.f32 %v5282_v60, %v5223_v56  ;;  %v6346_v56 = vld [vmem:[#allocation2 + $0x7b] sm:$0xff] }
 0x6e9   : > { %v5964_v61 = vadd.f32 %v5862_v34, %v5643_v40  ;;  %v6284_v59 = vadd.f32 %v6180_v21, %v5963_v53 }
 0x6ea   : > { %6431 = vmatmul.f32.gmra.mxu1 %v6343_v46 }
 0x6eb   : > { %6325 = vst [vmem:[%s7866_s26 + $0xf0] sm:$0xff] %v6284_v59 }
 0x6ed   : > { %v5865_v63 = vpop.f32.mrf.mxu3 }
 0x6ee   : > { %v5544_v17 = vpop.f32.mrf.mxu2 }
 0x6ef   : > { %v5644_v10 = vadd.f32 %v5544_v17, %v5323_v31  ;;  %v5226_v6 = vpop.f32.mrf.mxu1 }
 0x6f0   : > { %v6183_v29 = vpop.f32.mrf.mxu0  ;;  %v5324_v50 = vadd.f32 %v5283_v26, %v5226_v6  ;;  %v6347_v6 = vld [vmem:[#allocation2 + $0x83] sm:$0xff] }
 0x6f1   : > { %v5965_v44 = vadd.f32 %v5865_v63, %v5644_v10  ;;  %v9806_v27 = vadd.f32 %v6183_v29, %v5964_v61  ;;  %v5285_v61 = vld [vmem:[%s7866_s26 + $0x118] sm:$0xff] }
 0x6f2   : > { %6434 = vmatmul.f32.gmra.mxu1 %v6344_v15 }
 0x6f5   : > { %v5868_v30 = vpop.f32.mrf.mxu3 }
 0x6f6   : > { %v5547_v52 = vpop.f32.mrf.mxu2 }
 0x6f7   : > { %v5645_v43 = vadd.f32 %v5547_v52, %v5324_v50  ;;  %v5229_v35 = vpop.f32.mrf.mxu1 }
 0x6f8   : > { %v6186_v11 = vpop.f32.mrf.mxu0  ;;  %v5325_v51 = vadd.f32 %v5284_v20, %v5229_v35 }
 0x6f9   : > { %v5966_v24 = vadd.f32 %v5868_v30, %v5645_v43  ;;  %v9809_v32 = vadd.f32 %v6186_v11, %v5965_v44  ;;  %v5286_v44 = vld [vmem:[%s7866_s26 + $0x120] sm:$0xff]  ;;  %v5287_v11 = vld [vmem:[%s7866_s26 + $0x128] sm:$0xff] }
 0x6fa   : > { %6437 = vmatmul.f32.gmra.mxu1 %v6345_v13 }
 0x6fd   : > { %v5871_v58 = vpop.f32.mrf.mxu3 }
 0x6fe   : > { %v5550_v0 = vpop.f32.mrf.mxu2 }
 0x6ff   : > { %v5646_v54 = vadd.f32 %v5550_v0, %v5325_v51  ;;  %v5232_v8 = vpop.f32.mrf.mxu1 }
 0x700   : > { %v6189_v34 = vpop.f32.mrf.mxu0  ;;  %v5326_v21 = vadd.f32 %v5285_v61, %v5232_v8 }
 0x701   : > { %v5967_v40 = vadd.f32 %v5871_v58, %v5646_v54  ;;  %v9812_v53 = vadd.f32 %v6189_v34, %v5966_v24  ;;  %v6348_v24 = vld [vmem:[#allocation2 + $0x8b] sm:$0xff]  ;;  %v6349_v34 = vld [vmem:[#allocation2 + $0x93] sm:$0xff] }
 0x702   : > { %6440 = vmatmul.f32.gmra.mxu1 %v6346_v56  ;;  %v5288_v56 = vld [vmem:[%s7866_s26 + $0x130] sm:$0xff] }
 0x705   : > { %v5874_v60 = vpop.f32.mrf.mxu3 }
 0x706   : > { %v5553_v59 = vpop.f32.mrf.mxu2 }
 0x707   : > { %v5647_v46 = vadd.f32 %v5553_v59, %v5326_v21  ;;  %v5235_v31 = vpop.f32.mrf.mxu1 }
 0x708   : > { %v6192_v10 = vpop.f32.mrf.mxu0  ;;  %v5327_v29 = vadd.f32 %v5286_v44, %v5235_v31  ;;  %v5289_v44 = vld [vmem:[%s7866_s26 + $0x138] sm:$0xff] }
 0x709   : > { %v5968_v17 = vadd.f32 %v5874_v60, %v5647_v46  ;;  %v9815_v63 = vadd.f32 %v6192_v10, %v5967_v40 }
 0x70a   : > { %6443 = vmatmul.f32.gmra.mxu1 %v6347_v6  ;;  %v6350_v6 = vld [vmem:[#allocation2 + $0x9b] sm:$0xff] }
 0x70b   : > { %10900 = vst [vmem:[#allocation27_spill] sm:$0xff] %v9815_v63 }
 0x70d   : > { %v5877_v50 = vpop.f32.mrf.mxu3 }
 0x70e   : > { %v5556_v15 = vpop.f32.mrf.mxu2 }
 0x70f   : > { %v5648_v26 = vadd.f32 %v5556_v15, %v5327_v29  ;;  %v5238_v52 = vpop.f32.mrf.mxu1 }
 0x710   : > { %v6195_v30 = vpop.f32.mrf.mxu0  ;;  %v5328_v13 = vadd.f32 %v5287_v11, %v5238_v52 }
 0x711   : > { %v5969_v43 = vadd.f32 %v5877_v50, %v5648_v26  ;;  %v9818_v35 = vadd.f32 %v6195_v30, %v5968_v17 }
 0x712   : > { %6446 = vmatmul.f32.gmra.mxu1 %v6348_v24 }
 0x713   : > { %10901 = vst [vmem:[#allocation25_spill] sm:$0xff] %v9818_v35 }
 0x715   : > { %v5880_v0 = vpop.f32.mrf.mxu3 }
 0x716   : > { %v5559_v20 = vpop.f32.mrf.mxu2 }
 0x717   : > { %v5649_v51 = vadd.f32 %v5559_v20, %v5328_v13  ;;  %v5241_v54 = vpop.f32.mrf.mxu1  ;;  %v6351_v20 = vld [vmem:[#allocation2 + $0xa3] sm:$0xff] }
 0x718   : > { %v6198_v8 = vpop.f32.mrf.mxu0  ;;  %v5329_v61 = vadd.f32 %v5288_v56, %v5241_v54 }
 0x719   : > { %v5970_v58 = vadd.f32 %v5880_v0, %v5649_v51  ;;  %v9821_v40 = vadd.f32 %v6198_v8, %v5969_v43  ;;  %v5290_v43 = vld [vmem:[%s7866_s26 + $0x140] sm:$0xf]  ;;  %v6352_v8 = vld [vmem:[#allocation2 + $0xab] sm:$0xff] }
 0x71a   : > { %6449 = vmatmul.f32.gmra.mxu1 %v6349_v34 }
 0x71b   : > { %10902 = vst [vmem:[#allocation36_spill] sm:$0xff] %v9821_v40  ;;  %v6537_v40 = vld [vmem:[%s7866_s26 + $0x18] sm:$0xff] }
 0x71d   : > { %v5883_v46 = vpop.f32.mrf.mxu3 }
 0x71e   : > { %v5562_v21 = vpop.f32.mrf.mxu2 }
 0x71f   : > { %v5650_v59 = vadd.f32 %v5562_v21, %v5329_v61  ;;  %v5244_v60 = vpop.f32.mrf.mxu1  ;;  %v6353_v21 = vld [vmem:[#allocation2 + $0xb3] sm:$0xff] }
 0x720   : > { %v6201_v17 = vpop.f32.mrf.mxu0  ;;  %v5330_v29 = vadd.f32 %v5289_v44, %v5244_v60 }
 0x721   : > { %v5971_v31 = vadd.f32 %v5883_v46, %v5650_v59  ;;  %v9824_v10 = vadd.f32 %v6201_v17, %v5970_v58  ;;  %v6354_v17 = vld [vmem:[#allocation2 + $0xbb] sm:$0xff] }
 0x722   : > { %6452 = vmatmul.f32.gmra.mxu1 %v6350_v6 }
 0x723   : > { %10903 = vst [vmem:[#allocation42_spill] sm:$0xff] %v9824_v10  ;;  %v6536_v10 = vld [vmem:[%s7866_s26 + $0x10] sm:$0xff] }
 0x725   : > { %v5886_v50 = vpop.f32.mrf.mxu3 }
 0x726   : > { %v5565_v15 = vpop.f32.mrf.mxu2 }
 0x727   : > { %v5651_v26 = vadd.f32 %v5565_v15, %v5330_v29  ;;  %v5247_v52 = vpop.f32.mrf.mxu1 }
 0x728   : > { %v5331_v30 = vadd.f32 %v5290_v43, %v5247_v52  ;;  %v6204_v24 = vpop.f32.mrf.mxu0  ;;  %v6356_v52 = vld [vmem:[#allocation2 + $0xcb] sm:$0xff] }
 0x729   : > { %v5972_v11 = vadd.f32 %v5886_v50, %v5651_v26  ;;  %v9828_v13 = vadd.f32 %v6204_v24, %v5971_v31  ;;  %v6355_v26 = vld [vmem:[#allocation2 + $0xc3] sm:$0xff] }
 0x72a   : > { %5372 = vst [vmem:[%s7866_s26 + $0x140] sm:$0xf] %v5331_v30  ;;  %6455 = vmatmul.f32.gmra.mxu1 %v6351_v20  ;;  %v6357_v30 = vld [vmem:[#allocation2 + $0xd3] sm:$0xff] }
 0x72b   : > { %10904 = vst [vmem:[#allocation32_spill] sm:$0xff] %v9828_v13  ;;  %v6376_v13 = vld [vmem:[#allocation2 + $0x16b] sm:$0xf] }
 0x72d   : > { %v5889_v59 = vpop.f32.mrf.mxu3 }
 0x72e   : > { %v5568_v54 = vpop.f32.mrf.mxu2 }
 0x72f   : > { %v9831_v51 = vpop.f32.mrf.mxu1 }
 0x730   : > { %v6207_v0 = vpop.f32.mrf.mxu0 }
 0x731   : > { %v5611_v58 = vld [vmem:[%s7866_s26 + $0x140] sm:$0xf]  ;;  %v9834_v34 = vadd.f32 %v6207_v0, %v5972_v11 }
 0x732   : > { %v5652_v56 = vadd.f32 %v5611_v58, %v5568_v54  ;;  %6458 = vmatmul.f32.gmra.mxu1 %v6352_v8  ;;  %v6358_v11 = vld [vmem:[#allocation2 + $0xdb] sm:$0xff]  ;;  %v6359_v0 = vld [vmem:[#allocation2 + $0xe3] sm:$0xff]  ;;  %v6360_v58 = vld [vmem:[#allocation2 + $0xeb] sm:$0xff] }
 0x733   : > { %10905 = vst [vmem:[#allocation28_spill] sm:$0xff] %v9834_v34  ;;  %v6374_v34 = vld [vmem:[#allocation2 + $0x15b] sm:$0xff] }
 0x734   : > { %5693 = vst [vmem:[%s7866_s26 + $0x140] sm:$0xf] %v5652_v56  ;;  %v6361_v56 = vld [vmem:[#allocation2 + $0xf3] sm:$0xff] }
 0x737   : > { %v9837_v61 = vpop.f32.mrf.mxu1 }
 0x738   : > { %v6210_v6 = vpop.f32.mrf.mxu0 }
 0x73a   : > { %6461 = vmatmul.f32.gmra.mxu1 %v6353_v21 }
 0x73b   : > { %v5932_v46 = vld [vmem:[%s7866_s26 + $0x140] sm:$0xf] }
 0x73c   : > { %v5973_v60 = vadd.f32 %v5932_v46, %v5889_v59  ;;  %v6362_v59 = vld [vmem:[#allocation2 + $0xfb] sm:$0xff] }
 0x73e   : > { %6014 = vst [vmem:[%s7866_s26 + $0x140] sm:$0xf] %v5973_v60  ;;  %v6363_v60 = vld [vmem:[#allocation2 + $0x103] sm:$0xff] }
 0x73f   : > { %v9841_v31 = vpop.f32.mrf.mxu1 }
 0x740   : > { %v6577_v48 = vadd.f32 %v6536_v10, %v9841_v31 }
 0x742   : > { %6464 = vmatmul.f32.gmra.mxu1 %v6354_v17 }
 0x745   : > { %v6253_v44 = vld [vmem:[%s7866_s26 + $0x140] sm:$0xf] }
 0x746   : > { %v6294_v29 = vadd.f32 %v6253_v44, %v6210_v6  ;;  %v6364_v6 = vld [vmem:[#allocation2 + $0x10b] sm:$0xff] }
 0x747   : > { %v9844_v15 = vpop.f32.mrf.mxu1 }
 0x748   : > { %6335 = vst [vmem:[%s7866_s26 + $0x140] sm:$0xf] %v6294_v29  ;;  %v6365_v29 = vld [vmem:[#allocation2 + $0x113] sm:$0xff]  ;;  %v6578_v35 = vadd.f32 %v6537_v40, %v9844_v15 }
 0x74a   : > { %6467 = vmatmul.f32.gmra.mxu1 %v6355_v26 }
 0x74f   : > { %v9847_v50 = vpop.f32.mrf.mxu1 }
 0x752   : > { %6470 = vmatmul.f32.gmra.mxu1 %v6356_v52  ;;  %v6366_v52 = vld [vmem:[#allocation2 + $0x11b] sm:$0xff] }
 0x757   : > { %v9849_v43 = vpop.f32.mrf.mxu1 }
 0x75a   : > { %6473 = vmatmul.f32.gmra.mxu1 %v6357_v30 }
 0x75f   : > { %v9851_v24 = vpop.f32.mrf.mxu1 }
 0x762   : > { %6476 = vmatmul.f32.gmra.mxu1 %v6358_v11  ;;  %v6367_v11 = vld [vmem:[#allocation2 + $0x123] sm:$0xff] }
 0x767   : > { %v9853_v20 = vpop.f32.mrf.mxu1 }
 0x76a   : > { %6479 = vmatmul.f32.gmra.mxu1 %v6359_v0 }
 0x76f   : > { %v9855_v54 = vpop.f32.mrf.mxu1 }
 0x772   : > { %6482 = vmatmul.f32.gmra.mxu1 %v6360_v58  ;;  %v6368_v58 = vld [vmem:[#allocation2 + $0x12b] sm:$0xff] }
 0x777   : > { %v9857_v8 = vpop.f32.mrf.mxu1 }
 0x77a   : > { %6485 = vmatmul.f32.gmra.mxu1 %v6361_v56 }
 0x77f   : > { %v9859_v21 = vpop.f32.mrf.mxu1 }
 0x782   : > { %6488 = vmatmul.f32.gmra.mxu1 %v6362_v59  ;;  %v6369_v59 = vld [vmem:[#allocation2 + $0x133] sm:$0xff] }
 0x787   : > { %v9861_v46 = vpop.f32.mrf.mxu1 }
 0x78a   : > { %6491 = vmatmul.f32.gmra.mxu1 %v6363_v60 }
 0x78f   : > { %v9863_v17 = vpop.f32.mrf.mxu1 }
 0x792   : > { %6494 = vmatmul.f32.gmra.mxu1 %v6364_v6  ;;  %v6370_v6 = vld [vmem:[#allocation2 + $0x13b] sm:$0xff] }
 0x797   : > { %v9865_v44 = vpop.f32.mrf.mxu1 }
 0x79a   : > { %6497 = vmatmul.f32.gmra.mxu1 %v6365_v29 }
 0x79f   : > { %v9867_v26 = vpop.f32.mrf.mxu1 }
 0x7a2   : > { %6500 = vmatmul.f32.gmra.mxu1 %v6366_v52 }
 0x7a7   : > { %v9869_v30 = vpop.f32.mrf.mxu1 }
 0x7aa   : > { %6503 = vmatmul.f32.gmra.mxu1 %v6367_v11 }
 0x7af   : > { %v9871_v0 = vpop.f32.mrf.mxu1 }
 0x7b2   : > { %6506 = vmatmul.f32.gmra.mxu1 %v6368_v58  ;;  %v6373_v58 = vld [vmem:[#allocation2 + $0x153] sm:$0xff] }
 0x7b7   : > { %v9873_v56 = vpop.f32.mrf.mxu1 }
 0x7ba   : > { %6509 = vmatmul.f32.gmra.mxu1 %v6369_v59 }
 0x7bf   : > { %v9875_v60 = vpop.f32.mrf.mxu1 }
 0x7c2   : > { %6512 = vmatmul.f32.gmra.mxu1 %v6370_v6 }
 0x7c7   : > { %v9877_v29 = vpop.f32.mrf.mxu1 }
 0x7ca   : > { %6515 = vmatmul.f32.gmra.mxu1 %v6371_v28 }
 0x7cf   : > { %v9879_v52 = vpop.f32.mrf.mxu1 }
 0x7d2   : > { %6518 = vmatmul.f32.gmra.mxu1 %v6372_v49 }
 0x7d7   : > { %v9881_v11 = vpop.f32.mrf.mxu1 }
 0x7da   : > { %6521 = vmatmul.f32.gmra.mxu1 %v6373_v58 }
 0x7df   : > { %v9883_v59 = vpop.f32.mrf.mxu1 }
 0x7e2   : > { %6524 = vmatmul.f32.gmra.mxu1 %v6374_v34  ;;  %v6576_v34 = vadd.f32 %v6535_v45, %v9837_v61  ;;  %v6538_v45 = vld [vmem:[%s7866_s26 + $0x20] sm:$0xff] }
 0x7e7   : > { %v9885_v6 = vpop.f32.mrf.mxu1 }
 0x7ea   : > { %6527 = vmatmul.f32.gmra.mxu1 %v6375_v7  ;;  %v6575_v7 = vadd.f32 %v6534_v4, %v9831_v51  ;;  %v6579_v4 = vadd.f32 %v6538_v45, %v9847_v50  ;;  %v6539_v51 = vld [vmem:[%s7866_s26 + $0x28] sm:$0xff]  ;;  %v6541_v50 = vld [vmem:[%s7866_s26 + $0x38] sm:$0xff] }
 0x7eb   : > { %v6580_v31 = vadd.f32 %v6539_v51, %v9849_v43  ;;  %v6582_v45 = vadd.f32 %v6541_v50, %v9853_v20  ;;  %v6543_v43 = vld [vmem:[%s7866_s26 + $0x48] sm:$0xff] }
 0x7ef   : > { %v9887_v28 = vpop.f32.mrf.mxu1 }
 0x7f2   : > { %6530 = vmatmul.f32.gmra.mxu1 %v6376_v13  ;;  %v9905_v13 = vld [vmem:[%s10597_s5] ss:$0 sm:$0xff] }
 0x7f3   : > { %v6703_v18 = vadd.f32 %v9905_v13, %v6576_v34  ;;  %v6702_v61 = vadd.f32 %v9905_v13, %v6575_v7  ;;  %v6704_v25 = vadd.f32 %v9905_v13, %v6577_v48  ;;  %v6705_v10 = vadd.f32 %v9905_v13, %v6578_v35  ;;  %v6540_v34 = vld [vmem:[%s7866_s26 + $0x30] sm:$0xff] }
 0x7f4   : > { %v6706_v55 = vadd.f32 %v9905_v13, %v6579_v4  ;;  %v6707_v36 = vadd.f32 %v9905_v13, %v6580_v31  ;;  %v6709_v4 = vadd.f32 %v9905_v13, %v6582_v45 }
 0x7f5   : > { %v9918_v63 = vsel %vm3408_vm9, %v6703_v18, 0.0  ;;  %v9927_v15 = vsel %vm3407_vm10, %v6702_v61, 0.0  ;;  %v9931_v48 = vsel %vm3409_vm11, %v6704_v25, 0.0  ;;  %v6581_v18 = vadd.f32 %v6540_v34, %v9851_v24  ;;  %v6542_v61 = vld [vmem:[%s7866_s26 + $0x40] sm:$0xff] }
 0x7f6   : > { %10906 = vst [vmem:[#allocation37_spill] sm:$0xff] %v9918_v63  ;;  %v6832_v35 = vmul.f32 %v9918_v63, %v9918_v63  ;;  %v9940_v7 = vsel %vm3410_vm12, %v6705_v10, 0.0  ;;  %v6831_v25 = vmul.f32 %v9927_v15, %v9927_v15  ;;  %v6784_v22 = vadd.f32 %v9918_v63, %v9927_v15 }
 0x7f7   : > { %v9889_v49 = vpop.f32.mrf.mxu1  ;;  %10907 = vst [vmem:[#allocation43_spill] sm:$0xff] %v9927_v15  ;;  %v6833_v24 = vmul.f32 %v9931_v48, %v9931_v48  ;;  %v9953_v51 = vsel %vm3411_vm13, %v6706_v55, 0.0  ;;  %v6708_v10 = vadd.f32 %v9905_v13, %v6581_v18  ;;  %v6583_v31 = vadd.f32 %v6542_v61, %v9855_v54  ;;  %v6545_v61 = vld [vmem:[%s7866_s26 + $0x58] sm:$0xff] }
 0x7f8   : > { %v6872_v20 = vadd.f32 %v6832_v35, %v6831_v25  ;;  %v6785_v34 = vadd.f32 %v6784_v22, %v9931_v48  ;;  %v6834_v50 = vmul.f32 %v9940_v7, %v9940_v7  ;;  %v9963_v15 = vsel %vm3412_vm14, %v6707_v36, 0.0  ;;  %v6544_v35 = vld [vmem:[%s7866_s26 + $0x50] sm:$0xff] }
 0x7f9   : > { %v6584_v55 = vadd.f32 %v6543_v43, %v9857_v8  ;;  %v6835_v54 = vmul.f32 %v9953_v51, %v9953_v51  ;;  %v9975_v22 = vsel %vm3413_vm15, %v6708_v10, 0.0  ;;  %v6710_v63 = vadd.f32 %v9905_v13, %v6583_v31 }
 0x7fa   : > { %v6873_v37 = vadd.f32 %v6872_v20, %v6833_v24  ;;  %v6786_v18 = vadd.f32 %v6785_v34, %v9940_v7  ;;  %v6585_v36 = vadd.f32 %v6544_v35, %v9859_v21  ;;  %v6836_v24 = vmul.f32 %v9963_v15, %v9963_v15  ;;  %v6546_v21 = vld [vmem:[%s7866_s26 + $0x60] sm:$0xff] }
 0x7fb   : > { %v9985_v34 = vsel %vm3414_vm0, %v6709_v4, 0.0  ;;  %v6711_v42 = vadd.f32 %v9905_v13, %v6584_v55  ;;  %v6586_v10 = vadd.f32 %v6545_v61, %v9861_v46  ;;  %v6587_v4 = vadd.f32 %v6546_v21, %v9863_v17 }
 0x7fc   : > { %v6874_v45 = vadd.f32 %v6873_v37, %v6834_v50  ;;  %v6787_v8 = vadd.f32 %v6786_v18, %v9953_v51  ;;  %v6837_v37 = vmul.f32 %v9975_v22, %v9975_v22  ;;  %v9995_v18 = vsel %vm3415_vm1, %v6710_v63, 0.0 }
 0x7fd   : > { %v6712_v35 = vadd.f32 %v9905_v13, %v6585_v36  ;;  %v6838_v46 = vmul.f32 %v9985_v34, %v9985_v34  ;;  %v6713_v61 = vadd.f32 %v9905_v13, %v6586_v10  ;;  %v6839_v17 = vmul.f32 %v9995_v18, %v9995_v18 }
 0x7fe   : > { %v6875_v43 = vadd.f32 %v6874_v45, %v6835_v54  ;;  %v6788_v31 = vadd.f32 %v6787_v8, %v9963_v15  ;;  %v6547_v54 = vld [vmem:[%s7866_s26 + $0x68] sm:$0xff]  ;;  %v10005_v8 = vsel %vm3416_vm2, %v6711_v42, 0.0  ;;  %v6714_v42 = vadd.f32 %v9905_v13, %v6587_v4 }
 0x7ff   : > { %v9891_v62 = vpop.f32.mrf.mxu1  ;;  %v6588_v63 = vadd.f32 %v6547_v54, %v9865_v44  ;;  %v10015_v21 = vsel %vm3417_vm3, %v6712_v35, 0.0  ;;  %vm10922_vm12 = vcmp.eq.s32.totalorder %v10860_v1, 1  ;;  %vm10923_vm13 = vcmp.eq.s32.totalorder %v10863_v12, 1 }
 0x800   : > { %v6876_v20 = vadd.f32 %v6875_v43, %v6836_v24  ;;  %v6789_v55 = vadd.f32 %v6788_v31, %v9975_v22  ;;  %v6548_v24 = vld [vmem:[%s7866_s26 + $0x70] sm:$0xff]  ;;  %v10028_v31 = vsel %vm3418_vm4, %v6713_v61, 0.0  ;;  %vm10924_vm14 = vcmp.eq.s32.totalorder %v10866_v16, 1 }
 0x801   : > { %v6589_v45 = vadd.f32 %v6548_v24, %v9867_v26  ;;  %v6715_v35 = vadd.f32 %v9905_v13, %v6588_v63  ;;  %vm10925_vm15 = vcmp.eq.s32.totalorder %v10868_v5, 1  ;;  %vm10926_vm0 = vcmp.eq.s32.totalorder %v10870_v2, 1 }
 0x802   : > { %v6877_v50 = vadd.f32 %v6876_v20, %v6837_v37  ;;  %v6790_v36 = vadd.f32 %v6789_v55, %v9985_v34  ;;  %v6840_v20 = vmul.f32 %v10005_v8, %v10005_v8  ;;  %v6549_v55 = vld [vmem:[%s7866_s26 + $0x78] sm:$0xff]  ;;  %vm10927_vm1 = vcmp.eq.s32.totalorder %v10872_v14, 1 }
 0x803   : > { %v6590_v4 = vadd.f32 %v6549_v55, %v9869_v30  ;;  %v6842_v30 = vmul.f32 %v10028_v31, %v10028_v31  ;;  %vm10928_vm2 = vcmp.eq.s32.totalorder %v10874_v41, 1  ;;  %vm10929_vm3 = vcmp.eq.s32.totalorder %v10876_v23, 1 }
 0x804   : > { %v6878_v44 = vadd.f32 %v6877_v50, %v6838_v46  ;;  %v6791_v37 = vadd.f32 %v6790_v36, %v9995_v18  ;;  %v6841_v46 = vmul.f32 %v10015_v21, %v10015_v21  ;;  %v6550_v50 = vld [vmem:[%s7866_s26 + $0x80] sm:$0xff]  ;;  %vm10930_vm4 = vcmp.eq.s32.totalorder %v10878_v38, 1 }
 0x805   : > { %v10916_v36 = vld [vmem:[#allocation51_spill] sm:$0xff]  ;;  %v6591_v61 = vadd.f32 %v6550_v50, %v9871_v0  ;;  %v6717_v55 = vadd.f32 %v9905_v13, %v6590_v4 }
 0x806   : > { %v6879_v26 = vadd.f32 %v6878_v44, %v6839_v17  ;;  %vm10917_vm9 = vcmp.eq.s32.totalorder %v10916_v36, 1  ;;  %v6551_v17 = vld [vmem:[%s7866_s26 + $0x88] sm:$0xff]  ;;  %v10918_v44 = vld [vmem:[#allocation53_spill] sm:$0xff] }
 0x807   : > { %v9893_v58 = vpop.f32.mrf.mxu1  ;;  %v10038_v24 = vsel %vm10917_vm9, %v6714_v42, 0.0  ;;  %vm10919_vm10 = vcmp.eq.s32.totalorder %v10918_v44, 1  ;;  %v6592_v42 = vadd.f32 %v6551_v17, %v9873_v56  ;;  %v10071_v17 = vsel %vm10922_vm12, %v6717_v55, 0.0 }
 0x808   : > { %v6880_v54 = vadd.f32 %v6879_v26, %v6840_v20  ;;  %v6843_v0 = vmul.f32 %v10038_v24, %v10038_v24  ;;  %v6552_v20 = vld [vmem:[%s7866_s26 + $0x90] sm:$0xff]  ;;  %vm10935_vm9 = vcmp.eq.s32.totalorder %v9234_v3, 1  ;;  %v10938_v3 = vld [vmem:[#allocation27_spill] sm:$0xff] }
 0x809   : > { %v6593_v44 = vadd.f32 %v6552_v20, %v9875_v60 }
 0x80a   : > { %v6881_v36 = vadd.f32 %v6880_v54, %v6841_v46 }
 0x80b   : > { %v6720_v1 = vadd.f32 %v9905_v13, %v6593_v44 }
 0x80c   : > { %v6882_v56 = vadd.f32 %v6881_v36, %v6842_v30  ;;  %v6554_v36 = vld [vmem:[%s7866_s26 + $0xa0] sm:$0xff] }
 0x80d   : > { %v6595_v55 = vadd.f32 %v6554_v36, %v9879_v52 }
 0x80e   : > { %v6883_v60 = vadd.f32 %v6882_v56, %v6843_v0  ;;  %v6555_v0 = vld [vmem:[%s7866_s26 + $0xa8] sm:$0xff]  ;;  %v6556_v56 = vld [vmem:[%s7866_s26 + $0xb0] sm:$0xff] }
 0x80f   : > { %v9899_v9 = vpop.f32.mrf.mxu1  ;;  %v6722_v16 = vadd.f32 %v9905_v13, %v6595_v55  ;;  %v6558_v55 = vld [vmem:[%s7866_s26 + $0xc0] sm:$0xff] }
 0x817   : > { %v9923_v40 = vpop.f32.mrf.mxu1 }
 0x81f   : > { %v9971_v25 = vpop.f32.mrf.mxu1 }
 0x827   : > { %v6504_v43 = vpop.f32.mrf.mxu1 }
 0x828   : > { %v10020_v10 = vadd.f32 %v6504_v43, %v9806_v27  ;;  %v6792_v27 = vadd.f32 %v6791_v37, %v10005_v8  ;;  %v6716_v43 = vadd.f32 %v9905_v13, %v6589_v45  ;;  %v10048_v37 = vsel %vm10919_vm10, %v6715_v35, 0.0 }
 0x829   : > { %v6718_v35 = vadd.f32 %v9905_v13, %v6591_v61  ;;  %v6844_v54 = vmul.f32 %v10048_v37, %v10048_v37 }
 0x82a   : > { %v6793_v63 = vadd.f32 %v6792_v27, %v10015_v21  ;;  %v10920_v27 = vld [vmem:[#allocation55_spill] sm:$0xff] }
 0x82b   : > { %vm10921_vm11 = vcmp.eq.s32.totalorder %v10920_v27, 1  ;;  %v6884_v20 = vadd.f32 %v6883_v60, %v6844_v54  ;;  %v6596_v27 = vadd.f32 %v6555_v0, %v9881_v11  ;;  %v10101_v54 = vsel %vm10925_vm15, %v6720_v1, 0.0 }
 0x82c   : > { %v6794_v45 = vadd.f32 %v6793_v63, %v10028_v31  ;;  %v10058_v50 = vsel %vm10921_vm11, %v6716_v43, 0.0  ;;  %v6553_v63 = vld [vmem:[%s7866_s26 + $0x98] sm:$0xff]  ;;  %v6719_v43 = vadd.f32 %v9905_v13, %v6592_v42  ;;  %v6849_v1 = vmul.f32 %v10101_v54, %v10101_v54 }
 0x82d   : > { %v6594_v61 = vadd.f32 %v6553_v63, %v9877_v29  ;;  %v6845_v30 = vmul.f32 %v10058_v50, %v10058_v50  ;;  %v6846_v29 = vmul.f32 %v10071_v17, %v10071_v17  ;;  %v6597_v63 = vadd.f32 %v6556_v56, %v9883_v59  ;;  %v6560_v56 = vld [vmem:[%s7866_s26 + $0xd0] sm:$0xff] }
 0x82e   : > { %v6795_v46 = vadd.f32 %v6794_v45, %v10038_v24  ;;  %v10081_v45 = vsel %vm10923_vm13, %v6718_v35, 0.0 }
 0x82f   : > { %v6507_v26 = vpop.f32.mrf.mxu1  ;;  %v6721_v12 = vadd.f32 %v9905_v13, %v6594_v61  ;;  %v6885_v35 = vadd.f32 %v6884_v20, %v6845_v30  ;;  %v6847_v52 = vmul.f32 %v10081_v45, %v10081_v45  ;;  %v6723_v30 = vadd.f32 %v9905_v13, %v6596_v27 }
 0x830   : > { %v10063_v4 = vadd.f32 %v6507_v26, %v9809_v32  ;;  %v6796_v32 = vadd.f32 %v6795_v46, %v10048_v37  ;;  %v10091_v26 = vsel %vm10924_vm14, %v6719_v43, 0.0  ;;  %v10124_v20 = vsel %vm10927_vm1, %v6722_v16, 0.0 }
 0x831   : > { %v6886_v11 = vadd.f32 %v6885_v35, %v6846_v29  ;;  %v6848_v60 = vmul.f32 %v10091_v26, %v10091_v26  ;;  %v10114_v5 = vsel %vm10926_vm0, %v6721_v12, 0.0  ;;  %v6724_v2 = vadd.f32 %v9905_v13, %v6597_v63  ;;  %v6559_v12 = vld [vmem:[%s7866_s26 + $0xc8] sm:$0xff] }
 0x832   : > { %v6797_v42 = vadd.f32 %v6796_v32, %v10058_v50  ;;  %v6557_v32 = vld [vmem:[%s7866_s26 + $0xb8] sm:$0xff]  ;;  %v10134_v27 = vsel %vm10928_vm2, %v6723_v30, 0.0  ;;  %v6600_v35 = vadd.f32 %v6559_v12, %v9889_v49  ;;  %v6601_v63 = vadd.f32 %v6560_v56, %v9891_v62 }
 0x833   : > { %v6598_v36 = vadd.f32 %v6557_v32, %v9885_v6  ;;  %v6887_v59 = vadd.f32 %v6886_v11, %v6847_v52  ;;  %v6850_v6 = vmul.f32 %v10114_v5, %v10114_v5  ;;  %v10144_v16 = vsel %vm10929_vm3, %v6724_v2, 0.0 }
 0x834   : > { %v6798_v44 = vadd.f32 %v6797_v42, %v10071_v17  ;;  %v6599_v42 = vadd.f32 %v6558_v55, %v9887_v28  ;;  %v6851_v28 = vmul.f32 %v10124_v20, %v10124_v20  ;;  %v6727_v23 = vadd.f32 %v9905_v13, %v6600_v35  ;;  %v6564_v35 = vld [vmem:[%s7866_s26 + $0xf0] sm:$0xff] }
 0x835   : > { %v6888_v29 = vadd.f32 %v6887_v59, %v6848_v60  ;;  %v6725_v14 = vadd.f32 %v9905_v13, %v6598_v36  ;;  %v6561_v60 = vld [vmem:[%s7866_s26 + $0xd8] sm:$0xff]  ;;  %v6853_v62 = vmul.f32 %v10144_v16, %v10144_v16  ;;  %v6728_v38 = vadd.f32 %v9905_v13, %v6601_v63 }
 0x836   : > { %v6799_v61 = vadd.f32 %v6798_v44, %v10081_v45  ;;  %v6726_v41 = vadd.f32 %v9905_v13, %v6599_v42  ;;  %v6602_v30 = vadd.f32 %v6561_v60, %v9893_v58 }
 0x837   : > { %v6510_v46 = vpop.f32.mrf.mxu1  ;;  %v6889_v44 = vadd.f32 %v6888_v29, %v6849_v1  ;;  %v10154_v32 = vsel %vm10930_vm4, %v6725_v14, 0.0  ;;  %v6563_v29 = vld [vmem:[%s7866_s26 + $0xe8] sm:$0xff] }
 0x838   : > { %v10106_v43 = vadd.f32 %v6510_v46, %v9812_v53  ;;  %v6800_v53 = vadd.f32 %v6799_v61, %v10091_v26  ;;  %v6852_v61 = vmul.f32 %v10134_v27, %v10134_v27  ;;  %v10164_v1 = vsel %vm10931_vm7, %v6726_v41, 0.0 }
 0x839   : > { %v6890_v11 = vadd.f32 %v6889_v44, %v6850_v6  ;;  %v6854_v58 = vmul.f32 %v10154_v32, %v10154_v32  ;;  %v6729_v6 = vadd.f32 %v9905_v13, %v6602_v30  ;;  %v6604_v47 = vadd.f32 %v6563_v29, %v9923_v40 }
 0x83a   : > { %v6801_v0 = vadd.f32 %v6800_v53, %v10101_v54  ;;  %v6562_v53 = vld [vmem:[%s7866_s26 + $0xe0] sm:$0xff]  ;;  %vm10964_vm7 = vcmask 1043456  }
 0x83b   : > { %v6891_v36 = vadd.f32 %v6890_v11, %v6851_v28  ;;  %v6603_v55 = vadd.f32 %v6562_v53, %v9899_v9  ;;  %v6855_v9 = vmul.f32 %v10164_v1, %v10164_v1  ;;  %v6605_v28 = vadd.f32 %v6564_v35, %v9971_v25 }
 0x83c   : > { %v6802_v52 = vadd.f32 %v6801_v0, %v10114_v5  ;;  %v10174_v0 = vsel %vm3432_vm6, %v6727_v23, 0.0  ;;  %vm10933_vm6 = vcmp.eq.s32.totalorder %v10885_v39, 1  ;;  %v6731_v11 = vadd.f32 %v9905_v13, %v6604_v47  ;;  %v10939_v47 = vld [vmem:[#allocation23_spill] sm:$0xff] }
 0x83d   : > { %v6892_v2 = vadd.f32 %v6891_v36, %v6852_v61  ;;  %v6730_v33 = vadd.f32 %v9905_v13, %v6603_v55  ;;  %v6856_v40 = vmul.f32 %v10174_v0, %v10174_v0  ;;  %v10193_v63 = vsel %vm10933_vm6, %v6729_v6, 0.0  ;;  %v10936_v55 = vld [vmem:[#allocation20_spill] sm:$0xff] }
 0x83e   : > { %v6803_v49 = vadd.f32 %v6802_v52, %v10124_v20  ;;  %v10184_v52 = vsel %vm10932_vm8, %v6728_v38, 0.0  ;;  %v6732_v60 = vadd.f32 %v9905_v13, %v6605_v28  ;;  %v6858_v39 = vmul.f32 %v10193_v63, %v10193_v63  ;;  %v10942_v28 = vld [vmem:[#allocation13_spill] sm:$0xff]  ;;  %vm10965_vm8 = vmmov %vm10964_vm7 }
 0x83f   : > { %v6513_v46 = vpop.f32.mrf.mxu1  ;;  %v6893_v12 = vadd.f32 %v6892_v2, %v6853_v62  ;;  %v6857_v61 = vmul.f32 %v10184_v52, %v10184_v52  ;;  %v10201_v25 = vsel %vm10934_vm5, %v6730_v33, 0.0  ;;  %v10209_v36 = vsel %vm10935_vm9, %v6731_v11, 0.0 }
 0x840   : > { %v6804_v59 = vadd.f32 %v6803_v49, %v10134_v27  ;;  %v6859_v53 = vmul.f32 %v10201_v25, %v10201_v25  ;;  %vm10937_vm10 = vcmp.eq.s32.totalorder %v10936_v55, 1  ;;  %vm10940_vm11 = vcmp.eq.s32.totalorder %v10939_v47, 1 }
 0x841   : > { %v6894_v56 = vadd.f32 %v6893_v12, %v6854_v58  ;;  %v10218_v2 = vsel %vm10937_vm10, %v6732_v60, 0.0  ;;  %v6609_v58 = vadd.f32 %v6513_v46, %v10938_v3  ;;  %vm10943_vm12 = vcmp.eq.s32.totalorder %v10942_v28, 1 }
 0x842   : > { %v6805_v42 = vadd.f32 %v6804_v59, %v10144_v16  ;;  %v6733_v59 = vadd.f32 %v9905_v13, %v10020_v10  ;;  %v6860_v10 = vmul.f32 %v10209_v36, %v10209_v36  ;;  %v6861_v46 = vmul.f32 %v10218_v2, %v10218_v2 }
 0x843   : > { %v6895_v49 = vadd.f32 %v6894_v56, %v6855_v9  ;;  %v10941_v9 = vld [vmem:[#allocation25_spill] sm:$0xff] }
 0x844   : > { %v6806_v14 = vadd.f32 %v6805_v42, %v10154_v32  ;;  %v6734_v42 = vadd.f32 %v9905_v13, %v10063_v4  ;;  %v10228_v12 = vsel %vm10940_vm11, %v6733_v59, 0.0 }
 0x845   : > { %v6896_v23 = vadd.f32 %v6895_v49, %v6856_v40  ;;  %v10944_v40 = vld [vmem:[#allocation36_spill] sm:$0xff] }
 0x846   : > { %v6807_v41 = vadd.f32 %v6806_v14, %v10164_v1  ;;  %v6735_v14 = vadd.f32 %v9905_v13, %v10106_v43  ;;  %v10238_v56 = vsel %vm10943_vm12, %v6734_v42, 0.0  ;;  %v6862_v43 = vmul.f32 %v10228_v12, %v10228_v12 }
 0x847   : > { %v6516_v44 = vpop.f32.mrf.mxu1  ;;  %v6897_v62 = vadd.f32 %v6896_v23, %v6857_v61 }
 0x848   : > { %v6808_v57 = vadd.f32 %v6807_v41, %v10174_v0  ;;  %v6610_v35 = vadd.f32 %v6516_v44, %v10941_v9  ;;  %v6736_v41 = vadd.f32 %v9905_v13, %v6609_v58  ;;  %v10945_v44 = vld [vmem:[#allocation18_spill] sm:$0xff] }
 0x849   : > { %v6898_v29 = vadd.f32 %v6897_v62, %v6858_v39  ;;  %vm10946_vm13 = vcmp.eq.s32.totalorder %v10945_v44, 1  ;;  %v6863_v39 = vmul.f32 %v10238_v56, %v10238_v56  ;;  %v10947_v62 = vld [vmem:[#allocation16_spill] sm:$0xff] }
 0x84a   : > { %v6809_v30 = vadd.f32 %v6808_v57, %v10184_v52  ;;  %v10247_v61 = vsel %vm10946_vm13, %v6735_v14, 0.0  ;;  %v6737_v60 = vadd.f32 %v9905_v13, %v6610_v35  ;;  %vm10948_vm14 = vcmp.eq.s32.totalorder %v10947_v62, 1  ;;  %v10952_v35 = vld [vmem:[#allocation26_spill] sm:$0xff]  ;;  %v10956_v44 = vld [vmem:[#allocation32_spill] sm:$0xff] }
 0x84b   : > { %v6899_v33 = vadd.f32 %v6898_v29, %v6859_v53  ;;  %v6864_v58 = vmul.f32 %v10247_v61, %v10247_v61  ;;  %v10950_v29 = vld [vmem:[#allocation21_spill] sm:$0xff]  ;;  %vm10953_vm0 = vcmp.eq.s32.totalorder %v10952_v35, 1  ;;  %v10960_v35 = vld [vmem:[#allocation22_spill] sm:$0xff] }
 0x84c   : > { %v6810_v19 = vadd.f32 %v6809_v30, %v10193_v63  ;;  %vm10951_vm15 = vcmp.eq.s32.totalorder %v10950_v29, 1  ;;  %vm10961_vm3 = vcmp.eq.s32.totalorder %v10960_v35, 1 }
 0x84d   : > { %v6900_v49 = vadd.f32 %v6899_v33, %v6860_v10 }
 0x84e   : > { %v6811_v6 = vadd.f32 %v6810_v19, %v10201_v25  ;;  %v10255_v19 = vsel %vm10948_vm14, %v6736_v41, 0.0  ;;  %v10954_v41 = vld [vmem:[#allocation24_spill] sm:$0xff] }
 0x84f   : > { %v6519_v38 = vpop.f32.mrf.mxu1  ;;  %v6901_v23 = vadd.f32 %v6900_v49, %v6861_v46  ;;  %v6865_v9 = vmul.f32 %v10255_v19, %v10255_v19  ;;  %vm10955_vm1 = vcmp.eq.s32.totalorder %v10954_v41, 1 }
 0x850   : > { %v6812_v4 = vadd.f32 %v6811_v6, %v10209_v36  ;;  %v6611_v11 = vadd.f32 %v6519_v38, %v10944_v40  ;;  %v10949_v38 = vld [vmem:[#allocation42_spill] sm:$0xff]  ;;  %v10264_v6 = vsel %vm10951_vm15, %v6737_v60, 0.0 }
 0x851   : > { %v6902_v42 = vadd.f32 %v6901_v23, %v6862_v43  ;;  %v6866_v28 = vmul.f32 %v10264_v6, %v10264_v6 }
 0x852   : > { %v6813_v57 = vadd.f32 %v6812_v4, %v10218_v2  ;;  %v6738_v53 = vadd.f32 %v9905_v13, %v6611_v11 }
 0x853   : > { %v6903_v47 = vadd.f32 %v6902_v42, %v6863_v39 }
 0x854   : > { %v6814_v30 = vadd.f32 %v6813_v57, %v10228_v12  ;;  %v10272_v33 = vsel %vm10953_vm0, %v6738_v53, 0.0 }
 0x855   : > { %v6904_v4 = vadd.f32 %v6903_v47, %v6864_v58  ;;  %v6867_v57 = vmul.f32 %v10272_v33, %v10272_v33  ;;  %v10959_v47 = vld [vmem:[#allocation28_spill] sm:$0xff] }
 0x856   : > { %v6815_v3 = vadd.f32 %v6814_v30, %v10238_v56 }
 0x857   : > { %v6522_v59 = vpop.f32.mrf.mxu1  ;;  %v6905_v11 = vadd.f32 %v6904_v4, %v6865_v9 }
 0x858   : > { %v6612_v55 = vadd.f32 %v6522_v59, %v10949_v38  ;;  %v6816_v14 = vadd.f32 %v6815_v3, %v10247_v61  ;;  %v10957_v38 = vld [vmem:[#allocation19_spill] sm:$0xff] }
 0x859   : > { %v6906_v23 = vadd.f32 %v6905_v11, %v6866_v28  ;;  %vm10958_vm2 = vcmp.eq.s32.totalorder %v10957_v38, 1 }
 0x85a   : > { %v6739_v10 = vadd.f32 %v9905_v13, %v6612_v55  ;;  %v6817_v46 = vadd.f32 %v6816_v14, %v10255_v19 }
 0x85b   : > { %v6907_v62 = vadd.f32 %v6906_v23, %v6867_v57 }
 0x85c   : > { %v10279_v40 = vsel %vm10955_vm1, %v6739_v10, 0.0  ;;  %v6818_v49 = vadd.f32 %v6817_v46, %v10264_v6 }
 0x85d   : > { %v6868_v39 = vmul.f32 %v10279_v40, %v10279_v40 }
 0x85e   : > { %v6819_v30 = vadd.f32 %v6818_v49, %v10272_v33  ;;  %v6574_v49 = vld [vmem:[%s7866_s26 + $0x140] sm:$0xf] }
 0x85f   : > { %v6525_v43 = vpop.f32.mrf.mxu1  ;;  %v6908_v42 = vadd.f32 %v6907_v62, %v6868_v39 }
 0x860   : > { %v6613_v60 = vadd.f32 %v6525_v43, %v10956_v44  ;;  %v6820_v53 = vadd.f32 %v6819_v30, %v10279_v40 }
 0x862   : > { %v6740_v59 = vadd.f32 %v9905_v13, %v6613_v60  ;;  %v10962_v60 = vld [vmem:[#allocation30_spill] sm:$0xff] }
 0x863   : > { %vm10963_vm4 = vcmp.eq.s32.totalorder %v10962_v60, 1 }
 0x864   : > { %v10292_v55 = vsel %vm10958_vm2, %v6740_v59, 0.0 }
 0x865   : > { %v6821_v3 = vadd.f32 %v6820_v53, %v10292_v55  ;;  %v6869_v58 = vmul.f32 %v10292_v55, %v10292_v55 }
 0x867   : > { %v6909_v29 = vadd.f32 %v6908_v42, %v6869_v58  ;;  %v6528_v10 = vpop.f32.mrf.mxu1 }
 0x868   : > { %v6614_v14 = vadd.f32 %v6528_v10, %v10959_v47 }
 0x86a   : > { %v6741_v9 = vadd.f32 %v9905_v13, %v6614_v14 }
 0x86c   : > { %v10301_v4 = vsel %vm10961_vm3, %v6741_v9, 0.0 }
 0x86d   : > { %v6822_v46 = vadd.f32 %v6821_v3, %v10301_v4  ;;  %v6870_v28 = vmul.f32 %v10301_v4, %v10301_v4 }
 0x86f   : > { %v6910_v41 = vadd.f32 %v6909_v29, %v6870_v28  ;;  %v6531_v11 = vpop.f32.mrf.mxu1 }
 0x870   : > { %v6615_v57 = vadd.f32 %v6574_v49, %v6531_v11 }
 0x872   : > { %6656 = vst [vmem:[%s7866_s26 + $0x140] sm:$0xf] %v6615_v57 }
 0x879   : > { %v6697_v43 = vld [vmem:[%s7866_s26 + $0x140] sm:$0xf] }
 0x87a   : > { %v6742_v44 = vadd.f32 %v9905_v13, %v6697_v43 }
 0x87c   : > { %v10312_v23 = vsel %vm10963_vm4, %v6742_v44, 0.0 }
 0x87d   : > { %v6823_v30 = vsel %vm10964_vm7, %v10312_v23, 0.0  ;;  %v6871_v39 = vmul.f32 %v10312_v23, %v10312_v23 }
 0x87e   : > { %v6824_v59 = vadd.f32 %v6823_v30, %v6822_v46 }
 0x87f   : > { %v6911_v62 = vsel %vm10965_vm8, %v6871_v39, 0.0 }
 0x880   : > { %v6825_v53 = vrot.slane %v6824_v59, 4  ;;  %v6912_v38 = vadd.f32 %v6911_v62, %v6910_v41 }
 0x882   : > { %v6826_v42 = vadd.f32 %v6825_v53, %v6824_v59  ;;  %v6913_v3 = vrot.slane %v6912_v38, 4  ;;  %v10966_v59 = vld [vmem:[#allocation43_spill] sm:$0xff]  ;;  %v10967_v53 = vld [vmem:[#allocation37_spill] sm:$0xff] }
 0x884   : > { %v6827_v58 = vrot.slane %v6826_v42, 2  ;;  %v6914_v29 = vadd.f32 %v6913_v3, %v6912_v38 }
 0x886   : > { %v6828_v13 = vadd.f32 %v6827_v58, %v6826_v42  ;;  %v6915_v10 = vrot.slane %v6914_v29, 2 }
 0x888   : > { %v6829_v47 = vrot.slane %v6828_v13, 1  ;;  %v6916_v14 = vadd.f32 %v6915_v10, %v6914_v29 }
 0x88a   : > { %v6830_v9 = vadd.f32 %v6829_v47, %v6828_v13  ;;  %v6917_v35 = vrot.slane %v6916_v14, 1 }
 0x88c   : > { %v6918_v28 = vadd.f32 %v6917_v35, %v6916_v14  ;;  %v10319_v11 = vmul.f32 0.00390625, %v6830_v9 }
 0x88e   : > { %v6920_v49 = vmul.f32 0.00390625, %v6918_v28  ;;  %v6921_v46 = vmul.f32 %v10319_v11, %v10319_v11  ;;  %v6960_v41 = vsub.f32 %v10279_v40, %v10319_v11  ;;  %v6961_v43 = vsub.f32 %v10292_v55, %v10319_v11 }
 0x88f   : > { %v6962_v44 = vsub.f32 %v10301_v4, %v10319_v11  ;;  %v6923_v62 = vsub.f32 %v10966_v59, %v10319_v11  ;;  %v6924_v38 = vsub.f32 %v10967_v53, %v10319_v11  ;;  %v6925_v42 = vsub.f32 %v9931_v48, %v10319_v11 }
 0x890   : > { %v6922_v57 = vsub.f32 %v6920_v49, %v6921_v46  ;;  %v6926_v3 = vsub.f32 %v9940_v7, %v10319_v11  ;;  %v6927_v29 = vsub.f32 %v9953_v51, %v10319_v11  ;;  %v6928_v13 = vsub.f32 %v9963_v15, %v10319_v11 }
 0x891   : > { %v6929_v10 = vsub.f32 %v9975_v22, %v10319_v11  ;;  %v6930_v47 = vsub.f32 %v9985_v34, %v10319_v11  ;;  %v6931_v14 = vsub.f32 %v9995_v18, %v10319_v11  ;;  %v6932_v48 = vsub.f32 %v10005_v8, %v10319_v11 }
 0x892   : > { %v6964_v30 = vadd.f32 1e-05, %v6922_v57  ;;  %v6933_v7 = vsub.f32 %v10015_v21, %v10319_v11  ;;  %v6934_v51 = vsub.f32 %v10028_v31, %v10319_v11  ;;  %v6935_v15 = vsub.f32 %v10038_v24, %v10319_v11 }
 0x893   : > { %v6936_v22 = vsub.f32 %v10048_v37, %v10319_v11  ;;  %v6937_v34 = vsub.f32 %v10058_v50, %v10319_v11  ;;  %v6938_v18 = vsub.f32 %v10071_v17, %v10319_v11  ;;  %v6939_v8 = vsub.f32 %v10081_v45, %v10319_v11 }
 0x894   : > { %7409 = vrsqrt.f32 %v6964_v30  ;;  %v6940_v21 = vsub.f32 %v10091_v26, %v10319_v11  ;;  %v6941_v31 = vsub.f32 %v10101_v54, %v10319_v11  ;;  %v6942_v24 = vsub.f32 %v10114_v5, %v10319_v11 }
 0x895   : > { %v6943_v37 = vsub.f32 %v10124_v20, %v10319_v11  ;;  %v6944_v50 = vsub.f32 %v10134_v27, %v10319_v11  ;;  %v6945_v17 = vsub.f32 %v10144_v16, %v10319_v11  ;;  %v6946_v45 = vsub.f32 %v10154_v32, %v10319_v11 }
 0x896   : > { %v6947_v54 = vsub.f32 %v10164_v1, %v10319_v11  ;;  %v6948_v5 = vsub.f32 %v10174_v0, %v10319_v11  ;;  %v6949_v20 = vsub.f32 %v10184_v52, %v10319_v11  ;;  %v6950_v27 = vsub.f32 %v10193_v63, %v10319_v11 }
 0x897   : > { %v6951_v16 = vsub.f32 %v10201_v25, %v10319_v11  ;;  %v6952_v32 = vsub.f32 %v10209_v36, %v10319_v11  ;;  %vm6971_vm5 = vweird.f32 %v6964_v30  ;;  %v6953_v1 = vsub.f32 %v10218_v2, %v10319_v11 }
 0x898   : > { %v6954_v0 = vsub.f32 %v10228_v12, %v10319_v11  ;;  %v6955_v52 = vsub.f32 %v10238_v56, %v10319_v11  ;;  %v6956_v63 = vsub.f32 %v10247_v61, %v10319_v11  ;;  %v6957_v25 = vsub.f32 %v10255_v19, %v10319_v11 }
 0x899   : > { %v6958_v36 = vsub.f32 %v10264_v6, %v10319_v11  ;;  %v6959_v49 = vsub.f32 %v10272_v33, %v10319_v11 }
 0x89a   : > { %v7410_v39 = vpop.eup %7409 }
 0x89b   : > { %v6966_v58 = vmul.f32 %v7410_v39, %v6964_v30  ;;  %vm6972_vm6 = vweird.f32 %v7410_v39 }
 0x89c   : > { %vm6973_vm9 = vmor %vm6971_vm5, %vm6972_vm6 }
 0x89d   : > { %v6967_v9 = vmul.f32 %v7410_v39, %v6966_v58 }
 0x89f   : > { %v6968_v35 = vmul.f32 0.5, %v6967_v9 }
 0x8a1   : > { %v6969_v26 = vsub.f32 1.5, %v6968_v35 }
 0x8a3   : > { %v6970_v28 = vmul.f32 %v7410_v39, %v6969_v26 }
 0x8a5   : > { %v6974_v2 = vsel %vm6973_vm9, %v7410_v39, %v6970_v28  ;;  %v7022_v28 = vld [vmem:[%s7602_s24 + $0x48] sm:$0xff] }
 0x8a6   : > { %v6975_v46 = vmul.f32 %v6974_v2, %v6923_v62  ;;  %v6976_v57 = vmul.f32 %v6974_v2, %v6924_v38  ;;  %v6977_v12 = vmul.f32 %v6974_v2, %v6925_v42  ;;  %v6978_v30 = vmul.f32 %v6974_v2, %v6926_v3 }
 0x8a7   : > { %v6979_v59 = vmul.f32 %v6974_v2, %v6927_v29  ;;  %v6980_v56 = vmul.f32 %v6974_v2, %v6928_v13  ;;  %v6981_v53 = vmul.f32 %v6974_v2, %v6929_v10  ;;  %v6982_v58 = vmul.f32 %v6974_v2, %v6930_v47 }
 0x8a8   : > { %v6983_v61 = vmul.f32 %v6974_v2, %v6931_v14  ;;  %v6984_v9 = vmul.f32 %v6974_v2, %v6932_v48  ;;  %v6985_v35 = vmul.f32 %v6974_v2, %v6933_v7  ;;  %v10405_v26 = vmul.f32 %v6974_v2, %v6934_v51 }
 0x8a9   : > { %v10407_v19 = vmul.f32 %v6974_v2, %v6935_v15  ;;  %v10409_v6 = vmul.f32 %v6974_v2, %v6936_v22  ;;  %v10411_v60 = vmul.f32 %v6974_v2, %v6937_v34  ;;  %v10413_v33 = vmul.f32 %v6974_v2, %v6938_v18  ;;  %v7016_v18 = vld [vmem:[%s7602_s24 + $0x18] sm:$0xff] }
 0x8aa   : > { %v10415_v39 = vmul.f32 %v6974_v2, %v6939_v8  ;;  %v10417_v62 = vmul.f32 %v6974_v2, %v6940_v21  ;;  %v10419_v38 = vmul.f32 %v6974_v2, %v6941_v31  ;;  %v10421_v42 = vmul.f32 %v6974_v2, %v6942_v24  ;;  %v7017_v8 = vld [vmem:[%s7602_s24 + $0x20] sm:$0xff]  ;;  %v7018_v21 = vld [vmem:[%s7602_s24 + $0x28] sm:$0xff] }
 0x8ab   : > { %v10423_v3 = vmul.f32 %v6974_v2, %v6943_v37  ;;  %v10425_v29 = vmul.f32 %v6974_v2, %v6944_v50  ;;  %v10427_v13 = vmul.f32 %v6974_v2, %v6945_v17  ;;  %v10429_v10 = vmul.f32 %v6974_v2, %v6946_v45  ;;  %v7019_v17 = vld [vmem:[%s7602_s24 + $0x30] sm:$0xff] }
 0x8ac   : > { %v10431_v47 = vmul.f32 %v6974_v2, %v6947_v54  ;;  %v10433_v14 = vmul.f32 %v6974_v2, %v6948_v5  ;;  %v10435_v48 = vmul.f32 %v6974_v2, %v6949_v20  ;;  %v10437_v7 = vmul.f32 %v6974_v2, %v6950_v27  ;;  %v7020_v27 = vld [vmem:[%s7602_s24 + $0x38] sm:$0xff] }
 0x8ad   : > { %v10439_v51 = vmul.f32 %v6974_v2, %v6951_v16  ;;  %v10441_v15 = vmul.f32 %v6974_v2, %v6952_v32  ;;  %v10443_v22 = vmul.f32 %v6974_v2, %v6953_v1  ;;  %v10445_v34 = vmul.f32 %v6974_v2, %v6954_v0  ;;  %v7025_v0 = vld [vmem:[%s7602_s24 + $0x60] sm:$0xff] }
 0x8ae   : > { %v10450_v31 = vmul.f32 %v6974_v2, %v6955_v52  ;;  %v10452_v24 = vmul.f32 %v6974_v2, %v6956_v63  ;;  %v10454_v37 = vmul.f32 %v6974_v2, %v6957_v25  ;;  %v10456_v50 = vmul.f32 %v6974_v2, %v6958_v36  ;;  %v7026_v63 = vld [vmem:[%s7602_s24 + $0x68] sm:$0xff]  ;;  %v7027_v36 = vld [vmem:[%s7602_s24 + $0x70] sm:$0xff] }
 0x8af   : > { %v10459_v45 = vmul.f32 %v6974_v2, %v6959_v49  ;;  %v10464_v54 = vmul.f32 %v6974_v2, %v6960_v41  ;;  %v10469_v5 = vmul.f32 %v6974_v2, %v6961_v43  ;;  %v10474_v20 = vmul.f32 %v6974_v2, %v6962_v44  ;;  %v7021_v41 = vld [vmem:[%s7602_s24 + $0x40] sm:$0xff]  ;;  %v7023_v44 = vld [vmem:[%s7602_s24 + $0x50] sm:$0xff] }
 0x8b0   : > { %v10968_v16 = vsub.f32 %v10312_v23, %v10319_v11  ;;  %v7057_v32 = vadd.f32 %v7016_v18, %v6975_v46  ;;  %v7058_v55 = vadd.f32 %v7017_v8, %v6976_v57  ;;  %v7059_v43 = vadd.f32 %v7018_v21, %v6977_v12  ;;  %v7024_v23 = vld [vmem:[%s7602_s24 + $0x58] sm:$0xff]  ;;  %v7029_v57 = vld [vmem:[%s7602_s24 + $0x80] sm:$0xff] }
 0x8b1   : > { %v7060_v4 = vadd.f32 %v7019_v17, %v6978_v30  ;;  %v7061_v1 = vadd.f32 %v7020_v27, %v6979_v59  ;;  %v7062_v11 = vadd.f32 %v7021_v41, %v6980_v56  ;;  %v7063_v52 = vadd.f32 %v7022_v28, %v6981_v53  ;;  %v7030_v30 = vld [vmem:[%s7602_s24 + $0x88] sm:$0xff]  ;;  %v7031_v56 = vld [vmem:[%s7602_s24 + $0x90] sm:$0xff] }
 0x8b2   : > { %v10480_v40 = vmul.f32 %v6974_v2, %v10968_v16  ;;  %7098 = vst [vmem:[%s7866_s26] sm:$0xff] %v7057_v32  ;;  %v7064_v25 = vadd.f32 %v7023_v44, %v6982_v58  ;;  %v7065_v49 = vadd.f32 %v7024_v23, %v6983_v61  ;;  %v7028_v2 = vld [vmem:[%s7602_s24 + $0x78] sm:$0xff]  ;;  %v7066_v46 = vadd.f32 %v7025_v0, %v6984_v9  ;;  %v7033_v9 = vld [vmem:[%s7602_s24 + $0xa0] sm:$0xff] }
 0x8b3   : > { %7099 = vst [vmem:[%s7866_s26 + $0x8] sm:$0xff] %v7058_v55  ;;  %v7067_v12 = vadd.f32 %v7026_v63, %v6985_v35  ;;  %v7068_v59 = vadd.f32 %v7027_v36, %v10405_v26  ;;  %v7069_v53 = vadd.f32 %v7028_v2, %v10407_v19  ;;  %v7032_v58 = vld [vmem:[%s7602_s24 + $0x98] sm:$0xff]  ;;  %v7070_v61 = vadd.f32 %v7029_v57, %v10409_v6  ;;  %v7034_v26 = vld [vmem:[%s7602_s24 + $0xa8] sm:$0xff]  ;;  %v7035_v19 = vld [vmem:[%s7602_s24 + $0xb0] sm:$0xff] }
 0x8b4   : > { %7100 = vst [vmem:[%s7866_s26 + $0x10] sm:$0xff] %v7059_v43  ;;  %v7071_v35 = vadd.f32 %v7030_v30, %v10411_v60  ;;  %v7072_v18 = vadd.f32 %v7031_v56, %v10413_v33  ;;  %v7073_v8 = vadd.f32 %v7032_v58, %v10415_v39  ;;  %v7036_v6 = vld [vmem:[%s7602_s24 + $0xb8] sm:$0xff]  ;;  %v7074_v21 = vadd.f32 %v7033_v9, %v10417_v62  ;;  %v7037_v60 = vld [vmem:[%s7602_s24 + $0xc0] sm:$0xff]  ;;  %v7038_v33 = vld [vmem:[%s7602_s24 + $0xc8] sm:$0xff] }
 0x8b5   : > { %7101 = vst [vmem:[%s7866_s26 + $0x18] sm:$0xff] %v7060_v4  ;;  %v7075_v17 = vadd.f32 %v7034_v26, %v10419_v38  ;;  %v7076_v27 = vadd.f32 %v7035_v19, %v10421_v42  ;;  %v7039_v39 = vld [vmem:[%s7602_s24 + $0xd0] sm:$0xff]  ;;  %v7077_v16 = vadd.f32 %v7036_v6, %v10423_v3  ;;  %v7040_v62 = vld [vmem:[%s7602_s24 + $0xd8] sm:$0xff]  ;;  %v7078_v41 = vadd.f32 %v7037_v60, %v10425_v29  ;;  %v7041_v38 = vld [vmem:[%s7602_s24 + $0xe0] sm:$0xff] }
 0x8b6   : > { %7102 = vst [vmem:[%s7866_s26 + $0x20] sm:$0xff] %v7061_v1  ;;  %v7079_v32 = vadd.f32 %v7038_v33, %v10427_v13  ;;  %v7042_v42 = vld [vmem:[%s7602_s24 + $0xe8] sm:$0xff]  ;;  %v7080_v55 = vadd.f32 %v7039_v39, %v10429_v10  ;;  %v7043_v3 = vld [vmem:[%s7602_s24 + $0xf0] sm:$0xff]  ;;  %v7081_v43 = vadd.f32 %v7040_v62, %v10431_v47  ;;  %v7044_v29 = vld [vmem:[%s7602_s24 + $0xf8] sm:$0xff]  ;;  %v7082_v28 = vadd.f32 %v7041_v38, %v10433_v14 }
 0x8b7   : > { %7103 = vst [vmem:[%s7866_s26 + $0x28] sm:$0xff] %v7062_v11  ;;  %v7045_v13 = vld [vmem:[%s7602_s24 + $0x100] sm:$0xff]  ;;  %v7083_v4 = vadd.f32 %v7042_v42, %v10435_v48  ;;  %v7046_v10 = vld [vmem:[%s7602_s24 + $0x108] sm:$0xff]  ;;  %v7084_v44 = vadd.f32 %v7043_v3, %v10437_v7  ;;  %v7047_v47 = vld [vmem:[%s7602_s24 + $0x110] sm:$0xff]  ;;  %v7085_v1 = vadd.f32 %v7044_v29, %v10439_v51 }
 0x8b8   : > { %7104 = vst [vmem:[%s7866_s26 + $0x30] sm:$0xff] %v7063_v52  ;;  %v7048_v14 = vld [vmem:[%s7602_s24 + $0x118] sm:$0xff]  ;;  %v7086_v23 = vadd.f32 %v7045_v13, %v10441_v15  ;;  %v7049_v48 = vld [vmem:[%s7602_s24 + $0x120] sm:$0xff]  ;;  %v7087_v11 = vadd.f32 %v7046_v10, %v10443_v22  ;;  %v7050_v7 = vld [vmem:[%s7602_s24 + $0x128] sm:$0xff]  ;;  %v7088_v0 = vadd.f32 %v7047_v47, %v10445_v34 }
 0x8b9   : > { %7105 = vst [vmem:[%s7866_s26 + $0x38] sm:$0xff] %v7064_v25  ;;  %v7051_v51 = vld [vmem:[%s7602_s24 + $0x130] sm:$0xff]  ;;  %v7089_v52 = vadd.f32 %v7048_v14, %v10450_v31  ;;  %v7052_v15 = vld [vmem:[%s7602_s24 + $0x138] sm:$0xff]  ;;  %v7090_v63 = vadd.f32 %v7049_v48, %v10452_v24  ;;  %v7053_v22 = vld [vmem:[%s7602_s24 + $0x140] sm:$0xff]  ;;  %v7091_v25 = vadd.f32 %v7050_v7, %v10454_v37 }
 0x8ba   : > { %7106 = vst [vmem:[%s7866_s26 + $0x40] sm:$0xff] %v7065_v49  ;;  %v7054_v34 = vld [vmem:[%s7602_s24 + $0x148] sm:$0xff]  ;;  %v7092_v36 = vadd.f32 %v7051_v51, %v10456_v50  ;;  %v7055_v31 = vld [vmem:[%s7602_s24 + $0x150] sm:$0xff]  ;;  %v7093_v49 = vadd.f32 %v7052_v15, %v10459_v45  ;;  %v7056_v24 = vld [vmem:[%s7602_s24 + $0x158] sm:$0xf]  ;;  %v7094_v2 = vadd.f32 %v7053_v22, %v10464_v54 }
 0x8bb   : > { %7107 = vst [vmem:[%s7866_s26 + $0x48] sm:$0xff] %v7066_v46  ;;  %v7095_v37 = vadd.f32 %v7054_v34, %v10469_v5  ;;  %v7096_v46 = vadd.f32 %v7055_v31, %v10474_v20  ;;  %v7097_v57 = vadd.f32 %v7056_v24, %v10480_v40 }
 0x8bc   : > { %7108 = vst [vmem:[%s7866_s26 + $0x50] sm:$0xff] %v7067_v12 }
 0x8bd   : > { %7109 = vst [vmem:[%s7866_s26 + $0x58] sm:$0xff] %v7068_v59 }
 0x8be   : > { %7110 = vst [vmem:[%s7866_s26 + $0x60] sm:$0xff] %v7069_v53 }
 0x8bf   : > { %7111 = vst [vmem:[%s7866_s26 + $0x68] sm:$0xff] %v7070_v61 }
 0x8c0   : > { %7112 = vst [vmem:[%s7866_s26 + $0x70] sm:$0xff] %v7071_v35 }
 0x8c1   : > { %7113 = vst [vmem:[%s7866_s26 + $0x78] sm:$0xff] %v7072_v18 }
 0x8c2   : > { %7114 = vst [vmem:[%s7866_s26 + $0x80] sm:$0xff] %v7073_v8 }
 0x8c3   : > { %7115 = vst [vmem:[%s7866_s26 + $0x88] sm:$0xff] %v7074_v21 }
 0x8c4   : > { %7116 = vst [vmem:[%s7866_s26 + $0x90] sm:$0xff] %v7075_v17 }
 0x8c5   : > { %7117 = vst [vmem:[%s7866_s26 + $0x98] sm:$0xff] %v7076_v27 }
 0x8c6   : > { %7118 = vst [vmem:[%s7866_s26 + $0xa0] sm:$0xff] %v7077_v16 }
 0x8c7   : > { %7119 = vst [vmem:[%s7866_s26 + $0xa8] sm:$0xff] %v7078_v41 }
 0x8c8   : > { %7120 = vst [vmem:[%s7866_s26 + $0xb0] sm:$0xff] %v7079_v32 }
 0x8c9   : > { %7121 = vst [vmem:[%s7866_s26 + $0xb8] sm:$0xff] %v7080_v55 }
 0x8ca   : > { %7122 = vst [vmem:[%s7866_s26 + $0xc0] sm:$0xff] %v7081_v43 }
 0x8cb   : > { %7123 = vst [vmem:[%s7866_s26 + $0xc8] sm:$0xff] %v7082_v28 }
 0x8cc   : > { %7124 = vst [vmem:[%s7866_s26 + $0xd0] sm:$0xff] %v7083_v4 }
 0x8cd   : > { %7125 = vst [vmem:[%s7866_s26 + $0xd8] sm:$0xff] %v7084_v44 }
 0x8ce   : > { %7126 = vst [vmem:[%s7866_s26 + $0xe0] sm:$0xff] %v7085_v1 }
 0x8cf   : > { %7127 = vst [vmem:[%s7866_s26 + $0xe8] sm:$0xff] %v7086_v23 }
 0x8d0   : > { %7128 = vst [vmem:[%s7866_s26 + $0xf0] sm:$0xff] %v7087_v11 }
 0x8d1   : > { %7129 = vst [vmem:[%s7866_s26 + $0xf8] sm:$0xff] %v7088_v0 }
 0x8d2   : > { %7130 = vst [vmem:[%s7866_s26 + $0x100] sm:$0xff] %v7089_v52 }
 0x8d3   : > { %7131 = vst [vmem:[%s7866_s26 + $0x108] sm:$0xff] %v7090_v63 }
 0x8d4   : > { %7132 = vst [vmem:[%s7866_s26 + $0x110] sm:$0xff] %v7091_v25 }
 0x8d5   : > { %7133 = vst [vmem:[%s7866_s26 + $0x118] sm:$0xff] %v7092_v36 }
 0x8d6   : > { %7134 = vst [vmem:[%s7866_s26 + $0x120] sm:$0xff] %v7093_v49 }
 0x8d7   : > { %7135 = vst [vmem:[%s7866_s26 + $0x128] sm:$0xff] %v7094_v2 }
 0x8d8   : > { %7136 = vst [vmem:[%s7866_s26 + $0x130] sm:$0xff] %v7095_v37 }
 0x8d9   : > { %7137 = vst [vmem:[%s7866_s26 + $0x138] sm:$0xff] %v7096_v46 }
 0x8da   : > { %7138 = vst [vmem:[%s7866_s26 + $0x140] sm:$0xf] %v7097_v57 }
 0x8db PF: > { %s17_s21 = sadd.s32 1, %s7451_s21  }
 0x8dc   : > { %p14_p7 = scmp.ge.s32.totalorder %s17_s21, 4  }
 0x8de   :  { %16 = sbr.rel (!%p14_p7) target bundleno = 1 (0x1), region = 95 }
 0x8e3   :  { %7160 = vsyncpa [#allocation4], 1 }
 0x8e4   :  { %7162 = vsyncpa [#allocation4 + $0x1], 1 }

</bundles_post_ra>
